<compile_context>
chip_gen: v5e
topology: v5e:2x2
jax: 0.10.0
libtpu: 0.0.40
codegen_flags: <defaults>
</compile_context>

<pallas_src>
import functools

import jax
import jax.numpy as jnp
import numpy as np
from jax.experimental import pallas as pl
from jax.experimental.pallas import tpu as pltpu

_OUT_LANES = 128  # lane-dense output block; column 0 carries the prediction


def _predictor_kernel(
    # inputs -------------------------------------------------------------
    x_ref,                                    # (T, TB, D)  compute dtype
    w_ih0_ref, w_hh0_ref, b0_ref,             # (D,4H) cd, (H,4H) cd, (1,4H) f32
    w_ih1_ref, w_hh1_ref, b1_ref,             # (H,4H) cd, (H,4H) cd, (1,4H) f32
    w_a1_ref, b_a1_ref, w_a2_ref, b_a2_ref,   # (H,64) cd, (1,64), (1,64), (1,1)
    w_f1_ref, b_f1_ref,                       # (H,64) cd, (1,64)
    w_f2_ref, b_f2_ref,                       # (64,32) cd, (1,32)
    w_f3_ref, b_f3_ref,                       # (1,32) f32 row, (1,1)
    # outputs ------------------------------------------------------------
    y_ref,                                    # (TB, 128) f32, lane-dense
    # scratch ------------------------------------------------------------
    xg_ref,                                   # (T*TB, 4H) cd  pre-gates (reused by both layers)
    hid0_ref,                                 # (T*TB, H)  cd  layer-0 hidden states
    hid1_ref,                                 # (T*TB, H)  f32 layer-1 hidden states
    *, hidden_size: int, seq_len: int,
):
    H = hidden_size
    T = seq_len
    TB = y_ref.shape[0]
    f32 = jnp.float32
    cd = w_hh0_ref.dtype                      # MXU operand dtype (f32 or bf16)

    def sigmoid(v):                           # divide-free; rides the EUP tanh
        return 0.5 * jnp.tanh(0.5 * v) + 0.5

    def stage_pre_gates(src_fn, w_ih_ref, b_ref):
        # Batched input projection, one (TB,K)@(K,H) MXU pass per (t, gate);
        # each chunk goes straight to the pre-gate scratch so transients stay
        # small (<= (TB,H)) and nothing competes with the recurrence regalloc.
        for t in range(T):
            src_t = src_fn(t)                                     # (TB, K) cd
            for k in range(4):
                pre = jnp.dot(src_t, w_ih_ref[:, k * H:(k + 1) * H],
                              preferred_element_type=f32)
                pre = pre + b_ref[:, k * H:(k + 1) * H]
                xg_ref[t * TB:(t + 1) * TB, k * H:(k + 1) * H] = (
                    pre.astype(xg_ref.dtype))

    def run_layer(w_hh_ref, emit):
        # Gate-chunked recurrence (PyTorch gate order i, f, g, o): each gate's
        # pre-activation is read from scratch and its H->H recurrent matmul is
        # consumed immediately, capping live state at (TB, H).
        h = jnp.zeros((TB, H), f32)
        c = jnp.zeros((TB, H), f32)
        for t in range(T):                    # static unroll (T small, fixed)
            h_cd = h.astype(cd)
            row = t * TB

            def gate(k):
                pre = xg_ref[row:row + TB, k * H:(k + 1) * H].astype(f32)
                return pre + jnp.dot(h_cd, w_hh_ref[:, k * H:(k + 1) * H],
                                     preferred_element_type=f32)

            i = sigmoid(gate(0))
            g = jnp.tanh(gate(2))
            ig = i * g
            f = sigmoid(gate(1))
            c = f * c + ig
            o = sigmoid(gate(3))
            h = o * jnp.tanh(c)
            emit(t, h)

    def emit_hid0(t, h):
        hid0_ref[t * TB:(t + 1) * TB, :] = h.astype(hid0_ref.dtype)

    def emit_hid1(t, h):
        hid1_ref[t * TB:(t + 1) * TB, :] = h.astype(hid1_ref.dtype)

    # ---- layer 0: staged input projection, then the recurrence -------------
    stage_pre_gates(lambda t: x_ref[t], w_ih0_ref, b0_ref)
    run_layer(w_hh0_ref, emit_hid0)

    # ---- layer 1 ------------------------------------------------------------
    # TODO(synk): inter-layer LSTM dropout (p=0.2) is identity in eval; omitted.
    stage_pre_gates(lambda t: hid0_ref[t * TB:(t + 1) * TB, :], w_ih1_ref, b1_ref)
    run_layer(w_hh1_ref, emit_hid1)

    # ---- attention over time: online softmax from hid1 VMEM slices ----------
    m = jnp.full((TB, 1), -1e30, f32)
    den = jnp.zeros((TB, 1), f32)
    ctx = jnp.zeros((TB, H), f32)
    for t in range(T):
        h1 = hid1_ref[t * TB:(t + 1) * TB, :]                       # f32
        a1 = jnp.tanh(jnp.dot(h1.astype(cd), w_a1_ref[...],
                              preferred_element_type=f32) + b_a1_ref[...])
        s = jnp.sum(a1 * w_a2_ref[...], axis=-1, keepdims=True) + b_a2_ref[...]
        m_new = jnp.maximum(m, s)
        alpha = jnp.exp(m - m_new)
        p = jnp.exp(s - m_new)
        den = alpha * den + p
        ctx = alpha * ctx + p * h1
        m = m_new
    ctx = ctx * pl.reciprocal(den, approx=True)                     # EUP recip

    # ---- MLP head ------------------------------------------------------------
    # TODO(synk): nn.Dropout layers are identity in eval mode and are omitted.
    z = jnp.maximum(jnp.dot(ctx.astype(cd), w_f1_ref[...],
                            preferred_element_type=f32) + b_f1_ref[...], 0.0)
    z = jnp.maximum(jnp.dot(z.astype(cd), w_f2_ref[...],
                            preferred_element_type=f32) + b_f2_ref[...], 0.0)
    z = jnp.sum(z * w_f3_ref[...], axis=-1, keepdims=True) + b_f3_ref[...]
    y_ref[...] = jnp.broadcast_to(sigmoid(z), (TB, y_ref.shape[1]))


def _pick_tile(batch, cap):
    t = min(cap, batch)
    t -= t % 8
    t = max(t, 8)
    while batch % t:
        t -= 8
    return t


def client_performance_predictor(x_btd, params, *, hidden_size,
                                 compute_dtype=jnp.float32,
                                 batch_tile=None, vmem_limit_bytes=None):
    """x_btd: (B, T, input_size) float32 (PyTorch batch_first layout)."""
    (w_ih0, w_hh0, b0, w_ih1, w_hh1, b1,
     w_a1, b_a1, w_a2, b_a2, w_f1, b_f1, w_f2, b_f2, w_f3, b_f3) = params
    B0, T, D = x_btd.shape
    H = hidden_size
    cd = compute_dtype
    f32 = jnp.float32

    # Per-generation defaults (conservative fallback if detection fails).
    kind = ""
    try:
        kind = jax.devices()[0].device_kind.lower()
    except Exception:
        pass
    if "v7" in kind:       # 64 MiB VMEM / TC, 2 TCs per chip -> keep 2+ tiles
        cap, vmem_default, min_tiles = 256, 32 << 20, 2
    elif "v6" in kind:     # 128 MiB VMEM, 256-row MXU
        cap, vmem_default, min_tiles = 256, 64 << 20, 1
    elif "v5" in kind:     # 128-row MXU
        cap, vmem_default, min_tiles = 128, 64 << 20, 1
    else:
        cap, vmem_default, min_tiles = 256, 32 << 20, 1
    if vmem_limit_bytes is None:
        vmem_limit_bytes = vmem_default

    # Pad batch to a sublane multiple; padded rows are independent garbage and
    # are sliced off at the end (nothing reduces over batch inside the kernel).
    pad = (-B0) % 8
    if pad:
        x_btd = jnp.pad(x_btd, ((0, pad), (0, 0), (0, 0)))
    B = B0 + pad

    if batch_tile is None:
        batch_tile = _pick_tile(B, cap)
        if min_tiles > 1 and B // batch_tile < min_tiles and B >= 8 * min_tiles:
            batch_tile = _pick_tile(B, max(8, B // min_tiles))
    assert B % batch_tile == 0 and batch_tile % 8 == 0, (B, batch_tile)
    num_tiles = B // batch_tile

    # Stream raw x (time-major, compute dtype): ~32x less HBM traffic than
    # shipping precomputed layer-0 pre-gates; the projection is a cheap K=D MXU
    # pass inside the kernel, done before (not on) the serial recurrence.
    x_tbd = jnp.transpose(x_btd, (1, 0, 2)).astype(cd)              # (T, B, D)

    inputs = (
        x_tbd,
        w_ih0.astype(cd), w_hh0.astype(cd), b0,
        w_ih1.astype(cd), w_hh1.astype(cd), b1,
        w_a1.astype(cd), b_a1, jnp.transpose(w_a2), b_a2,
        w_f1.astype(cd), b_f1,
        w_f2.astype(cd), b_f2,
        jnp.transpose(w_f3), b_f3,
    )

    vmem = pl.BlockSpec(memory_space=pltpu.MemorySpace.VMEM)
    in_specs = [pl.BlockSpec((T, batch_tile, D), lambda i: (0, i, 0))]
    in_specs += [vmem] * (len(inputs) - 1)

    kernel = functools.partial(_predictor_kernel, hidden_size=H, seq_len=T)
    y = pl.pallas_call(
        kernel,
        out_shape=jax.ShapeDtypeStruct((B, _OUT_LANES), f32),
        grid=(num_tiles,),
        in_specs=in_specs,
        out_specs=pl.BlockSpec((batch_tile, _OUT_LANES), lambda i: (i, 0)),
        scratch_shapes=[
            pltpu.VMEM((T * batch_tile, 4 * H), cd),   # pre-gates (both layers)
            pltpu.VMEM((T * batch_tile, H), cd),       # layer-0 hidden states
            pltpu.VMEM((T * batch_tile, H), f32),      # layer-1 hidden states
        ],
        compiler_params=pltpu.CompilerParams(
            dimension_semantics=("parallel",),          # megacore / v7x 2 TCs
            vmem_limit_bytes=vmem_limit_bytes),
    )(*inputs)
    return y[:B0, :1]


# ---------------------------------------------------------------------------
# Deterministic parameter construction + pure-JAX reference.
# ---------------------------------------------------------------------------
def make_params(key, input_size, hidden_size):
    H = hidden_size
    shapes = [
        ("w_ih0", (input_size, 4 * H)), ("w_hh0", (H, 4 * H)), ("b0", (1, 4 * H)),
        ("w_ih1", (H, 4 * H)), ("w_hh1", (H, 4 * H)), ("b1", (1, 4 * H)),
        ("w_a1", (H, 64)), ("b_a1", (1, 64)), ("w_a2", (64, 1)), ("b_a2", (1, 1)),
        ("w_f1", (H, 64)), ("b_f1", (1, 64)),
        ("w_f2", (64, 32)), ("b_f2", (1, 32)),
        ("w_f3", (32, 1)), ("b_f3", (1, 1)),
    ]
    keys = jax.random.split(key, len(shapes))
    return [jax.random.uniform(k, s, jnp.float32, -0.1, 0.1)
            for k, (_, s) in zip(keys, shapes)]


def reference_forward(x_btd, params, hidden_size):
    (w_ih0, w_hh0, b0, w_ih1, w_hh1, b1,
     w_a1, b_a1, w_a2, b_a2, w_f1, b_f1, w_f2, b_f2, w_f3, b_f3) = params
    H = hidden_size
    B, T, _ = x_btd.shape
    hi = jax.lax.Precision.HIGHEST

    def sig(v):
        return 1.0 / (1.0 + jnp.exp(-v))

    def cell(x_t, h, c, w_ih, w_hh, b):
        g = jnp.dot(x_t, w_ih, precision=hi) + jnp.dot(h, w_hh, precision=hi) + b
        i = sig(g[:, :H]); f = sig(g[:, H:2 * H])
        gg = jnp.tanh(g[:, 2 * H:3 * H]); o = sig(g[:, 3 * H:])
        c = f * c + i * gg
        return o * jnp.tanh(c), c

    h0 = c0 = h1 = c1 = jnp.zeros((B, H), jnp.float32)
    outs = []
    for t in range(T):
        h0, c0 = cell(x_btd[:, t, :], h0, c0, w_ih0, w_hh0, b0)
        h1, c1 = cell(h0, h1, c1, w_ih1, w_hh1, b1)
        outs.append(h1)
    lstm_out = jnp.stack(outs, axis=1)                          # (B, T, H)

    a1 = jnp.tanh(jnp.einsum("bth,hk->btk", lstm_out, w_a1, precision=hi) + b_a1)
    scores = jnp.einsum("btk,ko->bto", a1, w_a2, precision=hi) + b_a2   # (B,T,1)
    attn = jax.nn.softmax(scores, axis=1)
    context = jnp.sum(attn * lstm_out, axis=1)                  # (B, H)

    z = jnp.maximum(jnp.dot(context, w_f1, precision=hi) + b_f1, 0.0)
    z = jnp.maximum(jnp.dot(z, w_f2, precision=hi) + b_f2, 0.0)
    z = jnp.dot(z, w_f3, precision=hi) + b_f3
    return sig(z)


if __name__ == "__main__":
    B, T, INPUT_SIZE, HIDDEN = 2, 8, 16, 128   # module default hidden_size=128

    key = jax.random.PRNGKey(0)
    kx, kp = jax.random.split(key)
    x = jax.random.normal(kx, (B, T, INPUT_SIZE), jnp.float32)
    params = make_params(kp, INPUT_SIZE, HIDDEN)

    y_ref = reference_forward(x, params, HIDDEN)

    # f32 MXU operands: tight check.
    y_f32 = jax.block_until_ready(
        client_performance_predictor(x, params, hidden_size=HIDDEN))
    np.testing.assert_allclose(np.asarray(y_f32), np.asarray(y_ref),
                               rtol=3e-3, atol=3e-3)

    # bf16 MXU operands + bf16 staging (v6e/v7x fast path), f32 cell/context.
    y_bf16 = jax.block_until_ready(
        client_performance_predictor(x, params, hidden_size=HIDDEN,
                                     compute_dtype=jnp.bfloat16))
    np.testing.assert_allclose(np.asarray(y_bf16), np.asarray(y_ref),
                               rtol=2.5e-2, atol=2.5e-2)

    print("KERNEL_OK")
</pallas_src>

<mosaic_0001>
module attributes {stable_mosaic.version = 11 : i64} {
  func.func @_predictor_kernel(%arg0: i32, %arg1: memref<8x8x16xf32, #tpu.memory_space<vmem>>, %arg2: memref<16x512xf32, #tpu.memory_space<vmem>>, %arg3: memref<128x512xf32, #tpu.memory_space<vmem>>, %arg4: memref<1x512xf32, #tpu.memory_space<vmem>>, %arg5: memref<128x512xf32, #tpu.memory_space<vmem>>, %arg6: memref<128x512xf32, #tpu.memory_space<vmem>>, %arg7: memref<1x512xf32, #tpu.memory_space<vmem>>, %arg8: memref<128x64xf32, #tpu.memory_space<vmem>>, %arg9: memref<1x64xf32, #tpu.memory_space<vmem>>, %arg10: memref<1x64xf32, #tpu.memory_space<vmem>>, %arg11: memref<1x1xf32, #tpu.memory_space<vmem>>, %arg12: memref<128x64xf32, #tpu.memory_space<vmem>>, %arg13: memref<1x64xf32, #tpu.memory_space<vmem>>, %arg14: memref<64x32xf32, #tpu.memory_space<vmem>>, %arg15: memref<1x32xf32, #tpu.memory_space<vmem>>, %arg16: memref<1x32xf32, #tpu.memory_space<vmem>>, %arg17: memref<1x1xf32, #tpu.memory_space<vmem>>, %arg18: memref<8x128xf32, #tpu.memory_space<vmem>>, %arg19: memref<64x512xf32, #tpu.memory_space<vmem>>, %arg20: memref<64x128xf32, #tpu.memory_space<vmem>>, %arg21: memref<64x128xf32, #tpu.memory_space<vmem>>) attributes {dimension_semantics = [#tpu.dimension_semantics<parallel>], iteration_bounds = array<i64: 1>, scalar_prefetch = 0 : i64, scratch_operands = 3 : i64, tpu.core_type = #tpu.core_type<tc>, window_params = [{transform_indices = @transform_0, window_bounds = array<i64: 8, 8, 16>}, {pipeline_mode = #tpu.pipeline_mode<synchronous>, transform_indices = @transform_1, window_bounds = array<i64: 16, 512>}, {pipeline_mode = #tpu.pipeline_mode<synchronous>, transform_indices = @transform_2, window_bounds = array<i64: 128, 512>}, {pipeline_mode = #tpu.pipeline_mode<synchronous>, transform_indices = @transform_3, window_bounds = array<i64: 1, 512>}, {pipeline_mode = #tpu.pipeline_mode<synchronous>, transform_indices = @transform_4, window_bounds = array<i64: 128, 512>}, {pipeline_mode = #tpu.pipeline_mode<synchronous>, transform_indices = @transform_5, window_bounds = array<i64: 128, 512>}, {pipeline_mode = #tpu.pipeline_mode<synchronous>, transform_indices = @transform_6, window_bounds = array<i64: 1, 512>}, {pipeline_mode = #tpu.pipeline_mode<synchronous>, transform_indices = @transform_7, window_bounds = array<i64: 128, 64>}, {pipeline_mode = #tpu.pipeline_mode<synchronous>, transform_indices = @transform_8, window_bounds = array<i64: 1, 64>}, {pipeline_mode = #tpu.pipeline_mode<synchronous>, transform_indices = @transform_9, window_bounds = array<i64: 1, 64>}, {pipeline_mode = #tpu.pipeline_mode<synchronous>, transform_indices = @transform_10, window_bounds = array<i64: 1, 1>}, {pipeline_mode = #tpu.pipeline_mode<synchronous>, transform_indices = @transform_11, window_bounds = array<i64: 128, 64>}, {pipeline_mode = #tpu.pipeline_mode<synchronous>, transform_indices = @transform_12, window_bounds = array<i64: 1, 64>}, {pipeline_mode = #tpu.pipeline_mode<synchronous>, transform_indices = @transform_13, window_bounds = array<i64: 64, 32>}, {pipeline_mode = #tpu.pipeline_mode<synchronous>, transform_indices = @transform_14, window_bounds = array<i64: 1, 32>}, {pipeline_mode = #tpu.pipeline_mode<synchronous>, transform_indices = @transform_15, window_bounds = array<i64: 1, 32>}, {pipeline_mode = #tpu.pipeline_mode<synchronous>, transform_indices = @transform_16, window_bounds = array<i64: 1, 1>}, {transform_indices = @transform_17, window_bounds = array<i64: 8, 128>}]} {
    %c0 = arith.constant 0 : index
    %c0_0 = arith.constant 0 : index
    %c0_1 = arith.constant 0 : index
    %0 = vector.load %arg1[%c0, %c0_0, %c0_1] : memref<8x8x16xf32, #tpu.memory_space<vmem>>, vector<1x8x16xf32>
    %1 = vector.shape_cast %0 : vector<1x8x16xf32> to vector<8x16xf32>
    %c0_2 = arith.constant 0 : index
    %c0_3 = arith.constant 0 : index
    %2 = vector.load %arg2[%c0_2, %c0_3] : memref<16x512xf32, #tpu.memory_space<vmem>>, vector<16x128xf32>
    %cst = arith.constant dense<0.000000e+00> : vector<8x128xf32>
    %3 = tpu.matmul %1, %2, %cst {dimension_numbers = #tpu.dot_dimension_numbers<[1], [0], [0], [1], [0, 0, 1, 1], [], []>} : vector<8x16xf32>, vector<16x128xf32>, vector<8x128xf32> -> vector<8x128xf32>
    %c0_4 = arith.constant 0 : index
    %c0_5 = arith.constant 0 : index
    %4 = vector.load %arg4[%c0_4, %c0_5] : memref<1x512xf32, #tpu.memory_space<vmem>>, vector<1x128xf32>
    %5 = vector.broadcast %4 : vector<1x128xf32> to vector<8x128xf32>
    %6 = arith.addf %3, %5 : vector<8x128xf32>
    %c0_6 = arith.constant 0 : index
    %c0_7 = arith.constant 0 : index
    %7 = vector.load %arg19[%c0_6, %c0_7] : memref<64x512xf32, #tpu.memory_space<vmem>>, vector<8x128xf32>
    tpu.vector_store %arg19[%c0_6, %c0_7], %6 {strides = array<i32>} : memref<64x512xf32, #tpu.memory_space<vmem>>, vector<8x128xf32>,
    %c0_8 = arith.constant 0 : index
    %c128 = arith.constant 128 : index
    %8 = vector.load %arg2[%c0_8, %c128] : memref<16x512xf32, #tpu.memory_space<vmem>>, vector<16x128xf32>
    %cst_9 = arith.constant dense<0.000000e+00> : vector<8x128xf32>
    %9 = tpu.matmul %1, %8, %cst_9 {dimension_numbers = #tpu.dot_dimension_numbers<[1], [0], [0], [1], [0, 0, 1, 1], [], []>} : vector<8x16xf32>, vector<16x128xf32>, vector<8x128xf32> -> vector<8x128xf32>
    %c0_10 = arith.constant 0 : index
    %c128_11 = arith.constant 128 : index
    %10 = vector.load %arg4[%c0_10, %c128_11] : memref<1x512xf32, #tpu.memory_space<vmem>>, vector<1x128xf32>
    %11 = vector.broadcast %10 : vector<1x128xf32> to vector<8x128xf32>
    %12 = arith.addf %9, %11 : vector<8x128xf32>
    %c0_12 = arith.constant 0 : index
    %c128_13 = arith.constant 128 : index
    %13 = vector.load %arg19[%c0_12, %c128_13] : memref<64x512xf32, #tpu.memory_space<vmem>>, vector<8x128xf32>
    tpu.vector_store %arg19[%c0_12, %c128_13], %12 {strides = array<i32>} : memref<64x512xf32, #tpu.memory_space<vmem>>, vector<8x128xf32>,
    %c0_14 = arith.constant 0 : index
    %c256 = arith.constant 256 : index
    %14 = vector.load %arg2[%c0_14, %c256] : memref<16x512xf32, #tpu.memory_space<vmem>>, vector<16x128xf32>
    %cst_15 = arith.constant dense<0.000000e+00> : vector<8x128xf32>
    %15 = tpu.matmul %1, %14, %cst_15 {dimension_numbers = #tpu.dot_dimension_numbers<[1], [0], [0], [1], [0, 0, 1, 1], [], []>} : vector<8x16xf32>, vector<16x128xf32>, vector<8x128xf32> -> vector<8x128xf32>
    %c0_16 = arith.constant 0 : index
    %c256_17 = arith.constant 256 : index
    %16 = vector.load %arg4[%c0_16, %c256_17] : memref<1x512xf32, #tpu.memory_space<vmem>>, vector<1x128xf32>
    %17 = vector.broadcast %16 : vector<1x128xf32> to vector<8x128xf32>
    %18 = arith.addf %15, %17 : vector<8x128xf32>
    %c0_18 = arith.constant 0 : index
    %c256_19 = arith.constant 256 : index
    %19 = vector.load %arg19[%c0_18, %c256_19] : memref<64x512xf32, #tpu.memory_space<vmem>>, vector<8x128xf32>
    tpu.vector_store %arg19[%c0_18, %c256_19], %18 {strides = array<i32>} : memref<64x512xf32, #tpu.memory_space<vmem>>, vector<8x128xf32>,
    %c0_20 = arith.constant 0 : index
    %c384 = arith.constant 384 : index
    %20 = vector.load %arg2[%c0_20, %c384] : memref<16x512xf32, #tpu.memory_space<vmem>>, vector<16x128xf32>
    %cst_21 = arith.constant dense<0.000000e+00> : vector<8x128xf32>
    %21 = tpu.matmul %1, %20, %cst_21 {dimension_numbers = #tpu.dot_dimension_numbers<[1], [0], [0], [1], [0, 0, 1, 1], [], []>} : vector<8x16xf32>, vector<16x128xf32>, vector<8x128xf32> -> vector<8x128xf32>
    %c0_22 = arith.constant 0 : index
    %c384_23 = arith.constant 384 : index
    %22 = vector.load %arg4[%c0_22, %c384_23] : memref<1x512xf32, #tpu.memory_space<vmem>>, vector<1x128xf32>
    %23 = vector.broadcast %22 : vector<1x128xf32> to vector<8x128xf32>
    %24 = arith.addf %21, %23 : vector<8x128xf32>
    %c0_24 = arith.constant 0 : index
    %c384_25 = arith.constant 384 : index
    %25 = vector.load %arg19[%c0_24, %c384_25] : memref<64x512xf32, #tpu.memory_space<vmem>>, vector<8x128xf32>
    tpu.vector_store %arg19[%c0_24, %c384_25], %24 {strides = array<i32>} : memref<64x512xf32, #tpu.memory_space<vmem>>, vector<8x128xf32>,
    %c1 = arith.constant 1 : index
    %c0_26 = arith.constant 0 : index
    %c0_27 = arith.constant 0 : index
    %26 = vector.load %arg1[%c1, %c0_26, %c0_27] : memref<8x8x16xf32, #tpu.memory_space<vmem>>, vector<1x8x16xf32>
    %27 = vector.shape_cast %26 : vector<1x8x16xf32> to vector<8x16xf32>
    %c0_28 = arith.constant 0 : index
    %c0_29 = arith.constant 0 : index
    %28 = vector.load %arg2[%c0_28, %c0_29] : memref<16x512xf32, #tpu.memory_space<vmem>>, vector<16x128xf32>
    %cst_30 = arith.constant dense<0.000000e+00> : vector<8x128xf32>
    %29 = tpu.matmul %27, %28, %cst_30 {dimension_numbers = #tpu.dot_dimension_numbers<[1], [0], [0], [1], [0, 0, 1, 1], [], []>} : vector<8x16xf32>, vector<16x128xf32>, vector<8x128xf32> -> vector<8x128xf32>
    %c0_31 = arith.constant 0 : index
    %c0_32 = arith.constant 0 : index
    %30 = vector.load %arg4[%c0_31, %c0_32] : memref<1x512xf32, #tpu.memory_space<vmem>>, vector<1x128xf32>
    %31 = vector.broadcast %30 : vector<1x128xf32> to vector<8x128xf32>
    %32 = arith.addf %29, %31 : vector<8x128xf32>
    %c8 = arith.constant 8 : index
    %c0_33 = arith.constant 0 : index
    %33 = vector.load %arg19[%c8, %c0_33] : memref<64x512xf32, #tpu.memory_space<vmem>>, vector<8x128xf32>
    tpu.vector_store %arg19[%c8, %c0_33], %32 {strides = array<i32>} : memref<64x512xf32, #tpu.memory_space<vmem>>, vector<8x128xf32>,
    %c0_34 = arith.constant 0 : index
    %c128_35 = arith.constant 128 : index
    %34 = vector.load %arg2[%c0_34, %c128_35] : memref<16x512xf32, #tpu.memory_space<vmem>>, vector<16x128xf32>
    %cst_36 = arith.constant dense<0.000000e+00> : vector<8x128xf32>
    %35 = tpu.matmul %27, %34, %cst_36 {dimension_numbers = #tpu.dot_dimension_numbers<[1], [0], [0], [1], [0, 0, 1, 1], [], []>} : vector<8x16xf32>, vector<16x128xf32>, vector<8x128xf32> -> vector<8x128xf32>
    %c0_37 = arith.constant 0 : index
    %c128_38 = arith.constant 128 : index
    %36 = vector.load %arg4[%c0_37, %c128_38] : memref<1x512xf32, #tpu.memory_space<vmem>>, vector<1x128xf32>
    %37 = vector.broadcast %36 : vector<1x128xf32> to vector<8x128xf32>
    %38 = arith.addf %35, %37 : vector<8x128xf32>
    %c8_39 = arith.constant 8 : index
    %c128_40 = arith.constant 128 : index
    %39 = vector.load %arg19[%c8_39, %c128_40] : memref<64x512xf32, #tpu.memory_space<vmem>>, vector<8x128xf32>
    tpu.vector_store %arg19[%c8_39, %c128_40], %38 {strides = array<i32>} : memref<64x512xf32, #tpu.memory_space<vmem>>, vector<8x128xf32>,
    %c0_41 = arith.constant 0 : index
    %c256_42 = arith.constant 256 : index
    %40 = vector.load %arg2[%c0_41, %c256_42] : memref<16x512xf32, #tpu.memory_space<vmem>>, vector<16x128xf32>
    %cst_43 = arith.constant dense<0.000000e+00> : vector<8x128xf32>
    %41 = tpu.matmul %27, %40, %cst_43 {dimension_numbers = #tpu.dot_dimension_numbers<[1], [0], [0], [1], [0, 0, 1, 1], [], []>} : vector<8x16xf32>, vector<16x128xf32>, vector<8x128xf32> -> vector<8x128xf32>
    %c0_44 = arith.constant 0 : index
    %c256_45 = arith.constant 256 : index
    %42 = vector.load %arg4[%c0_44, %c256_45] : memref<1x512xf32, #tpu.memory_space<vmem>>, vector<1x128xf32>
    %43 = vector.broadcast %42 : vector<1x128xf32> to vector<8x128xf32>
    %44 = arith.addf %41, %43 : vector<8x128xf32>
    %c8_46 = arith.constant 8 : index
    %c256_47 = arith.constant 256 : index
    %45 = vector.load %arg19[%c8_46, %c256_47] : memref<64x512xf32, #tpu.memory_space<vmem>>, vector<8x128xf32>
    tpu.vector_store %arg19[%c8_46, %c256_47], %44 {strides = array<i32>} : memref<64x512xf32, #tpu.memory_space<vmem>>, vector<8x128xf32>,
    %c0_48 = arith.constant 0 : index
    %c384_49 = arith.constant 384 : index
    %46 = vector.load %arg2[%c0_48, %c384_49] : memref<16x512xf32, #tpu.memory_space<vmem>>, vector<16x128xf32>
    %cst_50 = arith.constant dense<0.000000e+00> : vector<8x128xf32>
    %47 = tpu.matmul %27, %46, %cst_50 {dimension_numbers = #tpu.dot_dimension_numbers<[1], [0], [0], [1], [0, 0, 1, 1], [], []>} : vector<8x16xf32>, vector<16x128xf32>, vector<8x128xf32> -> vector<8x128xf32>
    %c0_51 = arith.constant 0 : index
    %c384_52 = arith.constant 384 : index
    %48 = vector.load %arg4[%c0_51, %c384_52] : memref<1x512xf32, #tpu.memory_space<vmem>>, vector<1x128xf32>
    %49 = vector.broadcast %48 : vector<1x128xf32> to vector<8x128xf32>
    %50 = arith.addf %47, %49 : vector<8x128xf32>
    %c8_53 = arith.constant 8 : index
    %c384_54 = arith.constant 384 : index
    %51 = vector.load %arg19[%c8_53, %c384_54] : memref<64x512xf32, #tpu.memory_space<vmem>>, vector<8x128xf32>
    tpu.vector_store %arg19[%c8_53, %c384_54], %50 {strides = array<i32>} : memref<64x512xf32, #tpu.memory_space<vmem>>, vector<8x128xf32>,
    %c2 = arith.constant 2 : index
    %c0_55 = arith.constant 0 : index
    %c0_56 = arith.constant 0 : index
    %52 = vector.load %arg1[%c2, %c0_55, %c0_56] : memref<8x8x16xf32, #tpu.memory_space<vmem>>, vector<1x8x16xf32>
    %53 = vector.shape_cast %52 : vector<1x8x16xf32> to vector<8x16xf32>
    %c0_57 = arith.constant 0 : index
    %c0_58 = arith.constant 0 : index
    %54 = vector.load %arg2[%c0_57, %c0_58] : memref<16x512xf32, #tpu.memory_space<vmem>>, vector<16x128xf32>
    %cst_59 = arith.constant dense<0.000000e+00> : vector<8x128xf32>
    %55 = tpu.matmul %53, %54, %cst_59 {dimension_numbers = #tpu.dot_dimension_numbers<[1], [0], [0], [1], [0, 0, 1, 1], [], []>} : vector<8x16xf32>, vector<16x128xf32>, vector<8x128xf32> -> vector<8x128xf32>
    %c0_60 = arith.constant 0 : index
    %c0_61 = arith.constant 0 : index
    %56 = vector.load %arg4[%c0_60, %c0_61] : memref<1x512xf32, #tpu.memory_space<vmem>>, vector<1x128xf32>
    %57 = vector.broadcast %56 : vector<1x128xf32> to vector<8x128xf32>
    %58 = arith.addf %55, %57 : vector<8x128xf32>
    %c16 = arith.constant 16 : index
    %c0_62 = arith.constant 0 : index
    %59 = vector.load %arg19[%c16, %c0_62] : memref<64x512xf32, #tpu.memory_space<vmem>>, vector<8x128xf32>
    tpu.vector_store %arg19[%c16, %c0_62], %58 {strides = array<i32>} : memref<64x512xf32, #tpu.memory_space<vmem>>, vector<8x128xf32>,
    %c0_63 = arith.constant 0 : index
    %c128_64 = arith.constant 128 : index
    %60 = vector.load %arg2[%c0_63, %c128_64] : memref<16x512xf32, #tpu.memory_space<vmem>>, vector<16x128xf32>
    %cst_65 = arith.constant dense<0.000000e+00> : vector<8x128xf32>
    %61 = tpu.matmul %53, %60, %cst_65 {dimension_numbers = #tpu.dot_dimension_numbers<[1], [0], [0], [1], [0, 0, 1, 1], [], []>} : vector<8x16xf32>, vector<16x128xf32>, vector<8x128xf32> -> vector<8x128xf32>
    %c0_66 = arith.constant 0 : index
    %c128_67 = arith.constant 128 : index
    %62 = vector.load %arg4[%c0_66, %c128_67] : memref<1x512xf32, #tpu.memory_space<vmem>>, vector<1x128xf32>
    %63 = vector.broadcast %62 : vector<1x128xf32> to vector<8x128xf32>
    %64 = arith.addf %61, %63 : vector<8x128xf32>
    %c16_68 = arith.constant 16 : index
    %c128_69 = arith.constant 128 : index
    %65 = vector.load %arg19[%c16_68, %c128_69] : memref<64x512xf32, #tpu.memory_space<vmem>>, vector<8x128xf32>
    tpu.vector_store %arg19[%c16_68, %c128_69], %64 {strides = array<i32>} : memref<64x512xf32, #tpu.memory_space<vmem>>, vector<8x128xf32>,
    %c0_70 = arith.constant 0 : index
    %c256_71 = arith.constant 256 : index
    %66 = vector.load %arg2[%c0_70, %c256_71] : memref<16x512xf32, #tpu.memory_space<vmem>>, vector<16x128xf32>
    %cst_72 = arith.constant dense<0.000000e+00> : vector<8x128xf32>
    %67 = tpu.matmul %53, %66, %cst_72 {dimension_numbers = #tpu.dot_dimension_numbers<[1], [0], [0], [1], [0, 0, 1, 1], [], []>} : vector<8x16xf32>, vector<16x128xf32>, vector<8x128xf32> -> vector<8x128xf32>
    %c0_73 = arith.constant 0 : index
    %c256_74 = arith.constant 256 : index
    %68 = vector.load %arg4[%c0_73, %c256_74] : memref<1x512xf32, #tpu.memory_space<vmem>>, vector<1x128xf32>
    %69 = vector.broadcast %68 : vector<1x128xf32> to vector<8x128xf32>
    %70 = arith.addf %67, %69 : vector<8x128xf32>
    %c16_75 = arith.constant 16 : index
    %c256_76 = arith.constant 256 : index
    %71 = vector.load %arg19[%c16_75, %c256_76] : memref<64x512xf32, #tpu.memory_space<vmem>>, vector<8x128xf32>
    tpu.vector_store %arg19[%c16_75, %c256_76], %70 {strides = array<i32>} : memref<64x512xf32, #tpu.memory_space<vmem>>, vector<8x128xf32>,
    %c0_77 = arith.constant 0 : index
    %c384_78 = arith.constant 384 : index
    %72 = vector.load %arg2[%c0_77, %c384_78] : memref<16x512xf32, #tpu.memory_space<vmem>>, vector<16x128xf32>
    %cst_79 = arith.constant dense<0.000000e+00> : vector<8x128xf32>
    %73 = tpu.matmul %53, %72, %cst_79 {dimension_numbers = #tpu.dot_dimension_numbers<[1], [0], [0], [1], [0, 0, 1, 1], [], []>} : vector<8x16xf32>, vector<16x128xf32>, vector<8x128xf32> -> vector<8x128xf32>
    %c0_80 = arith.constant 0 : index
    %c384_81 = arith.constant 384 : index
    %74 = vector.load %arg4[%c0_80, %c384_81] : memref<1x512xf32, #tpu.memory_space<vmem>>, vector<1x128xf32>
    %75 = vector.broadcast %74 : vector<1x128xf32> to vector<8x128xf32>
    %76 = arith.addf %73, %75 : vector<8x128xf32>
    %c16_82 = arith.constant 16 : index
    %c384_83 = arith.constant 384 : index
    %77 = vector.load %arg19[%c16_82, %c384_83] : memref<64x512xf32, #tpu.memory_space<vmem>>, vector<8x128xf32>
    tpu.vector_store %arg19[%c16_82, %c384_83], %76 {strides = array<i32>} : memref<64x512xf32, #tpu.memory_space<vmem>>, vector<8x128xf32>,
    %c3 = arith.constant 3 : index
    %c0_84 = arith.constant 0 : index
    %c0_85 = arith.constant 0 : index
    %78 = vector.load %arg1[%c3, %c0_84, %c0_85] : memref<8x8x16xf32, #tpu.memory_space<vmem>>, vector<1x8x16xf32>
    %79 = vector.shape_cast %78 : vector<1x8x16xf32> to vector<8x16xf32>
    %c0_86 = arith.constant 0 : index
    %c0_87 = arith.constant 0 : index
    %80 = vector.load %arg2[%c0_86, %c0_87] : memref<16x512xf32, #tpu.memory_space<vmem>>, vector<16x128xf32>
    %cst_88 = arith.constant dense<0.000000e+00> : vector<8x128xf32>
    %81 = tpu.matmul %79, %80, %cst_88 {dimension_numbers = #tpu.dot_dimension_numbers<[1], [0], [0], [1], [0, 0, 1, 1], [], []>} : vector<8x16xf32>, vector<16x128xf32>, vector<8x128xf32> -> vector<8x128xf32>
    %c0_89 = arith.constant 0 : index
    %c0_90 = arith.constant 0 : index
    %82 = vector.load %arg4[%c0_89, %c0_90] : memref<1x512xf32, #tpu.memory_space<vmem>>, vector<1x128xf32>
    %83 = vector.broadcast %82 : vector<1x128xf32> to vector<8x128xf32>
    %84 = arith.addf %81, %83 : vector<8x128xf32>
    %c24 = arith.constant 24 : index
    %c0_91 = arith.constant 0 : index
    %85 = vector.load %arg19[%c24, %c0_91] : memref<64x512xf32, #tpu.memory_space<vmem>>, vector<8x128xf32>
    tpu.vector_store %arg19[%c24, %c0_91], %84 {strides = array<i32>} : memref<64x512xf32, #tpu.memory_space<vmem>>, vector<8x128xf32>,
    %c0_92 = arith.constant 0 : index
    %c128_93 = arith.constant 128 : index
    %86 = vector.load %arg2[%c0_92, %c128_93] : memref<16x512xf32, #tpu.memory_space<vmem>>, vector<16x128xf32>
    %cst_94 = arith.constant dense<0.000000e+00> : vector<8x128xf32>
    %87 = tpu.matmul %79, %86, %cst_94 {dimension_numbers = #tpu.dot_dimension_numbers<[1], [0], [0], [1], [0, 0, 1, 1], [], []>} : vector<8x16xf32>, vector<16x128xf32>, vector<8x128xf32> -> vector<8x128xf32>
    %c0_95 = arith.constant 0 : index
    %c128_96 = arith.constant 128 : index
    %88 = vector.load %arg4[%c0_95, %c128_96] : memref<1x512xf32, #tpu.memory_space<vmem>>, vector<1x128xf32>
    %89 = vector.broadcast %88 : vector<1x128xf32> to vector<8x128xf32>
    %90 = arith.addf %87, %89 : vector<8x128xf32>
    %c24_97 = arith.constant 24 : index
    %c128_98 = arith.constant 128 : index
    %91 = vector.load %arg19[%c24_97, %c128_98] : memref<64x512xf32, #tpu.memory_space<vmem>>, vector<8x128xf32>
    tpu.vector_store %arg19[%c24_97, %c128_98], %90 {strides = array<i32>} : memref<64x512xf32, #tpu.memory_space<vmem>>, vector<8x128xf32>,
    %c0_99 = arith.constant 0 : index
    %c256_100 = arith.constant 256 : index
    %92 = vector.load %arg2[%c0_99, %c256_100] : memref<16x512xf32, #tpu.memory_space<vmem>>, vector<16x128xf32>
    %cst_101 = arith.constant dense<0.000000e+00> : vector<8x128xf32>
    %93 = tpu.matmul %79, %92, %cst_101 {dimension_numbers = #tpu.dot_dimension_numbers<[1], [0], [0], [1], [0, 0, 1, 1], [], []>} : vector<8x16xf32>, vector<16x128xf32>, vector<8x128xf32> -> vector<8x128xf32>
    %c0_102 = arith.constant 0 : index
    %c256_103 = arith.constant 256 : index
    %94 = vector.load %arg4[%c0_102, %c256_103] : memref<1x512xf32, #tpu.memory_space<vmem>>, vector<1x128xf32>
    %95 = vector.broadcast %94 : vector<1x128xf32> to vector<8x128xf32>
    %96 = arith.addf %93, %95 : vector<8x128xf32>
    %c24_104 = arith.constant 24 : index
    %c256_105 = arith.constant 256 : index
    %97 = vector.load %arg19[%c24_104, %c256_105] : memref<64x512xf32, #tpu.memory_space<vmem>>, vector<8x128xf32>
    tpu.vector_store %arg19[%c24_104, %c256_105], %96 {strides = array<i32>} : memref<64x512xf32, #tpu.memory_space<vmem>>, vector<8x128xf32>,
    %c0_106 = arith.constant 0 : index
    %c384_107 = arith.constant 384 : index
    %98 = vector.load %arg2[%c0_106, %c384_107] : memref<16x512xf32, #tpu.memory_space<vmem>>, vector<16x128xf32>
    %cst_108 = arith.constant dense<0.000000e+00> : vector<8x128xf32>
    %99 = tpu.matmul %79, %98, %cst_108 {dimension_numbers = #tpu.dot_dimension_numbers<[1], [0], [0], [1], [0, 0, 1, 1], [], []>} : vector<8x16xf32>, vector<16x128xf32>, vector<8x128xf32> -> vector<8x128xf32>
    %c0_109 = arith.constant 0 : index
    %c384_110 = arith.constant 384 : index
    %100 = vector.load %arg4[%c0_109, %c384_110] : memref<1x512xf32, #tpu.memory_space<vmem>>, vector<1x128xf32>
    %101 = vector.broadcast %100 : vector<1x128xf32> to vector<8x128xf32>
    %102 = arith.addf %99, %101 : vector<8x128xf32>
    %c24_111 = arith.constant 24 : index
    %c384_112 = arith.constant 384 : index
    %103 = vector.load %arg19[%c24_111, %c384_112] : memref<64x512xf32, #tpu.memory_space<vmem>>, vector<8x128xf32>
    tpu.vector_store %arg19[%c24_111, %c384_112], %102 {strides = array<i32>} : memref<64x512xf32, #tpu.memory_space<vmem>>, vector<8x128xf32>,
    %c4 = arith.constant 4 : index
    %c0_113 = arith.constant 0 : index
    %c0_114 = arith.constant 0 : index
    %104 = vector.load %arg1[%c4, %c0_113, %c0_114] : memref<8x8x16xf32, #tpu.memory_space<vmem>>, vector<1x8x16xf32>
    %105 = vector.shape_cast %104 : vector<1x8x16xf32> to vector<8x16xf32>
    %c0_115 = arith.constant 0 : index
    %c0_116 = arith.constant 0 : index
    %106 = vector.load %arg2[%c0_115, %c0_116] : memref<16x512xf32, #tpu.memory_space<vmem>>, vector<16x128xf32>
    %cst_117 = arith.constant dense<0.000000e+00> : vector<8x128xf32>
    %107 = tpu.matmul %105, %106, %cst_117 {dimension_numbers = #tpu.dot_dimension_numbers<[1], [0], [0], [1], [0, 0, 1, 1], [], []>} : vector<8x16xf32>, vector<16x128xf32>, vector<8x128xf32> -> vector<8x128xf32>
    %c0_118 = arith.constant 0 : index
    %c0_119 = arith.constant 0 : index
    %108 = vector.load %arg4[%c0_118, %c0_119] : memref<1x512xf32, #tpu.memory_space<vmem>>, vector<1x128xf32>
    %109 = vector.broadcast %108 : vector<1x128xf32> to vector<8x128xf32>
    %110 = arith.addf %107, %109 : vector<8x128xf32>
    %c32 = arith.constant 32 : index
    %c0_120 = arith.constant 0 : index
    %111 = vector.load %arg19[%c32, %c0_120] : memref<64x512xf32, #tpu.memory_space<vmem>>, vector<8x128xf32>
    tpu.vector_store %arg19[%c32, %c0_120], %110 {strides = array<i32>} : memref<64x512xf32, #tpu.memory_space<vmem>>, vector<8x128xf32>,
    %c0_121 = arith.constant 0 : index
    %c128_122 = arith.constant 128 : index
    %112 = vector.load %arg2[%c0_121, %c128_122] : memref<16x512xf32, #tpu.memory_space<vmem>>, vector<16x128xf32>
    %cst_123 = arith.constant dense<0.000000e+00> : vector<8x128xf32>
    %113 = tpu.matmul %105, %112, %cst_123 {dimension_numbers = #tpu.dot_dimension_numbers<[1], [0], [0], [1], [0, 0, 1, 1], [], []>} : vector<8x16xf32>, vector<16x128xf32>, vector<8x128xf32> -> vector<8x128xf32>
    %c0_124 = arith.constant 0 : index
    %c128_125 = arith.constant 128 : index
    %114 = vector.load %arg4[%c0_124, %c128_125] : memref<1x512xf32, #tpu.memory_space<vmem>>, vector<1x128xf32>
    %115 = vector.broadcast %114 : vector<1x128xf32> to vector<8x128xf32>
    %116 = arith.addf %113, %115 : vector<8x128xf32>
    %c32_126 = arith.constant 32 : index
    %c128_127 = arith.constant 128 : index
    %117 = vector.load %arg19[%c32_126, %c128_127] : memref<64x512xf32, #tpu.memory_space<vmem>>, vector<8x128xf32>
    tpu.vector_store %arg19[%c32_126, %c128_127], %116 {strides = array<i32>} : memref<64x512xf32, #tpu.memory_space<vmem>>, vector<8x128xf32>,
    %c0_128 = arith.constant 0 : index
    %c256_129 = arith.constant 256 : index
    %118 = vector.load %arg2[%c0_128, %c256_129] : memref<16x512xf32, #tpu.memory_space<vmem>>, vector<16x128xf32>
    %cst_130 = arith.constant dense<0.000000e+00> : vector<8x128xf32>
    %119 = tpu.matmul %105, %118, %cst_130 {dimension_numbers = #tpu.dot_dimension_numbers<[1], [0], [0], [1], [0, 0, 1, 1], [], []>} : vector<8x16xf32>, vector<16x128xf32>, vector<8x128xf32> -> vector<8x128xf32>
    %c0_131 = arith.constant 0 : index
    %c256_132 = arith.constant 256 : index
    %120 = vector.load %arg4[%c0_131, %c256_132] : memref<1x512xf32, #tpu.memory_space<vmem>>, vector<1x128xf32>
    %121 = vector.broadcast %120 : vector<1x128xf32> to vector<8x128xf32>
    %122 = arith.addf %119, %121 : vector<8x128xf32>
    %c32_133 = arith.constant 32 : index
    %c256_134 = arith.constant 256 : index
    %123 = vector.load %arg19[%c32_133, %c256_134] : memref<64x512xf32, #tpu.memory_space<vmem>>, vector<8x128xf32>
    tpu.vector_store %arg19[%c32_133, %c256_134], %122 {strides = array<i32>} : memref<64x512xf32, #tpu.memory_space<vmem>>, vector<8x128xf32>,
    %c0_135 = arith.constant 0 : index
    %c384_136 = arith.constant 384 : index
    %124 = vector.load %arg2[%c0_135, %c384_136] : memref<16x512xf32, #tpu.memory_space<vmem>>, vector<16x128xf32>
    %cst_137 = arith.constant dense<0.000000e+00> : vector<8x128xf32>
    %125 = tpu.matmul %105, %124, %cst_137 {dimension_numbers = #tpu.dot_dimension_numbers<[1], [0], [0], [1], [0, 0, 1, 1], [], []>} : vector<8x16xf32>, vector<16x128xf32>, vector<8x128xf32> -> vector<8x128xf32>
    %c0_138 = arith.constant 0 : index
    %c384_139 = arith.constant 384 : index
    %126 = vector.load %arg4[%c0_138, %c384_139] : memref<1x512xf32, #tpu.memory_space<vmem>>, vector<1x128xf32>
    %127 = vector.broadcast %126 : vector<1x128xf32> to vector<8x128xf32>
    %128 = arith.addf %125, %127 : vector<8x128xf32>
    %c32_140 = arith.constant 32 : index
    %c384_141 = arith.constant 384 : index
    %129 = vector.load %arg19[%c32_140, %c384_141] : memref<64x512xf32, #tpu.memory_space<vmem>>, vector<8x128xf32>
    tpu.vector_store %arg19[%c32_140, %c384_141], %128 {strides = array<i32>} : memref<64x512xf32, #tpu.memory_space<vmem>>, vector<8x128xf32>,
    %c5 = arith.constant 5 : index
    %c0_142 = arith.constant 0 : index
    %c0_143 = arith.constant 0 : index
    %130 = vector.load %arg1[%c5, %c0_142, %c0_143] : memref<8x8x16xf32, #tpu.memory_space<vmem>>, vector<1x8x16xf32>
    %131 = vector.shape_cast %130 : vector<1x8x16xf32> to vector<8x16xf32>
    %c0_144 = arith.constant 0 : index
    %c0_145 = arith.constant 0 : index
    %132 = vector.load %arg2[%c0_144, %c0_145] : memref<16x512xf32, #tpu.memory_space<vmem>>, vector<16x128xf32>
    %cst_146 = arith.constant dense<0.000000e+00> : vector<8x128xf32>
    %133 = tpu.matmul %131, %132, %cst_146 {dimension_numbers = #tpu.dot_dimension_numbers<[1], [0], [0], [1], [0, 0, 1, 1], [], []>} : vector<8x16xf32>, vector<16x128xf32>, vector<8x128xf32> -> vector<8x128xf32>
    %c0_147 = arith.constant 0 : index
    %c0_148 = arith.constant 0 : index
    %134 = vector.load %arg4[%c0_147, %c0_148] : memref<1x512xf32, #tpu.memory_space<vmem>>, vector<1x128xf32>
    %135 = vector.broadcast %134 : vector<1x128xf32> to vector<8x128xf32>
    %136 = arith.addf %133, %135 : vector<8x128xf32>
    %c40 = arith.constant 40 : index
    %c0_149 = arith.constant 0 : index
    %137 = vector.load %arg19[%c40, %c0_149] : memref<64x512xf32, #tpu.memory_space<vmem>>, vector<8x128xf32>
    tpu.vector_store %arg19[%c40, %c0_149], %136 {strides = array<i32>} : memref<64x512xf32, #tpu.memory_space<vmem>>, vector<8x128xf32>,
    %c0_150 = arith.constant 0 : index
    %c128_151 = arith.constant 128 : index
    %138 = vector.load %arg2[%c0_150, %c128_151] : memref<16x512xf32, #tpu.memory_space<vmem>>, vector<16x128xf32>
    %cst_152 = arith.constant dense<0.000000e+00> : vector<8x128xf32>
    %139 = tpu.matmul %131, %138, %cst_152 {dimension_numbers = #tpu.dot_dimension_numbers<[1], [0], [0], [1], [0, 0, 1, 1], [], []>} : vector<8x16xf32>, vector<16x128xf32>, vector<8x128xf32> -> vector<8x128xf32>
    %c0_153 = arith.constant 0 : index
    %c128_154 = arith.constant 128 : index
    %140 = vector.load %arg4[%c0_153, %c128_154] : memref<1x512xf32, #tpu.memory_space<vmem>>, vector<1x128xf32>
    %141 = vector.broadcast %140 : vector<1x128xf32> to vector<8x128xf32>
    %142 = arith.addf %139, %141 : vector<8x128xf32>
    %c40_155 = arith.constant 40 : index
    %c128_156 = arith.constant 128 : index
    %143 = vector.load %arg19[%c40_155, %c128_156] : memref<64x512xf32, #tpu.memory_space<vmem>>, vector<8x128xf32>
    tpu.vector_store %arg19[%c40_155, %c128_156], %142 {strides = array<i32>} : memref<64x512xf32, #tpu.memory_space<vmem>>, vector<8x128xf32>,
    %c0_157 = arith.constant 0 : index
    %c256_158 = arith.constant 256 : index
    %144 = vector.load %arg2[%c0_157, %c256_158] : memref<16x512xf32, #tpu.memory_space<vmem>>, vector<16x128xf32>
    %cst_159 = arith.constant dense<0.000000e+00> : vector<8x128xf32>
    %145 = tpu.matmul %131, %144, %cst_159 {dimension_numbers = #tpu.dot_dimension_numbers<[1], [0], [0], [1], [0, 0, 1, 1], [], []>} : vector<8x16xf32>, vector<16x128xf32>, vector<8x128xf32> -> vector<8x128xf32>
    %c0_160 = arith.constant 0 : index
    %c256_161 = arith.constant 256 : index
    %146 = vector.load %arg4[%c0_160, %c256_161] : memref<1x512xf32, #tpu.memory_space<vmem>>, vector<1x128xf32>
    %147 = vector.broadcast %146 : vector<1x128xf32> to vector<8x128xf32>
    %148 = arith.addf %145, %147 : vector<8x128xf32>
    %c40_162 = arith.constant 40 : index
    %c256_163 = arith.constant 256 : index
    %149 = vector.load %arg19[%c40_162, %c256_163] : memref<64x512xf32, #tpu.memory_space<vmem>>, vector<8x128xf32>
    tpu.vector_store %arg19[%c40_162, %c256_163], %148 {strides = array<i32>} : memref<64x512xf32, #tpu.memory_space<vmem>>, vector<8x128xf32>,
    %c0_164 = arith.constant 0 : index
    %c384_165 = arith.constant 384 : index
    %150 = vector.load %arg2[%c0_164, %c384_165] : memref<16x512xf32, #tpu.memory_space<vmem>>, vector<16x128xf32>
    %cst_166 = arith.constant dense<0.000000e+00> : vector<8x128xf32>
    %151 = tpu.matmul %131, %150, %cst_166 {dimension_numbers = #tpu.dot_dimension_numbers<[1], [0], [0], [1], [0, 0, 1, 1], [], []>} : vector<8x16xf32>, vector<16x128xf32>, vector<8x128xf32> -> vector<8x128xf32>
    %c0_167 = arith.constant 0 : index
    %c384_168 = arith.constant 384 : index
    %152 = vector.load %arg4[%c0_167, %c384_168] : memref<1x512xf32, #tpu.memory_space<vmem>>, vector<1x128xf32>
    %153 = vector.broadcast %152 : vector<1x128xf32> to vector<8x128xf32>
    %154 = arith.addf %151, %153 : vector<8x128xf32>
    %c40_169 = arith.constant 40 : index
    %c384_170 = arith.constant 384 : index
    %155 = vector.load %arg19[%c40_169, %c384_170] : memref<64x512xf32, #tpu.memory_space<vmem>>, vector<8x128xf32>
    tpu.vector_store %arg19[%c40_169, %c384_170], %154 {strides = array<i32>} : memref<64x512xf32, #tpu.memory_space<vmem>>, vector<8x128xf32>,
    %c6 = arith.constant 6 : index
    %c0_171 = arith.constant 0 : index
    %c0_172 = arith.constant 0 : index
    %156 = vector.load %arg1[%c6, %c0_171, %c0_172] : memref<8x8x16xf32, #tpu.memory_space<vmem>>, vector<1x8x16xf32>
    %157 = vector.shape_cast %156 : vector<1x8x16xf32> to vector<8x16xf32>
    %c0_173 = arith.constant 0 : index
    %c0_174 = arith.constant 0 : index
    %158 = vector.load %arg2[%c0_173, %c0_174] : memref<16x512xf32, #tpu.memory_space<vmem>>, vector<16x128xf32>
    %cst_175 = arith.constant dense<0.000000e+00> : vector<8x128xf32>
    %159 = tpu.matmul %157, %158, %cst_175 {dimension_numbers = #tpu.dot_dimension_numbers<[1], [0], [0], [1], [0, 0, 1, 1], [], []>} : vector<8x16xf32>, vector<16x128xf32>, vector<8x128xf32> -> vector<8x128xf32>
    %c0_176 = arith.constant 0 : index
    %c0_177 = arith.constant 0 : index
    %160 = vector.load %arg4[%c0_176, %c0_177] : memref<1x512xf32, #tpu.memory_space<vmem>>, vector<1x128xf32>
    %161 = vector.broadcast %160 : vector<1x128xf32> to vector<8x128xf32>
    %162 = arith.addf %159, %161 : vector<8x128xf32>
    %c48 = arith.constant 48 : index
    %c0_178 = arith.constant 0 : index
    %163 = vector.load %arg19[%c48, %c0_178] : memref<64x512xf32, #tpu.memory_space<vmem>>, vector<8x128xf32>
    tpu.vector_store %arg19[%c48, %c0_178], %162 {strides = array<i32>} : memref<64x512xf32, #tpu.memory_space<vmem>>, vector<8x128xf32>,
    %c0_179 = arith.constant 0 : index
    %c128_180 = arith.constant 128 : index
    %164 = vector.load %arg2[%c0_179, %c128_180] : memref<16x512xf32, #tpu.memory_space<vmem>>, vector<16x128xf32>
    %cst_181 = arith.constant dense<0.000000e+00> : vector<8x128xf32>
    %165 = tpu.matmul %157, %164, %cst_181 {dimension_numbers = #tpu.dot_dimension_numbers<[1], [0], [0], [1], [0, 0, 1, 1], [], []>} : vector<8x16xf32>, vector<16x128xf32>, vector<8x128xf32> -> vector<8x128xf32>
    %c0_182 = arith.constant 0 : index
    %c128_183 = arith.constant 128 : index
    %166 = vector.load %arg4[%c0_182, %c128_183] : memref<1x512xf32, #tpu.memory_space<vmem>>, vector<1x128xf32>
    %167 = vector.broadcast %166 : vector<1x128xf32> to vector<8x128xf32>
    %168 = arith.addf %165, %167 : vector<8x128xf32>
    %c48_184 = arith.constant 48 : index
    %c128_185 = arith.constant 128 : index
    %169 = vector.load %arg19[%c48_184, %c128_185] : memref<64x512xf32, #tpu.memory_space<vmem>>, vector<8x128xf32>
    tpu.vector_store %arg19[%c48_184, %c128_185], %168 {strides = array<i32>} : memref<64x512xf32, #tpu.memory_space<vmem>>, vector<8x128xf32>,
    %c0_186 = arith.constant 0 : index
    %c256_187 = arith.constant 256 : index
    %170 = vector.load %arg2[%c0_186, %c256_187] : memref<16x512xf32, #tpu.memory_space<vmem>>, vector<16x128xf32>
    %cst_188 = arith.constant dense<0.000000e+00> : vector<8x128xf32>
    %171 = tpu.matmul %157, %170, %cst_188 {dimension_numbers = #tpu.dot_dimension_numbers<[1], [0], [0], [1], [0, 0, 1, 1], [], []>} : vector<8x16xf32>, vector<16x128xf32>, vector<8x128xf32> -> vector<8x128xf32>
    %c0_189 = arith.constant 0 : index
    %c256_190 = arith.constant 256 : index
    %172 = vector.load %arg4[%c0_189, %c256_190] : memref<1x512xf32, #tpu.memory_space<vmem>>, vector<1x128xf32>
    %173 = vector.broadcast %172 : vector<1x128xf32> to vector<8x128xf32>
    %174 = arith.addf %171, %173 : vector<8x128xf32>
    %c48_191 = arith.constant 48 : index
    %c256_192 = arith.constant 256 : index
    %175 = vector.load %arg19[%c48_191, %c256_192] : memref<64x512xf32, #tpu.memory_space<vmem>>, vector<8x128xf32>
    tpu.vector_store %arg19[%c48_191, %c256_192], %174 {strides = array<i32>} : memref<64x512xf32, #tpu.memory_space<vmem>>, vector<8x128xf32>,
    %c0_193 = arith.constant 0 : index
    %c384_194 = arith.constant 384 : index
    %176 = vector.load %arg2[%c0_193, %c384_194] : memref<16x512xf32, #tpu.memory_space<vmem>>, vector<16x128xf32>
    %cst_195 = arith.constant dense<0.000000e+00> : vector<8x128xf32>
    %177 = tpu.matmul %157, %176, %cst_195 {dimension_numbers = #tpu.dot_dimension_numbers<[1], [0], [0], [1], [0, 0, 1, 1], [], []>} : vector<8x16xf32>, vector<16x128xf32>, vector<8x128xf32> -> vector<8x128xf32>
    %c0_196 = arith.constant 0 : index
    %c384_197 = arith.constant 384 : index
    %178 = vector.load %arg4[%c0_196, %c384_197] : memref<1x512xf32, #tpu.memory_space<vmem>>, vector<1x128xf32>
    %179 = vector.broadcast %178 : vector<1x128xf32> to vector<8x128xf32>
    %180 = arith.addf %177, %179 : vector<8x128xf32>
    %c48_198 = arith.constant 48 : index
    %c384_199 = arith.constant 384 : index
    %181 = vector.load %arg19[%c48_198, %c384_199] : memref<64x512xf32, #tpu.memory_space<vmem>>, vector<8x128xf32>
    tpu.vector_store %arg19[%c48_198, %c384_199], %180 {strides = array<i32>} : memref<64x512xf32, #tpu.memory_space<vmem>>, vector<8x128xf32>,
    %c7 = arith.constant 7 : index
    %c0_200 = arith.constant 0 : index
    %c0_201 = arith.constant 0 : index
    %182 = vector.load %arg1[%c7, %c0_200, %c0_201] : memref<8x8x16xf32, #tpu.memory_space<vmem>>, vector<1x8x16xf32>
    %183 = vector.shape_cast %182 : vector<1x8x16xf32> to vector<8x16xf32>
    %c0_202 = arith.constant 0 : index
    %c0_203 = arith.constant 0 : index
    %184 = vector.load %arg2[%c0_202, %c0_203] : memref<16x512xf32, #tpu.memory_space<vmem>>, vector<16x128xf32>
    %cst_204 = arith.constant dense<0.000000e+00> : vector<8x128xf32>
    %185 = tpu.matmul %183, %184, %cst_204 {dimension_numbers = #tpu.dot_dimension_numbers<[1], [0], [0], [1], [0, 0, 1, 1], [], []>} : vector<8x16xf32>, vector<16x128xf32>, vector<8x128xf32> -> vector<8x128xf32>
    %c0_205 = arith.constant 0 : index
    %c0_206 = arith.constant 0 : index
    %186 = vector.load %arg4[%c0_205, %c0_206] : memref<1x512xf32, #tpu.memory_space<vmem>>, vector<1x128xf32>
    %187 = vector.broadcast %186 : vector<1x128xf32> to vector<8x128xf32>
    %188 = arith.addf %185, %187 : vector<8x128xf32>
    %c56 = arith.constant 56 : index
    %c0_207 = arith.constant 0 : index
    %189 = vector.load %arg19[%c56, %c0_207] : memref<64x512xf32, #tpu.memory_space<vmem>>, vector<8x128xf32>
    tpu.vector_store %arg19[%c56, %c0_207], %188 {strides = array<i32>} : memref<64x512xf32, #tpu.memory_space<vmem>>, vector<8x128xf32>,
    %c0_208 = arith.constant 0 : index
    %c128_209 = arith.constant 128 : index
    %190 = vector.load %arg2[%c0_208, %c128_209] : memref<16x512xf32, #tpu.memory_space<vmem>>, vector<16x128xf32>
    %cst_210 = arith.constant dense<0.000000e+00> : vector<8x128xf32>
    %191 = tpu.matmul %183, %190, %cst_210 {dimension_numbers = #tpu.dot_dimension_numbers<[1], [0], [0], [1], [0, 0, 1, 1], [], []>} : vector<8x16xf32>, vector<16x128xf32>, vector<8x128xf32> -> vector<8x128xf32>
    %c0_211 = arith.constant 0 : index
    %c128_212 = arith.constant 128 : index
    %192 = vector.load %arg4[%c0_211, %c128_212] : memref<1x512xf32, #tpu.memory_space<vmem>>, vector<1x128xf32>
    %193 = vector.broadcast %192 : vector<1x128xf32> to vector<8x128xf32>
    %194 = arith.addf %191, %193 : vector<8x128xf32>
    %c56_213 = arith.constant 56 : index
    %c128_214 = arith.constant 128 : index
    %195 = vector.load %arg19[%c56_213, %c128_214] : memref<64x512xf32, #tpu.memory_space<vmem>>, vector<8x128xf32>
    tpu.vector_store %arg19[%c56_213, %c128_214], %194 {strides = array<i32>} : memref<64x512xf32, #tpu.memory_space<vmem>>, vector<8x128xf32>,
    %c0_215 = arith.constant 0 : index
    %c256_216 = arith.constant 256 : index
    %196 = vector.load %arg2[%c0_215, %c256_216] : memref<16x512xf32, #tpu.memory_space<vmem>>, vector<16x128xf32>
    %cst_217 = arith.constant dense<0.000000e+00> : vector<8x128xf32>
    %197 = tpu.matmul %183, %196, %cst_217 {dimension_numbers = #tpu.dot_dimension_numbers<[1], [0], [0], [1], [0, 0, 1, 1], [], []>} : vector<8x16xf32>, vector<16x128xf32>, vector<8x128xf32> -> vector<8x128xf32>
    %c0_218 = arith.constant 0 : index
    %c256_219 = arith.constant 256 : index
    %198 = vector.load %arg4[%c0_218, %c256_219] : memref<1x512xf32, #tpu.memory_space<vmem>>, vector<1x128xf32>
    %199 = vector.broadcast %198 : vector<1x128xf32> to vector<8x128xf32>
    %200 = arith.addf %197, %199 : vector<8x128xf32>
    %c56_220 = arith.constant 56 : index
    %c256_221 = arith.constant 256 : index
    %201 = vector.load %arg19[%c56_220, %c256_221] : memref<64x512xf32, #tpu.memory_space<vmem>>, vector<8x128xf32>
    tpu.vector_store %arg19[%c56_220, %c256_221], %200 {strides = array<i32>} : memref<64x512xf32, #tpu.memory_space<vmem>>, vector<8x128xf32>,
    %c0_222 = arith.constant 0 : index
    %c384_223 = arith.constant 384 : index
    %202 = vector.load %arg2[%c0_222, %c384_223] : memref<16x512xf32, #tpu.memory_space<vmem>>, vector<16x128xf32>
    %cst_224 = arith.constant dense<0.000000e+00> : vector<8x128xf32>
    %203 = tpu.matmul %183, %202, %cst_224 {dimension_numbers = #tpu.dot_dimension_numbers<[1], [0], [0], [1], [0, 0, 1, 1], [], []>} : vector<8x16xf32>, vector<16x128xf32>, vector<8x128xf32> -> vector<8x128xf32>
    %c0_225 = arith.constant 0 : index
    %c384_226 = arith.constant 384 : index
    %204 = vector.load %arg4[%c0_225, %c384_226] : memref<1x512xf32, #tpu.memory_space<vmem>>, vector<1x128xf32>
    %205 = vector.broadcast %204 : vector<1x128xf32> to vector<8x128xf32>
    %206 = arith.addf %203, %205 : vector<8x128xf32>
    %c56_227 = arith.constant 56 : index
    %c384_228 = arith.constant 384 : index
    %207 = vector.load %arg19[%c56_227, %c384_228] : memref<64x512xf32, #tpu.memory_space<vmem>>, vector<8x128xf32>
    tpu.vector_store %arg19[%c56_227, %c384_228], %206 {strides = array<i32>} : memref<64x512xf32, #tpu.memory_space<vmem>>, vector<8x128xf32>,
    %cst_229 = arith.constant 0.000000e+00 : f32
    %208 = vector.broadcast %cst_229 : f32 to vector<8x128xf32>
    %cst_230 = arith.constant 0.000000e+00 : f32
    %209 = vector.broadcast %cst_230 : f32 to vector<8x128xf32>
    %c0_231 = arith.constant 0 : index
    %c0_232 = arith.constant 0 : index
    %210 = vector.load %arg19[%c0_231, %c0_232] : memref<64x512xf32, #tpu.memory_space<vmem>>, vector<8x128xf32>
    %c0_233 = arith.constant 0 : index
    %c0_234 = arith.constant 0 : index
    %211 = vector.load %arg3[%c0_233, %c0_234] : memref<128x512xf32, #tpu.memory_space<vmem>>, vector<128x128xf32>
    %cst_235 = arith.constant dense<0.000000e+00> : vector<8x128xf32>
    %212 = tpu.matmul %208, %211, %cst_235 {dimension_numbers = #tpu.dot_dimension_numbers<[1], [0], [0], [1], [0, 0, 1, 1], [], []>} : vector<8x128xf32>, vector<128x128xf32>, vector<8x128xf32> -> vector<8x128xf32>
    %213 = arith.addf %210, %212 : vector<8x128xf32>
    %cst_236 = arith.constant 5.000000e-01 : f32
    %214 = vector.broadcast %cst_236 : f32 to vector<8x128xf32>
    %215 = arith.mulf %214, %213 : vector<8x128xf32>
    %216 = math.tanh %215 : vector<8x128xf32>
    %cst_237 = arith.constant 5.000000e-01 : f32
    %217 = vector.broadcast %cst_237 : f32 to vector<8x128xf32>
    %218 = arith.mulf %217, %216 : vector<8x128xf32>
    %cst_238 = arith.constant 5.000000e-01 : f32
    %219 = vector.broadcast %cst_238 : f32 to vector<8x128xf32>
    %220 = arith.addf %218, %219 : vector<8x128xf32>
    %c0_239 = arith.constant 0 : index
    %c256_240 = arith.constant 256 : index
    %221 = vector.load %arg19[%c0_239, %c256_240] : memref<64x512xf32, #tpu.memory_space<vmem>>, vector<8x128xf32>
    %c0_241 = arith.constant 0 : index
    %c256_242 = arith.constant 256 : index
    %222 = vector.load %arg3[%c0_241, %c256_242] : memref<128x512xf32, #tpu.memory_space<vmem>>, vector<128x128xf32>
    %cst_243 = arith.constant dense<0.000000e+00> : vector<8x128xf32>
    %223 = tpu.matmul %208, %222, %cst_243 {dimension_numbers = #tpu.dot_dimension_numbers<[1], [0], [0], [1], [0, 0, 1, 1], [], []>} : vector<8x128xf32>, vector<128x128xf32>, vector<8x128xf32> -> vector<8x128xf32>
    %224 = arith.addf %221, %223 : vector<8x128xf32>
    %225 = math.tanh %224 : vector<8x128xf32>
    %226 = arith.mulf %220, %225 : vector<8x128xf32>
    %c0_244 = arith.constant 0 : index
    %c128_245 = arith.constant 128 : index
    %227 = vector.load %arg19[%c0_244, %c128_245] : memref<64x512xf32, #tpu.memory_space<vmem>>, vector<8x128xf32>
    %c0_246 = arith.constant 0 : index
    %c128_247 = arith.constant 128 : index
    %228 = vector.load %arg3[%c0_246, %c128_247] : memref<128x512xf32, #tpu.memory_space<vmem>>, vector<128x128xf32>
    %cst_248 = arith.constant dense<0.000000e+00> : vector<8x128xf32>
    %229 = tpu.matmul %208, %228, %cst_248 {dimension_numbers = #tpu.dot_dimension_numbers<[1], [0], [0], [1], [0, 0, 1, 1], [], []>} : vector<8x128xf32>, vector<128x128xf32>, vector<8x128xf32> -> vector<8x128xf32>
    %230 = arith.addf %227, %229 : vector<8x128xf32>
    %cst_249 = arith.constant 5.000000e-01 : f32
    %231 = vector.broadcast %cst_249 : f32 to vector<8x128xf32>
    %232 = arith.mulf %231, %230 : vector<8x128xf32>
    %233 = math.tanh %232 : vector<8x128xf32>
    %cst_250 = arith.constant 5.000000e-01 : f32
    %234 = vector.broadcast %cst_250 : f32 to vector<8x128xf32>
    %235 = arith.mulf %234, %233 : vector<8x128xf32>
    %cst_251 = arith.constant 5.000000e-01 : f32
    %236 = vector.broadcast %cst_251 : f32 to vector<8x128xf32>
    %237 = arith.addf %235, %236 : vector<8x128xf32>
    %238 = arith.mulf %237, %209 : vector<8x128xf32>
    %239 = arith.addf %238, %226 : vector<8x128xf32>
    %c0_252 = arith.constant 0 : index
    %c384_253 = arith.constant 384 : index
    %240 = vector.load %arg19[%c0_252, %c384_253] : memref<64x512xf32, #tpu.memory_space<vmem>>, vector<8x128xf32>
    %c0_254 = arith.constant 0 : index
    %c384_255 = arith.constant 384 : index
    %241 = vector.load %arg3[%c0_254, %c384_255] : memref<128x512xf32, #tpu.memory_space<vmem>>, vector<128x128xf32>
    %cst_256 = arith.constant dense<0.000000e+00> : vector<8x128xf32>
    %242 = tpu.matmul %208, %241, %cst_256 {dimension_numbers = #tpu.dot_dimension_numbers<[1], [0], [0], [1], [0, 0, 1, 1], [], []>} : vector<8x128xf32>, vector<128x128xf32>, vector<8x128xf32> -> vector<8x128xf32>
    %243 = arith.addf %240, %242 : vector<8x128xf32>
    %cst_257 = arith.constant 5.000000e-01 : f32
    %244 = vector.broadcast %cst_257 : f32 to vector<8x128xf32>
    %245 = arith.mulf %244, %243 : vector<8x128xf32>
    %246 = math.tanh %245 : vector<8x128xf32>
    %cst_258 = arith.constant 5.000000e-01 : f32
    %247 = vector.broadcast %cst_258 : f32 to vector<8x128xf32>
    %248 = arith.mulf %247, %246 : vector<8x128xf32>
    %cst_259 = arith.constant 5.000000e-01 : f32
    %249 = vector.broadcast %cst_259 : f32 to vector<8x128xf32>
    %250 = arith.addf %248, %249 : vector<8x128xf32>
    %251 = math.tanh %239 : vector<8x128xf32>
    %252 = arith.mulf %250, %251 : vector<8x128xf32>
    %c0_260 = arith.constant 0 : index
    %c0_261 = arith.constant 0 : index
    %253 = vector.load %arg20[%c0_260, %c0_261] : memref<64x128xf32, #tpu.memory_space<vmem>>, vector<8x128xf32>
    tpu.vector_store %arg20[%c0_260, %c0_261], %252 {strides = array<i32>} : memref<64x128xf32, #tpu.memory_space<vmem>>, vector<8x128xf32>,
    %c8_262 = arith.constant 8 : index
    %c0_263 = arith.constant 0 : index
    %254 = vector.load %arg19[%c8_262, %c0_263] : memref<64x512xf32, #tpu.memory_space<vmem>>, vector<8x128xf32>
    %c0_264 = arith.constant 0 : index
    %c0_265 = arith.constant 0 : index
    %255 = vector.load %arg3[%c0_264, %c0_265] : memref<128x512xf32, #tpu.memory_space<vmem>>, vector<128x128xf32>
    %cst_266 = arith.constant dense<0.000000e+00> : vector<8x128xf32>
    %256 = tpu.matmul %252, %255, %cst_266 {dimension_numbers = #tpu.dot_dimension_numbers<[1], [0], [0], [1], [0, 0, 1, 1], [], []>} : vector<8x128xf32>, vector<128x128xf32>, vector<8x128xf32> -> vector<8x128xf32>
    %257 = arith.addf %254, %256 : vector<8x128xf32>
    %cst_267 = arith.constant 5.000000e-01 : f32
    %258 = vector.broadcast %cst_267 : f32 to vector<8x128xf32>
    %259 = arith.mulf %258, %257 : vector<8x128xf32>
    %260 = math.tanh %259 : vector<8x128xf32>
    %cst_268 = arith.constant 5.000000e-01 : f32
    %261 = vector.broadcast %cst_268 : f32 to vector<8x128xf32>
    %262 = arith.mulf %261, %260 : vector<8x128xf32>
    %cst_269 = arith.constant 5.000000e-01 : f32
    %263 = vector.broadcast %cst_269 : f32 to vector<8x128xf32>
    %264 = arith.addf %262, %263 : vector<8x128xf32>
    %c8_270 = arith.constant 8 : index
    %c256_271 = arith.constant 256 : index
    %265 = vector.load %arg19[%c8_270, %c256_271] : memref<64x512xf32, #tpu.memory_space<vmem>>, vector<8x128xf32>
    %c0_272 = arith.constant 0 : index
    %c256_273 = arith.constant 256 : index
    %266 = vector.load %arg3[%c0_272, %c256_273] : memref<128x512xf32, #tpu.memory_space<vmem>>, vector<128x128xf32>
    %cst_274 = arith.constant dense<0.000000e+00> : vector<8x128xf32>
    %267 = tpu.matmul %252, %266, %cst_274 {dimension_numbers = #tpu.dot_dimension_numbers<[1], [0], [0], [1], [0, 0, 1, 1], [], []>} : vector<8x128xf32>, vector<128x128xf32>, vector<8x128xf32> -> vector<8x128xf32>
    %268 = arith.addf %265, %267 : vector<8x128xf32>
    %269 = math.tanh %268 : vector<8x128xf32>
    %270 = arith.mulf %264, %269 : vector<8x128xf32>
    %c8_275 = arith.constant 8 : index
    %c128_276 = arith.constant 128 : index
    %271 = vector.load %arg19[%c8_275, %c128_276] : memref<64x512xf32, #tpu.memory_space<vmem>>, vector<8x128xf32>
    %c0_277 = arith.constant 0 : index
    %c128_278 = arith.constant 128 : index
    %272 = vector.load %arg3[%c0_277, %c128_278] : memref<128x512xf32, #tpu.memory_space<vmem>>, vector<128x128xf32>
    %cst_279 = arith.constant dense<0.000000e+00> : vector<8x128xf32>
    %273 = tpu.matmul %252, %272, %cst_279 {dimension_numbers = #tpu.dot_dimension_numbers<[1], [0], [0], [1], [0, 0, 1, 1], [], []>} : vector<8x128xf32>, vector<128x128xf32>, vector<8x128xf32> -> vector<8x128xf32>
    %274 = arith.addf %271, %273 : vector<8x128xf32>
    %cst_280 = arith.constant 5.000000e-01 : f32
    %275 = vector.broadcast %cst_280 : f32 to vector<8x128xf32>
    %276 = arith.mulf %275, %274 : vector<8x128xf32>
    %277 = math.tanh %276 : vector<8x128xf32>
    %cst_281 = arith.constant 5.000000e-01 : f32
    %278 = vector.broadcast %cst_281 : f32 to vector<8x128xf32>
    %279 = arith.mulf %278, %277 : vector<8x128xf32>
    %cst_282 = arith.constant 5.000000e-01 : f32
    %280 = vector.broadcast %cst_282 : f32 to vector<8x128xf32>
    %281 = arith.addf %279, %280 : vector<8x128xf32>
    %282 = arith.mulf %281, %239 : vector<8x128xf32>
    %283 = arith.addf %282, %270 : vector<8x128xf32>
    %c8_283 = arith.constant 8 : index
    %c384_284 = arith.constant 384 : index
    %284 = vector.load %arg19[%c8_283, %c384_284] : memref<64x512xf32, #tpu.memory_space<vmem>>, vector<8x128xf32>
    %c0_285 = arith.constant 0 : index
    %c384_286 = arith.constant 384 : index
    %285 = vector.load %arg3[%c0_285, %c384_286] : memref<128x512xf32, #tpu.memory_space<vmem>>, vector<128x128xf32>
    %cst_287 = arith.constant dense<0.000000e+00> : vector<8x128xf32>
    %286 = tpu.matmul %252, %285, %cst_287 {dimension_numbers = #tpu.dot_dimension_numbers<[1], [0], [0], [1], [0, 0, 1, 1], [], []>} : vector<8x128xf32>, vector<128x128xf32>, vector<8x128xf32> -> vector<8x128xf32>
    %287 = arith.addf %284, %286 : vector<8x128xf32>
    %cst_288 = arith.constant 5.000000e-01 : f32
    %288 = vector.broadcast %cst_288 : f32 to vector<8x128xf32>
    %289 = arith.mulf %288, %287 : vector<8x128xf32>
    %290 = math.tanh %289 : vector<8x128xf32>
    %cst_289 = arith.constant 5.000000e-01 : f32
    %291 = vector.broadcast %cst_289 : f32 to vector<8x128xf32>
    %292 = arith.mulf %291, %290 : vector<8x128xf32>
    %cst_290 = arith.constant 5.000000e-01 : f32
    %293 = vector.broadcast %cst_290 : f32 to vector<8x128xf32>
    %294 = arith.addf %292, %293 : vector<8x128xf32>
    %295 = math.tanh %283 : vector<8x128xf32>
    %296 = arith.mulf %294, %295 : vector<8x128xf32>
    %c8_291 = arith.constant 8 : index
    %c0_292 = arith.constant 0 : index
    %297 = vector.load %arg20[%c8_291, %c0_292] : memref<64x128xf32, #tpu.memory_space<vmem>>, vector<8x128xf32>
    tpu.vector_store %arg20[%c8_291, %c0_292], %296 {strides = array<i32>} : memref<64x128xf32, #tpu.memory_space<vmem>>, vector<8x128xf32>,
    %c16_293 = arith.constant 16 : index
    %c0_294 = arith.constant 0 : index
    %298 = vector.load %arg19[%c16_293, %c0_294] : memref<64x512xf32, #tpu.memory_space<vmem>>, vector<8x128xf32>
    %c0_295 = arith.constant 0 : index
    %c0_296 = arith.constant 0 : index
    %299 = vector.load %arg3[%c0_295, %c0_296] : memref<128x512xf32, #tpu.memory_space<vmem>>, vector<128x128xf32>
    %cst_297 = arith.constant dense<0.000000e+00> : vector<8x128xf32>
    %300 = tpu.matmul %296, %299, %cst_297 {dimension_numbers = #tpu.dot_dimension_numbers<[1], [0], [0], [1], [0, 0, 1, 1], [], []>} : vector<8x128xf32>, vector<128x128xf32>, vector<8x128xf32> -> vector<8x128xf32>
    %301 = arith.addf %298, %300 : vector<8x128xf32>
    %cst_298 = arith.constant 5.000000e-01 : f32
    %302 = vector.broadcast %cst_298 : f32 to vector<8x128xf32>
    %303 = arith.mulf %302, %301 : vector<8x128xf32>
    %304 = math.tanh %303 : vector<8x128xf32>
    %cst_299 = arith.constant 5.000000e-01 : f32
    %305 = vector.broadcast %cst_299 : f32 to vector<8x128xf32>
    %306 = arith.mulf %305, %304 : vector<8x128xf32>
    %cst_300 = arith.constant 5.000000e-01 : f32
    %307 = vector.broadcast %cst_300 : f32 to vector<8x128xf32>
    %308 = arith.addf %306, %307 : vector<8x128xf32>
    %c16_301 = arith.constant 16 : index
    %c256_302 = arith.constant 256 : index
    %309 = vector.load %arg19[%c16_301, %c256_302] : memref<64x512xf32, #tpu.memory_space<vmem>>, vector<8x128xf32>
    %c0_303 = arith.constant 0 : index
    %c256_304 = arith.constant 256 : index
    %310 = vector.load %arg3[%c0_303, %c256_304] : memref<128x512xf32, #tpu.memory_space<vmem>>, vector<128x128xf32>
    %cst_305 = arith.constant dense<0.000000e+00> : vector<8x128xf32>
    %311 = tpu.matmul %296, %310, %cst_305 {dimension_numbers = #tpu.dot_dimension_numbers<[1], [0], [0], [1], [0, 0, 1, 1], [], []>} : vector<8x128xf32>, vector<128x128xf32>, vector<8x128xf32> -> vector<8x128xf32>
    %312 = arith.addf %309, %311 : vector<8x128xf32>
    %313 = math.tanh %312 : vector<8x128xf32>
    %314 = arith.mulf %308, %313 : vector<8x128xf32>
    %c16_306 = arith.constant 16 : index
    %c128_307 = arith.constant 128 : index
    %315 = vector.load %arg19[%c16_306, %c128_307] : memref<64x512xf32, #tpu.memory_space<vmem>>, vector<8x128xf32>
    %c0_308 = arith.constant 0 : index
    %c128_309 = arith.constant 128 : index
    %316 = vector.load %arg3[%c0_308, %c128_309] : memref<128x512xf32, #tpu.memory_space<vmem>>, vector<128x128xf32>
    %cst_310 = arith.constant dense<0.000000e+00> : vector<8x128xf32>
    %317 = tpu.matmul %296, %316, %cst_310 {dimension_numbers = #tpu.dot_dimension_numbers<[1], [0], [0], [1], [0, 0, 1, 1], [], []>} : vector<8x128xf32>, vector<128x128xf32>, vector<8x128xf32> -> vector<8x128xf32>
    %318 = arith.addf %315, %317 : vector<8x128xf32>
    %cst_311 = arith.constant 5.000000e-01 : f32
    %319 = vector.broadcast %cst_311 : f32 to vector<8x128xf32>
    %320 = arith.mulf %319, %318 : vector<8x128xf32>
    %321 = math.tanh %320 : vector<8x128xf32>
    %cst_312 = arith.constant 5.000000e-01 : f32
    %322 = vector.broadcast %cst_312 : f32 to vector<8x128xf32>
    %323 = arith.mulf %322, %321 : vector<8x128xf32>
    %cst_313 = arith.constant 5.000000e-01 : f32
    %324 = vector.broadcast %cst_313 : f32 to vector<8x128xf32>
    %325 = arith.addf %323, %324 : vector<8x128xf32>
    %326 = arith.mulf %325, %283 : vector<8x128xf32>
    %327 = arith.addf %326, %314 : vector<8x128xf32>
    %c16_314 = arith.constant 16 : index
    %c384_315 = arith.constant 384 : index
    %328 = vector.load %arg19[%c16_314, %c384_315] : memref<64x512xf32, #tpu.memory_space<vmem>>, vector<8x128xf32>
    %c0_316 = arith.constant 0 : index
    %c384_317 = arith.constant 384 : index
    %329 = vector.load %arg3[%c0_316, %c384_317] : memref<128x512xf32, #tpu.memory_space<vmem>>, vector<128x128xf32>
    %cst_318 = arith.constant dense<0.000000e+00> : vector<8x128xf32>
    %330 = tpu.matmul %296, %329, %cst_318 {dimension_numbers = #tpu.dot_dimension_numbers<[1], [0], [0], [1], [0, 0, 1, 1], [], []>} : vector<8x128xf32>, vector<128x128xf32>, vector<8x128xf32> -> vector<8x128xf32>
    %331 = arith.addf %328, %330 : vector<8x128xf32>
    %cst_319 = arith.constant 5.000000e-01 : f32
    %332 = vector.broadcast %cst_319 : f32 to vector<8x128xf32>
    %333 = arith.mulf %332, %331 : vector<8x128xf32>
    %334 = math.tanh %333 : vector<8x128xf32>
    %cst_320 = arith.constant 5.000000e-01 : f32
    %335 = vector.broadcast %cst_320 : f32 to vector<8x128xf32>
    %336 = arith.mulf %335, %334 : vector<8x128xf32>
    %cst_321 = arith.constant 5.000000e-01 : f32
    %337 = vector.broadcast %cst_321 : f32 to vector<8x128xf32>
    %338 = arith.addf %336, %337 : vector<8x128xf32>
    %339 = math.tanh %327 : vector<8x128xf32>
    %340 = arith.mulf %338, %339 : vector<8x128xf32>
    %c16_322 = arith.constant 16 : index
    %c0_323 = arith.constant 0 : index
    %341 = vector.load %arg20[%c16_322, %c0_323] : memref<64x128xf32, #tpu.memory_space<vmem>>, vector<8x128xf32>
    tpu.vector_store %arg20[%c16_322, %c0_323], %340 {strides = array<i32>} : memref<64x128xf32, #tpu.memory_space<vmem>>, vector<8x128xf32>,
    %c24_324 = arith.constant 24 : index
    %c0_325 = arith.constant 0 : index
    %342 = vector.load %arg19[%c24_324, %c0_325] : memref<64x512xf32, #tpu.memory_space<vmem>>, vector<8x128xf32>
    %c0_326 = arith.constant 0 : index
    %c0_327 = arith.constant 0 : index
    %343 = vector.load %arg3[%c0_326, %c0_327] : memref<128x512xf32, #tpu.memory_space<vmem>>, vector<128x128xf32>
    %cst_328 = arith.constant dense<0.000000e+00> : vector<8x128xf32>
    %344 = tpu.matmul %340, %343, %cst_328 {dimension_numbers = #tpu.dot_dimension_numbers<[1], [0], [0], [1], [0, 0, 1, 1], [], []>} : vector<8x128xf32>, vector<128x128xf32>, vector<8x128xf32> -> vector<8x128xf32>
    %345 = arith.addf %342, %344 : vector<8x128xf32>
    %cst_329 = arith.constant 5.000000e-01 : f32
    %346 = vector.broadcast %cst_329 : f32 to vector<8x128xf32>
    %347 = arith.mulf %346, %345 : vector<8x128xf32>
    %348 = math.tanh %347 : vector<8x128xf32>
    %cst_330 = arith.constant 5.000000e-01 : f32
    %349 = vector.broadcast %cst_330 : f32 to vector<8x128xf32>
    %350 = arith.mulf %349, %348 : vector<8x128xf32>
    %cst_331 = arith.constant 5.000000e-01 : f32
    %351 = vector.broadcast %cst_331 : f32 to vector<8x128xf32>
    %352 = arith.addf %350, %351 : vector<8x128xf32>
    %c24_332 = arith.constant 24 : index
    %c256_333 = arith.constant 256 : index
    %353 = vector.load %arg19[%c24_332, %c256_333] : memref<64x512xf32, #tpu.memory_space<vmem>>, vector<8x128xf32>
    %c0_334 = arith.constant 0 : index
    %c256_335 = arith.constant 256 : index
    %354 = vector.load %arg3[%c0_334, %c256_335] : memref<128x512xf32, #tpu.memory_space<vmem>>, vector<128x128xf32>
    %cst_336 = arith.constant dense<0.000000e+00> : vector<8x128xf32>
    %355 = tpu.matmul %340, %354, %cst_336 {dimension_numbers = #tpu.dot_dimension_numbers<[1], [0], [0], [1], [0, 0, 1, 1], [], []>} : vector<8x128xf32>, vector<128x128xf32>, vector<8x128xf32> -> vector<8x128xf32>
    %356 = arith.addf %353, %355 : vector<8x128xf32>
    %357 = math.tanh %356 : vector<8x128xf32>
    %358 = arith.mulf %352, %357 : vector<8x128xf32>
    %c24_337 = arith.constant 24 : index
    %c128_338 = arith.constant 128 : index
    %359 = vector.load %arg19[%c24_337, %c128_338] : memref<64x512xf32, #tpu.memory_space<vmem>>, vector<8x128xf32>
    %c0_339 = arith.constant 0 : index
    %c128_340 = arith.constant 128 : index
    %360 = vector.load %arg3[%c0_339, %c128_340] : memref<128x512xf32, #tpu.memory_space<vmem>>, vector<128x128xf32>
    %cst_341 = arith.constant dense<0.000000e+00> : vector<8x128xf32>
    %361 = tpu.matmul %340, %360, %cst_341 {dimension_numbers = #tpu.dot_dimension_numbers<[1], [0], [0], [1], [0, 0, 1, 1], [], []>} : vector<8x128xf32>, vector<128x128xf32>, vector<8x128xf32> -> vector<8x128xf32>
    %362 = arith.addf %359, %361 : vector<8x128xf32>
    %cst_342 = arith.constant 5.000000e-01 : f32
    %363 = vector.broadcast %cst_342 : f32 to vector<8x128xf32>
    %364 = arith.mulf %363, %362 : vector<8x128xf32>
    %365 = math.tanh %364 : vector<8x128xf32>
    %cst_343 = arith.constant 5.000000e-01 : f32
    %366 = vector.broadcast %cst_343 : f32 to vector<8x128xf32>
    %367 = arith.mulf %366, %365 : vector<8x128xf32>
    %cst_344 = arith.constant 5.000000e-01 : f32
    %368 = vector.broadcast %cst_344 : f32 to vector<8x128xf32>
    %369 = arith.addf %367, %368 : vector<8x128xf32>
    %370 = arith.mulf %369, %327 : vector<8x128xf32>
    %371 = arith.addf %370, %358 : vector<8x128xf32>
    %c24_345 = arith.constant 24 : index
    %c384_346 = arith.constant 384 : index
    %372 = vector.load %arg19[%c24_345, %c384_346] : memref<64x512xf32, #tpu.memory_space<vmem>>, vector<8x128xf32>
    %c0_347 = arith.constant 0 : index
    %c384_348 = arith.constant 384 : index
    %373 = vector.load %arg3[%c0_347, %c384_348] : memref<128x512xf32, #tpu.memory_space<vmem>>, vector<128x128xf32>
    %cst_349 = arith.constant dense<0.000000e+00> : vector<8x128xf32>
    %374 = tpu.matmul %340, %373, %cst_349 {dimension_numbers = #tpu.dot_dimension_numbers<[1], [0], [0], [1], [0, 0, 1, 1], [], []>} : vector<8x128xf32>, vector<128x128xf32>, vector<8x128xf32> -> vector<8x128xf32>
    %375 = arith.addf %372, %374 : vector<8x128xf32>
    %cst_350 = arith.constant 5.000000e-01 : f32
    %376 = vector.broadcast %cst_350 : f32 to vector<8x128xf32>
    %377 = arith.mulf %376, %375 : vector<8x128xf32>
    %378 = math.tanh %377 : vector<8x128xf32>
    %cst_351 = arith.constant 5.000000e-01 : f32
    %379 = vector.broadcast %cst_351 : f32 to vector<8x128xf32>
    %380 = arith.mulf %379, %378 : vector<8x128xf32>
    %cst_352 = arith.constant 5.000000e-01 : f32
    %381 = vector.broadcast %cst_352 : f32 to vector<8x128xf32>
    %382 = arith.addf %380, %381 : vector<8x128xf32>
    %383 = math.tanh %371 : vector<8x128xf32>
    %384 = arith.mulf %382, %383 : vector<8x128xf32>
    %c24_353 = arith.constant 24 : index
    %c0_354 = arith.constant 0 : index
    %385 = vector.load %arg20[%c24_353, %c0_354] : memref<64x128xf32, #tpu.memory_space<vmem>>, vector<8x128xf32>
    tpu.vector_store %arg20[%c24_353, %c0_354], %384 {strides = array<i32>} : memref<64x128xf32, #tpu.memory_space<vmem>>, vector<8x128xf32>,
    %c32_355 = arith.constant 32 : index
    %c0_356 = arith.constant 0 : index
    %386 = vector.load %arg19[%c32_355, %c0_356] : memref<64x512xf32, #tpu.memory_space<vmem>>, vector<8x128xf32>
    %c0_357 = arith.constant 0 : index
    %c0_358 = arith.constant 0 : index
    %387 = vector.load %arg3[%c0_357, %c0_358] : memref<128x512xf32, #tpu.memory_space<vmem>>, vector<128x128xf32>
    %cst_359 = arith.constant dense<0.000000e+00> : vector<8x128xf32>
    %388 = tpu.matmul %384, %387, %cst_359 {dimension_numbers = #tpu.dot_dimension_numbers<[1], [0], [0], [1], [0, 0, 1, 1], [], []>} : vector<8x128xf32>, vector<128x128xf32>, vector<8x128xf32> -> vector<8x128xf32>
    %389 = arith.addf %386, %388 : vector<8x128xf32>
    %cst_360 = arith.constant 5.000000e-01 : f32
    %390 = vector.broadcast %cst_360 : f32 to vector<8x128xf32>
    %391 = arith.mulf %390, %389 : vector<8x128xf32>
    %392 = math.tanh %391 : vector<8x128xf32>
    %cst_361 = arith.constant 5.000000e-01 : f32
    %393 = vector.broadcast %cst_361 : f32 to vector<8x128xf32>
    %394 = arith.mulf %393, %392 : vector<8x128xf32>
    %cst_362 = arith.constant 5.000000e-01 : f32
    %395 = vector.broadcast %cst_362 : f32 to vector<8x128xf32>
    %396 = arith.addf %394, %395 : vector<8x128xf32>
    %c32_363 = arith.constant 32 : index
    %c256_364 = arith.constant 256 : index
    %397 = vector.load %arg19[%c32_363, %c256_364] : memref<64x512xf32, #tpu.memory_space<vmem>>, vector<8x128xf32>
    %c0_365 = arith.constant 0 : index
    %c256_366 = arith.constant 256 : index
    %398 = vector.load %arg3[%c0_365, %c256_366] : memref<128x512xf32, #tpu.memory_space<vmem>>, vector<128x128xf32>
    %cst_367 = arith.constant dense<0.000000e+00> : vector<8x128xf32>
    %399 = tpu.matmul %384, %398, %cst_367 {dimension_numbers = #tpu.dot_dimension_numbers<[1], [0], [0], [1], [0, 0, 1, 1], [], []>} : vector<8x128xf32>, vector<128x128xf32>, vector<8x128xf32> -> vector<8x128xf32>
    %400 = arith.addf %397, %399 : vector<8x128xf32>
    %401 = math.tanh %400 : vector<8x128xf32>
    %402 = arith.mulf %396, %401 : vector<8x128xf32>
    %c32_368 = arith.constant 32 : index
    %c128_369 = arith.constant 128 : index
    %403 = vector.load %arg19[%c32_368, %c128_369] : memref<64x512xf32, #tpu.memory_space<vmem>>, vector<8x128xf32>
    %c0_370 = arith.constant 0 : index
    %c128_371 = arith.constant 128 : index
    %404 = vector.load %arg3[%c0_370, %c128_371] : memref<128x512xf32, #tpu.memory_space<vmem>>, vector<128x128xf32>
    %cst_372 = arith.constant dense<0.000000e+00> : vector<8x128xf32>
    %405 = tpu.matmul %384, %404, %cst_372 {dimension_numbers = #tpu.dot_dimension_numbers<[1], [0], [0], [1], [0, 0, 1, 1], [], []>} : vector<8x128xf32>, vector<128x128xf32>, vector<8x128xf32> -> vector<8x128xf32>
    %406 = arith.addf %403, %405 : vector<8x128xf32>
    %cst_373 = arith.constant 5.000000e-01 : f32
    %407 = vector.broadcast %cst_373 : f32 to vector<8x128xf32>
    %408 = arith.mulf %407, %406 : vector<8x128xf32>
    %409 = math.tanh %408 : vector<8x128xf32>
    %cst_374 = arith.constant 5.000000e-01 : f32
    %410 = vector.broadcast %cst_374 : f32 to vector<8x128xf32>
    %411 = arith.mulf %410, %409 : vector<8x128xf32>
    %cst_375 = arith.constant 5.000000e-01 : f32
    %412 = vector.broadcast %cst_375 : f32 to vector<8x128xf32>
    %413 = arith.addf %411, %412 : vector<8x128xf32>
    %414 = arith.mulf %413, %371 : vector<8x128xf32>
    %415 = arith.addf %414, %402 : vector<8x128xf32>
    %c32_376 = arith.constant 32 : index
    %c384_377 = arith.constant 384 : index
    %416 = vector.load %arg19[%c32_376, %c384_377] : memref<64x512xf32, #tpu.memory_space<vmem>>, vector<8x128xf32>
    %c0_378 = arith.constant 0 : index
    %c384_379 = arith.constant 384 : index
    %417 = vector.load %arg3[%c0_378, %c384_379] : memref<128x512xf32, #tpu.memory_space<vmem>>, vector<128x128xf32>
    %cst_380 = arith.constant dense<0.000000e+00> : vector<8x128xf32>
    %418 = tpu.matmul %384, %417, %cst_380 {dimension_numbers = #tpu.dot_dimension_numbers<[1], [0], [0], [1], [0, 0, 1, 1], [], []>} : vector<8x128xf32>, vector<128x128xf32>, vector<8x128xf32> -> vector<8x128xf32>
    %419 = arith.addf %416, %418 : vector<8x128xf32>
    %cst_381 = arith.constant 5.000000e-01 : f32
    %420 = vector.broadcast %cst_381 : f32 to vector<8x128xf32>
    %421 = arith.mulf %420, %419 : vector<8x128xf32>
    %422 = math.tanh %421 : vector<8x128xf32>
    %cst_382 = arith.constant 5.000000e-01 : f32
    %423 = vector.broadcast %cst_382 : f32 to vector<8x128xf32>
    %424 = arith.mulf %423, %422 : vector<8x128xf32>
    %cst_383 = arith.constant 5.000000e-01 : f32
    %425 = vector.broadcast %cst_383 : f32 to vector<8x128xf32>
    %426 = arith.addf %424, %425 : vector<8x128xf32>
    %427 = math.tanh %415 : vector<8x128xf32>
    %428 = arith.mulf %426, %427 : vector<8x128xf32>
    %c32_384 = arith.constant 32 : index
    %c0_385 = arith.constant 0 : index
    %429 = vector.load %arg20[%c32_384, %c0_385] : memref<64x128xf32, #tpu.memory_space<vmem>>, vector<8x128xf32>
    tpu.vector_store %arg20[%c32_384, %c0_385], %428 {strides = array<i32>} : memref<64x128xf32, #tpu.memory_space<vmem>>, vector<8x128xf32>,
    %c40_386 = arith.constant 40 : index
    %c0_387 = arith.constant 0 : index
    %430 = vector.load %arg19[%c40_386, %c0_387] : memref<64x512xf32, #tpu.memory_space<vmem>>, vector<8x128xf32>
    %c0_388 = arith.constant 0 : index
    %c0_389 = arith.constant 0 : index
    %431 = vector.load %arg3[%c0_388, %c0_389] : memref<128x512xf32, #tpu.memory_space<vmem>>, vector<128x128xf32>
    %cst_390 = arith.constant dense<0.000000e+00> : vector<8x128xf32>
    %432 = tpu.matmul %428, %431, %cst_390 {dimension_numbers = #tpu.dot_dimension_numbers<[1], [0], [0], [1], [0, 0, 1, 1], [], []>} : vector<8x128xf32>, vector<128x128xf32>, vector<8x128xf32> -> vector<8x128xf32>
    %433 = arith.addf %430, %432 : vector<8x128xf32>
    %cst_391 = arith.constant 5.000000e-01 : f32
    %434 = vector.broadcast %cst_391 : f32 to vector<8x128xf32>
    %435 = arith.mulf %434, %433 : vector<8x128xf32>
    %436 = math.tanh %435 : vector<8x128xf32>
    %cst_392 = arith.constant 5.000000e-01 : f32
    %437 = vector.broadcast %cst_392 : f32 to vector<8x128xf32>
    %438 = arith.mulf %437, %436 : vector<8x128xf32>
    %cst_393 = arith.constant 5.000000e-01 : f32
    %439 = vector.broadcast %cst_393 : f32 to vector<8x128xf32>
    %440 = arith.addf %438, %439 : vector<8x128xf32>
    %c40_394 = arith.constant 40 : index
    %c256_395 = arith.constant 256 : index
    %441 = vector.load %arg19[%c40_394, %c256_395] : memref<64x512xf32, #tpu.memory_space<vmem>>, vector<8x128xf32>
    %c0_396 = arith.constant 0 : index
    %c256_397 = arith.constant 256 : index
    %442 = vector.load %arg3[%c0_396, %c256_397] : memref<128x512xf32, #tpu.memory_space<vmem>>, vector<128x128xf32>
    %cst_398 = arith.constant dense<0.000000e+00> : vector<8x128xf32>
    %443 = tpu.matmul %428, %442, %cst_398 {dimension_numbers = #tpu.dot_dimension_numbers<[1], [0], [0], [1], [0, 0, 1, 1], [], []>} : vector<8x128xf32>, vector<128x128xf32>, vector<8x128xf32> -> vector<8x128xf32>
    %444 = arith.addf %441, %443 : vector<8x128xf32>
    %445 = math.tanh %444 : vector<8x128xf32>
    %446 = arith.mulf %440, %445 : vector<8x128xf32>
    %c40_399 = arith.constant 40 : index
    %c128_400 = arith.constant 128 : index
    %447 = vector.load %arg19[%c40_399, %c128_400] : memref<64x512xf32, #tpu.memory_space<vmem>>, vector<8x128xf32>
    %c0_401 = arith.constant 0 : index
    %c128_402 = arith.constant 128 : index
    %448 = vector.load %arg3[%c0_401, %c128_402] : memref<128x512xf32, #tpu.memory_space<vmem>>, vector<128x128xf32>
    %cst_403 = arith.constant dense<0.000000e+00> : vector<8x128xf32>
    %449 = tpu.matmul %428, %448, %cst_403 {dimension_numbers = #tpu.dot_dimension_numbers<[1], [0], [0], [1], [0, 0, 1, 1], [], []>} : vector<8x128xf32>, vector<128x128xf32>, vector<8x128xf32> -> vector<8x128xf32>
    %450 = arith.addf %447, %449 : vector<8x128xf32>
    %cst_404 = arith.constant 5.000000e-01 : f32
    %451 = vector.broadcast %cst_404 : f32 to vector<8x128xf32>
    %452 = arith.mulf %451, %450 : vector<8x128xf32>
    %453 = math.tanh %452 : vector<8x128xf32>
    %cst_405 = arith.constant 5.000000e-01 : f32
    %454 = vector.broadcast %cst_405 : f32 to vector<8x128xf32>
    %455 = arith.mulf %454, %453 : vector<8x128xf32>
    %cst_406 = arith.constant 5.000000e-01 : f32
    %456 = vector.broadcast %cst_406 : f32 to vector<8x128xf32>
    %457 = arith.addf %455, %456 : vector<8x128xf32>
    %458 = arith.mulf %457, %415 : vector<8x128xf32>
    %459 = arith.addf %458, %446 : vector<8x128xf32>
    %c40_407 = arith.constant 40 : index
    %c384_408 = arith.constant 384 : index
    %460 = vector.load %arg19[%c40_407, %c384_408] : memref<64x512xf32, #tpu.memory_space<vmem>>, vector<8x128xf32>
    %c0_409 = arith.constant 0 : index
    %c384_410 = arith.constant 384 : index
    %461 = vector.load %arg3[%c0_409, %c384_410] : memref<128x512xf32, #tpu.memory_space<vmem>>, vector<128x128xf32>
    %cst_411 = arith.constant dense<0.000000e+00> : vector<8x128xf32>
    %462 = tpu.matmul %428, %461, %cst_411 {dimension_numbers = #tpu.dot_dimension_numbers<[1], [0], [0], [1], [0, 0, 1, 1], [], []>} : vector<8x128xf32>, vector<128x128xf32>, vector<8x128xf32> -> vector<8x128xf32>
    %463 = arith.addf %460, %462 : vector<8x128xf32>
    %cst_412 = arith.constant 5.000000e-01 : f32
    %464 = vector.broadcast %cst_412 : f32 to vector<8x128xf32>
    %465 = arith.mulf %464, %463 : vector<8x128xf32>
    %466 = math.tanh %465 : vector<8x128xf32>
    %cst_413 = arith.constant 5.000000e-01 : f32
    %467 = vector.broadcast %cst_413 : f32 to vector<8x128xf32>
    %468 = arith.mulf %467, %466 : vector<8x128xf32>
    %cst_414 = arith.constant 5.000000e-01 : f32
    %469 = vector.broadcast %cst_414 : f32 to vector<8x128xf32>
    %470 = arith.addf %468, %469 : vector<8x128xf32>
    %471 = math.tanh %459 : vector<8x128xf32>
    %472 = arith.mulf %470, %471 : vector<8x128xf32>
    %c40_415 = arith.constant 40 : index
    %c0_416 = arith.constant 0 : index
    %473 = vector.load %arg20[%c40_415, %c0_416] : memref<64x128xf32, #tpu.memory_space<vmem>>, vector<8x128xf32>
    tpu.vector_store %arg20[%c40_415, %c0_416], %472 {strides = array<i32>} : memref<64x128xf32, #tpu.memory_space<vmem>>, vector<8x128xf32>,
    %c48_417 = arith.constant 48 : index
    %c0_418 = arith.constant 0 : index
    %474 = vector.load %arg19[%c48_417, %c0_418] : memref<64x512xf32, #tpu.memory_space<vmem>>, vector<8x128xf32>
    %c0_419 = arith.constant 0 : index
    %c0_420 = arith.constant 0 : index
    %475 = vector.load %arg3[%c0_419, %c0_420] : memref<128x512xf32, #tpu.memory_space<vmem>>, vector<128x128xf32>
    %cst_421 = arith.constant dense<0.000000e+00> : vector<8x128xf32>
    %476 = tpu.matmul %472, %475, %cst_421 {dimension_numbers = #tpu.dot_dimension_numbers<[1], [0], [0], [1], [0, 0, 1, 1], [], []>} : vector<8x128xf32>, vector<128x128xf32>, vector<8x128xf32> -> vector<8x128xf32>
    %477 = arith.addf %474, %476 : vector<8x128xf32>
    %cst_422 = arith.constant 5.000000e-01 : f32
    %478 = vector.broadcast %cst_422 : f32 to vector<8x128xf32>
    %479 = arith.mulf %478, %477 : vector<8x128xf32>
    %480 = math.tanh %479 : vector<8x128xf32>
    %cst_423 = arith.constant 5.000000e-01 : f32
    %481 = vector.broadcast %cst_423 : f32 to vector<8x128xf32>
    %482 = arith.mulf %481, %480 : vector<8x128xf32>
    %cst_424 = arith.constant 5.000000e-01 : f32
    %483 = vector.broadcast %cst_424 : f32 to vector<8x128xf32>
    %484 = arith.addf %482, %483 : vector<8x128xf32>
    %c48_425 = arith.constant 48 : index
    %c256_426 = arith.constant 256 : index
    %485 = vector.load %arg19[%c48_425, %c256_426] : memref<64x512xf32, #tpu.memory_space<vmem>>, vector<8x128xf32>
    %c0_427 = arith.constant 0 : index
    %c256_428 = arith.constant 256 : index
    %486 = vector.load %arg3[%c0_427, %c256_428] : memref<128x512xf32, #tpu.memory_space<vmem>>, vector<128x128xf32>
    %cst_429 = arith.constant dense<0.000000e+00> : vector<8x128xf32>
    %487 = tpu.matmul %472, %486, %cst_429 {dimension_numbers = #tpu.dot_dimension_numbers<[1], [0], [0], [1], [0, 0, 1, 1], [], []>} : vector<8x128xf32>, vector<128x128xf32>, vector<8x128xf32> -> vector<8x128xf32>
    %488 = arith.addf %485, %487 : vector<8x128xf32>
    %489 = math.tanh %488 : vector<8x128xf32>
    %490 = arith.mulf %484, %489 : vector<8x128xf32>
    %c48_430 = arith.constant 48 : index
    %c128_431 = arith.constant 128 : index
    %491 = vector.load %arg19[%c48_430, %c128_431] : memref<64x512xf32, #tpu.memory_space<vmem>>, vector<8x128xf32>
    %c0_432 = arith.constant 0 : index
    %c128_433 = arith.constant 128 : index
    %492 = vector.load %arg3[%c0_432, %c128_433] : memref<128x512xf32, #tpu.memory_space<vmem>>, vector<128x128xf32>
    %cst_434 = arith.constant dense<0.000000e+00> : vector<8x128xf32>
    %493 = tpu.matmul %472, %492, %cst_434 {dimension_numbers = #tpu.dot_dimension_numbers<[1], [0], [0], [1], [0, 0, 1, 1], [], []>} : vector<8x128xf32>, vector<128x128xf32>, vector<8x128xf32> -> vector<8x128xf32>
    %494 = arith.addf %491, %493 : vector<8x128xf32>
    %cst_435 = arith.constant 5.000000e-01 : f32
    %495 = vector.broadcast %cst_435 : f32 to vector<8x128xf32>
    %496 = arith.mulf %495, %494 : vector<8x128xf32>
    %497 = math.tanh %496 : vector<8x128xf32>
    %cst_436 = arith.constant 5.000000e-01 : f32
    %498 = vector.broadcast %cst_436 : f32 to vector<8x128xf32>
    %499 = arith.mulf %498, %497 : vector<8x128xf32>
    %cst_437 = arith.constant 5.000000e-01 : f32
    %500 = vector.broadcast %cst_437 : f32 to vector<8x128xf32>
    %501 = arith.addf %499, %500 : vector<8x128xf32>
    %502 = arith.mulf %501, %459 : vector<8x128xf32>
    %503 = arith.addf %502, %490 : vector<8x128xf32>
    %c48_438 = arith.constant 48 : index
    %c384_439 = arith.constant 384 : index
    %504 = vector.load %arg19[%c48_438, %c384_439] : memref<64x512xf32, #tpu.memory_space<vmem>>, vector<8x128xf32>
    %c0_440 = arith.constant 0 : index
    %c384_441 = arith.constant 384 : index
    %505 = vector.load %arg3[%c0_440, %c384_441] : memref<128x512xf32, #tpu.memory_space<vmem>>, vector<128x128xf32>
    %cst_442 = arith.constant dense<0.000000e+00> : vector<8x128xf32>
    %506 = tpu.matmul %472, %505, %cst_442 {dimension_numbers = #tpu.dot_dimension_numbers<[1], [0], [0], [1], [0, 0, 1, 1], [], []>} : vector<8x128xf32>, vector<128x128xf32>, vector<8x128xf32> -> vector<8x128xf32>
    %507 = arith.addf %504, %506 : vector<8x128xf32>
    %cst_443 = arith.constant 5.000000e-01 : f32
    %508 = vector.broadcast %cst_443 : f32 to vector<8x128xf32>
    %509 = arith.mulf %508, %507 : vector<8x128xf32>
    %510 = math.tanh %509 : vector<8x128xf32>
    %cst_444 = arith.constant 5.000000e-01 : f32
    %511 = vector.broadcast %cst_444 : f32 to vector<8x128xf32>
    %512 = arith.mulf %511, %510 : vector<8x128xf32>
    %cst_445 = arith.constant 5.000000e-01 : f32
    %513 = vector.broadcast %cst_445 : f32 to vector<8x128xf32>
    %514 = arith.addf %512, %513 : vector<8x128xf32>
    %515 = math.tanh %503 : vector<8x128xf32>
    %516 = arith.mulf %514, %515 : vector<8x128xf32>
    %c48_446 = arith.constant 48 : index
    %c0_447 = arith.constant 0 : index
    %517 = vector.load %arg20[%c48_446, %c0_447] : memref<64x128xf32, #tpu.memory_space<vmem>>, vector<8x128xf32>
    tpu.vector_store %arg20[%c48_446, %c0_447], %516 {strides = array<i32>} : memref<64x128xf32, #tpu.memory_space<vmem>>, vector<8x128xf32>,
    %c56_448 = arith.constant 56 : index
    %c0_449 = arith.constant 0 : index
    %518 = vector.load %arg19[%c56_448, %c0_449] : memref<64x512xf32, #tpu.memory_space<vmem>>, vector<8x128xf32>
    %c0_450 = arith.constant 0 : index
    %c0_451 = arith.constant 0 : index
    %519 = vector.load %arg3[%c0_450, %c0_451] : memref<128x512xf32, #tpu.memory_space<vmem>>, vector<128x128xf32>
    %cst_452 = arith.constant dense<0.000000e+00> : vector<8x128xf32>
    %520 = tpu.matmul %516, %519, %cst_452 {dimension_numbers = #tpu.dot_dimension_numbers<[1], [0], [0], [1], [0, 0, 1, 1], [], []>} : vector<8x128xf32>, vector<128x128xf32>, vector<8x128xf32> -> vector<8x128xf32>
    %521 = arith.addf %518, %520 : vector<8x128xf32>
    %cst_453 = arith.constant 5.000000e-01 : f32
    %522 = vector.broadcast %cst_453 : f32 to vector<8x128xf32>
    %523 = arith.mulf %522, %521 : vector<8x128xf32>
    %524 = math.tanh %523 : vector<8x128xf32>
    %cst_454 = arith.constant 5.000000e-01 : f32
    %525 = vector.broadcast %cst_454 : f32 to vector<8x128xf32>
    %526 = arith.mulf %525, %524 : vector<8x128xf32>
    %cst_455 = arith.constant 5.000000e-01 : f32
    %527 = vector.broadcast %cst_455 : f32 to vector<8x128xf32>
    %528 = arith.addf %526, %527 : vector<8x128xf32>
    %c56_456 = arith.constant 56 : index
    %c256_457 = arith.constant 256 : index
    %529 = vector.load %arg19[%c56_456, %c256_457] : memref<64x512xf32, #tpu.memory_space<vmem>>, vector<8x128xf32>
    %c0_458 = arith.constant 0 : index
    %c256_459 = arith.constant 256 : index
    %530 = vector.load %arg3[%c0_458, %c256_459] : memref<128x512xf32, #tpu.memory_space<vmem>>, vector<128x128xf32>
    %cst_460 = arith.constant dense<0.000000e+00> : vector<8x128xf32>
    %531 = tpu.matmul %516, %530, %cst_460 {dimension_numbers = #tpu.dot_dimension_numbers<[1], [0], [0], [1], [0, 0, 1, 1], [], []>} : vector<8x128xf32>, vector<128x128xf32>, vector<8x128xf32> -> vector<8x128xf32>
    %532 = arith.addf %529, %531 : vector<8x128xf32>
    %533 = math.tanh %532 : vector<8x128xf32>
    %534 = arith.mulf %528, %533 : vector<8x128xf32>
    %c56_461 = arith.constant 56 : index
    %c128_462 = arith.constant 128 : index
    %535 = vector.load %arg19[%c56_461, %c128_462] : memref<64x512xf32, #tpu.memory_space<vmem>>, vector<8x128xf32>
    %c0_463 = arith.constant 0 : index
    %c128_464 = arith.constant 128 : index
    %536 = vector.load %arg3[%c0_463, %c128_464] : memref<128x512xf32, #tpu.memory_space<vmem>>, vector<128x128xf32>
    %cst_465 = arith.constant dense<0.000000e+00> : vector<8x128xf32>
    %537 = tpu.matmul %516, %536, %cst_465 {dimension_numbers = #tpu.dot_dimension_numbers<[1], [0], [0], [1], [0, 0, 1, 1], [], []>} : vector<8x128xf32>, vector<128x128xf32>, vector<8x128xf32> -> vector<8x128xf32>
    %538 = arith.addf %535, %537 : vector<8x128xf32>
    %cst_466 = arith.constant 5.000000e-01 : f32
    %539 = vector.broadcast %cst_466 : f32 to vector<8x128xf32>
    %540 = arith.mulf %539, %538 : vector<8x128xf32>
    %541 = math.tanh %540 : vector<8x128xf32>
    %cst_467 = arith.constant 5.000000e-01 : f32
    %542 = vector.broadcast %cst_467 : f32 to vector<8x128xf32>
    %543 = arith.mulf %542, %541 : vector<8x128xf32>
    %cst_468 = arith.constant 5.000000e-01 : f32
    %544 = vector.broadcast %cst_468 : f32 to vector<8x128xf32>
    %545 = arith.addf %543, %544 : vector<8x128xf32>
    %546 = arith.mulf %545, %503 : vector<8x128xf32>
    %547 = arith.addf %546, %534 : vector<8x128xf32>
    %c56_469 = arith.constant 56 : index
    %c384_470 = arith.constant 384 : index
    %548 = vector.load %arg19[%c56_469, %c384_470] : memref<64x512xf32, #tpu.memory_space<vmem>>, vector<8x128xf32>
    %c0_471 = arith.constant 0 : index
    %c384_472 = arith.constant 384 : index
    %549 = vector.load %arg3[%c0_471, %c384_472] : memref<128x512xf32, #tpu.memory_space<vmem>>, vector<128x128xf32>
    %cst_473 = arith.constant dense<0.000000e+00> : vector<8x128xf32>
    %550 = tpu.matmul %516, %549, %cst_473 {dimension_numbers = #tpu.dot_dimension_numbers<[1], [0], [0], [1], [0, 0, 1, 1], [], []>} : vector<8x128xf32>, vector<128x128xf32>, vector<8x128xf32> -> vector<8x128xf32>
    %551 = arith.addf %548, %550 : vector<8x128xf32>
    %cst_474 = arith.constant 5.000000e-01 : f32
    %552 = vector.broadcast %cst_474 : f32 to vector<8x128xf32>
    %553 = arith.mulf %552, %551 : vector<8x128xf32>
    %554 = math.tanh %553 : vector<8x128xf32>
    %cst_475 = arith.constant 5.000000e-01 : f32
    %555 = vector.broadcast %cst_475 : f32 to vector<8x128xf32>
    %556 = arith.mulf %555, %554 : vector<8x128xf32>
    %cst_476 = arith.constant 5.000000e-01 : f32
    %557 = vector.broadcast %cst_476 : f32 to vector<8x128xf32>
    %558 = arith.addf %556, %557 : vector<8x128xf32>
    %559 = math.tanh %547 : vector<8x128xf32>
    %560 = arith.mulf %558, %559 : vector<8x128xf32>
    %c56_477 = arith.constant 56 : index
    %c0_478 = arith.constant 0 : index
    %561 = vector.load %arg20[%c56_477, %c0_478] : memref<64x128xf32, #tpu.memory_space<vmem>>, vector<8x128xf32>
    tpu.vector_store %arg20[%c56_477, %c0_478], %560 {strides = array<i32>} : memref<64x128xf32, #tpu.memory_space<vmem>>, vector<8x128xf32>,
    %c0_479 = arith.constant 0 : index
    %c0_480 = arith.constant 0 : index
    %562 = vector.load %arg20[%c0_479, %c0_480] : memref<64x128xf32, #tpu.memory_space<vmem>>, vector<8x128xf32>
    %c0_481 = arith.constant 0 : index
    %c0_482 = arith.constant 0 : index
    %563 = vector.load %arg5[%c0_481, %c0_482] : memref<128x512xf32, #tpu.memory_space<vmem>>, vector<128x128xf32>
    %cst_483 = arith.constant dense<0.000000e+00> : vector<8x128xf32>
    %564 = tpu.matmul %562, %563, %cst_483 {dimension_numbers = #tpu.dot_dimension_numbers<[1], [0], [0], [1], [0, 0, 1, 1], [], []>} : vector<8x128xf32>, vector<128x128xf32>, vector<8x128xf32> -> vector<8x128xf32>
    %c0_484 = arith.constant 0 : index
    %c0_485 = arith.constant 0 : index
    %565 = vector.load %arg7[%c0_484, %c0_485] : memref<1x512xf32, #tpu.memory_space<vmem>>, vector<1x128xf32>
    %566 = vector.broadcast %565 : vector<1x128xf32> to vector<8x128xf32>
    %567 = arith.addf %564, %566 : vector<8x128xf32>
    %c0_486 = arith.constant 0 : index
    %c0_487 = arith.constant 0 : index
    %568 = vector.load %arg19[%c0_486, %c0_487] : memref<64x512xf32, #tpu.memory_space<vmem>>, vector<8x128xf32>
    tpu.vector_store %arg19[%c0_486, %c0_487], %567 {strides = array<i32>} : memref<64x512xf32, #tpu.memory_space<vmem>>, vector<8x128xf32>,
    %c0_488 = arith.constant 0 : index
    %c128_489 = arith.constant 128 : index
    %569 = vector.load %arg5[%c0_488, %c128_489] : memref<128x512xf32, #tpu.memory_space<vmem>>, vector<128x128xf32>
    %cst_490 = arith.constant dense<0.000000e+00> : vector<8x128xf32>
    %570 = tpu.matmul %562, %569, %cst_490 {dimension_numbers = #tpu.dot_dimension_numbers<[1], [0], [0], [1], [0, 0, 1, 1], [], []>} : vector<8x128xf32>, vector<128x128xf32>, vector<8x128xf32> -> vector<8x128xf32>
    %c0_491 = arith.constant 0 : index
    %c128_492 = arith.constant 128 : index
    %571 = vector.load %arg7[%c0_491, %c128_492] : memref<1x512xf32, #tpu.memory_space<vmem>>, vector<1x128xf32>
    %572 = vector.broadcast %571 : vector<1x128xf32> to vector<8x128xf32>
    %573 = arith.addf %570, %572 : vector<8x128xf32>
    %c0_493 = arith.constant 0 : index
    %c128_494 = arith.constant 128 : index
    %574 = vector.load %arg19[%c0_493, %c128_494] : memref<64x512xf32, #tpu.memory_space<vmem>>, vector<8x128xf32>
    tpu.vector_store %arg19[%c0_493, %c128_494], %573 {strides = array<i32>} : memref<64x512xf32, #tpu.memory_space<vmem>>, vector<8x128xf32>,
    %c0_495 = arith.constant 0 : index
    %c256_496 = arith.constant 256 : index
    %575 = vector.load %arg5[%c0_495, %c256_496] : memref<128x512xf32, #tpu.memory_space<vmem>>, vector<128x128xf32>
    %cst_497 = arith.constant dense<0.000000e+00> : vector<8x128xf32>
    %576 = tpu.matmul %562, %575, %cst_497 {dimension_numbers = #tpu.dot_dimension_numbers<[1], [0], [0], [1], [0, 0, 1, 1], [], []>} : vector<8x128xf32>, vector<128x128xf32>, vector<8x128xf32> -> vector<8x128xf32>
    %c0_498 = arith.constant 0 : index
    %c256_499 = arith.constant 256 : index
    %577 = vector.load %arg7[%c0_498, %c256_499] : memref<1x512xf32, #tpu.memory_space<vmem>>, vector<1x128xf32>
    %578 = vector.broadcast %577 : vector<1x128xf32> to vector<8x128xf32>
    %579 = arith.addf %576, %578 : vector<8x128xf32>
    %c0_500 = arith.constant 0 : index
    %c256_501 = arith.constant 256 : index
    %580 = vector.load %arg19[%c0_500, %c256_501] : memref<64x512xf32, #tpu.memory_space<vmem>>, vector<8x128xf32>
    tpu.vector_store %arg19[%c0_500, %c256_501], %579 {strides = array<i32>} : memref<64x512xf32, #tpu.memory_space<vmem>>, vector<8x128xf32>,
    %c0_502 = arith.constant 0 : index
    %c384_503 = arith.constant 384 : index
    %581 = vector.load %arg5[%c0_502, %c384_503] : memref<128x512xf32, #tpu.memory_space<vmem>>, vector<128x128xf32>
    %cst_504 = arith.constant dense<0.000000e+00> : vector<8x128xf32>
    %582 = tpu.matmul %562, %581, %cst_504 {dimension_numbers = #tpu.dot_dimension_numbers<[1], [0], [0], [1], [0, 0, 1, 1], [], []>} : vector<8x128xf32>, vector<128x128xf32>, vector<8x128xf32> -> vector<8x128xf32>
    %c0_505 = arith.constant 0 : index
    %c384_506 = arith.constant 384 : index
    %583 = vector.load %arg7[%c0_505, %c384_506] : memref<1x512xf32, #tpu.memory_space<vmem>>, vector<1x128xf32>
    %584 = vector.broadcast %583 : vector<1x128xf32> to vector<8x128xf32>
    %585 = arith.addf %582, %584 : vector<8x128xf32>
    %c0_507 = arith.constant 0 : index
    %c384_508 = arith.constant 384 : index
    %586 = vector.load %arg19[%c0_507, %c384_508] : memref<64x512xf32, #tpu.memory_space<vmem>>, vector<8x128xf32>
    tpu.vector_store %arg19[%c0_507, %c384_508], %585 {strides = array<i32>} : memref<64x512xf32, #tpu.memory_space<vmem>>, vector<8x128xf32>,
    %c8_509 = arith.constant 8 : index
    %c0_510 = arith.constant 0 : index
    %587 = vector.load %arg20[%c8_509, %c0_510] : memref<64x128xf32, #tpu.memory_space<vmem>>, vector<8x128xf32>
    %c0_511 = arith.constant 0 : index
    %c0_512 = arith.constant 0 : index
    %588 = vector.load %arg5[%c0_511, %c0_512] : memref<128x512xf32, #tpu.memory_space<vmem>>, vector<128x128xf32>
    %cst_513 = arith.constant dense<0.000000e+00> : vector<8x128xf32>
    %589 = tpu.matmul %587, %588, %cst_513 {dimension_numbers = #tpu.dot_dimension_numbers<[1], [0], [0], [1], [0, 0, 1, 1], [], []>} : vector<8x128xf32>, vector<128x128xf32>, vector<8x128xf32> -> vector<8x128xf32>
    %c0_514 = arith.constant 0 : index
    %c0_515 = arith.constant 0 : index
    %590 = vector.load %arg7[%c0_514, %c0_515] : memref<1x512xf32, #tpu.memory_space<vmem>>, vector<1x128xf32>
    %591 = vector.broadcast %590 : vector<1x128xf32> to vector<8x128xf32>
    %592 = arith.addf %589, %591 : vector<8x128xf32>
    %c8_516 = arith.constant 8 : index
    %c0_517 = arith.constant 0 : index
    %593 = vector.load %arg19[%c8_516, %c0_517] : memref<64x512xf32, #tpu.memory_space<vmem>>, vector<8x128xf32>
    tpu.vector_store %arg19[%c8_516, %c0_517], %592 {strides = array<i32>} : memref<64x512xf32, #tpu.memory_space<vmem>>, vector<8x128xf32>,
    %c0_518 = arith.constant 0 : index
    %c128_519 = arith.constant 128 : index
    %594 = vector.load %arg5[%c0_518, %c128_519] : memref<128x512xf32, #tpu.memory_space<vmem>>, vector<128x128xf32>
    %cst_520 = arith.constant dense<0.000000e+00> : vector<8x128xf32>
    %595 = tpu.matmul %587, %594, %cst_520 {dimension_numbers = #tpu.dot_dimension_numbers<[1], [0], [0], [1], [0, 0, 1, 1], [], []>} : vector<8x128xf32>, vector<128x128xf32>, vector<8x128xf32> -> vector<8x128xf32>
    %c0_521 = arith.constant 0 : index
    %c128_522 = arith.constant 128 : index
    %596 = vector.load %arg7[%c0_521, %c128_522] : memref<1x512xf32, #tpu.memory_space<vmem>>, vector<1x128xf32>
    %597 = vector.broadcast %596 : vector<1x128xf32> to vector<8x128xf32>
    %598 = arith.addf %595, %597 : vector<8x128xf32>
    %c8_523 = arith.constant 8 : index
    %c128_524 = arith.constant 128 : index
    %599 = vector.load %arg19[%c8_523, %c128_524] : memref<64x512xf32, #tpu.memory_space<vmem>>, vector<8x128xf32>
    tpu.vector_store %arg19[%c8_523, %c128_524], %598 {strides = array<i32>} : memref<64x512xf32, #tpu.memory_space<vmem>>, vector<8x128xf32>,
    %c0_525 = arith.constant 0 : index
    %c256_526 = arith.constant 256 : index
    %600 = vector.load %arg5[%c0_525, %c256_526] : memref<128x512xf32, #tpu.memory_space<vmem>>, vector<128x128xf32>
    %cst_527 = arith.constant dense<0.000000e+00> : vector<8x128xf32>
    %601 = tpu.matmul %587, %600, %cst_527 {dimension_numbers = #tpu.dot_dimension_numbers<[1], [0], [0], [1], [0, 0, 1, 1], [], []>} : vector<8x128xf32>, vector<128x128xf32>, vector<8x128xf32> -> vector<8x128xf32>
    %c0_528 = arith.constant 0 : index
    %c256_529 = arith.constant 256 : index
    %602 = vector.load %arg7[%c0_528, %c256_529] : memref<1x512xf32, #tpu.memory_space<vmem>>, vector<1x128xf32>
    %603 = vector.broadcast %602 : vector<1x128xf32> to vector<8x128xf32>
    %604 = arith.addf %601, %603 : vector<8x128xf32>
    %c8_530 = arith.constant 8 : index
    %c256_531 = arith.constant 256 : index
    %605 = vector.load %arg19[%c8_530, %c256_531] : memref<64x512xf32, #tpu.memory_space<vmem>>, vector<8x128xf32>
    tpu.vector_store %arg19[%c8_530, %c256_531], %604 {strides = array<i32>} : memref<64x512xf32, #tpu.memory_space<vmem>>, vector<8x128xf32>,
    %c0_532 = arith.constant 0 : index
    %c384_533 = arith.constant 384 : index
    %606 = vector.load %arg5[%c0_532, %c384_533] : memref<128x512xf32, #tpu.memory_space<vmem>>, vector<128x128xf32>
    %cst_534 = arith.constant dense<0.000000e+00> : vector<8x128xf32>
    %607 = tpu.matmul %587, %606, %cst_534 {dimension_numbers = #tpu.dot_dimension_numbers<[1], [0], [0], [1], [0, 0, 1, 1], [], []>} : vector<8x128xf32>, vector<128x128xf32>, vector<8x128xf32> -> vector<8x128xf32>
    %c0_535 = arith.constant 0 : index
    %c384_536 = arith.constant 384 : index
    %608 = vector.load %arg7[%c0_535, %c384_536] : memref<1x512xf32, #tpu.memory_space<vmem>>, vector<1x128xf32>
    %609 = vector.broadcast %608 : vector<1x128xf32> to vector<8x128xf32>
    %610 = arith.addf %607, %609 : vector<8x128xf32>
    %c8_537 = arith.constant 8 : index
    %c384_538 = arith.constant 384 : index
    %611 = vector.load %arg19[%c8_537, %c384_538] : memref<64x512xf32, #tpu.memory_space<vmem>>, vector<8x128xf32>
    tpu.vector_store %arg19[%c8_537, %c384_538], %610 {strides = array<i32>} : memref<64x512xf32, #tpu.memory_space<vmem>>, vector<8x128xf32>,
    %c16_539 = arith.constant 16 : index
    %c0_540 = arith.constant 0 : index
    %612 = vector.load %arg20[%c16_539, %c0_540] : memref<64x128xf32, #tpu.memory_space<vmem>>, vector<8x128xf32>
    %c0_541 = arith.constant 0 : index
    %c0_542 = arith.constant 0 : index
    %613 = vector.load %arg5[%c0_541, %c0_542] : memref<128x512xf32, #tpu.memory_space<vmem>>, vector<128x128xf32>
    %cst_543 = arith.constant dense<0.000000e+00> : vector<8x128xf32>
    %614 = tpu.matmul %612, %613, %cst_543 {dimension_numbers = #tpu.dot_dimension_numbers<[1], [0], [0], [1], [0, 0, 1, 1], [], []>} : vector<8x128xf32>, vector<128x128xf32>, vector<8x128xf32> -> vector<8x128xf32>
    %c0_544 = arith.constant 0 : index
    %c0_545 = arith.constant 0 : index
    %615 = vector.load %arg7[%c0_544, %c0_545] : memref<1x512xf32, #tpu.memory_space<vmem>>, vector<1x128xf32>
    %616 = vector.broadcast %615 : vector<1x128xf32> to vector<8x128xf32>
    %617 = arith.addf %614, %616 : vector<8x128xf32>
    %c16_546 = arith.constant 16 : index
    %c0_547 = arith.constant 0 : index
    %618 = vector.load %arg19[%c16_546, %c0_547] : memref<64x512xf32, #tpu.memory_space<vmem>>, vector<8x128xf32>
    tpu.vector_store %arg19[%c16_546, %c0_547], %617 {strides = array<i32>} : memref<64x512xf32, #tpu.memory_space<vmem>>, vector<8x128xf32>,
    %c0_548 = arith.constant 0 : index
    %c128_549 = arith.constant 128 : index
    %619 = vector.load %arg5[%c0_548, %c128_549] : memref<128x512xf32, #tpu.memory_space<vmem>>, vector<128x128xf32>
    %cst_550 = arith.constant dense<0.000000e+00> : vector<8x128xf32>
    %620 = tpu.matmul %612, %619, %cst_550 {dimension_numbers = #tpu.dot_dimension_numbers<[1], [0], [0], [1], [0, 0, 1, 1], [], []>} : vector<8x128xf32>, vector<128x128xf32>, vector<8x128xf32> -> vector<8x128xf32>
    %c0_551 = arith.constant 0 : index
    %c128_552 = arith.constant 128 : index
    %621 = vector.load %arg7[%c0_551, %c128_552] : memref<1x512xf32, #tpu.memory_space<vmem>>, vector<1x128xf32>
    %622 = vector.broadcast %621 : vector<1x128xf32> to vector<8x128xf32>
    %623 = arith.addf %620, %622 : vector<8x128xf32>
    %c16_553 = arith.constant 16 : index
    %c128_554 = arith.constant 128 : index
    %624 = vector.load %arg19[%c16_553, %c128_554] : memref<64x512xf32, #tpu.memory_space<vmem>>, vector<8x128xf32>
    tpu.vector_store %arg19[%c16_553, %c128_554], %623 {strides = array<i32>} : memref<64x512xf32, #tpu.memory_space<vmem>>, vector<8x128xf32>,
    %c0_555 = arith.constant 0 : index
    %c256_556 = arith.constant 256 : index
    %625 = vector.load %arg5[%c0_555, %c256_556] : memref<128x512xf32, #tpu.memory_space<vmem>>, vector<128x128xf32>
    %cst_557 = arith.constant dense<0.000000e+00> : vector<8x128xf32>
    %626 = tpu.matmul %612, %625, %cst_557 {dimension_numbers = #tpu.dot_dimension_numbers<[1], [0], [0], [1], [0, 0, 1, 1], [], []>} : vector<8x128xf32>, vector<128x128xf32>, vector<8x128xf32> -> vector<8x128xf32>
    %c0_558 = arith.constant 0 : index
    %c256_559 = arith.constant 256 : index
    %627 = vector.load %arg7[%c0_558, %c256_559] : memref<1x512xf32, #tpu.memory_space<vmem>>, vector<1x128xf32>
    %628 = vector.broadcast %627 : vector<1x128xf32> to vector<8x128xf32>
    %629 = arith.addf %626, %628 : vector<8x128xf32>
    %c16_560 = arith.constant 16 : index
    %c256_561 = arith.constant 256 : index
    %630 = vector.load %arg19[%c16_560, %c256_561] : memref<64x512xf32, #tpu.memory_space<vmem>>, vector<8x128xf32>
    tpu.vector_store %arg19[%c16_560, %c256_561], %629 {strides = array<i32>} : memref<64x512xf32, #tpu.memory_space<vmem>>, vector<8x128xf32>,
    %c0_562 = arith.constant 0 : index
    %c384_563 = arith.constant 384 : index
    %631 = vector.load %arg5[%c0_562, %c384_563] : memref<128x512xf32, #tpu.memory_space<vmem>>, vector<128x128xf32>
    %cst_564 = arith.constant dense<0.000000e+00> : vector<8x128xf32>
    %632 = tpu.matmul %612, %631, %cst_564 {dimension_numbers = #tpu.dot_dimension_numbers<[1], [0], [0], [1], [0, 0, 1, 1], [], []>} : vector<8x128xf32>, vector<128x128xf32>, vector<8x128xf32> -> vector<8x128xf32>
    %c0_565 = arith.constant 0 : index
    %c384_566 = arith.constant 384 : index
    %633 = vector.load %arg7[%c0_565, %c384_566] : memref<1x512xf32, #tpu.memory_space<vmem>>, vector<1x128xf32>
    %634 = vector.broadcast %633 : vector<1x128xf32> to vector<8x128xf32>
    %635 = arith.addf %632, %634 : vector<8x128xf32>
    %c16_567 = arith.constant 16 : index
    %c384_568 = arith.constant 384 : index
    %636 = vector.load %arg19[%c16_567, %c384_568] : memref<64x512xf32, #tpu.memory_space<vmem>>, vector<8x128xf32>
    tpu.vector_store %arg19[%c16_567, %c384_568], %635 {strides = array<i32>} : memref<64x512xf32, #tpu.memory_space<vmem>>, vector<8x128xf32>,
    %c24_569 = arith.constant 24 : index
    %c0_570 = arith.constant 0 : index
    %637 = vector.load %arg20[%c24_569, %c0_570] : memref<64x128xf32, #tpu.memory_space<vmem>>, vector<8x128xf32>
    %c0_571 = arith.constant 0 : index
    %c0_572 = arith.constant 0 : index
    %638 = vector.load %arg5[%c0_571, %c0_572] : memref<128x512xf32, #tpu.memory_space<vmem>>, vector<128x128xf32>
    %cst_573 = arith.constant dense<0.000000e+00> : vector<8x128xf32>
    %639 = tpu.matmul %637, %638, %cst_573 {dimension_numbers = #tpu.dot_dimension_numbers<[1], [0], [0], [1], [0, 0, 1, 1], [], []>} : vector<8x128xf32>, vector<128x128xf32>, vector<8x128xf32> -> vector<8x128xf32>
    %c0_574 = arith.constant 0 : index
    %c0_575 = arith.constant 0 : index
    %640 = vector.load %arg7[%c0_574, %c0_575] : memref<1x512xf32, #tpu.memory_space<vmem>>, vector<1x128xf32>
    %641 = vector.broadcast %640 : vector<1x128xf32> to vector<8x128xf32>
    %642 = arith.addf %639, %641 : vector<8x128xf32>
    %c24_576 = arith.constant 24 : index
    %c0_577 = arith.constant 0 : index
    %643 = vector.load %arg19[%c24_576, %c0_577] : memref<64x512xf32, #tpu.memory_space<vmem>>, vector<8x128xf32>
    tpu.vector_store %arg19[%c24_576, %c0_577], %642 {strides = array<i32>} : memref<64x512xf32, #tpu.memory_space<vmem>>, vector<8x128xf32>,
    %c0_578 = arith.constant 0 : index
    %c128_579 = arith.constant 128 : index
    %644 = vector.load %arg5[%c0_578, %c128_579] : memref<128x512xf32, #tpu.memory_space<vmem>>, vector<128x128xf32>
    %cst_580 = arith.constant dense<0.000000e+00> : vector<8x128xf32>
    %645 = tpu.matmul %637, %644, %cst_580 {dimension_numbers = #tpu.dot_dimension_numbers<[1], [0], [0], [1], [0, 0, 1, 1], [], []>} : vector<8x128xf32>, vector<128x128xf32>, vector<8x128xf32> -> vector<8x128xf32>
    %c0_581 = arith.constant 0 : index
    %c128_582 = arith.constant 128 : index
    %646 = vector.load %arg7[%c0_581, %c128_582] : memref<1x512xf32, #tpu.memory_space<vmem>>, vector<1x128xf32>
    %647 = vector.broadcast %646 : vector<1x128xf32> to vector<8x128xf32>
    %648 = arith.addf %645, %647 : vector<8x128xf32>
    %c24_583 = arith.constant 24 : index
    %c128_584 = arith.constant 128 : index
    %649 = vector.load %arg19[%c24_583, %c128_584] : memref<64x512xf32, #tpu.memory_space<vmem>>, vector<8x128xf32>
    tpu.vector_store %arg19[%c24_583, %c128_584], %648 {strides = array<i32>} : memref<64x512xf32, #tpu.memory_space<vmem>>, vector<8x128xf32>,
    %c0_585 = arith.constant 0 : index
    %c256_586 = arith.constant 256 : index
    %650 = vector.load %arg5[%c0_585, %c256_586] : memref<128x512xf32, #tpu.memory_space<vmem>>, vector<128x128xf32>
    %cst_587 = arith.constant dense<0.000000e+00> : vector<8x128xf32>
    %651 = tpu.matmul %637, %650, %cst_587 {dimension_numbers = #tpu.dot_dimension_numbers<[1], [0], [0], [1], [0, 0, 1, 1], [], []>} : vector<8x128xf32>, vector<128x128xf32>, vector<8x128xf32> -> vector<8x128xf32>
    %c0_588 = arith.constant 0 : index
    %c256_589 = arith.constant 256 : index
    %652 = vector.load %arg7[%c0_588, %c256_589] : memref<1x512xf32, #tpu.memory_space<vmem>>, vector<1x128xf32>
    %653 = vector.broadcast %652 : vector<1x128xf32> to vector<8x128xf32>
    %654 = arith.addf %651, %653 : vector<8x128xf32>
    %c24_590 = arith.constant 24 : index
    %c256_591 = arith.constant 256 : index
    %655 = vector.load %arg19[%c24_590, %c256_591] : memref<64x512xf32, #tpu.memory_space<vmem>>, vector<8x128xf32>
    tpu.vector_store %arg19[%c24_590, %c256_591], %654 {strides = array<i32>} : memref<64x512xf32, #tpu.memory_space<vmem>>, vector<8x128xf32>,
    %c0_592 = arith.constant 0 : index
    %c384_593 = arith.constant 384 : index
    %656 = vector.load %arg5[%c0_592, %c384_593] : memref<128x512xf32, #tpu.memory_space<vmem>>, vector<128x128xf32>
    %cst_594 = arith.constant dense<0.000000e+00> : vector<8x128xf32>
    %657 = tpu.matmul %637, %656, %cst_594 {dimension_numbers = #tpu.dot_dimension_numbers<[1], [0], [0], [1], [0, 0, 1, 1], [], []>} : vector<8x128xf32>, vector<128x128xf32>, vector<8x128xf32> -> vector<8x128xf32>
    %c0_595 = arith.constant 0 : index
    %c384_596 = arith.constant 384 : index
    %658 = vector.load %arg7[%c0_595, %c384_596] : memref<1x512xf32, #tpu.memory_space<vmem>>, vector<1x128xf32>
    %659 = vector.broadcast %658 : vector<1x128xf32> to vector<8x128xf32>
    %660 = arith.addf %657, %659 : vector<8x128xf32>
    %c24_597 = arith.constant 24 : index
    %c384_598 = arith.constant 384 : index
    %661 = vector.load %arg19[%c24_597, %c384_598] : memref<64x512xf32, #tpu.memory_space<vmem>>, vector<8x128xf32>
    tpu.vector_store %arg19[%c24_597, %c384_598], %660 {strides = array<i32>} : memref<64x512xf32, #tpu.memory_space<vmem>>, vector<8x128xf32>,
    %c32_599 = arith.constant 32 : index
    %c0_600 = arith.constant 0 : index
    %662 = vector.load %arg20[%c32_599, %c0_600] : memref<64x128xf32, #tpu.memory_space<vmem>>, vector<8x128xf32>
    %c0_601 = arith.constant 0 : index
    %c0_602 = arith.constant 0 : index
    %663 = vector.load %arg5[%c0_601, %c0_602] : memref<128x512xf32, #tpu.memory_space<vmem>>, vector<128x128xf32>
    %cst_603 = arith.constant dense<0.000000e+00> : vector<8x128xf32>
    %664 = tpu.matmul %662, %663, %cst_603 {dimension_numbers = #tpu.dot_dimension_numbers<[1], [0], [0], [1], [0, 0, 1, 1], [], []>} : vector<8x128xf32>, vector<128x128xf32>, vector<8x128xf32> -> vector<8x128xf32>
    %c0_604 = arith.constant 0 : index
    %c0_605 = arith.constant 0 : index
    %665 = vector.load %arg7[%c0_604, %c0_605] : memref<1x512xf32, #tpu.memory_space<vmem>>, vector<1x128xf32>
    %666 = vector.broadcast %665 : vector<1x128xf32> to vector<8x128xf32>
    %667 = arith.addf %664, %666 : vector<8x128xf32>
    %c32_606 = arith.constant 32 : index
    %c0_607 = arith.constant 0 : index
    %668 = vector.load %arg19[%c32_606, %c0_607] : memref<64x512xf32, #tpu.memory_space<vmem>>, vector<8x128xf32>
    tpu.vector_store %arg19[%c32_606, %c0_607], %667 {strides = array<i32>} : memref<64x512xf32, #tpu.memory_space<vmem>>, vector<8x128xf32>,
    %c0_608 = arith.constant 0 : index
    %c128_609 = arith.constant 128 : index
    %669 = vector.load %arg5[%c0_608, %c128_609] : memref<128x512xf32, #tpu.memory_space<vmem>>, vector<128x128xf32>
    %cst_610 = arith.constant dense<0.000000e+00> : vector<8x128xf32>
    %670 = tpu.matmul %662, %669, %cst_610 {dimension_numbers = #tpu.dot_dimension_numbers<[1], [0], [0], [1], [0, 0, 1, 1], [], []>} : vector<8x128xf32>, vector<128x128xf32>, vector<8x128xf32> -> vector<8x128xf32>
    %c0_611 = arith.constant 0 : index
    %c128_612 = arith.constant 128 : index
    %671 = vector.load %arg7[%c0_611, %c128_612] : memref<1x512xf32, #tpu.memory_space<vmem>>, vector<1x128xf32>
    %672 = vector.broadcast %671 : vector<1x128xf32> to vector<8x128xf32>
    %673 = arith.addf %670, %672 : vector<8x128xf32>
    %c32_613 = arith.constant 32 : index
    %c128_614 = arith.constant 128 : index
    %674 = vector.load %arg19[%c32_613, %c128_614] : memref<64x512xf32, #tpu.memory_space<vmem>>, vector<8x128xf32>
    tpu.vector_store %arg19[%c32_613, %c128_614], %673 {strides = array<i32>} : memref<64x512xf32, #tpu.memory_space<vmem>>, vector<8x128xf32>,
    %c0_615 = arith.constant 0 : index
    %c256_616 = arith.constant 256 : index
    %675 = vector.load %arg5[%c0_615, %c256_616] : memref<128x512xf32, #tpu.memory_space<vmem>>, vector<128x128xf32>
    %cst_617 = arith.constant dense<0.000000e+00> : vector<8x128xf32>
    %676 = tpu.matmul %662, %675, %cst_617 {dimension_numbers = #tpu.dot_dimension_numbers<[1], [0], [0], [1], [0, 0, 1, 1], [], []>} : vector<8x128xf32>, vector<128x128xf32>, vector<8x128xf32> -> vector<8x128xf32>
    %c0_618 = arith.constant 0 : index
    %c256_619 = arith.constant 256 : index
    %677 = vector.load %arg7[%c0_618, %c256_619] : memref<1x512xf32, #tpu.memory_space<vmem>>, vector<1x128xf32>
    %678 = vector.broadcast %677 : vector<1x128xf32> to vector<8x128xf32>
    %679 = arith.addf %676, %678 : vector<8x128xf32>
    %c32_620 = arith.constant 32 : index
    %c256_621 = arith.constant 256 : index
    %680 = vector.load %arg19[%c32_620, %c256_621] : memref<64x512xf32, #tpu.memory_space<vmem>>, vector<8x128xf32>
    tpu.vector_store %arg19[%c32_620, %c256_621], %679 {strides = array<i32>} : memref<64x512xf32, #tpu.memory_space<vmem>>, vector<8x128xf32>,
    %c0_622 = arith.constant 0 : index
    %c384_623 = arith.constant 384 : index
    %681 = vector.load %arg5[%c0_622, %c384_623] : memref<128x512xf32, #tpu.memory_space<vmem>>, vector<128x128xf32>
    %cst_624 = arith.constant dense<0.000000e+00> : vector<8x128xf32>
    %682 = tpu.matmul %662, %681, %cst_624 {dimension_numbers = #tpu.dot_dimension_numbers<[1], [0], [0], [1], [0, 0, 1, 1], [], []>} : vector<8x128xf32>, vector<128x128xf32>, vector<8x128xf32> -> vector<8x128xf32>
    %c0_625 = arith.constant 0 : index
    %c384_626 = arith.constant 384 : index
    %683 = vector.load %arg7[%c0_625, %c384_626] : memref<1x512xf32, #tpu.memory_space<vmem>>, vector<1x128xf32>
    %684 = vector.broadcast %683 : vector<1x128xf32> to vector<8x128xf32>
    %685 = arith.addf %682, %684 : vector<8x128xf32>
    %c32_627 = arith.constant 32 : index
    %c384_628 = arith.constant 384 : index
    %686 = vector.load %arg19[%c32_627, %c384_628] : memref<64x512xf32, #tpu.memory_space<vmem>>, vector<8x128xf32>
    tpu.vector_store %arg19[%c32_627, %c384_628], %685 {strides = array<i32>} : memref<64x512xf32, #tpu.memory_space<vmem>>, vector<8x128xf32>,
    %c40_629 = arith.constant 40 : index
    %c0_630 = arith.constant 0 : index
    %687 = vector.load %arg20[%c40_629, %c0_630] : memref<64x128xf32, #tpu.memory_space<vmem>>, vector<8x128xf32>
    %c0_631 = arith.constant 0 : index
    %c0_632 = arith.constant 0 : index
    %688 = vector.load %arg5[%c0_631, %c0_632] : memref<128x512xf32, #tpu.memory_space<vmem>>, vector<128x128xf32>
    %cst_633 = arith.constant dense<0.000000e+00> : vector<8x128xf32>
    %689 = tpu.matmul %687, %688, %cst_633 {dimension_numbers = #tpu.dot_dimension_numbers<[1], [0], [0], [1], [0, 0, 1, 1], [], []>} : vector<8x128xf32>, vector<128x128xf32>, vector<8x128xf32> -> vector<8x128xf32>
    %c0_634 = arith.constant 0 : index
    %c0_635 = arith.constant 0 : index
    %690 = vector.load %arg7[%c0_634, %c0_635] : memref<1x512xf32, #tpu.memory_space<vmem>>, vector<1x128xf32>
    %691 = vector.broadcast %690 : vector<1x128xf32> to vector<8x128xf32>
    %692 = arith.addf %689, %691 : vector<8x128xf32>
    %c40_636 = arith.constant 40 : index
    %c0_637 = arith.constant 0 : index
    %693 = vector.load %arg19[%c40_636, %c0_637] : memref<64x512xf32, #tpu.memory_space<vmem>>, vector<8x128xf32>
    tpu.vector_store %arg19[%c40_636, %c0_637], %692 {strides = array<i32>} : memref<64x512xf32, #tpu.memory_space<vmem>>, vector<8x128xf32>,
    %c0_638 = arith.constant 0 : index
    %c128_639 = arith.constant 128 : index
    %694 = vector.load %arg5[%c0_638, %c128_639] : memref<128x512xf32, #tpu.memory_space<vmem>>, vector<128x128xf32>
    %cst_640 = arith.constant dense<0.000000e+00> : vector<8x128xf32>
    %695 = tpu.matmul %687, %694, %cst_640 {dimension_numbers = #tpu.dot_dimension_numbers<[1], [0], [0], [1], [0, 0, 1, 1], [], []>} : vector<8x128xf32>, vector<128x128xf32>, vector<8x128xf32> -> vector<8x128xf32>
    %c0_641 = arith.constant 0 : index
    %c128_642 = arith.constant 128 : index
    %696 = vector.load %arg7[%c0_641, %c128_642] : memref<1x512xf32, #tpu.memory_space<vmem>>, vector<1x128xf32>
    %697 = vector.broadcast %696 : vector<1x128xf32> to vector<8x128xf32>
    %698 = arith.addf %695, %697 : vector<8x128xf32>
    %c40_643 = arith.constant 40 : index
    %c128_644 = arith.constant 128 : index
    %699 = vector.load %arg19[%c40_643, %c128_644] : memref<64x512xf32, #tpu.memory_space<vmem>>, vector<8x128xf32>
    tpu.vector_store %arg19[%c40_643, %c128_644], %698 {strides = array<i32>} : memref<64x512xf32, #tpu.memory_space<vmem>>, vector<8x128xf32>,
    %c0_645 = arith.constant 0 : index
    %c256_646 = arith.constant 256 : index
    %700 = vector.load %arg5[%c0_645, %c256_646] : memref<128x512xf32, #tpu.memory_space<vmem>>, vector<128x128xf32>
    %cst_647 = arith.constant dense<0.000000e+00> : vector<8x128xf32>
    %701 = tpu.matmul %687, %700, %cst_647 {dimension_numbers = #tpu.dot_dimension_numbers<[1], [0], [0], [1], [0, 0, 1, 1], [], []>} : vector<8x128xf32>, vector<128x128xf32>, vector<8x128xf32> -> vector<8x128xf32>
    %c0_648 = arith.constant 0 : index
    %c256_649 = arith.constant 256 : index
    %702 = vector.load %arg7[%c0_648, %c256_649] : memref<1x512xf32, #tpu.memory_space<vmem>>, vector<1x128xf32>
    %703 = vector.broadcast %702 : vector<1x128xf32> to vector<8x128xf32>
    %704 = arith.addf %701, %703 : vector<8x128xf32>
    %c40_650 = arith.constant 40 : index
    %c256_651 = arith.constant 256 : index
    %705 = vector.load %arg19[%c40_650, %c256_651] : memref<64x512xf32, #tpu.memory_space<vmem>>, vector<8x128xf32>
    tpu.vector_store %arg19[%c40_650, %c256_651], %704 {strides = array<i32>} : memref<64x512xf32, #tpu.memory_space<vmem>>, vector<8x128xf32>,
    %c0_652 = arith.constant 0 : index
    %c384_653 = arith.constant 384 : index
    %706 = vector.load %arg5[%c0_652, %c384_653] : memref<128x512xf32, #tpu.memory_space<vmem>>, vector<128x128xf32>
    %cst_654 = arith.constant dense<0.000000e+00> : vector<8x128xf32>
    %707 = tpu.matmul %687, %706, %cst_654 {dimension_numbers = #tpu.dot_dimension_numbers<[1], [0], [0], [1], [0, 0, 1, 1], [], []>} : vector<8x128xf32>, vector<128x128xf32>, vector<8x128xf32> -> vector<8x128xf32>
    %c0_655 = arith.constant 0 : index
    %c384_656 = arith.constant 384 : index
    %708 = vector.load %arg7[%c0_655, %c384_656] : memref<1x512xf32, #tpu.memory_space<vmem>>, vector<1x128xf32>
    %709 = vector.broadcast %708 : vector<1x128xf32> to vector<8x128xf32>
    %710 = arith.addf %707, %709 : vector<8x128xf32>
    %c40_657 = arith.constant 40 : index
    %c384_658 = arith.constant 384 : index
    %711 = vector.load %arg19[%c40_657, %c384_658] : memref<64x512xf32, #tpu.memory_space<vmem>>, vector<8x128xf32>
    tpu.vector_store %arg19[%c40_657, %c384_658], %710 {strides = array<i32>} : memref<64x512xf32, #tpu.memory_space<vmem>>, vector<8x128xf32>,
    %c48_659 = arith.constant 48 : index
    %c0_660 = arith.constant 0 : index
    %712 = vector.load %arg20[%c48_659, %c0_660] : memref<64x128xf32, #tpu.memory_space<vmem>>, vector<8x128xf32>
    %c0_661 = arith.constant 0 : index
    %c0_662 = arith.constant 0 : index
    %713 = vector.load %arg5[%c0_661, %c0_662] : memref<128x512xf32, #tpu.memory_space<vmem>>, vector<128x128xf32>
    %cst_663 = arith.constant dense<0.000000e+00> : vector<8x128xf32>
    %714 = tpu.matmul %712, %713, %cst_663 {dimension_numbers = #tpu.dot_dimension_numbers<[1], [0], [0], [1], [0, 0, 1, 1], [], []>} : vector<8x128xf32>, vector<128x128xf32>, vector<8x128xf32> -> vector<8x128xf32>
    %c0_664 = arith.constant 0 : index
    %c0_665 = arith.constant 0 : index
    %715 = vector.load %arg7[%c0_664, %c0_665] : memref<1x512xf32, #tpu.memory_space<vmem>>, vector<1x128xf32>
    %716 = vector.broadcast %715 : vector<1x128xf32> to vector<8x128xf32>
    %717 = arith.addf %714, %716 : vector<8x128xf32>
    %c48_666 = arith.constant 48 : index
    %c0_667 = arith.constant 0 : index
    %718 = vector.load %arg19[%c48_666, %c0_667] : memref<64x512xf32, #tpu.memory_space<vmem>>, vector<8x128xf32>
    tpu.vector_store %arg19[%c48_666, %c0_667], %717 {strides = array<i32>} : memref<64x512xf32, #tpu.memory_space<vmem>>, vector<8x128xf32>,
    %c0_668 = arith.constant 0 : index
    %c128_669 = arith.constant 128 : index
    %719 = vector.load %arg5[%c0_668, %c128_669] : memref<128x512xf32, #tpu.memory_space<vmem>>, vector<128x128xf32>
    %cst_670 = arith.constant dense<0.000000e+00> : vector<8x128xf32>
    %720 = tpu.matmul %712, %719, %cst_670 {dimension_numbers = #tpu.dot_dimension_numbers<[1], [0], [0], [1], [0, 0, 1, 1], [], []>} : vector<8x128xf32>, vector<128x128xf32>, vector<8x128xf32> -> vector<8x128xf32>
    %c0_671 = arith.constant 0 : index
    %c128_672 = arith.constant 128 : index
    %721 = vector.load %arg7[%c0_671, %c128_672] : memref<1x512xf32, #tpu.memory_space<vmem>>, vector<1x128xf32>
    %722 = vector.broadcast %721 : vector<1x128xf32> to vector<8x128xf32>
    %723 = arith.addf %720, %722 : vector<8x128xf32>
    %c48_673 = arith.constant 48 : index
    %c128_674 = arith.constant 128 : index
    %724 = vector.load %arg19[%c48_673, %c128_674] : memref<64x512xf32, #tpu.memory_space<vmem>>, vector<8x128xf32>
    tpu.vector_store %arg19[%c48_673, %c128_674], %723 {strides = array<i32>} : memref<64x512xf32, #tpu.memory_space<vmem>>, vector<8x128xf32>,
    %c0_675 = arith.constant 0 : index
    %c256_676 = arith.constant 256 : index
    %725 = vector.load %arg5[%c0_675, %c256_676] : memref<128x512xf32, #tpu.memory_space<vmem>>, vector<128x128xf32>
    %cst_677 = arith.constant dense<0.000000e+00> : vector<8x128xf32>
    %726 = tpu.matmul %712, %725, %cst_677 {dimension_numbers = #tpu.dot_dimension_numbers<[1], [0], [0], [1], [0, 0, 1, 1], [], []>} : vector<8x128xf32>, vector<128x128xf32>, vector<8x128xf32> -> vector<8x128xf32>
    %c0_678 = arith.constant 0 : index
    %c256_679 = arith.constant 256 : index
    %727 = vector.load %arg7[%c0_678, %c256_679] : memref<1x512xf32, #tpu.memory_space<vmem>>, vector<1x128xf32>
    %728 = vector.broadcast %727 : vector<1x128xf32> to vector<8x128xf32>
    %729 = arith.addf %726, %728 : vector<8x128xf32>
    %c48_680 = arith.constant 48 : index
    %c256_681 = arith.constant 256 : index
    %730 = vector.load %arg19[%c48_680, %c256_681] : memref<64x512xf32, #tpu.memory_space<vmem>>, vector<8x128xf32>
    tpu.vector_store %arg19[%c48_680, %c256_681], %729 {strides = array<i32>} : memref<64x512xf32, #tpu.memory_space<vmem>>, vector<8x128xf32>,
    %c0_682 = arith.constant 0 : index
    %c384_683 = arith.constant 384 : index
    %731 = vector.load %arg5[%c0_682, %c384_683] : memref<128x512xf32, #tpu.memory_space<vmem>>, vector<128x128xf32>
    %cst_684 = arith.constant dense<0.000000e+00> : vector<8x128xf32>
    %732 = tpu.matmul %712, %731, %cst_684 {dimension_numbers = #tpu.dot_dimension_numbers<[1], [0], [0], [1], [0, 0, 1, 1], [], []>} : vector<8x128xf32>, vector<128x128xf32>, vector<8x128xf32> -> vector<8x128xf32>
    %c0_685 = arith.constant 0 : index
    %c384_686 = arith.constant 384 : index
    %733 = vector.load %arg7[%c0_685, %c384_686] : memref<1x512xf32, #tpu.memory_space<vmem>>, vector<1x128xf32>
    %734 = vector.broadcast %733 : vector<1x128xf32> to vector<8x128xf32>
    %735 = arith.addf %732, %734 : vector<8x128xf32>
    %c48_687 = arith.constant 48 : index
    %c384_688 = arith.constant 384 : index
    %736 = vector.load %arg19[%c48_687, %c384_688] : memref<64x512xf32, #tpu.memory_space<vmem>>, vector<8x128xf32>
    tpu.vector_store %arg19[%c48_687, %c384_688], %735 {strides = array<i32>} : memref<64x512xf32, #tpu.memory_space<vmem>>, vector<8x128xf32>,
    %c56_689 = arith.constant 56 : index
    %c0_690 = arith.constant 0 : index
    %737 = vector.load %arg20[%c56_689, %c0_690] : memref<64x128xf32, #tpu.memory_space<vmem>>, vector<8x128xf32>
    %c0_691 = arith.constant 0 : index
    %c0_692 = arith.constant 0 : index
    %738 = vector.load %arg5[%c0_691, %c0_692] : memref<128x512xf32, #tpu.memory_space<vmem>>, vector<128x128xf32>
    %cst_693 = arith.constant dense<0.000000e+00> : vector<8x128xf32>
    %739 = tpu.matmul %737, %738, %cst_693 {dimension_numbers = #tpu.dot_dimension_numbers<[1], [0], [0], [1], [0, 0, 1, 1], [], []>} : vector<8x128xf32>, vector<128x128xf32>, vector<8x128xf32> -> vector<8x128xf32>
    %c0_694 = arith.constant 0 : index
    %c0_695 = arith.constant 0 : index
    %740 = vector.load %arg7[%c0_694, %c0_695] : memref<1x512xf32, #tpu.memory_space<vmem>>, vector<1x128xf32>
    %741 = vector.broadcast %740 : vector<1x128xf32> to vector<8x128xf32>
    %742 = arith.addf %739, %741 : vector<8x128xf32>
    %c56_696 = arith.constant 56 : index
    %c0_697 = arith.constant 0 : index
    %743 = vector.load %arg19[%c56_696, %c0_697] : memref<64x512xf32, #tpu.memory_space<vmem>>, vector<8x128xf32>
    tpu.vector_store %arg19[%c56_696, %c0_697], %742 {strides = array<i32>} : memref<64x512xf32, #tpu.memory_space<vmem>>, vector<8x128xf32>,
    %c0_698 = arith.constant 0 : index
    %c128_699 = arith.constant 128 : index
    %744 = vector.load %arg5[%c0_698, %c128_699] : memref<128x512xf32, #tpu.memory_space<vmem>>, vector<128x128xf32>
    %cst_700 = arith.constant dense<0.000000e+00> : vector<8x128xf32>
    %745 = tpu.matmul %737, %744, %cst_700 {dimension_numbers = #tpu.dot_dimension_numbers<[1], [0], [0], [1], [0, 0, 1, 1], [], []>} : vector<8x128xf32>, vector<128x128xf32>, vector<8x128xf32> -> vector<8x128xf32>
    %c0_701 = arith.constant 0 : index
    %c128_702 = arith.constant 128 : index
    %746 = vector.load %arg7[%c0_701, %c128_702] : memref<1x512xf32, #tpu.memory_space<vmem>>, vector<1x128xf32>
    %747 = vector.broadcast %746 : vector<1x128xf32> to vector<8x128xf32>
    %748 = arith.addf %745, %747 : vector<8x128xf32>
    %c56_703 = arith.constant 56 : index
    %c128_704 = arith.constant 128 : index
    %749 = vector.load %arg19[%c56_703, %c128_704] : memref<64x512xf32, #tpu.memory_space<vmem>>, vector<8x128xf32>
    tpu.vector_store %arg19[%c56_703, %c128_704], %748 {strides = array<i32>} : memref<64x512xf32, #tpu.memory_space<vmem>>, vector<8x128xf32>,
    %c0_705 = arith.constant 0 : index
    %c256_706 = arith.constant 256 : index
    %750 = vector.load %arg5[%c0_705, %c256_706] : memref<128x512xf32, #tpu.memory_space<vmem>>, vector<128x128xf32>
    %cst_707 = arith.constant dense<0.000000e+00> : vector<8x128xf32>
    %751 = tpu.matmul %737, %750, %cst_707 {dimension_numbers = #tpu.dot_dimension_numbers<[1], [0], [0], [1], [0, 0, 1, 1], [], []>} : vector<8x128xf32>, vector<128x128xf32>, vector<8x128xf32> -> vector<8x128xf32>
    %c0_708 = arith.constant 0 : index
    %c256_709 = arith.constant 256 : index
    %752 = vector.load %arg7[%c0_708, %c256_709] : memref<1x512xf32, #tpu.memory_space<vmem>>, vector<1x128xf32>
    %753 = vector.broadcast %752 : vector<1x128xf32> to vector<8x128xf32>
    %754 = arith.addf %751, %753 : vector<8x128xf32>
    %c56_710 = arith.constant 56 : index
    %c256_711 = arith.constant 256 : index
    %755 = vector.load %arg19[%c56_710, %c256_711] : memref<64x512xf32, #tpu.memory_space<vmem>>, vector<8x128xf32>
    tpu.vector_store %arg19[%c56_710, %c256_711], %754 {strides = array<i32>} : memref<64x512xf32, #tpu.memory_space<vmem>>, vector<8x128xf32>,
    %c0_712 = arith.constant 0 : index
    %c384_713 = arith.constant 384 : index
    %756 = vector.load %arg5[%c0_712, %c384_713] : memref<128x512xf32, #tpu.memory_space<vmem>>, vector<128x128xf32>
    %cst_714 = arith.constant dense<0.000000e+00> : vector<8x128xf32>
    %757 = tpu.matmul %737, %756, %cst_714 {dimension_numbers = #tpu.dot_dimension_numbers<[1], [0], [0], [1], [0, 0, 1, 1], [], []>} : vector<8x128xf32>, vector<128x128xf32>, vector<8x128xf32> -> vector<8x128xf32>
    %c0_715 = arith.constant 0 : index
    %c384_716 = arith.constant 384 : index
    %758 = vector.load %arg7[%c0_715, %c384_716] : memref<1x512xf32, #tpu.memory_space<vmem>>, vector<1x128xf32>
    %759 = vector.broadcast %758 : vector<1x128xf32> to vector<8x128xf32>
    %760 = arith.addf %757, %759 : vector<8x128xf32>
    %c56_717 = arith.constant 56 : index
    %c384_718 = arith.constant 384 : index
    %761 = vector.load %arg19[%c56_717, %c384_718] : memref<64x512xf32, #tpu.memory_space<vmem>>, vector<8x128xf32>
    tpu.vector_store %arg19[%c56_717, %c384_718], %760 {strides = array<i32>} : memref<64x512xf32, #tpu.memory_space<vmem>>, vector<8x128xf32>,
    %cst_719 = arith.constant 0.000000e+00 : f32
    %762 = vector.broadcast %cst_719 : f32 to vector<8x128xf32>
    %cst_720 = arith.constant 0.000000e+00 : f32
    %763 = vector.broadcast %cst_720 : f32 to vector<8x128xf32>
    %c0_721 = arith.constant 0 : index
    %c0_722 = arith.constant 0 : index
    %764 = vector.load %arg19[%c0_721, %c0_722] : memref<64x512xf32, #tpu.memory_space<vmem>>, vector<8x128xf32>
    %c0_723 = arith.constant 0 : index
    %c0_724 = arith.constant 0 : index
    %765 = vector.load %arg6[%c0_723, %c0_724] : memref<128x512xf32, #tpu.memory_space<vmem>>, vector<128x128xf32>
    %cst_725 = arith.constant dense<0.000000e+00> : vector<8x128xf32>
    %766 = tpu.matmul %762, %765, %cst_725 {dimension_numbers = #tpu.dot_dimension_numbers<[1], [0], [0], [1], [0, 0, 1, 1], [], []>} : vector<8x128xf32>, vector<128x128xf32>, vector<8x128xf32> -> vector<8x128xf32>
    %767 = arith.addf %764, %766 : vector<8x128xf32>
    %cst_726 = arith.constant 5.000000e-01 : f32
    %768 = vector.broadcast %cst_726 : f32 to vector<8x128xf32>
    %769 = arith.mulf %768, %767 : vector<8x128xf32>
    %770 = math.tanh %769 : vector<8x128xf32>
    %cst_727 = arith.constant 5.000000e-01 : f32
    %771 = vector.broadcast %cst_727 : f32 to vector<8x128xf32>
    %772 = arith.mulf %771, %770 : vector<8x128xf32>
    %cst_728 = arith.constant 5.000000e-01 : f32
    %773 = vector.broadcast %cst_728 : f32 to vector<8x128xf32>
    %774 = arith.addf %772, %773 : vector<8x128xf32>
    %c0_729 = arith.constant 0 : index
    %c256_730 = arith.constant 256 : index
    %775 = vector.load %arg19[%c0_729, %c256_730] : memref<64x512xf32, #tpu.memory_space<vmem>>, vector<8x128xf32>
    %c0_731 = arith.constant 0 : index
    %c256_732 = arith.constant 256 : index
    %776 = vector.load %arg6[%c0_731, %c256_732] : memref<128x512xf32, #tpu.memory_space<vmem>>, vector<128x128xf32>
    %cst_733 = arith.constant dense<0.000000e+00> : vector<8x128xf32>
    %777 = tpu.matmul %762, %776, %cst_733 {dimension_numbers = #tpu.dot_dimension_numbers<[1], [0], [0], [1], [0, 0, 1, 1], [], []>} : vector<8x128xf32>, vector<128x128xf32>, vector<8x128xf32> -> vector<8x128xf32>
    %778 = arith.addf %775, %777 : vector<8x128xf32>
    %779 = math.tanh %778 : vector<8x128xf32>
    %780 = arith.mulf %774, %779 : vector<8x128xf32>
    %c0_734 = arith.constant 0 : index
    %c128_735 = arith.constant 128 : index
    %781 = vector.load %arg19[%c0_734, %c128_735] : memref<64x512xf32, #tpu.memory_space<vmem>>, vector<8x128xf32>
    %c0_736 = arith.constant 0 : index
    %c128_737 = arith.constant 128 : index
    %782 = vector.load %arg6[%c0_736, %c128_737] : memref<128x512xf32, #tpu.memory_space<vmem>>, vector<128x128xf32>
    %cst_738 = arith.constant dense<0.000000e+00> : vector<8x128xf32>
    %783 = tpu.matmul %762, %782, %cst_738 {dimension_numbers = #tpu.dot_dimension_numbers<[1], [0], [0], [1], [0, 0, 1, 1], [], []>} : vector<8x128xf32>, vector<128x128xf32>, vector<8x128xf32> -> vector<8x128xf32>
    %784 = arith.addf %781, %783 : vector<8x128xf32>
    %cst_739 = arith.constant 5.000000e-01 : f32
    %785 = vector.broadcast %cst_739 : f32 to vector<8x128xf32>
    %786 = arith.mulf %785, %784 : vector<8x128xf32>
    %787 = math.tanh %786 : vector<8x128xf32>
    %cst_740 = arith.constant 5.000000e-01 : f32
    %788 = vector.broadcast %cst_740 : f32 to vector<8x128xf32>
    %789 = arith.mulf %788, %787 : vector<8x128xf32>
    %cst_741 = arith.constant 5.000000e-01 : f32
    %790 = vector.broadcast %cst_741 : f32 to vector<8x128xf32>
    %791 = arith.addf %789, %790 : vector<8x128xf32>
    %792 = arith.mulf %791, %763 : vector<8x128xf32>
    %793 = arith.addf %792, %780 : vector<8x128xf32>
    %c0_742 = arith.constant 0 : index
    %c384_743 = arith.constant 384 : index
    %794 = vector.load %arg19[%c0_742, %c384_743] : memref<64x512xf32, #tpu.memory_space<vmem>>, vector<8x128xf32>
    %c0_744 = arith.constant 0 : index
    %c384_745 = arith.constant 384 : index
    %795 = vector.load %arg6[%c0_744, %c384_745] : memref<128x512xf32, #tpu.memory_space<vmem>>, vector<128x128xf32>
    %cst_746 = arith.constant dense<0.000000e+00> : vector<8x128xf32>
    %796 = tpu.matmul %762, %795, %cst_746 {dimension_numbers = #tpu.dot_dimension_numbers<[1], [0], [0], [1], [0, 0, 1, 1], [], []>} : vector<8x128xf32>, vector<128x128xf32>, vector<8x128xf32> -> vector<8x128xf32>
    %797 = arith.addf %794, %796 : vector<8x128xf32>
    %cst_747 = arith.constant 5.000000e-01 : f32
    %798 = vector.broadcast %cst_747 : f32 to vector<8x128xf32>
    %799 = arith.mulf %798, %797 : vector<8x128xf32>
    %800 = math.tanh %799 : vector<8x128xf32>
    %cst_748 = arith.constant 5.000000e-01 : f32
    %801 = vector.broadcast %cst_748 : f32 to vector<8x128xf32>
    %802 = arith.mulf %801, %800 : vector<8x128xf32>
    %cst_749 = arith.constant 5.000000e-01 : f32
    %803 = vector.broadcast %cst_749 : f32 to vector<8x128xf32>
    %804 = arith.addf %802, %803 : vector<8x128xf32>
    %805 = math.tanh %793 : vector<8x128xf32>
    %806 = arith.mulf %804, %805 : vector<8x128xf32>
    %c0_750 = arith.constant 0 : index
    %c0_751 = arith.constant 0 : index
    %807 = vector.load %arg21[%c0_750, %c0_751] : memref<64x128xf32, #tpu.memory_space<vmem>>, vector<8x128xf32>
    tpu.vector_store %arg21[%c0_750, %c0_751], %806 {strides = array<i32>} : memref<64x128xf32, #tpu.memory_space<vmem>>, vector<8x128xf32>,
    %c8_752 = arith.constant 8 : index
    %c0_753 = arith.constant 0 : index
    %808 = vector.load %arg19[%c8_752, %c0_753] : memref<64x512xf32, #tpu.memory_space<vmem>>, vector<8x128xf32>
    %c0_754 = arith.constant 0 : index
    %c0_755 = arith.constant 0 : index
    %809 = vector.load %arg6[%c0_754, %c0_755] : memref<128x512xf32, #tpu.memory_space<vmem>>, vector<128x128xf32>
    %cst_756 = arith.constant dense<0.000000e+00> : vector<8x128xf32>
    %810 = tpu.matmul %806, %809, %cst_756 {dimension_numbers = #tpu.dot_dimension_numbers<[1], [0], [0], [1], [0, 0, 1, 1], [], []>} : vector<8x128xf32>, vector<128x128xf32>, vector<8x128xf32> -> vector<8x128xf32>
    %811 = arith.addf %808, %810 : vector<8x128xf32>
    %cst_757 = arith.constant 5.000000e-01 : f32
    %812 = vector.broadcast %cst_757 : f32 to vector<8x128xf32>
    %813 = arith.mulf %812, %811 : vector<8x128xf32>
    %814 = math.tanh %813 : vector<8x128xf32>
    %cst_758 = arith.constant 5.000000e-01 : f32
    %815 = vector.broadcast %cst_758 : f32 to vector<8x128xf32>
    %816 = arith.mulf %815, %814 : vector<8x128xf32>
    %cst_759 = arith.constant 5.000000e-01 : f32
    %817 = vector.broadcast %cst_759 : f32 to vector<8x128xf32>
    %818 = arith.addf %816, %817 : vector<8x128xf32>
    %c8_760 = arith.constant 8 : index
    %c256_761 = arith.constant 256 : index
    %819 = vector.load %arg19[%c8_760, %c256_761] : memref<64x512xf32, #tpu.memory_space<vmem>>, vector<8x128xf32>
    %c0_762 = arith.constant 0 : index
    %c256_763 = arith.constant 256 : index
    %820 = vector.load %arg6[%c0_762, %c256_763] : memref<128x512xf32, #tpu.memory_space<vmem>>, vector<128x128xf32>
    %cst_764 = arith.constant dense<0.000000e+00> : vector<8x128xf32>
    %821 = tpu.matmul %806, %820, %cst_764 {dimension_numbers = #tpu.dot_dimension_numbers<[1], [0], [0], [1], [0, 0, 1, 1], [], []>} : vector<8x128xf32>, vector<128x128xf32>, vector<8x128xf32> -> vector<8x128xf32>
    %822 = arith.addf %819, %821 : vector<8x128xf32>
    %823 = math.tanh %822 : vector<8x128xf32>
    %824 = arith.mulf %818, %823 : vector<8x128xf32>
    %c8_765 = arith.constant 8 : index
    %c128_766 = arith.constant 128 : index
    %825 = vector.load %arg19[%c8_765, %c128_766] : memref<64x512xf32, #tpu.memory_space<vmem>>, vector<8x128xf32>
    %c0_767 = arith.constant 0 : index
    %c128_768 = arith.constant 128 : index
    %826 = vector.load %arg6[%c0_767, %c128_768] : memref<128x512xf32, #tpu.memory_space<vmem>>, vector<128x128xf32>
    %cst_769 = arith.constant dense<0.000000e+00> : vector<8x128xf32>
    %827 = tpu.matmul %806, %826, %cst_769 {dimension_numbers = #tpu.dot_dimension_numbers<[1], [0], [0], [1], [0, 0, 1, 1], [], []>} : vector<8x128xf32>, vector<128x128xf32>, vector<8x128xf32> -> vector<8x128xf32>
    %828 = arith.addf %825, %827 : vector<8x128xf32>
    %cst_770 = arith.constant 5.000000e-01 : f32
    %829 = vector.broadcast %cst_770 : f32 to vector<8x128xf32>
    %830 = arith.mulf %829, %828 : vector<8x128xf32>
    %831 = math.tanh %830 : vector<8x128xf32>
    %cst_771 = arith.constant 5.000000e-01 : f32
    %832 = vector.broadcast %cst_771 : f32 to vector<8x128xf32>
    %833 = arith.mulf %832, %831 : vector<8x128xf32>
    %cst_772 = arith.constant 5.000000e-01 : f32
    %834 = vector.broadcast %cst_772 : f32 to vector<8x128xf32>
    %835 = arith.addf %833, %834 : vector<8x128xf32>
    %836 = arith.mulf %835, %793 : vector<8x128xf32>
    %837 = arith.addf %836, %824 : vector<8x128xf32>
    %c8_773 = arith.constant 8 : index
    %c384_774 = arith.constant 384 : index
    %838 = vector.load %arg19[%c8_773, %c384_774] : memref<64x512xf32, #tpu.memory_space<vmem>>, vector<8x128xf32>
    %c0_775 = arith.constant 0 : index
    %c384_776 = arith.constant 384 : index
    %839 = vector.load %arg6[%c0_775, %c384_776] : memref<128x512xf32, #tpu.memory_space<vmem>>, vector<128x128xf32>
    %cst_777 = arith.constant dense<0.000000e+00> : vector<8x128xf32>
    %840 = tpu.matmul %806, %839, %cst_777 {dimension_numbers = #tpu.dot_dimension_numbers<[1], [0], [0], [1], [0, 0, 1, 1], [], []>} : vector<8x128xf32>, vector<128x128xf32>, vector<8x128xf32> -> vector<8x128xf32>
    %841 = arith.addf %838, %840 : vector<8x128xf32>
    %cst_778 = arith.constant 5.000000e-01 : f32
    %842 = vector.broadcast %cst_778 : f32 to vector<8x128xf32>
    %843 = arith.mulf %842, %841 : vector<8x128xf32>
    %844 = math.tanh %843 : vector<8x128xf32>
    %cst_779 = arith.constant 5.000000e-01 : f32
    %845 = vector.broadcast %cst_779 : f32 to vector<8x128xf32>
    %846 = arith.mulf %845, %844 : vector<8x128xf32>
    %cst_780 = arith.constant 5.000000e-01 : f32
    %847 = vector.broadcast %cst_780 : f32 to vector<8x128xf32>
    %848 = arith.addf %846, %847 : vector<8x128xf32>
    %849 = math.tanh %837 : vector<8x128xf32>
    %850 = arith.mulf %848, %849 : vector<8x128xf32>
    %c8_781 = arith.constant 8 : index
    %c0_782 = arith.constant 0 : index
    %851 = vector.load %arg21[%c8_781, %c0_782] : memref<64x128xf32, #tpu.memory_space<vmem>>, vector<8x128xf32>
    tpu.vector_store %arg21[%c8_781, %c0_782], %850 {strides = array<i32>} : memref<64x128xf32, #tpu.memory_space<vmem>>, vector<8x128xf32>,
    %c16_783 = arith.constant 16 : index
    %c0_784 = arith.constant 0 : index
    %852 = vector.load %arg19[%c16_783, %c0_784] : memref<64x512xf32, #tpu.memory_space<vmem>>, vector<8x128xf32>
    %c0_785 = arith.constant 0 : index
    %c0_786 = arith.constant 0 : index
    %853 = vector.load %arg6[%c0_785, %c0_786] : memref<128x512xf32, #tpu.memory_space<vmem>>, vector<128x128xf32>
    %cst_787 = arith.constant dense<0.000000e+00> : vector<8x128xf32>
    %854 = tpu.matmul %850, %853, %cst_787 {dimension_numbers = #tpu.dot_dimension_numbers<[1], [0], [0], [1], [0, 0, 1, 1], [], []>} : vector<8x128xf32>, vector<128x128xf32>, vector<8x128xf32> -> vector<8x128xf32>
    %855 = arith.addf %852, %854 : vector<8x128xf32>
    %cst_788 = arith.constant 5.000000e-01 : f32
    %856 = vector.broadcast %cst_788 : f32 to vector<8x128xf32>
    %857 = arith.mulf %856, %855 : vector<8x128xf32>
    %858 = math.tanh %857 : vector<8x128xf32>
    %cst_789 = arith.constant 5.000000e-01 : f32
    %859 = vector.broadcast %cst_789 : f32 to vector<8x128xf32>
    %860 = arith.mulf %859, %858 : vector<8x128xf32>
    %cst_790 = arith.constant 5.000000e-01 : f32
    %861 = vector.broadcast %cst_790 : f32 to vector<8x128xf32>
    %862 = arith.addf %860, %861 : vector<8x128xf32>
    %c16_791 = arith.constant 16 : index
    %c256_792 = arith.constant 256 : index
    %863 = vector.load %arg19[%c16_791, %c256_792] : memref<64x512xf32, #tpu.memory_space<vmem>>, vector<8x128xf32>
    %c0_793 = arith.constant 0 : index
    %c256_794 = arith.constant 256 : index
    %864 = vector.load %arg6[%c0_793, %c256_794] : memref<128x512xf32, #tpu.memory_space<vmem>>, vector<128x128xf32>
    %cst_795 = arith.constant dense<0.000000e+00> : vector<8x128xf32>
    %865 = tpu.matmul %850, %864, %cst_795 {dimension_numbers = #tpu.dot_dimension_numbers<[1], [0], [0], [1], [0, 0, 1, 1], [], []>} : vector<8x128xf32>, vector<128x128xf32>, vector<8x128xf32> -> vector<8x128xf32>
    %866 = arith.addf %863, %865 : vector<8x128xf32>
    %867 = math.tanh %866 : vector<8x128xf32>
    %868 = arith.mulf %862, %867 : vector<8x128xf32>
    %c16_796 = arith.constant 16 : index
    %c128_797 = arith.constant 128 : index
    %869 = vector.load %arg19[%c16_796, %c128_797] : memref<64x512xf32, #tpu.memory_space<vmem>>, vector<8x128xf32>
    %c0_798 = arith.constant 0 : index
    %c128_799 = arith.constant 128 : index
    %870 = vector.load %arg6[%c0_798, %c128_799] : memref<128x512xf32, #tpu.memory_space<vmem>>, vector<128x128xf32>
    %cst_800 = arith.constant dense<0.000000e+00> : vector<8x128xf32>
    %871 = tpu.matmul %850, %870, %cst_800 {dimension_numbers = #tpu.dot_dimension_numbers<[1], [0], [0], [1], [0, 0, 1, 1], [], []>} : vector<8x128xf32>, vector<128x128xf32>, vector<8x128xf32> -> vector<8x128xf32>
    %872 = arith.addf %869, %871 : vector<8x128xf32>
    %cst_801 = arith.constant 5.000000e-01 : f32
    %873 = vector.broadcast %cst_801 : f32 to vector<8x128xf32>
    %874 = arith.mulf %873, %872 : vector<8x128xf32>
    %875 = math.tanh %874 : vector<8x128xf32>
    %cst_802 = arith.constant 5.000000e-01 : f32
    %876 = vector.broadcast %cst_802 : f32 to vector<8x128xf32>
    %877 = arith.mulf %876, %875 : vector<8x128xf32>
    %cst_803 = arith.constant 5.000000e-01 : f32
    %878 = vector.broadcast %cst_803 : f32 to vector<8x128xf32>
    %879 = arith.addf %877, %878 : vector<8x128xf32>
    %880 = arith.mulf %879, %837 : vector<8x128xf32>
    %881 = arith.addf %880, %868 : vector<8x128xf32>
    %c16_804 = arith.constant 16 : index
    %c384_805 = arith.constant 384 : index
    %882 = vector.load %arg19[%c16_804, %c384_805] : memref<64x512xf32, #tpu.memory_space<vmem>>, vector<8x128xf32>
    %c0_806 = arith.constant 0 : index
    %c384_807 = arith.constant 384 : index
    %883 = vector.load %arg6[%c0_806, %c384_807] : memref<128x512xf32, #tpu.memory_space<vmem>>, vector<128x128xf32>
    %cst_808 = arith.constant dense<0.000000e+00> : vector<8x128xf32>
    %884 = tpu.matmul %850, %883, %cst_808 {dimension_numbers = #tpu.dot_dimension_numbers<[1], [0], [0], [1], [0, 0, 1, 1], [], []>} : vector<8x128xf32>, vector<128x128xf32>, vector<8x128xf32> -> vector<8x128xf32>
    %885 = arith.addf %882, %884 : vector<8x128xf32>
    %cst_809 = arith.constant 5.000000e-01 : f32
    %886 = vector.broadcast %cst_809 : f32 to vector<8x128xf32>
    %887 = arith.mulf %886, %885 : vector<8x128xf32>
    %888 = math.tanh %887 : vector<8x128xf32>
    %cst_810 = arith.constant 5.000000e-01 : f32
    %889 = vector.broadcast %cst_810 : f32 to vector<8x128xf32>
    %890 = arith.mulf %889, %888 : vector<8x128xf32>
    %cst_811 = arith.constant 5.000000e-01 : f32
    %891 = vector.broadcast %cst_811 : f32 to vector<8x128xf32>
    %892 = arith.addf %890, %891 : vector<8x128xf32>
    %893 = math.tanh %881 : vector<8x128xf32>
    %894 = arith.mulf %892, %893 : vector<8x128xf32>
    %c16_812 = arith.constant 16 : index
    %c0_813 = arith.constant 0 : index
    %895 = vector.load %arg21[%c16_812, %c0_813] : memref<64x128xf32, #tpu.memory_space<vmem>>, vector<8x128xf32>
    tpu.vector_store %arg21[%c16_812, %c0_813], %894 {strides = array<i32>} : memref<64x128xf32, #tpu.memory_space<vmem>>, vector<8x128xf32>,
    %c24_814 = arith.constant 24 : index
    %c0_815 = arith.constant 0 : index
    %896 = vector.load %arg19[%c24_814, %c0_815] : memref<64x512xf32, #tpu.memory_space<vmem>>, vector<8x128xf32>
    %c0_816 = arith.constant 0 : index
    %c0_817 = arith.constant 0 : index
    %897 = vector.load %arg6[%c0_816, %c0_817] : memref<128x512xf32, #tpu.memory_space<vmem>>, vector<128x128xf32>
    %cst_818 = arith.constant dense<0.000000e+00> : vector<8x128xf32>
    %898 = tpu.matmul %894, %897, %cst_818 {dimension_numbers = #tpu.dot_dimension_numbers<[1], [0], [0], [1], [0, 0, 1, 1], [], []>} : vector<8x128xf32>, vector<128x128xf32>, vector<8x128xf32> -> vector<8x128xf32>
    %899 = arith.addf %896, %898 : vector<8x128xf32>
    %cst_819 = arith.constant 5.000000e-01 : f32
    %900 = vector.broadcast %cst_819 : f32 to vector<8x128xf32>
    %901 = arith.mulf %900, %899 : vector<8x128xf32>
    %902 = math.tanh %901 : vector<8x128xf32>
    %cst_820 = arith.constant 5.000000e-01 : f32
    %903 = vector.broadcast %cst_820 : f32 to vector<8x128xf32>
    %904 = arith.mulf %903, %902 : vector<8x128xf32>
    %cst_821 = arith.constant 5.000000e-01 : f32
    %905 = vector.broadcast %cst_821 : f32 to vector<8x128xf32>
    %906 = arith.addf %904, %905 : vector<8x128xf32>
    %c24_822 = arith.constant 24 : index
    %c256_823 = arith.constant 256 : index
    %907 = vector.load %arg19[%c24_822, %c256_823] : memref<64x512xf32, #tpu.memory_space<vmem>>, vector<8x128xf32>
    %c0_824 = arith.constant 0 : index
    %c256_825 = arith.constant 256 : index
    %908 = vector.load %arg6[%c0_824, %c256_825] : memref<128x512xf32, #tpu.memory_space<vmem>>, vector<128x128xf32>
    %cst_826 = arith.constant dense<0.000000e+00> : vector<8x128xf32>
    %909 = tpu.matmul %894, %908, %cst_826 {dimension_numbers = #tpu.dot_dimension_numbers<[1], [0], [0], [1], [0, 0, 1, 1], [], []>} : vector<8x128xf32>, vector<128x128xf32>, vector<8x128xf32> -> vector<8x128xf32>
    %910 = arith.addf %907, %909 : vector<8x128xf32>
    %911 = math.tanh %910 : vector<8x128xf32>
    %912 = arith.mulf %906, %911 : vector<8x128xf32>
    %c24_827 = arith.constant 24 : index
    %c128_828 = arith.constant 128 : index
    %913 = vector.load %arg19[%c24_827, %c128_828] : memref<64x512xf32, #tpu.memory_space<vmem>>, vector<8x128xf32>
    %c0_829 = arith.constant 0 : index
    %c128_830 = arith.constant 128 : index
    %914 = vector.load %arg6[%c0_829, %c128_830] : memref<128x512xf32, #tpu.memory_space<vmem>>, vector<128x128xf32>
    %cst_831 = arith.constant dense<0.000000e+00> : vector<8x128xf32>
    %915 = tpu.matmul %894, %914, %cst_831 {dimension_numbers = #tpu.dot_dimension_numbers<[1], [0], [0], [1], [0, 0, 1, 1], [], []>} : vector<8x128xf32>, vector<128x128xf32>, vector<8x128xf32> -> vector<8x128xf32>
    %916 = arith.addf %913, %915 : vector<8x128xf32>
    %cst_832 = arith.constant 5.000000e-01 : f32
    %917 = vector.broadcast %cst_832 : f32 to vector<8x128xf32>
    %918 = arith.mulf %917, %916 : vector<8x128xf32>
    %919 = math.tanh %918 : vector<8x128xf32>
    %cst_833 = arith.constant 5.000000e-01 : f32
    %920 = vector.broadcast %cst_833 : f32 to vector<8x128xf32>
    %921 = arith.mulf %920, %919 : vector<8x128xf32>
    %cst_834 = arith.constant 5.000000e-01 : f32
    %922 = vector.broadcast %cst_834 : f32 to vector<8x128xf32>
    %923 = arith.addf %921, %922 : vector<8x128xf32>
    %924 = arith.mulf %923, %881 : vector<8x128xf32>
    %925 = arith.addf %924, %912 : vector<8x128xf32>
    %c24_835 = arith.constant 24 : index
    %c384_836 = arith.constant 384 : index
    %926 = vector.load %arg19[%c24_835, %c384_836] : memref<64x512xf32, #tpu.memory_space<vmem>>, vector<8x128xf32>
    %c0_837 = arith.constant 0 : index
    %c384_838 = arith.constant 384 : index
    %927 = vector.load %arg6[%c0_837, %c384_838] : memref<128x512xf32, #tpu.memory_space<vmem>>, vector<128x128xf32>
    %cst_839 = arith.constant dense<0.000000e+00> : vector<8x128xf32>
    %928 = tpu.matmul %894, %927, %cst_839 {dimension_numbers = #tpu.dot_dimension_numbers<[1], [0], [0], [1], [0, 0, 1, 1], [], []>} : vector<8x128xf32>, vector<128x128xf32>, vector<8x128xf32> -> vector<8x128xf32>
    %929 = arith.addf %926, %928 : vector<8x128xf32>
    %cst_840 = arith.constant 5.000000e-01 : f32
    %930 = vector.broadcast %cst_840 : f32 to vector<8x128xf32>
    %931 = arith.mulf %930, %929 : vector<8x128xf32>
    %932 = math.tanh %931 : vector<8x128xf32>
    %cst_841 = arith.constant 5.000000e-01 : f32
    %933 = vector.broadcast %cst_841 : f32 to vector<8x128xf32>
    %934 = arith.mulf %933, %932 : vector<8x128xf32>
    %cst_842 = arith.constant 5.000000e-01 : f32
    %935 = vector.broadcast %cst_842 : f32 to vector<8x128xf32>
    %936 = arith.addf %934, %935 : vector<8x128xf32>
    %937 = math.tanh %925 : vector<8x128xf32>
    %938 = arith.mulf %936, %937 : vector<8x128xf32>
    %c24_843 = arith.constant 24 : index
    %c0_844 = arith.constant 0 : index
    %939 = vector.load %arg21[%c24_843, %c0_844] : memref<64x128xf32, #tpu.memory_space<vmem>>, vector<8x128xf32>
    tpu.vector_store %arg21[%c24_843, %c0_844], %938 {strides = array<i32>} : memref<64x128xf32, #tpu.memory_space<vmem>>, vector<8x128xf32>,
    %c32_845 = arith.constant 32 : index
    %c0_846 = arith.constant 0 : index
    %940 = vector.load %arg19[%c32_845, %c0_846] : memref<64x512xf32, #tpu.memory_space<vmem>>, vector<8x128xf32>
    %c0_847 = arith.constant 0 : index
    %c0_848 = arith.constant 0 : index
    %941 = vector.load %arg6[%c0_847, %c0_848] : memref<128x512xf32, #tpu.memory_space<vmem>>, vector<128x128xf32>
    %cst_849 = arith.constant dense<0.000000e+00> : vector<8x128xf32>
    %942 = tpu.matmul %938, %941, %cst_849 {dimension_numbers = #tpu.dot_dimension_numbers<[1], [0], [0], [1], [0, 0, 1, 1], [], []>} : vector<8x128xf32>, vector<128x128xf32>, vector<8x128xf32> -> vector<8x128xf32>
    %943 = arith.addf %940, %942 : vector<8x128xf32>
    %cst_850 = arith.constant 5.000000e-01 : f32
    %944 = vector.broadcast %cst_850 : f32 to vector<8x128xf32>
    %945 = arith.mulf %944, %943 : vector<8x128xf32>
    %946 = math.tanh %945 : vector<8x128xf32>
    %cst_851 = arith.constant 5.000000e-01 : f32
    %947 = vector.broadcast %cst_851 : f32 to vector<8x128xf32>
    %948 = arith.mulf %947, %946 : vector<8x128xf32>
    %cst_852 = arith.constant 5.000000e-01 : f32
    %949 = vector.broadcast %cst_852 : f32 to vector<8x128xf32>
    %950 = arith.addf %948, %949 : vector<8x128xf32>
    %c32_853 = arith.constant 32 : index
    %c256_854 = arith.constant 256 : index
    %951 = vector.load %arg19[%c32_853, %c256_854] : memref<64x512xf32, #tpu.memory_space<vmem>>, vector<8x128xf32>
    %c0_855 = arith.constant 0 : index
    %c256_856 = arith.constant 256 : index
    %952 = vector.load %arg6[%c0_855, %c256_856] : memref<128x512xf32, #tpu.memory_space<vmem>>, vector<128x128xf32>
    %cst_857 = arith.constant dense<0.000000e+00> : vector<8x128xf32>
    %953 = tpu.matmul %938, %952, %cst_857 {dimension_numbers = #tpu.dot_dimension_numbers<[1], [0], [0], [1], [0, 0, 1, 1], [], []>} : vector<8x128xf32>, vector<128x128xf32>, vector<8x128xf32> -> vector<8x128xf32>
    %954 = arith.addf %951, %953 : vector<8x128xf32>
    %955 = math.tanh %954 : vector<8x128xf32>
    %956 = arith.mulf %950, %955 : vector<8x128xf32>
    %c32_858 = arith.constant 32 : index
    %c128_859 = arith.constant 128 : index
    %957 = vector.load %arg19[%c32_858, %c128_859] : memref<64x512xf32, #tpu.memory_space<vmem>>, vector<8x128xf32>
    %c0_860 = arith.constant 0 : index
    %c128_861 = arith.constant 128 : index
    %958 = vector.load %arg6[%c0_860, %c128_861] : memref<128x512xf32, #tpu.memory_space<vmem>>, vector<128x128xf32>
    %cst_862 = arith.constant dense<0.000000e+00> : vector<8x128xf32>
    %959 = tpu.matmul %938, %958, %cst_862 {dimension_numbers = #tpu.dot_dimension_numbers<[1], [0], [0], [1], [0, 0, 1, 1], [], []>} : vector<8x128xf32>, vector<128x128xf32>, vector<8x128xf32> -> vector<8x128xf32>
    %960 = arith.addf %957, %959 : vector<8x128xf32>
    %cst_863 = arith.constant 5.000000e-01 : f32
    %961 = vector.broadcast %cst_863 : f32 to vector<8x128xf32>
    %962 = arith.mulf %961, %960 : vector<8x128xf32>
    %963 = math.tanh %962 : vector<8x128xf32>
    %cst_864 = arith.constant 5.000000e-01 : f32
    %964 = vector.broadcast %cst_864 : f32 to vector<8x128xf32>
    %965 = arith.mulf %964, %963 : vector<8x128xf32>
    %cst_865 = arith.constant 5.000000e-01 : f32
    %966 = vector.broadcast %cst_865 : f32 to vector<8x128xf32>
    %967 = arith.addf %965, %966 : vector<8x128xf32>
    %968 = arith.mulf %967, %925 : vector<8x128xf32>
    %969 = arith.addf %968, %956 : vector<8x128xf32>
    %c32_866 = arith.constant 32 : index
    %c384_867 = arith.constant 384 : index
    %970 = vector.load %arg19[%c32_866, %c384_867] : memref<64x512xf32, #tpu.memory_space<vmem>>, vector<8x128xf32>
    %c0_868 = arith.constant 0 : index
    %c384_869 = arith.constant 384 : index
    %971 = vector.load %arg6[%c0_868, %c384_869] : memref<128x512xf32, #tpu.memory_space<vmem>>, vector<128x128xf32>
    %cst_870 = arith.constant dense<0.000000e+00> : vector<8x128xf32>
    %972 = tpu.matmul %938, %971, %cst_870 {dimension_numbers = #tpu.dot_dimension_numbers<[1], [0], [0], [1], [0, 0, 1, 1], [], []>} : vector<8x128xf32>, vector<128x128xf32>, vector<8x128xf32> -> vector<8x128xf32>
    %973 = arith.addf %970, %972 : vector<8x128xf32>
    %cst_871 = arith.constant 5.000000e-01 : f32
    %974 = vector.broadcast %cst_871 : f32 to vector<8x128xf32>
    %975 = arith.mulf %974, %973 : vector<8x128xf32>
    %976 = math.tanh %975 : vector<8x128xf32>
    %cst_872 = arith.constant 5.000000e-01 : f32
    %977 = vector.broadcast %cst_872 : f32 to vector<8x128xf32>
    %978 = arith.mulf %977, %976 : vector<8x128xf32>
    %cst_873 = arith.constant 5.000000e-01 : f32
    %979 = vector.broadcast %cst_873 : f32 to vector<8x128xf32>
    %980 = arith.addf %978, %979 : vector<8x128xf32>
    %981 = math.tanh %969 : vector<8x128xf32>
    %982 = arith.mulf %980, %981 : vector<8x128xf32>
    %c32_874 = arith.constant 32 : index
    %c0_875 = arith.constant 0 : index
    %983 = vector.load %arg21[%c32_874, %c0_875] : memref<64x128xf32, #tpu.memory_space<vmem>>, vector<8x128xf32>
    tpu.vector_store %arg21[%c32_874, %c0_875], %982 {strides = array<i32>} : memref<64x128xf32, #tpu.memory_space<vmem>>, vector<8x128xf32>,
    %c40_876 = arith.constant 40 : index
    %c0_877 = arith.constant 0 : index
    %984 = vector.load %arg19[%c40_876, %c0_877] : memref<64x512xf32, #tpu.memory_space<vmem>>, vector<8x128xf32>
    %c0_878 = arith.constant 0 : index
    %c0_879 = arith.constant 0 : index
    %985 = vector.load %arg6[%c0_878, %c0_879] : memref<128x512xf32, #tpu.memory_space<vmem>>, vector<128x128xf32>
    %cst_880 = arith.constant dense<0.000000e+00> : vector<8x128xf32>
    %986 = tpu.matmul %982, %985, %cst_880 {dimension_numbers = #tpu.dot_dimension_numbers<[1], [0], [0], [1], [0, 0, 1, 1], [], []>} : vector<8x128xf32>, vector<128x128xf32>, vector<8x128xf32> -> vector<8x128xf32>
    %987 = arith.addf %984, %986 : vector<8x128xf32>
    %cst_881 = arith.constant 5.000000e-01 : f32
    %988 = vector.broadcast %cst_881 : f32 to vector<8x128xf32>
    %989 = arith.mulf %988, %987 : vector<8x128xf32>
    %990 = math.tanh %989 : vector<8x128xf32>
    %cst_882 = arith.constant 5.000000e-01 : f32
    %991 = vector.broadcast %cst_882 : f32 to vector<8x128xf32>
    %992 = arith.mulf %991, %990 : vector<8x128xf32>
    %cst_883 = arith.constant 5.000000e-01 : f32
    %993 = vector.broadcast %cst_883 : f32 to vector<8x128xf32>
    %994 = arith.addf %992, %993 : vector<8x128xf32>
    %c40_884 = arith.constant 40 : index
    %c256_885 = arith.constant 256 : index
    %995 = vector.load %arg19[%c40_884, %c256_885] : memref<64x512xf32, #tpu.memory_space<vmem>>, vector<8x128xf32>
    %c0_886 = arith.constant 0 : index
    %c256_887 = arith.constant 256 : index
    %996 = vector.load %arg6[%c0_886, %c256_887] : memref<128x512xf32, #tpu.memory_space<vmem>>, vector<128x128xf32>
    %cst_888 = arith.constant dense<0.000000e+00> : vector<8x128xf32>
    %997 = tpu.matmul %982, %996, %cst_888 {dimension_numbers = #tpu.dot_dimension_numbers<[1], [0], [0], [1], [0, 0, 1, 1], [], []>} : vector<8x128xf32>, vector<128x128xf32>, vector<8x128xf32> -> vector<8x128xf32>
    %998 = arith.addf %995, %997 : vector<8x128xf32>
    %999 = math.tanh %998 : vector<8x128xf32>
    %1000 = arith.mulf %994, %999 : vector<8x128xf32>
    %c40_889 = arith.constant 40 : index
    %c128_890 = arith.constant 128 : index
    %1001 = vector.load %arg19[%c40_889, %c128_890] : memref<64x512xf32, #tpu.memory_space<vmem>>, vector<8x128xf32>
    %c0_891 = arith.constant 0 : index
    %c128_892 = arith.constant 128 : index
    %1002 = vector.load %arg6[%c0_891, %c128_892] : memref<128x512xf32, #tpu.memory_space<vmem>>, vector<128x128xf32>
    %cst_893 = arith.constant dense<0.000000e+00> : vector<8x128xf32>
    %1003 = tpu.matmul %982, %1002, %cst_893 {dimension_numbers = #tpu.dot_dimension_numbers<[1], [0], [0], [1], [0, 0, 1, 1], [], []>} : vector<8x128xf32>, vector<128x128xf32>, vector<8x128xf32> -> vector<8x128xf32>
    %1004 = arith.addf %1001, %1003 : vector<8x128xf32>
    %cst_894 = arith.constant 5.000000e-01 : f32
    %1005 = vector.broadcast %cst_894 : f32 to vector<8x128xf32>
    %1006 = arith.mulf %1005, %1004 : vector<8x128xf32>
    %1007 = math.tanh %1006 : vector<8x128xf32>
    %cst_895 = arith.constant 5.000000e-01 : f32
    %1008 = vector.broadcast %cst_895 : f32 to vector<8x128xf32>
    %1009 = arith.mulf %1008, %1007 : vector<8x128xf32>
    %cst_896 = arith.constant 5.000000e-01 : f32
    %1010 = vector.broadcast %cst_896 : f32 to vector<8x128xf32>
    %1011 = arith.addf %1009, %1010 : vector<8x128xf32>
    %1012 = arith.mulf %1011, %969 : vector<8x128xf32>
    %1013 = arith.addf %1012, %1000 : vector<8x128xf32>
    %c40_897 = arith.constant 40 : index
    %c384_898 = arith.constant 384 : index
    %1014 = vector.load %arg19[%c40_897, %c384_898] : memref<64x512xf32, #tpu.memory_space<vmem>>, vector<8x128xf32>
    %c0_899 = arith.constant 0 : index
    %c384_900 = arith.constant 384 : index
    %1015 = vector.load %arg6[%c0_899, %c384_900] : memref<128x512xf32, #tpu.memory_space<vmem>>, vector<128x128xf32>
    %cst_901 = arith.constant dense<0.000000e+00> : vector<8x128xf32>
    %1016 = tpu.matmul %982, %1015, %cst_901 {dimension_numbers = #tpu.dot_dimension_numbers<[1], [0], [0], [1], [0, 0, 1, 1], [], []>} : vector<8x128xf32>, vector<128x128xf32>, vector<8x128xf32> -> vector<8x128xf32>
    %1017 = arith.addf %1014, %1016 : vector<8x128xf32>
    %cst_902 = arith.constant 5.000000e-01 : f32
    %1018 = vector.broadcast %cst_902 : f32 to vector<8x128xf32>
    %1019 = arith.mulf %1018, %1017 : vector<8x128xf32>
    %1020 = math.tanh %1019 : vector<8x128xf32>
    %cst_903 = arith.constant 5.000000e-01 : f32
    %1021 = vector.broadcast %cst_903 : f32 to vector<8x128xf32>
    %1022 = arith.mulf %1021, %1020 : vector<8x128xf32>
    %cst_904 = arith.constant 5.000000e-01 : f32
    %1023 = vector.broadcast %cst_904 : f32 to vector<8x128xf32>
    %1024 = arith.addf %1022, %1023 : vector<8x128xf32>
    %1025 = math.tanh %1013 : vector<8x128xf32>
    %1026 = arith.mulf %1024, %1025 : vector<8x128xf32>
    %c40_905 = arith.constant 40 : index
    %c0_906 = arith.constant 0 : index
    %1027 = vector.load %arg21[%c40_905, %c0_906] : memref<64x128xf32, #tpu.memory_space<vmem>>, vector<8x128xf32>
    tpu.vector_store %arg21[%c40_905, %c0_906], %1026 {strides = array<i32>} : memref<64x128xf32, #tpu.memory_space<vmem>>, vector<8x128xf32>,
    %c48_907 = arith.constant 48 : index
    %c0_908 = arith.constant 0 : index
    %1028 = vector.load %arg19[%c48_907, %c0_908] : memref<64x512xf32, #tpu.memory_space<vmem>>, vector<8x128xf32>
    %c0_909 = arith.constant 0 : index
    %c0_910 = arith.constant 0 : index
    %1029 = vector.load %arg6[%c0_909, %c0_910] : memref<128x512xf32, #tpu.memory_space<vmem>>, vector<128x128xf32>
    %cst_911 = arith.constant dense<0.000000e+00> : vector<8x128xf32>
    %1030 = tpu.matmul %1026, %1029, %cst_911 {dimension_numbers = #tpu.dot_dimension_numbers<[1], [0], [0], [1], [0, 0, 1, 1], [], []>} : vector<8x128xf32>, vector<128x128xf32>, vector<8x128xf32> -> vector<8x128xf32>
    %1031 = arith.addf %1028, %1030 : vector<8x128xf32>
    %cst_912 = arith.constant 5.000000e-01 : f32
    %1032 = vector.broadcast %cst_912 : f32 to vector<8x128xf32>
    %1033 = arith.mulf %1032, %1031 : vector<8x128xf32>
    %1034 = math.tanh %1033 : vector<8x128xf32>
    %cst_913 = arith.constant 5.000000e-01 : f32
    %1035 = vector.broadcast %cst_913 : f32 to vector<8x128xf32>
    %1036 = arith.mulf %1035, %1034 : vector<8x128xf32>
    %cst_914 = arith.constant 5.000000e-01 : f32
    %1037 = vector.broadcast %cst_914 : f32 to vector<8x128xf32>
    %1038 = arith.addf %1036, %1037 : vector<8x128xf32>
    %c48_915 = arith.constant 48 : index
    %c256_916 = arith.constant 256 : index
    %1039 = vector.load %arg19[%c48_915, %c256_916] : memref<64x512xf32, #tpu.memory_space<vmem>>, vector<8x128xf32>
    %c0_917 = arith.constant 0 : index
    %c256_918 = arith.constant 256 : index
    %1040 = vector.load %arg6[%c0_917, %c256_918] : memref<128x512xf32, #tpu.memory_space<vmem>>, vector<128x128xf32>
    %cst_919 = arith.constant dense<0.000000e+00> : vector<8x128xf32>
    %1041 = tpu.matmul %1026, %1040, %cst_919 {dimension_numbers = #tpu.dot_dimension_numbers<[1], [0], [0], [1], [0, 0, 1, 1], [], []>} : vector<8x128xf32>, vector<128x128xf32>, vector<8x128xf32> -> vector<8x128xf32>
    %1042 = arith.addf %1039, %1041 : vector<8x128xf32>
    %1043 = math.tanh %1042 : vector<8x128xf32>
    %1044 = arith.mulf %1038, %1043 : vector<8x128xf32>
    %c48_920 = arith.constant 48 : index
    %c128_921 = arith.constant 128 : index
    %1045 = vector.load %arg19[%c48_920, %c128_921] : memref<64x512xf32, #tpu.memory_space<vmem>>, vector<8x128xf32>
    %c0_922 = arith.constant 0 : index
    %c128_923 = arith.constant 128 : index
    %1046 = vector.load %arg6[%c0_922, %c128_923] : memref<128x512xf32, #tpu.memory_space<vmem>>, vector<128x128xf32>
    %cst_924 = arith.constant dense<0.000000e+00> : vector<8x128xf32>
    %1047 = tpu.matmul %1026, %1046, %cst_924 {dimension_numbers = #tpu.dot_dimension_numbers<[1], [0], [0], [1], [0, 0, 1, 1], [], []>} : vector<8x128xf32>, vector<128x128xf32>, vector<8x128xf32> -> vector<8x128xf32>
    %1048 = arith.addf %1045, %1047 : vector<8x128xf32>
    %cst_925 = arith.constant 5.000000e-01 : f32
    %1049 = vector.broadcast %cst_925 : f32 to vector<8x128xf32>
    %1050 = arith.mulf %1049, %1048 : vector<8x128xf32>
    %1051 = math.tanh %1050 : vector<8x128xf32>
    %cst_926 = arith.constant 5.000000e-01 : f32
    %1052 = vector.broadcast %cst_926 : f32 to vector<8x128xf32>
    %1053 = arith.mulf %1052, %1051 : vector<8x128xf32>
    %cst_927 = arith.constant 5.000000e-01 : f32
    %1054 = vector.broadcast %cst_927 : f32 to vector<8x128xf32>
    %1055 = arith.addf %1053, %1054 : vector<8x128xf32>
    %1056 = arith.mulf %1055, %1013 : vector<8x128xf32>
    %1057 = arith.addf %1056, %1044 : vector<8x128xf32>
    %c48_928 = arith.constant 48 : index
    %c384_929 = arith.constant 384 : index
    %1058 = vector.load %arg19[%c48_928, %c384_929] : memref<64x512xf32, #tpu.memory_space<vmem>>, vector<8x128xf32>
    %c0_930 = arith.constant 0 : index
    %c384_931 = arith.constant 384 : index
    %1059 = vector.load %arg6[%c0_930, %c384_931] : memref<128x512xf32, #tpu.memory_space<vmem>>, vector<128x128xf32>
    %cst_932 = arith.constant dense<0.000000e+00> : vector<8x128xf32>
    %1060 = tpu.matmul %1026, %1059, %cst_932 {dimension_numbers = #tpu.dot_dimension_numbers<[1], [0], [0], [1], [0, 0, 1, 1], [], []>} : vector<8x128xf32>, vector<128x128xf32>, vector<8x128xf32> -> vector<8x128xf32>
    %1061 = arith.addf %1058, %1060 : vector<8x128xf32>
    %cst_933 = arith.constant 5.000000e-01 : f32
    %1062 = vector.broadcast %cst_933 : f32 to vector<8x128xf32>
    %1063 = arith.mulf %1062, %1061 : vector<8x128xf32>
    %1064 = math.tanh %1063 : vector<8x128xf32>
    %cst_934 = arith.constant 5.000000e-01 : f32
    %1065 = vector.broadcast %cst_934 : f32 to vector<8x128xf32>
    %1066 = arith.mulf %1065, %1064 : vector<8x128xf32>
    %cst_935 = arith.constant 5.000000e-01 : f32
    %1067 = vector.broadcast %cst_935 : f32 to vector<8x128xf32>
    %1068 = arith.addf %1066, %1067 : vector<8x128xf32>
    %1069 = math.tanh %1057 : vector<8x128xf32>
    %1070 = arith.mulf %1068, %1069 : vector<8x128xf32>
    %c48_936 = arith.constant 48 : index
    %c0_937 = arith.constant 0 : index
    %1071 = vector.load %arg21[%c48_936, %c0_937] : memref<64x128xf32, #tpu.memory_space<vmem>>, vector<8x128xf32>
    tpu.vector_store %arg21[%c48_936, %c0_937], %1070 {strides = array<i32>} : memref<64x128xf32, #tpu.memory_space<vmem>>, vector<8x128xf32>,
    %c56_938 = arith.constant 56 : index
    %c0_939 = arith.constant 0 : index
    %1072 = vector.load %arg19[%c56_938, %c0_939] : memref<64x512xf32, #tpu.memory_space<vmem>>, vector<8x128xf32>
    %c0_940 = arith.constant 0 : index
    %c0_941 = arith.constant 0 : index
    %1073 = vector.load %arg6[%c0_940, %c0_941] : memref<128x512xf32, #tpu.memory_space<vmem>>, vector<128x128xf32>
    %cst_942 = arith.constant dense<0.000000e+00> : vector<8x128xf32>
    %1074 = tpu.matmul %1070, %1073, %cst_942 {dimension_numbers = #tpu.dot_dimension_numbers<[1], [0], [0], [1], [0, 0, 1, 1], [], []>} : vector<8x128xf32>, vector<128x128xf32>, vector<8x128xf32> -> vector<8x128xf32>
    %1075 = arith.addf %1072, %1074 : vector<8x128xf32>
    %cst_943 = arith.constant 5.000000e-01 : f32
    %1076 = vector.broadcast %cst_943 : f32 to vector<8x128xf32>
    %1077 = arith.mulf %1076, %1075 : vector<8x128xf32>
    %1078 = math.tanh %1077 : vector<8x128xf32>
    %cst_944 = arith.constant 5.000000e-01 : f32
    %1079 = vector.broadcast %cst_944 : f32 to vector<8x128xf32>
    %1080 = arith.mulf %1079, %1078 : vector<8x128xf32>
    %cst_945 = arith.constant 5.000000e-01 : f32
    %1081 = vector.broadcast %cst_945 : f32 to vector<8x128xf32>
    %1082 = arith.addf %1080, %1081 : vector<8x128xf32>
    %c56_946 = arith.constant 56 : index
    %c256_947 = arith.constant 256 : index
    %1083 = vector.load %arg19[%c56_946, %c256_947] : memref<64x512xf32, #tpu.memory_space<vmem>>, vector<8x128xf32>
    %c0_948 = arith.constant 0 : index
    %c256_949 = arith.constant 256 : index
    %1084 = vector.load %arg6[%c0_948, %c256_949] : memref<128x512xf32, #tpu.memory_space<vmem>>, vector<128x128xf32>
    %cst_950 = arith.constant dense<0.000000e+00> : vector<8x128xf32>
    %1085 = tpu.matmul %1070, %1084, %cst_950 {dimension_numbers = #tpu.dot_dimension_numbers<[1], [0], [0], [1], [0, 0, 1, 1], [], []>} : vector<8x128xf32>, vector<128x128xf32>, vector<8x128xf32> -> vector<8x128xf32>
    %1086 = arith.addf %1083, %1085 : vector<8x128xf32>
    %1087 = math.tanh %1086 : vector<8x128xf32>
    %1088 = arith.mulf %1082, %1087 : vector<8x128xf32>
    %c56_951 = arith.constant 56 : index
    %c128_952 = arith.constant 128 : index
    %1089 = vector.load %arg19[%c56_951, %c128_952] : memref<64x512xf32, #tpu.memory_space<vmem>>, vector<8x128xf32>
    %c0_953 = arith.constant 0 : index
    %c128_954 = arith.constant 128 : index
    %1090 = vector.load %arg6[%c0_953, %c128_954] : memref<128x512xf32, #tpu.memory_space<vmem>>, vector<128x128xf32>
    %cst_955 = arith.constant dense<0.000000e+00> : vector<8x128xf32>
    %1091 = tpu.matmul %1070, %1090, %cst_955 {dimension_numbers = #tpu.dot_dimension_numbers<[1], [0], [0], [1], [0, 0, 1, 1], [], []>} : vector<8x128xf32>, vector<128x128xf32>, vector<8x128xf32> -> vector<8x128xf32>
    %1092 = arith.addf %1089, %1091 : vector<8x128xf32>
    %cst_956 = arith.constant 5.000000e-01 : f32
    %1093 = vector.broadcast %cst_956 : f32 to vector<8x128xf32>
    %1094 = arith.mulf %1093, %1092 : vector<8x128xf32>
    %1095 = math.tanh %1094 : vector<8x128xf32>
    %cst_957 = arith.constant 5.000000e-01 : f32
    %1096 = vector.broadcast %cst_957 : f32 to vector<8x128xf32>
    %1097 = arith.mulf %1096, %1095 : vector<8x128xf32>
    %cst_958 = arith.constant 5.000000e-01 : f32
    %1098 = vector.broadcast %cst_958 : f32 to vector<8x128xf32>
    %1099 = arith.addf %1097, %1098 : vector<8x128xf32>
    %1100 = arith.mulf %1099, %1057 : vector<8x128xf32>
    %1101 = arith.addf %1100, %1088 : vector<8x128xf32>
    %c56_959 = arith.constant 56 : index
    %c384_960 = arith.constant 384 : index
    %1102 = vector.load %arg19[%c56_959, %c384_960] : memref<64x512xf32, #tpu.memory_space<vmem>>, vector<8x128xf32>
    %c0_961 = arith.constant 0 : index
    %c384_962 = arith.constant 384 : index
    %1103 = vector.load %arg6[%c0_961, %c384_962] : memref<128x512xf32, #tpu.memory_space<vmem>>, vector<128x128xf32>
    %cst_963 = arith.constant dense<0.000000e+00> : vector<8x128xf32>
    %1104 = tpu.matmul %1070, %1103, %cst_963 {dimension_numbers = #tpu.dot_dimension_numbers<[1], [0], [0], [1], [0, 0, 1, 1], [], []>} : vector<8x128xf32>, vector<128x128xf32>, vector<8x128xf32> -> vector<8x128xf32>
    %1105 = arith.addf %1102, %1104 : vector<8x128xf32>
    %cst_964 = arith.constant 5.000000e-01 : f32
    %1106 = vector.broadcast %cst_964 : f32 to vector<8x128xf32>
    %1107 = arith.mulf %1106, %1105 : vector<8x128xf32>
    %1108 = math.tanh %1107 : vector<8x128xf32>
    %cst_965 = arith.constant 5.000000e-01 : f32
    %1109 = vector.broadcast %cst_965 : f32 to vector<8x128xf32>
    %1110 = arith.mulf %1109, %1108 : vector<8x128xf32>
    %cst_966 = arith.constant 5.000000e-01 : f32
    %1111 = vector.broadcast %cst_966 : f32 to vector<8x128xf32>
    %1112 = arith.addf %1110, %1111 : vector<8x128xf32>
    %1113 = math.tanh %1101 : vector<8x128xf32>
    %1114 = arith.mulf %1112, %1113 : vector<8x128xf32>
    %c56_967 = arith.constant 56 : index
    %c0_968 = arith.constant 0 : index
    %1115 = vector.load %arg21[%c56_967, %c0_968] : memref<64x128xf32, #tpu.memory_space<vmem>>, vector<8x128xf32>
    tpu.vector_store %arg21[%c56_967, %c0_968], %1114 {strides = array<i32>} : memref<64x128xf32, #tpu.memory_space<vmem>>, vector<8x128xf32>,
    %cst_969 = arith.constant -1.000000e+30 : f32
    %1116 = vector.broadcast %cst_969 : f32 to vector<8x1xf32>
    %cst_970 = arith.constant 0.000000e+00 : f32
    %1117 = vector.broadcast %cst_970 : f32 to vector<8x1xf32>
    %cst_971 = arith.constant 0.000000e+00 : f32
    %1118 = vector.broadcast %cst_971 : f32 to vector<8x128xf32>
    %c0_972 = arith.constant 0 : index
    %c0_973 = arith.constant 0 : index
    %1119 = vector.load %arg21[%c0_972, %c0_973] : memref<64x128xf32, #tpu.memory_space<vmem>>, vector<8x128xf32>
    %c0_974 = arith.constant 0 : index
    %c0_975 = arith.constant 0 : index
    %1120 = vector.load %arg8[%c0_974, %c0_975] : memref<128x64xf32, #tpu.memory_space<vmem>>, vector<128x64xf32>
    %cst_976 = arith.constant dense<0.000000e+00> : vector<8x64xf32>
    %1121 = tpu.matmul %1119, %1120, %cst_976 {dimension_numbers = #tpu.dot_dimension_numbers<[1], [0], [0], [1], [0, 0, 1, 1], [], []>} : vector<8x128xf32>, vector<128x64xf32>, vector<8x64xf32> -> vector<8x64xf32>
    %c0_977 = arith.constant 0 : index
    %c0_978 = arith.constant 0 : index
    %1122 = vector.load %arg9[%c0_977, %c0_978] : memref<1x64xf32, #tpu.memory_space<vmem>>, vector<1x64xf32>
    %1123 = vector.broadcast %1122 : vector<1x64xf32> to vector<8x64xf32>
    %1124 = arith.addf %1121, %1123 : vector<8x64xf32>
    %1125 = math.tanh %1124 : vector<8x64xf32>
    %c0_979 = arith.constant 0 : index
    %c0_980 = arith.constant 0 : index
    %1126 = vector.load %arg10[%c0_979, %c0_980] : memref<1x64xf32, #tpu.memory_space<vmem>>, vector<1x64xf32>
    %1127 = vector.broadcast %1126 : vector<1x64xf32> to vector<8x64xf32>
    %1128 = arith.mulf %1125, %1127 : vector<8x64xf32>
    %cst_981 = arith.constant dense<0.000000e+00> : vector<8xf32>
    %1129 = vector.multi_reduction <add>, %1128, %cst_981 [1] : vector<8x64xf32> to vector<8xf32>
    %1130 = vector.shape_cast %1129 : vector<8xf32> to vector<8x1xf32>
    %c0_982 = arith.constant 0 : index
    %c0_983 = arith.constant 0 : index
    %1131 = vector.load %arg11[%c0_982, %c0_983] : memref<1x1xf32, #tpu.memory_space<vmem>>, vector<1x1xf32>
    %1132 = vector.broadcast %1131 : vector<1x1xf32> to vector<8x1xf32>
    %1133 = arith.addf %1130, %1132 : vector<8x1xf32>
    %1134 = arith.maximumf %1116, %1133 : vector<8x1xf32>
    %1135 = arith.subf %1116, %1134 : vector<8x1xf32>
    %1136 = math.exp %1135 : vector<8x1xf32>
    %1137 = arith.subf %1133, %1134 : vector<8x1xf32>
    %1138 = math.exp %1137 : vector<8x1xf32>
    %1139 = arith.mulf %1136, %1117 : vector<8x1xf32>
    %1140 = arith.addf %1139, %1138 : vector<8x1xf32>
    %1141 = vector.broadcast %1136 : vector<8x1xf32> to vector<8x128xf32>
    %1142 = arith.mulf %1141, %1118 : vector<8x128xf32>
    %1143 = vector.broadcast %1138 : vector<8x1xf32> to vector<8x128xf32>
    %1144 = arith.mulf %1143, %1119 : vector<8x128xf32>
    %1145 = arith.addf %1142, %1144 : vector<8x128xf32>
    %c8_984 = arith.constant 8 : index
    %c0_985 = arith.constant 0 : index
    %1146 = vector.load %arg21[%c8_984, %c0_985] : memref<64x128xf32, #tpu.memory_space<vmem>>, vector<8x128xf32>
    %c0_986 = arith.constant 0 : index
    %c0_987 = arith.constant 0 : index
    %1147 = vector.load %arg8[%c0_986, %c0_987] : memref<128x64xf32, #tpu.memory_space<vmem>>, vector<128x64xf32>
    %cst_988 = arith.constant dense<0.000000e+00> : vector<8x64xf32>
    %1148 = tpu.matmul %1146, %1147, %cst_988 {dimension_numbers = #tpu.dot_dimension_numbers<[1], [0], [0], [1], [0, 0, 1, 1], [], []>} : vector<8x128xf32>, vector<128x64xf32>, vector<8x64xf32> -> vector<8x64xf32>
    %c0_989 = arith.constant 0 : index
    %c0_990 = arith.constant 0 : index
    %1149 = vector.load %arg9[%c0_989, %c0_990] : memref<1x64xf32, #tpu.memory_space<vmem>>, vector<1x64xf32>
    %1150 = vector.broadcast %1149 : vector<1x64xf32> to vector<8x64xf32>
    %1151 = arith.addf %1148, %1150 : vector<8x64xf32>
    %1152 = math.tanh %1151 : vector<8x64xf32>
    %c0_991 = arith.constant 0 : index
    %c0_992 = arith.constant 0 : index
    %1153 = vector.load %arg10[%c0_991, %c0_992] : memref<1x64xf32, #tpu.memory_space<vmem>>, vector<1x64xf32>
    %1154 = vector.broadcast %1153 : vector<1x64xf32> to vector<8x64xf32>
    %1155 = arith.mulf %1152, %1154 : vector<8x64xf32>
    %cst_993 = arith.constant dense<0.000000e+00> : vector<8xf32>
    %1156 = vector.multi_reduction <add>, %1155, %cst_993 [1] : vector<8x64xf32> to vector<8xf32>
    %1157 = vector.shape_cast %1156 : vector<8xf32> to vector<8x1xf32>
    %c0_994 = arith.constant 0 : index
    %c0_995 = arith.constant 0 : index
    %1158 = vector.load %arg11[%c0_994, %c0_995] : memref<1x1xf32, #tpu.memory_space<vmem>>, vector<1x1xf32>
    %1159 = vector.broadcast %1158 : vector<1x1xf32> to vector<8x1xf32>
    %1160 = arith.addf %1157, %1159 : vector<8x1xf32>
    %1161 = arith.maximumf %1134, %1160 : vector<8x1xf32>
    %1162 = arith.subf %1134, %1161 : vector<8x1xf32>
    %1163 = math.exp %1162 : vector<8x1xf32>
    %1164 = arith.subf %1160, %1161 : vector<8x1xf32>
    %1165 = math.exp %1164 : vector<8x1xf32>
    %1166 = arith.mulf %1163, %1140 : vector<8x1xf32>
    %1167 = arith.addf %1166, %1165 : vector<8x1xf32>
    %1168 = vector.broadcast %1163 : vector<8x1xf32> to vector<8x128xf32>
    %1169 = arith.mulf %1168, %1145 : vector<8x128xf32>
    %1170 = vector.broadcast %1165 : vector<8x1xf32> to vector<8x128xf32>
    %1171 = arith.mulf %1170, %1146 : vector<8x128xf32>
    %1172 = arith.addf %1169, %1171 : vector<8x128xf32>
    %c16_996 = arith.constant 16 : index
    %c0_997 = arith.constant 0 : index
    %1173 = vector.load %arg21[%c16_996, %c0_997] : memref<64x128xf32, #tpu.memory_space<vmem>>, vector<8x128xf32>
    %c0_998 = arith.constant 0 : index
    %c0_999 = arith.constant 0 : index
    %1174 = vector.load %arg8[%c0_998, %c0_999] : memref<128x64xf32, #tpu.memory_space<vmem>>, vector<128x64xf32>
    %cst_1000 = arith.constant dense<0.000000e+00> : vector<8x64xf32>
    %1175 = tpu.matmul %1173, %1174, %cst_1000 {dimension_numbers = #tpu.dot_dimension_numbers<[1], [0], [0], [1], [0, 0, 1, 1], [], []>} : vector<8x128xf32>, vector<128x64xf32>, vector<8x64xf32> -> vector<8x64xf32>
    %c0_1001 = arith.constant 0 : index
    %c0_1002 = arith.constant 0 : index
    %1176 = vector.load %arg9[%c0_1001, %c0_1002] : memref<1x64xf32, #tpu.memory_space<vmem>>, vector<1x64xf32>
    %1177 = vector.broadcast %1176 : vector<1x64xf32> to vector<8x64xf32>
    %1178 = arith.addf %1175, %1177 : vector<8x64xf32>
    %1179 = math.tanh %1178 : vector<8x64xf32>
    %c0_1003 = arith.constant 0 : index
    %c0_1004 = arith.constant 0 : index
    %1180 = vector.load %arg10[%c0_1003, %c0_1004] : memref<1x64xf32, #tpu.memory_space<vmem>>, vector<1x64xf32>
    %1181 = vector.broadcast %1180 : vector<1x64xf32> to vector<8x64xf32>
    %1182 = arith.mulf %1179, %1181 : vector<8x64xf32>
    %cst_1005 = arith.constant dense<0.000000e+00> : vector<8xf32>
    %1183 = vector.multi_reduction <add>, %1182, %cst_1005 [1] : vector<8x64xf32> to vector<8xf32>
    %1184 = vector.shape_cast %1183 : vector<8xf32> to vector<8x1xf32>
    %c0_1006 = arith.constant 0 : index
    %c0_1007 = arith.constant 0 : index
    %1185 = vector.load %arg11[%c0_1006, %c0_1007] : memref<1x1xf32, #tpu.memory_space<vmem>>, vector<1x1xf32>
    %1186 = vector.broadcast %1185 : vector<1x1xf32> to vector<8x1xf32>
    %1187 = arith.addf %1184, %1186 : vector<8x1xf32>
    %1188 = arith.maximumf %1161, %1187 : vector<8x1xf32>
    %1189 = arith.subf %1161, %1188 : vector<8x1xf32>
    %1190 = math.exp %1189 : vector<8x1xf32>
    %1191 = arith.subf %1187, %1188 : vector<8x1xf32>
    %1192 = math.exp %1191 : vector<8x1xf32>
    %1193 = arith.mulf %1190, %1167 : vector<8x1xf32>
    %1194 = arith.addf %1193, %1192 : vector<8x1xf32>
    %1195 = vector.broadcast %1190 : vector<8x1xf32> to vector<8x128xf32>
    %1196 = arith.mulf %1195, %1172 : vector<8x128xf32>
    %1197 = vector.broadcast %1192 : vector<8x1xf32> to vector<8x128xf32>
    %1198 = arith.mulf %1197, %1173 : vector<8x128xf32>
    %1199 = arith.addf %1196, %1198 : vector<8x128xf32>
    %c24_1008 = arith.constant 24 : index
    %c0_1009 = arith.constant 0 : index
    %1200 = vector.load %arg21[%c24_1008, %c0_1009] : memref<64x128xf32, #tpu.memory_space<vmem>>, vector<8x128xf32>
    %c0_1010 = arith.constant 0 : index
    %c0_1011 = arith.constant 0 : index
    %1201 = vector.load %arg8[%c0_1010, %c0_1011] : memref<128x64xf32, #tpu.memory_space<vmem>>, vector<128x64xf32>
    %cst_1012 = arith.constant dense<0.000000e+00> : vector<8x64xf32>
    %1202 = tpu.matmul %1200, %1201, %cst_1012 {dimension_numbers = #tpu.dot_dimension_numbers<[1], [0], [0], [1], [0, 0, 1, 1], [], []>} : vector<8x128xf32>, vector<128x64xf32>, vector<8x64xf32> -> vector<8x64xf32>
    %c0_1013 = arith.constant 0 : index
    %c0_1014 = arith.constant 0 : index
    %1203 = vector.load %arg9[%c0_1013, %c0_1014] : memref<1x64xf32, #tpu.memory_space<vmem>>, vector<1x64xf32>
    %1204 = vector.broadcast %1203 : vector<1x64xf32> to vector<8x64xf32>
    %1205 = arith.addf %1202, %1204 : vector<8x64xf32>
    %1206 = math.tanh %1205 : vector<8x64xf32>
    %c0_1015 = arith.constant 0 : index
    %c0_1016 = arith.constant 0 : index
    %1207 = vector.load %arg10[%c0_1015, %c0_1016] : memref<1x64xf32, #tpu.memory_space<vmem>>, vector<1x64xf32>
    %1208 = vector.broadcast %1207 : vector<1x64xf32> to vector<8x64xf32>
    %1209 = arith.mulf %1206, %1208 : vector<8x64xf32>
    %cst_1017 = arith.constant dense<0.000000e+00> : vector<8xf32>
    %1210 = vector.multi_reduction <add>, %1209, %cst_1017 [1] : vector<8x64xf32> to vector<8xf32>
    %1211 = vector.shape_cast %1210 : vector<8xf32> to vector<8x1xf32>
    %c0_1018 = arith.constant 0 : index
    %c0_1019 = arith.constant 0 : index
    %1212 = vector.load %arg11[%c0_1018, %c0_1019] : memref<1x1xf32, #tpu.memory_space<vmem>>, vector<1x1xf32>
    %1213 = vector.broadcast %1212 : vector<1x1xf32> to vector<8x1xf32>
    %1214 = arith.addf %1211, %1213 : vector<8x1xf32>
    %1215 = arith.maximumf %1188, %1214 : vector<8x1xf32>
    %1216 = arith.subf %1188, %1215 : vector<8x1xf32>
    %1217 = math.exp %1216 : vector<8x1xf32>
    %1218 = arith.subf %1214, %1215 : vector<8x1xf32>
    %1219 = math.exp %1218 : vector<8x1xf32>
    %1220 = arith.mulf %1217, %1194 : vector<8x1xf32>
    %1221 = arith.addf %1220, %1219 : vector<8x1xf32>
    %1222 = vector.broadcast %1217 : vector<8x1xf32> to vector<8x128xf32>
    %1223 = arith.mulf %1222, %1199 : vector<8x128xf32>
    %1224 = vector.broadcast %1219 : vector<8x1xf32> to vector<8x128xf32>
    %1225 = arith.mulf %1224, %1200 : vector<8x128xf32>
    %1226 = arith.addf %1223, %1225 : vector<8x128xf32>
    %c32_1020 = arith.constant 32 : index
    %c0_1021 = arith.constant 0 : index
    %1227 = vector.load %arg21[%c32_1020, %c0_1021] : memref<64x128xf32, #tpu.memory_space<vmem>>, vector<8x128xf32>
    %c0_1022 = arith.constant 0 : index
    %c0_1023 = arith.constant 0 : index
    %1228 = vector.load %arg8[%c0_1022, %c0_1023] : memref<128x64xf32, #tpu.memory_space<vmem>>, vector<128x64xf32>
    %cst_1024 = arith.constant dense<0.000000e+00> : vector<8x64xf32>
    %1229 = tpu.matmul %1227, %1228, %cst_1024 {dimension_numbers = #tpu.dot_dimension_numbers<[1], [0], [0], [1], [0, 0, 1, 1], [], []>} : vector<8x128xf32>, vector<128x64xf32>, vector<8x64xf32> -> vector<8x64xf32>
    %c0_1025 = arith.constant 0 : index
    %c0_1026 = arith.constant 0 : index
    %1230 = vector.load %arg9[%c0_1025, %c0_1026] : memref<1x64xf32, #tpu.memory_space<vmem>>, vector<1x64xf32>
    %1231 = vector.broadcast %1230 : vector<1x64xf32> to vector<8x64xf32>
    %1232 = arith.addf %1229, %1231 : vector<8x64xf32>
    %1233 = math.tanh %1232 : vector<8x64xf32>
    %c0_1027 = arith.constant 0 : index
    %c0_1028 = arith.constant 0 : index
    %1234 = vector.load %arg10[%c0_1027, %c0_1028] : memref<1x64xf32, #tpu.memory_space<vmem>>, vector<1x64xf32>
    %1235 = vector.broadcast %1234 : vector<1x64xf32> to vector<8x64xf32>
    %1236 = arith.mulf %1233, %1235 : vector<8x64xf32>
    %cst_1029 = arith.constant dense<0.000000e+00> : vector<8xf32>
    %1237 = vector.multi_reduction <add>, %1236, %cst_1029 [1] : vector<8x64xf32> to vector<8xf32>
    %1238 = vector.shape_cast %1237 : vector<8xf32> to vector<8x1xf32>
    %c0_1030 = arith.constant 0 : index
    %c0_1031 = arith.constant 0 : index
    %1239 = vector.load %arg11[%c0_1030, %c0_1031] : memref<1x1xf32, #tpu.memory_space<vmem>>, vector<1x1xf32>
    %1240 = vector.broadcast %1239 : vector<1x1xf32> to vector<8x1xf32>
    %1241 = arith.addf %1238, %1240 : vector<8x1xf32>
    %1242 = arith.maximumf %1215, %1241 : vector<8x1xf32>
    %1243 = arith.subf %1215, %1242 : vector<8x1xf32>
    %1244 = math.exp %1243 : vector<8x1xf32>
    %1245 = arith.subf %1241, %1242 : vector<8x1xf32>
    %1246 = math.exp %1245 : vector<8x1xf32>
    %1247 = arith.mulf %1244, %1221 : vector<8x1xf32>
    %1248 = arith.addf %1247, %1246 : vector<8x1xf32>
    %1249 = vector.broadcast %1244 : vector<8x1xf32> to vector<8x128xf32>
    %1250 = arith.mulf %1249, %1226 : vector<8x128xf32>
    %1251 = vector.broadcast %1246 : vector<8x1xf32> to vector<8x128xf32>
    %1252 = arith.mulf %1251, %1227 : vector<8x128xf32>
    %1253 = arith.addf %1250, %1252 : vector<8x128xf32>
    %c40_1032 = arith.constant 40 : index
    %c0_1033 = arith.constant 0 : index
    %1254 = vector.load %arg21[%c40_1032, %c0_1033] : memref<64x128xf32, #tpu.memory_space<vmem>>, vector<8x128xf32>
    %c0_1034 = arith.constant 0 : index
    %c0_1035 = arith.constant 0 : index
    %1255 = vector.load %arg8[%c0_1034, %c0_1035] : memref<128x64xf32, #tpu.memory_space<vmem>>, vector<128x64xf32>
    %cst_1036 = arith.constant dense<0.000000e+00> : vector<8x64xf32>
    %1256 = tpu.matmul %1254, %1255, %cst_1036 {dimension_numbers = #tpu.dot_dimension_numbers<[1], [0], [0], [1], [0, 0, 1, 1], [], []>} : vector<8x128xf32>, vector<128x64xf32>, vector<8x64xf32> -> vector<8x64xf32>
    %c0_1037 = arith.constant 0 : index
    %c0_1038 = arith.constant 0 : index
    %1257 = vector.load %arg9[%c0_1037, %c0_1038] : memref<1x64xf32, #tpu.memory_space<vmem>>, vector<1x64xf32>
    %1258 = vector.broadcast %1257 : vector<1x64xf32> to vector<8x64xf32>
    %1259 = arith.addf %1256, %1258 : vector<8x64xf32>
    %1260 = math.tanh %1259 : vector<8x64xf32>
    %c0_1039 = arith.constant 0 : index
    %c0_1040 = arith.constant 0 : index
    %1261 = vector.load %arg10[%c0_1039, %c0_1040] : memref<1x64xf32, #tpu.memory_space<vmem>>, vector<1x64xf32>
    %1262 = vector.broadcast %1261 : vector<1x64xf32> to vector<8x64xf32>
    %1263 = arith.mulf %1260, %1262 : vector<8x64xf32>
    %cst_1041 = arith.constant dense<0.000000e+00> : vector<8xf32>
    %1264 = vector.multi_reduction <add>, %1263, %cst_1041 [1] : vector<8x64xf32> to vector<8xf32>
    %1265 = vector.shape_cast %1264 : vector<8xf32> to vector<8x1xf32>
    %c0_1042 = arith.constant 0 : index
    %c0_1043 = arith.constant 0 : index
    %1266 = vector.load %arg11[%c0_1042, %c0_1043] : memref<1x1xf32, #tpu.memory_space<vmem>>, vector<1x1xf32>
    %1267 = vector.broadcast %1266 : vector<1x1xf32> to vector<8x1xf32>
    %1268 = arith.addf %1265, %1267 : vector<8x1xf32>
    %1269 = arith.maximumf %1242, %1268 : vector<8x1xf32>
    %1270 = arith.subf %1242, %1269 : vector<8x1xf32>
    %1271 = math.exp %1270 : vector<8x1xf32>
    %1272 = arith.subf %1268, %1269 : vector<8x1xf32>
    %1273 = math.exp %1272 : vector<8x1xf32>
    %1274 = arith.mulf %1271, %1248 : vector<8x1xf32>
    %1275 = arith.addf %1274, %1273 : vector<8x1xf32>
    %1276 = vector.broadcast %1271 : vector<8x1xf32> to vector<8x128xf32>
    %1277 = arith.mulf %1276, %1253 : vector<8x128xf32>
    %1278 = vector.broadcast %1273 : vector<8x1xf32> to vector<8x128xf32>
    %1279 = arith.mulf %1278, %1254 : vector<8x128xf32>
    %1280 = arith.addf %1277, %1279 : vector<8x128xf32>
    %c48_1044 = arith.constant 48 : index
    %c0_1045 = arith.constant 0 : index
    %1281 = vector.load %arg21[%c48_1044, %c0_1045] : memref<64x128xf32, #tpu.memory_space<vmem>>, vector<8x128xf32>
    %c0_1046 = arith.constant 0 : index
    %c0_1047 = arith.constant 0 : index
    %1282 = vector.load %arg8[%c0_1046, %c0_1047] : memref<128x64xf32, #tpu.memory_space<vmem>>, vector<128x64xf32>
    %cst_1048 = arith.constant dense<0.000000e+00> : vector<8x64xf32>
    %1283 = tpu.matmul %1281, %1282, %cst_1048 {dimension_numbers = #tpu.dot_dimension_numbers<[1], [0], [0], [1], [0, 0, 1, 1], [], []>} : vector<8x128xf32>, vector<128x64xf32>, vector<8x64xf32> -> vector<8x64xf32>
    %c0_1049 = arith.constant 0 : index
    %c0_1050 = arith.constant 0 : index
    %1284 = vector.load %arg9[%c0_1049, %c0_1050] : memref<1x64xf32, #tpu.memory_space<vmem>>, vector<1x64xf32>
    %1285 = vector.broadcast %1284 : vector<1x64xf32> to vector<8x64xf32>
    %1286 = arith.addf %1283, %1285 : vector<8x64xf32>
    %1287 = math.tanh %1286 : vector<8x64xf32>
    %c0_1051 = arith.constant 0 : index
    %c0_1052 = arith.constant 0 : index
    %1288 = vector.load %arg10[%c0_1051, %c0_1052] : memref<1x64xf32, #tpu.memory_space<vmem>>, vector<1x64xf32>
    %1289 = vector.broadcast %1288 : vector<1x64xf32> to vector<8x64xf32>
    %1290 = arith.mulf %1287, %1289 : vector<8x64xf32>
    %cst_1053 = arith.constant dense<0.000000e+00> : vector<8xf32>
    %1291 = vector.multi_reduction <add>, %1290, %cst_1053 [1] : vector<8x64xf32> to vector<8xf32>
    %1292 = vector.shape_cast %1291 : vector<8xf32> to vector<8x1xf32>
    %c0_1054 = arith.constant 0 : index
    %c0_1055 = arith.constant 0 : index
    %1293 = vector.load %arg11[%c0_1054, %c0_1055] : memref<1x1xf32, #tpu.memory_space<vmem>>, vector<1x1xf32>
    %1294 = vector.broadcast %1293 : vector<1x1xf32> to vector<8x1xf32>
    %1295 = arith.addf %1292, %1294 : vector<8x1xf32>
    %1296 = arith.maximumf %1269, %1295 : vector<8x1xf32>
    %1297 = arith.subf %1269, %1296 : vector<8x1xf32>
    %1298 = math.exp %1297 : vector<8x1xf32>
    %1299 = arith.subf %1295, %1296 : vector<8x1xf32>
    %1300 = math.exp %1299 : vector<8x1xf32>
    %1301 = arith.mulf %1298, %1275 : vector<8x1xf32>
    %1302 = arith.addf %1301, %1300 : vector<8x1xf32>
    %1303 = vector.broadcast %1298 : vector<8x1xf32> to vector<8x128xf32>
    %1304 = arith.mulf %1303, %1280 : vector<8x128xf32>
    %1305 = vector.broadcast %1300 : vector<8x1xf32> to vector<8x128xf32>
    %1306 = arith.mulf %1305, %1281 : vector<8x128xf32>
    %1307 = arith.addf %1304, %1306 : vector<8x128xf32>
    %c56_1056 = arith.constant 56 : index
    %c0_1057 = arith.constant 0 : index
    %1308 = vector.load %arg21[%c56_1056, %c0_1057] : memref<64x128xf32, #tpu.memory_space<vmem>>, vector<8x128xf32>
    %c0_1058 = arith.constant 0 : index
    %c0_1059 = arith.constant 0 : index
    %1309 = vector.load %arg8[%c0_1058, %c0_1059] : memref<128x64xf32, #tpu.memory_space<vmem>>, vector<128x64xf32>
    %cst_1060 = arith.constant dense<0.000000e+00> : vector<8x64xf32>
    %1310 = tpu.matmul %1308, %1309, %cst_1060 {dimension_numbers = #tpu.dot_dimension_numbers<[1], [0], [0], [1], [0, 0, 1, 1], [], []>} : vector<8x128xf32>, vector<128x64xf32>, vector<8x64xf32> -> vector<8x64xf32>
    %c0_1061 = arith.constant 0 : index
    %c0_1062 = arith.constant 0 : index
    %1311 = vector.load %arg9[%c0_1061, %c0_1062] : memref<1x64xf32, #tpu.memory_space<vmem>>, vector<1x64xf32>
    %1312 = vector.broadcast %1311 : vector<1x64xf32> to vector<8x64xf32>
    %1313 = arith.addf %1310, %1312 : vector<8x64xf32>
    %1314 = math.tanh %1313 : vector<8x64xf32>
    %c0_1063 = arith.constant 0 : index
    %c0_1064 = arith.constant 0 : index
    %1315 = vector.load %arg10[%c0_1063, %c0_1064] : memref<1x64xf32, #tpu.memory_space<vmem>>, vector<1x64xf32>
    %1316 = vector.broadcast %1315 : vector<1x64xf32> to vector<8x64xf32>
    %1317 = arith.mulf %1314, %1316 : vector<8x64xf32>
    %cst_1065 = arith.constant dense<0.000000e+00> : vector<8xf32>
    %1318 = vector.multi_reduction <add>, %1317, %cst_1065 [1] : vector<8x64xf32> to vector<8xf32>
    %1319 = vector.shape_cast %1318 : vector<8xf32> to vector<8x1xf32>
    %c0_1066 = arith.constant 0 : index
    %c0_1067 = arith.constant 0 : index
    %1320 = vector.load %arg11[%c0_1066, %c0_1067] : memref<1x1xf32, #tpu.memory_space<vmem>>, vector<1x1xf32>
    %1321 = vector.broadcast %1320 : vector<1x1xf32> to vector<8x1xf32>
    %1322 = arith.addf %1319, %1321 : vector<8x1xf32>
    %1323 = arith.maximumf %1296, %1322 : vector<8x1xf32>
    %1324 = arith.subf %1296, %1323 : vector<8x1xf32>
    %1325 = math.exp %1324 : vector<8x1xf32>
    %1326 = arith.subf %1322, %1323 : vector<8x1xf32>
    %1327 = math.exp %1326 : vector<8x1xf32>
    %1328 = arith.mulf %1325, %1302 : vector<8x1xf32>
    %1329 = arith.addf %1328, %1327 : vector<8x1xf32>
    %1330 = vector.broadcast %1325 : vector<8x1xf32> to vector<8x128xf32>
    %1331 = arith.mulf %1330, %1307 : vector<8x128xf32>
    %1332 = vector.broadcast %1327 : vector<8x1xf32> to vector<8x128xf32>
    %1333 = arith.mulf %1332, %1308 : vector<8x128xf32>
    %1334 = arith.addf %1331, %1333 : vector<8x128xf32>
    %1335 = tpu.reciprocal %1329 {approx = true} : vector<8x1xf32> -> vector<8x1xf32>
    %1336 = vector.broadcast %1335 : vector<8x1xf32> to vector<8x128xf32>
    %1337 = arith.mulf %1334, %1336 : vector<8x128xf32>
    %c0_1068 = arith.constant 0 : index
    %c0_1069 = arith.constant 0 : index
    %1338 = vector.load %arg12[%c0_1068, %c0_1069] : memref<128x64xf32, #tpu.memory_space<vmem>>, vector<128x64xf32>
    %cst_1070 = arith.constant dense<0.000000e+00> : vector<8x64xf32>
    %1339 = tpu.matmul %1337, %1338, %cst_1070 {dimension_numbers = #tpu.dot_dimension_numbers<[1], [0], [0], [1], [0, 0, 1, 1], [], []>} : vector<8x128xf32>, vector<128x64xf32>, vector<8x64xf32> -> vector<8x64xf32>
    %c0_1071 = arith.constant 0 : index
    %c0_1072 = arith.constant 0 : index
    %1340 = vector.load %arg13[%c0_1071, %c0_1072] : memref<1x64xf32, #tpu.memory_space<vmem>>, vector<1x64xf32>
    %1341 = vector.broadcast %1340 : vector<1x64xf32> to vector<8x64xf32>
    %1342 = arith.addf %1339, %1341 : vector<8x64xf32>
    %cst_1073 = arith.constant 0.000000e+00 : f32
    %1343 = vector.broadcast %cst_1073 : f32 to vector<8x64xf32>
    %1344 = arith.maximumf %1342, %1343 : vector<8x64xf32>
    %c0_1074 = arith.constant 0 : index
    %c0_1075 = arith.constant 0 : index
    %1345 = vector.load %arg14[%c0_1074, %c0_1075] : memref<64x32xf32, #tpu.memory_space<vmem>>, vector<64x32xf32>
    %cst_1076 = arith.constant dense<0.000000e+00> : vector<8x32xf32>
    %1346 = tpu.matmul %1344, %1345, %cst_1076 {dimension_numbers = #tpu.dot_dimension_numbers<[1], [0], [0], [1], [0, 0, 1, 1], [], []>} : vector<8x64xf32>, vector<64x32xf32>, vector<8x32xf32> -> vector<8x32xf32>
    %c0_1077 = arith.constant 0 : index
    %c0_1078 = arith.constant 0 : index
    %1347 = vector.load %arg15[%c0_1077, %c0_1078] : memref<1x32xf32, #tpu.memory_space<vmem>>, vector<1x32xf32>
    %1348 = vector.broadcast %1347 : vector<1x32xf32> to vector<8x32xf32>
    %1349 = arith.addf %1346, %1348 : vector<8x32xf32>
    %cst_1079 = arith.constant 0.000000e+00 : f32
    %1350 = vector.broadcast %cst_1079 : f32 to vector<8x32xf32>
    %1351 = arith.maximumf %1349, %1350 : vector<8x32xf32>
    %c0_1080 = arith.constant 0 : index
    %c0_1081 = arith.constant 0 : index
    %1352 = vector.load %arg16[%c0_1080, %c0_1081] : memref<1x32xf32, #tpu.memory_space<vmem>>, vector<1x32xf32>
    %1353 = vector.broadcast %1352 : vector<1x32xf32> to vector<8x32xf32>
    %1354 = arith.mulf %1351, %1353 : vector<8x32xf32>
    %cst_1082 = arith.constant dense<0.000000e+00> : vector<8xf32>
    %1355 = vector.multi_reduction <add>, %1354, %cst_1082 [1] : vector<8x32xf32> to vector<8xf32>
    %1356 = vector.shape_cast %1355 : vector<8xf32> to vector<8x1xf32>
    %c0_1083 = arith.constant 0 : index
    %c0_1084 = arith.constant 0 : index
    %1357 = vector.load %arg17[%c0_1083, %c0_1084] : memref<1x1xf32, #tpu.memory_space<vmem>>, vector<1x1xf32>
    %1358 = vector.broadcast %1357 : vector<1x1xf32> to vector<8x1xf32>
    %1359 = arith.addf %1356, %1358 : vector<8x1xf32>
    %cst_1085 = arith.constant 5.000000e-01 : f32
    %1360 = vector.broadcast %cst_1085 : f32 to vector<8x1xf32>
    %1361 = arith.mulf %1360, %1359 : vector<8x1xf32>
    %1362 = math.tanh %1361 : vector<8x1xf32>
    %cst_1086 = arith.constant 5.000000e-01 : f32
    %1363 = vector.broadcast %cst_1086 : f32 to vector<8x1xf32>
    %1364 = arith.mulf %1363, %1362 : vector<8x1xf32>
    %cst_1087 = arith.constant 5.000000e-01 : f32
    %1365 = vector.broadcast %cst_1087 : f32 to vector<8x1xf32>
    %1366 = arith.addf %1364, %1365 : vector<8x1xf32>
    %1367 = vector.shape_cast %1366 : vector<8x1xf32> to vector<8x1xf32>
    %1368 = vector.broadcast %1367 : vector<8x1xf32> to vector<8x128xf32>
    %c0_1088 = arith.constant 0 : index
    %c0_1089 = arith.constant 0 : index
    %1369 = vector.load %arg18[%c0_1088, %c0_1089] : memref<8x128xf32, #tpu.memory_space<vmem>>, vector<8x128xf32>
    tpu.vector_store %arg18[%c0_1088, %c0_1089], %1368 {strides = array<i32>} : memref<8x128xf32, #tpu.memory_space<vmem>>, vector<8x128xf32>,
    return
  }
  func.func @transform_0(%arg0: i32) -> (i32, i32, i32) {
    %c0_i32 = arith.constant 0 : i32
    %c0_i32_0 = arith.constant 0 : i32
    %c0_i32_1 = arith.constant 0 : i32
    return %c0_i32, %arg0, %c0_i32_0 : i32, i32, i32
  }
  func.func @transform_1(%arg0: i32) -> (i32, i32) {
    %c0_i32 = arith.constant 0 : i32
    %c0_i32_0 = arith.constant 0 : i32
    %c0_i32_1 = arith.constant 0 : i32
    return %c0_i32, %c0_i32_0 : i32, i32
  }
  func.func @transform_2(%arg0: i32) -> (i32, i32) {
    %c0_i32 = arith.constant 0 : i32
    %c0_i32_0 = arith.constant 0 : i32
    %c0_i32_1 = arith.constant 0 : i32
    return %c0_i32, %c0_i32_0 : i32, i32
  }
  func.func @transform_3(%arg0: i32) -> (i32, i32) {
    %c0_i32 = arith.constant 0 : i32
    %c0_i32_0 = arith.constant 0 : i32
    %c0_i32_1 = arith.constant 0 : i32
    return %c0_i32, %c0_i32_0 : i32, i32
  }
  func.func @transform_4(%arg0: i32) -> (i32, i32) {
    %c0_i32 = arith.constant 0 : i32
    %c0_i32_0 = arith.constant 0 : i32
    %c0_i32_1 = arith.constant 0 : i32
    return %c0_i32, %c0_i32_0 : i32, i32
  }
  func.func @transform_5(%arg0: i32) -> (i32, i32) {
    %c0_i32 = arith.constant 0 : i32
    %c0_i32_0 = arith.constant 0 : i32
    %c0_i32_1 = arith.constant 0 : i32
    return %c0_i32, %c0_i32_0 : i32, i32
  }
  func.func @transform_6(%arg0: i32) -> (i32, i32) {
    %c0_i32 = arith.constant 0 : i32
    %c0_i32_0 = arith.constant 0 : i32
    %c0_i32_1 = arith.constant 0 : i32
    return %c0_i32, %c0_i32_0 : i32, i32
  }
  func.func @transform_7(%arg0: i32) -> (i32, i32) {
    %c0_i32 = arith.constant 0 : i32
    %c0_i32_0 = arith.constant 0 : i32
    %c0_i32_1 = arith.constant 0 : i32
    return %c0_i32, %c0_i32_0 : i32, i32
  }
  func.func @transform_8(%arg0: i32) -> (i32, i32) {
    %c0_i32 = arith.constant 0 : i32
    %c0_i32_0 = arith.constant 0 : i32
    %c0_i32_1 = arith.constant 0 : i32
    return %c0_i32, %c0_i32_0 : i32, i32
  }
  func.func @transform_9(%arg0: i32) -> (i32, i32) {
    %c0_i32 = arith.constant 0 : i32
    %c0_i32_0 = arith.constant 0 : i32
    %c0_i32_1 = arith.constant 0 : i32
    return %c0_i32, %c0_i32_0 : i32, i32
  }
  func.func @transform_10(%arg0: i32) -> (i32, i32) {
    %c0_i32 = arith.constant 0 : i32
    %c0_i32_0 = arith.constant 0 : i32
    %c0_i32_1 = arith.constant 0 : i32
    return %c0_i32, %c0_i32_0 : i32, i32
  }
  func.func @transform_11(%arg0: i32) -> (i32, i32) {
    %c0_i32 = arith.constant 0 : i32
    %c0_i32_0 = arith.constant 0 : i32
    %c0_i32_1 = arith.constant 0 : i32
    return %c0_i32, %c0_i32_0 : i32, i32
  }
  func.func @transform_12(%arg0: i32) -> (i32, i32) {
    %c0_i32 = arith.constant 0 : i32
    %c0_i32_0 = arith.constant 0 : i32
    %c0_i32_1 = arith.constant 0 : i32
    return %c0_i32, %c0_i32_0 : i32, i32
  }
  func.func @transform_13(%arg0: i32) -> (i32, i32) {
    %c0_i32 = arith.constant 0 : i32
    %c0_i32_0 = arith.constant 0 : i32
    %c0_i32_1 = arith.constant 0 : i32
    return %c0_i32, %c0_i32_0 : i32, i32
  }
  func.func @transform_14(%arg0: i32) -> (i32, i32) {
    %c0_i32 = arith.constant 0 : i32
    %c0_i32_0 = arith.constant 0 : i32
    %c0_i32_1 = arith.constant 0 : i32
    return %c0_i32, %c0_i32_0 : i32, i32
  }
  func.func @transform_15(%arg0: i32) -> (i32, i32) {
    %c0_i32 = arith.constant 0 : i32
    %c0_i32_0 = arith.constant 0 : i32
    %c0_i32_1 = arith.constant 0 : i32
    return %c0_i32, %c0_i32_0 : i32, i32
  }
  func.func @transform_16(%arg0: i32) -> (i32, i32) {
    %c0_i32 = arith.constant 0 : i32
    %c0_i32_0 = arith.constant 0 : i32
    %c0_i32_1 = arith.constant 0 : i32
    return %c0_i32, %c0_i32_0 : i32, i32
  }
  func.func @transform_17(%arg0: i32) -> (i32, i32) {
    %c0_i32 = arith.constant 0 : i32
    %c0_i32_0 = arith.constant 0 : i32
    return %arg0, %c0_i32 : i32, i32
  }
}

</mosaic_0001>

<bundles_post_ra>
// kernel: tpu_custom_call.1
= control target key start
LH: loop header
LB: loop body
LE: loop exit
PB: predicated region body
PF: predicated region fallthrough
CT: control target
= control target key end

     0   :  { %s9425_s0 = inlined_call_operand.vmem [shape: f32[8,8,16], index: 0, kind: input, shape index: {}]   ;;  %s9426_s1 = inlined_call_operand.vmem [shape: f32[16,512], index: 1, kind: input, shape index: {}]   ;;  %s9427_s2 = inlined_call_operand.hbm [shape: f32[128,512], index: 2, kind: input, shape index: {}]   ;;  %s9428_s3 = inlined_call_operand.vmem [shape: f32[1,512], index: 3, kind: input, shape index: {}]   ;;  %s9429_s4 = inlined_call_operand.hbm [shape: f32[128,512], index: 4, kind: input, shape index: {}]   ;;  %s9430_s5 = inlined_call_operand.hbm [shape: f32[128,512], index: 5, kind: input, shape index: {}]   ;;  %s9431_s6 = inlined_call_operand.vmem [shape: f32[1,512], index: 6, kind: input, shape index: {}]   ;;  %s9432_s7 = inlined_call_operand.vmem [shape: f32[128,64], index: 7, kind: input, shape index: {}]   ;;  %s9433_s8 = inlined_call_operand.vmem [shape: f32[1,64], index: 8, kind: input, shape index: {}]   ;;  %s9434_s9 = inlined_call_operand.vmem [shape: f32[1,64], index: 9, kind: input, shape index: {}]   ;;  %s9435_s10 = inlined_call_operand.<no memory space> [shape: f32[1,1], index: 10, kind: input, shape index: {}]   ;;  %s9436_s11 = inlined_call_operand.vmem [shape: f32[128,64], index: 11, kind: input, shape index: {}]   ;;  %s9437_s12 = inlined_call_operand.vmem [shape: f32[1,64], index: 12, kind: input, shape index: {}]   ;;  %s9438_s13 = inlined_call_operand.vmem [shape: f32[64,32], index: 13, kind: input, shape index: {}]   ;;  %s9439_s14 = inlined_call_operand.vmem [shape: f32[1,32], index: 14, kind: input, shape index: {}]   ;;  %s9440_s15 = inlined_call_operand.vmem [shape: f32[1,32], index: 15, kind: input, shape index: {}]   ;;  %s9441_s17 = inlined_call_operand.hbm [shape: f32[8,128], index: 17, kind: output, shape index: {}]   ;;  %s9442_s16 = inlined_call_operand.<no memory space> [shape: f32[1,1], index: 16, kind: input, shape index: {}]  }
   0x1   :  { %9618 = sst [smem:[#allocation63_spill]] %s9425_s0  ;;  %v22_v0 = vstv %s9435_s10  ;;  %v24_v1 = vstv %s9442_s16 }
   0x2   :  { %9619 = sst [smem:[#allocation64_spill]] %s9426_s1  ;;  %23 = vst [vmem:[#allocation5] sm:$0x1] %v22_v0 }
   0x3   :  { %25 = vst [vmem:[#allocation6] sm:$0x1] %v24_v1 }
   0x4   :  { %26 = vsyncpa [#allocation8], 0 }
   0x5   :  { %27 = vsyncpa [#allocation11], 0 }
   0x6   :  { %28 = vsyncpa [#allocation9], 0  ;;  %s52_s0 = sshll.u32 %s9429_s4, 4  ;;  %s6051_s30 = smov [#allocation10]   ;;  %s53_s0 = int_to_ptr.hbm [resolvable:$true] %s52_s0 }
   0x7   :  { %s54_s18 = sshll.u32 %s6051_s30, 4  ;;  %s37_s10 = sshll.u32 %s9427_s2, 4  ;;  %s55_s18 = int_to_ptr.vmem [resolvable:$true] %s54_s18  ;;  %s38_s10 = int_to_ptr.hbm [resolvable:$true] %s37_s10 }
   0x8   :  { %s6052_s20 = smov 512   ;;  %s6053_s21 = smov 32  }
   0x9   :  { %60 = dma.hbm_to_vmem [thread:$0]  %s53_s0, 8192, %s55_s18, [#allocation11], %s6052_s20, %s6052_s20, %s6053_s21  }
   0xa   :  { %s6054_s16 = smov [#allocation7]   ;;  %s65_s25 = sshll.u32 %s9430_s5, 4  ;;  %s66_s25 = int_to_ptr.hbm [resolvable:$true] %s65_s25 }
   0xb   :  { %s39_s22 = sshll.u32 %s6054_s16, 4  ;;  %s6055_s4 = smov [#allocation12]   ;;  %s40_s22 = int_to_ptr.vmem [resolvable:$true] %s39_s22 }
   0xc   :  { %45 = dma.hbm_to_vmem [thread:$0]  %s38_s10, 8192, %s40_s22, [#allocation8], %s6052_s20, %s6052_s20, %s6053_s21  }
   0xd   :  { %s67_s26 = sshll.u32 %s6055_s4, 4  ;;  %s68_s26 = int_to_ptr.vmem [resolvable:$true] %s67_s26 }
   0xe   :  { %73 = dma.hbm_to_vmem [thread:$0]  %s66_s25, 8192, %s68_s26, [#allocation11], %s6052_s20, %s6052_s20, %s6053_s21  }
   0xf   :  { %6045 = dma.done.wait [#allocation8], 8192  }
  0x10   :  { %6046 = vsyncadd [#allocation8], 4294959104 }
  0x11   :  { %6047 = dma.done.wait [#allocation11], 16384  }
  0x12   :  { %6048 = vsyncadd [#allocation11], 4294950912  ;;  %s9620_s28 = sld [smem:[#allocation64_spill]]  ;;  %vm115_vm0 = vcmask 130048   ;;  %v6291_v17 = vld [vmem:[#allocation7 + $0x1e0] sm:$0xff]  ;;  %v6341_v27 = vld [vmem:[#allocation7 + $0x1f0] sm:$0xff] }
  0x13   :  { %s9621_s23 = sld [smem:[#allocation63_spill]]  ;;  %v6298_v18 = vld [vmem:[#allocation7 + $0x1c0] sm:$0xff]  ;;  %v6352_v29 = vld [vmem:[#allocation7 + $0x1d0] sm:$0xff]  ;;  %v6378_v36 = vld [vmem:[#allocation7 + $0x1e8] sm:$0xff]  ;;  %v9445_v54 = vmov 0.0   ;;  %vm5115_vm1 = vcmask 523264  }
  0x14   :  { %v6302_v19 = vld [vmem:[#allocation7 + $0x1a0] sm:$0xff]  ;;  %v6358_v31 = vld [vmem:[#allocation7 + $0x1b0] sm:$0xff]  ;;  %v6380_v37 = vld [vmem:[#allocation7 + $0x1f8] sm:$0xff]  ;;  %vm5578_vm2 = vcmask 261120  }
  0x15   :  { %v6308_v20 = vld [vmem:[#allocation7 + $0x180] sm:$0xff]  ;;  %v6366_v33 = vld [vmem:[#allocation7 + $0x190] sm:$0xff]  ;;  %v6392_v40 = vld [vmem:[#allocation7 + $0x1c8] sm:$0xff] }
  0x16   :  { %v6313_v21 = vld [vmem:[#allocation7 + $0x160] sm:$0xff]  ;;  %v6374_v35 = vld [vmem:[#allocation7 + $0x170] sm:$0xff]  ;;  %v6394_v41 = vld [vmem:[#allocation7 + $0x1d8] sm:$0xff] }
  0x17   :  { %v6319_v22 = vld [vmem:[#allocation7 + $0x140] sm:$0xff]  ;;  %v6388_v39 = vld [vmem:[#allocation7 + $0x150] sm:$0xff]  ;;  %v6404_v44 = vld [vmem:[#allocation7 + $0x1a8] sm:$0xff] }
  0x18   :  { %v6167_v2 = vld [vmem:[%s9620_s28 + $0x20] sm:$0xff]  ;;  %v6172_v3 = vld [vmem:[%s9620_s28 + $0x28] sm:$0xff]  ;;  %v6177_v4 = vld [vmem:[%s9620_s28 + $0x38] sm:$0xff] }
  0x19   :  { %133 = vmatpush.msra.mxu2 %v6167_v2  ;;  %160 = vmatpush.msra.mxu1 %v6172_v3  ;;  %v6184_v5 = vld [vmem:[%s9620_s28] sm:$0xff]  ;;  %v6189_v6 = vld [vmem:[%s9620_s28 + $0x8] sm:$0xff]  ;;  %v6194_v7 = vld [vmem:[%s9620_s28 + $0x18] sm:$0xff] }
  0x1a   :  { %214 = vmatpush.msra.mxu3 %v6177_v4  ;;  %359 = vmatpush.msra.mxu0 %v6167_v2  ;;  %v108_v8 = vld [vmem:[%s9621_s23] sm:$0xff]  ;;  %v5624_v9 = vld [vmem:[%s9621_s23 + $0x10] sm:$0xff]  ;;  %v5619_v12 = vld [vmem:[%s9621_s23 + $0x8] sm:$0xff] }
  0x1b   :  { %134 = vmatpush.msra.mxu2 %v6184_v5  ;;  %161 = vmatpush.msra.mxu1 %v6189_v6  ;;  %v6211_v10 = vld [vmem:[%s9620_s28 + $0x30] sm:$0xff]  ;;  %v5629_v13 = vld [vmem:[%s9621_s23 + $0x18] sm:$0xff]  ;;  %v5634_v14 = vld [vmem:[%s9621_s23 + $0x20] sm:$0xff] }
  0x1c   :  { %215 = vmatpush.msra.mxu3 %v6194_v7  ;;  %360 = vmatpush.msra.mxu0 %v6184_v5  ;;  %v6218_v11 = vld [vmem:[%s9620_s28 + $0x10] sm:$0xff]  ;;  %v5639_v15 = vld [vmem:[%s9621_s23 + $0x28] sm:$0xff]  ;;  %v6332_v24 = vld [vmem:[%s9621_s23 + $0x38] sm:$0xff] }
  0x1d   :  { %5615 = vmatmul.msk.f32.vlgmr.msra.gmra.mxu2 %vm115_vm0, %v108_v8  ;;  %5616 = vmatmul.msk.f32.vlgmr.msra.gmra.mxu1 %vm115_vm0, %v108_v8  ;;  %v6289_v16 = vld [vmem:[%s9621_s23 + $0x30] sm:$0xff]  ;;  %v6323_v23 = vld [vmem:[#allocation7 + $0x120] sm:$0xff]  ;;  %v6406_v45 = vld [vmem:[#allocation7 + $0x1b8] sm:$0xff] }
  0x1e   :  { %5618 = vmatmul.msk.f32.vlgmr.msra.gmra.mxu3 %vm115_vm0, %v108_v8  ;;  %5625 = vmatmul.msk.f32.vlgmr.msra.gmra.mxu0 %vm115_vm0, %v5624_v9  ;;  %v6334_v25 = vld [vmem:[#allocation7 + $0x100] sm:$0xff]  ;;  %v6400_v43 = vld [vmem:[#allocation7 + $0x130] sm:$0xff]  ;;  %v6416_v48 = vld [vmem:[#allocation7 + $0x188] sm:$0xff] }
  0x1f   :  { %187 = vmatpush.msrb.mxu2 %v6211_v10  ;;  %246 = vmatpush.msrb.mxu3 %v6167_v2  ;;  %v6339_v26 = vld [vmem:[#allocation7 + $0xe0] sm:$0xff]  ;;  %v6412_v47 = vld [vmem:[#allocation7 + $0x110] sm:$0xff]  ;;  %v6418_v49 = vld [vmem:[#allocation7 + $0x198] sm:$0xff] }
  0x20   :  { %273 = vmatpush.msrb.mxu1 %v6172_v3  ;;  %472 = vmatpush.msrb.mxu0 %v6167_v2  ;;  %v6350_v28 = vld [vmem:[#allocation7 + $0xc0] sm:$0xff]  ;;  %v6422_v50 = vld [vmem:[#allocation7 + $0xf0] sm:$0xff]  ;;  %v6426_v51 = vld [vmem:[#allocation7 + $0x168] sm:$0xff] }
  0x21   :  { %188 = vmatpush.msrb.mxu2 %v6218_v11  ;;  %247 = vmatpush.msrb.mxu3 %v6184_v5  ;;  %v6356_v30 = vld [vmem:[#allocation7 + $0xa0] sm:$0xff]  ;;  %v6428_v52 = vld [vmem:[#allocation7 + $0x178] sm:$0xff]  ;;  %v6432_v53 = vld [vmem:[#allocation7 + $0xd0] sm:$0xff] }
  0x22   :  { %274 = vmatpush.msrb.mxu1 %v6189_v6  ;;  %473 = vmatpush.msrb.mxu0 %v6184_v5  ;;  %v6364_v32 = vld [vmem:[#allocation7 + $0x80] sm:$0xff]  ;;  %v6436_v55 = vld [vmem:[#allocation7 + $0x148] sm:$0xff]  ;;  %v6438_v56 = vld [vmem:[#allocation7 + $0x158] sm:$0xff] }
  0x23   :  { %300 = vmatpush.msra.mxu2 %v6211_v10  ;;  %327 = vmatpush.msra.mxu3 %v6177_v4  ;;  %v6372_v34 = vld [vmem:[#allocation7 + $0x60] sm:$0xff]  ;;  %v6442_v57 = vld [vmem:[#allocation7 + $0xb0] sm:$0xff]  ;;  %v6445_v58 = vld [vmem:[#allocation7 + $0x128] sm:$0xff] }
  0x24   :  { %386 = vmatpush.msra.mxu1 %v6172_v3  ;;  %585 = vmatpush.msra.mxu0 %v6167_v2  ;;  %v6386_v38 = vld [vmem:[#allocation7 + $0x40] sm:$0xff]  ;;  %v6447_v59 = vld [vmem:[#allocation7 + $0x138] sm:$0xff]  ;;  %v6453_v60 = vld [vmem:[#allocation7 + $0x90] sm:$0xff] }
  0x25   :  { %5617 = vmatmul.msk.f32.vlgmr.msrb.gmra.mxu2 %vm115_vm0, %v108_v8  ;;  %5621 = vmatmul.msk.f32.vlgmr.msrb.gmra.mxu1 %vm115_vm0, %v5619_v12  ;;  %v6398_v42 = vld [vmem:[#allocation7 + $0x20] sm:$0xff]  ;;  %v6456_v61 = vld [vmem:[#allocation7 + $0x108] sm:$0xff]  ;;  %v6458_v62 = vld [vmem:[#allocation7 + $0x118] sm:$0xff] }
  0x26   :  { %5620 = vmatmul.msk.f32.vlgmr.msrb.gmra.mxu3 %vm115_vm0, %v5619_v12  ;;  %5630 = vmatmul.msk.f32.vlgmr.msrb.gmra.mxu0 %vm115_vm0, %v5629_v13  ;;  %v6410_v46 = vld [vmem:[#allocation7] sm:$0xff]  ;;  %v6465_v63 = vld [vmem:[#allocation7 + $0x70] sm:$0xff]  ;;  %v6467_v0 = vld [vmem:[#allocation7 + $0xe8] sm:$0xff] }
  0x27   :  { %301 = vmatpush.msra.mxu2 %v6218_v11  ;;  %328 = vmatpush.msra.mxu3 %v6194_v7  ;;  %v6472_v1 = vld [vmem:[#allocation7 + $0xf8] sm:$0xff]  ;;  %v6496_v8 = vld [vmem:[#allocation7 + $0x10] sm:$0xff] }
  0x28   :  { %387 = vmatpush.msra.mxu1 %v6189_v6  ;;  %586 = vmatpush.msra.mxu0 %v6184_v5 }
  0x29   :  { %413 = vmatpush.msrb.mxu2 %v6211_v10  ;;  %440 = vmatpush.msrb.mxu3 %v6177_v4 }
  0x2a   :  { %499 = vmatpush.msrb.mxu1 %v6172_v3  ;;  %698 = vmatpush.msrb.mxu0 %v6167_v2 }
  0x2b   :  { %414 = vmatpush.msrb.mxu2 %v6218_v11  ;;  %441 = vmatpush.msrb.mxu3 %v6194_v7 }
  0x2c   :  { %500 = vmatpush.msrb.mxu1 %v6189_v6  ;;  %699 = vmatpush.msrb.mxu0 %v6184_v5 }
  0x2d   :  { %5622 = vmatmul.msk.f32.vlgmr.msra.gmra.mxu2 %vm115_vm0, %v5619_v12  ;;  %5626 = vmatmul.msk.f32.vlgmr.msra.gmra.mxu1 %vm115_vm0, %v5624_v9 }
  0x2e   :  { %5623 = vmatmul.msk.f32.vlgmr.msra.gmra.mxu3 %vm115_vm0, %v5619_v12  ;;  %5635 = vmatmul.msk.f32.vlgmr.msra.gmra.mxu0 %vm115_vm0, %v5634_v14  ;;  %v6511_v12 = vld [vmem:[#allocation7 + $0x78] sm:$0xff] }
  0x2f   :  { %811 = vmatpush.msra.mxu0 %v6167_v2  ;;  %526 = vmatpush.msra.mxu2 %v6211_v10 }
  0x30   :  { %553 = vmatpush.msra.mxu3 %v6177_v4  ;;  %612 = vmatpush.msra.mxu1 %v6172_v3 }
  0x31   :  { %812 = vmatpush.msra.mxu0 %v6184_v5  ;;  %527 = vmatpush.msra.mxu2 %v6218_v11 }
  0x32   :  { %554 = vmatpush.msra.mxu3 %v6194_v7  ;;  %613 = vmatpush.msra.mxu1 %v6189_v6 }
  0x35   :  { %5627 = vmatmul.msk.f32.vlgmr.msrb.gmra.mxu2 %vm115_vm0, %v5624_v9  ;;  %5631 = vmatmul.msk.f32.vlgmr.msrb.gmra.mxu1 %vm115_vm0, %v5629_v13 }
  0x36   :  { %5628 = vmatmul.msk.f32.vlgmr.msrb.gmra.mxu3 %vm115_vm0, %v5624_v9  ;;  %5640 = vmatmul.msk.f32.vlgmr.msrb.gmra.mxu0 %vm115_vm0, %v5639_v15  ;;  %v6498_v9 = vld [vmem:[#allocation7 + $0x88] sm:$0xff] }
  0x37   :  { %924 = vmatpush.msrb.mxu0 %v6167_v2  ;;  %639 = vmatpush.msrb.mxu2 %v6211_v10  ;;  %v6476_v2 = vld [vmem:[#allocation7 + $0x50] sm:$0xff] }
  0x38   :  { %666 = vmatpush.msrb.mxu3 %v6177_v4  ;;  %725 = vmatpush.msrb.mxu1 %v6172_v3 }
  0x39   :  { %925 = vmatpush.msrb.mxu0 %v6184_v5  ;;  %640 = vmatpush.msrb.mxu2 %v6218_v11  ;;  %v6486_v5 = vld [vmem:[#allocation7 + $0x30] sm:$0xff] }
  0x3a   :  { %667 = vmatpush.msrb.mxu3 %v6194_v7  ;;  %726 = vmatpush.msrb.mxu1 %v6189_v6 }
  0x3d   :  { %5632 = vmatmul.msk.f32.vlgmr.msra.gmra.mxu2 %vm115_vm0, %v5629_v13  ;;  %5636 = vmatmul.msk.f32.vlgmr.msra.gmra.mxu1 %vm115_vm0, %v5634_v14 }
  0x3e   :  { %5633 = vmatmul.msk.f32.vlgmr.msra.gmra.mxu3 %vm115_vm0, %v5629_v13  ;;  %5645 = vmatmul.msk.f32.vlgmr.msra.gmra.mxu0 %vm115_vm0, %v6289_v16  ;;  %v6515_v13 = vld [vmem:[#allocation7 + $0x48] sm:$0xff] }
  0x3f   :  { %1029 = vmatpush.msra.mxu0 %v6291_v17  ;;  %838 = vmatpush.msra.mxu1 %v6172_v3 }
  0x40   :  { %752 = vmatpush.msra.mxu2 %v6211_v10  ;;  %779 = vmatpush.msra.mxu3 %v6177_v4 }
  0x41   :  { %1030 = vmatpush.msra.mxu0 %v6298_v18  ;;  %839 = vmatpush.msra.mxu1 %v6189_v6 }
  0x42   :  { %753 = vmatpush.msra.mxu2 %v6218_v11  ;;  %780 = vmatpush.msra.mxu3 %v6194_v7 }
  0x43   :  { %1031 = vmatpush.msra.mxu0 %v6302_v19 }
  0x45   :  { %1032 = vmatpush.msra.mxu0 %v6308_v20  ;;  %5637 = vmatmul.msk.f32.vlgmr.msrb.gmra.mxu2 %vm115_vm0, %v5634_v14 }
  0x46   :  { %5638 = vmatmul.msk.f32.vlgmr.msrb.gmra.mxu3 %vm115_vm0, %v5634_v14  ;;  %5641 = vmatmul.msk.f32.vlgmr.msrb.gmra.mxu1 %vm115_vm0, %v5639_v15  ;;  %v6518_v14 = vld [vmem:[#allocation7 + $0x58] sm:$0xff] }
  0x47   :  { %1033 = vmatpush.msra.mxu0 %v6313_v21  ;;  %951 = vmatpush.msrb.mxu1 %v6172_v3  ;;  %v6478_v3 = vld [vmem:[#allocation7 + $0xc8] sm:$0xff] }
  0x48   :  { %865 = vmatpush.msrb.mxu2 %v6211_v10  ;;  %892 = vmatpush.msrb.mxu3 %v6177_v4 }
  0x49   :  { %1034 = vmatpush.msra.mxu0 %v6319_v22  ;;  %952 = vmatpush.msrb.mxu1 %v6189_v6  ;;  %v6488_v6 = vld [vmem:[#allocation7 + $0xa8] sm:$0xff] }
  0x4a   :  { %866 = vmatpush.msrb.mxu2 %v6218_v11  ;;  %893 = vmatpush.msrb.mxu3 %v6194_v7 }
  0x4b   :  { %1035 = vmatpush.msra.mxu0 %v6323_v23 }
  0x4c   :  { %5650 = vmatmul.msk.f32.vlgmr.msrb.gmra.mxu0 %vm115_vm0, %v6332_v24 }
  0x4d   :  { %1036 = vmatpush.msra.mxu0 %v6334_v25  ;;  %5642 = vmatmul.msk.f32.vlgmr.msra.gmra.mxu2 %vm115_vm0, %v5639_v15 }
  0x4e   :  { %5643 = vmatmul.msk.f32.vlgmr.msra.gmra.mxu3 %vm115_vm0, %v5639_v15  ;;  %5646 = vmatmul.msk.f32.vlgmr.msra.gmra.mxu1 %vm115_vm0, %v6289_v16  ;;  %v6522_v15 = vld [vmem:[#allocation7 + $0x28] sm:$0xff] }
  0x4f   :  { %1037 = vmatpush.msra.mxu0 %v6339_v26  ;;  %1071 = vmatpush.msra.mxu1 %v6341_v27 }
  0x50   :  { %978 = vmatpush.msra.mxu2 %v6211_v10  ;;  %1005 = vmatpush.msra.mxu3 %v6177_v4  ;;  %v6483_v4 = vld [vmem:[#allocation7 + $0xd8] sm:$0xff] }
  0x51   :  { %1038 = vmatpush.msra.mxu0 %v6350_v28  ;;  %1072 = vmatpush.msra.mxu1 %v6352_v29  ;;  %v6503_v10 = vld [vmem:[#allocation7 + $0x98] sm:$0xff] }
  0x52   :  { %979 = vmatpush.msra.mxu2 %v6218_v11  ;;  %1006 = vmatpush.msra.mxu3 %v6194_v7  ;;  %v6493_v7 = vld [vmem:[#allocation7 + $0xb8] sm:$0xff]  ;;  %v6506_v11 = vld [vmem:[#allocation7 + $0x68] sm:$0xff] }
  0x53   :  { %1039 = vmatpush.msra.mxu0 %v6356_v30  ;;  %1073 = vmatpush.msra.mxu1 %v6358_v31 }
  0x55   :  { %1040 = vmatpush.msra.mxu0 %v6364_v32  ;;  %1074 = vmatpush.msra.mxu1 %v6366_v33 }
  0x56   :  { %5647 = vmatmul.msk.f32.vlgmr.msrb.gmra.mxu2 %vm115_vm0, %v6289_v16  ;;  %5648 = vmatmul.msk.f32.vlgmr.msrb.gmra.mxu3 %vm115_vm0, %v6289_v16  ;;  %v6526_v16 = vld [vmem:[#allocation7 + $0x38] sm:$0xff] }
  0x57   :  { %1041 = vmatpush.msra.mxu0 %v6372_v34  ;;  %1075 = vmatpush.msra.mxu1 %v6374_v35 }
  0x58   :  { %1111 = vmatpush.msrb.mxu2 %v6378_v36  ;;  %1155 = vmatpush.msrb.mxu3 %v6380_v37 }
  0x59   :  { %1042 = vmatpush.msra.mxu0 %v6386_v38  ;;  %1076 = vmatpush.msra.mxu1 %v6388_v39 }
  0x5a   :  { %1112 = vmatpush.msrb.mxu2 %v6392_v40  ;;  %1156 = vmatpush.msrb.mxu3 %v6394_v41 }
  0x5b   :  { %1043 = vmatpush.msra.mxu0 %v6398_v42  ;;  %1077 = vmatpush.msra.mxu1 %v6400_v43 }
  0x5c   :  { %1113 = vmatpush.msrb.mxu2 %v6404_v44  ;;  %1157 = vmatpush.msrb.mxu3 %v6406_v45 }
  0x5d   :  { %1044 = vmatpush.msra.mxu0 %v6410_v46  ;;  %1078 = vmatpush.msra.mxu1 %v6412_v47 }
  0x5e   :  { %1114 = vmatpush.msrb.mxu2 %v6416_v48  ;;  %1158 = vmatpush.msrb.mxu3 %v6418_v49 }
  0x5f   :  { %1045 = vmatmul.f32.vlgmr.msra.gmra.mxu0 %v9445_v54  ;;  %1079 = vmatpush.msra.mxu1 %v6422_v50 }
  0x60   :  { %1115 = vmatpush.msrb.mxu2 %v6426_v51  ;;  %1159 = vmatpush.msrb.mxu3 %v6428_v52 }
  0x61   :  { %1080 = vmatpush.msra.mxu1 %v6432_v53  ;;  %5652 = vmatmul.msk.f32.vlgmr.msra.gmra.mxu2 %vm115_vm0, %v6332_v24 }
  0x62   :  { %1116 = vmatpush.msrb.mxu2 %v6436_v55  ;;  %1160 = vmatpush.msrb.mxu3 %v6438_v56 }
  0x63   :  { %1081 = vmatpush.msra.mxu1 %v6442_v57  ;;  %5653 = vmatmul.msk.f32.vlgmr.msra.gmra.mxu3 %vm115_vm0, %v6332_v24 }
  0x64   :  { %1117 = vmatpush.msrb.mxu2 %v6445_v58  ;;  %1161 = vmatpush.msrb.mxu3 %v6447_v59 }
  0x65   :  { %1082 = vmatpush.msra.mxu1 %v6453_v60  ;;  %1200 = vmatpush.msrb.mxu0 %v6291_v17 }
  0x66   :  { %1118 = vmatpush.msrb.mxu2 %v6456_v61  ;;  %1162 = vmatpush.msrb.mxu3 %v6458_v62 }
  0x67   :  { %5651 = vmatmul.msk.f32.vlgmr.msrb.gmra.mxu1 %vm115_vm0, %v6332_v24  ;;  %1201 = vmatpush.msrb.mxu0 %v6298_v18 }
  0x68   :  { %1083 = vmatpush.msra.mxu1 %v6465_v63  ;;  %1119 = vmatpush.msrb.mxu2 %v6467_v0 }
  0x69   :  { %1163 = vmatpush.msrb.mxu3 %v6472_v1  ;;  %1202 = vmatpush.msrb.mxu0 %v6302_v19  ;;  %v6530_v19 = vld [vmem:[#allocation7 + $0x8] sm:$0xff] }
  0x6a   :  { %1084 = vmatpush.msra.mxu1 %v6476_v2  ;;  %1120 = vmatpush.msrb.mxu2 %v6478_v3 }
  0x6b   :  { %1164 = vmatpush.msrb.mxu3 %v6483_v4  ;;  %1203 = vmatpush.msrb.mxu0 %v6308_v20  ;;  %v6534_v20 = vld [vmem:[#allocation7 + $0x18] sm:$0xff] }
  0x6c   :  { %1085 = vmatpush.msra.mxu1 %v6486_v5  ;;  %1121 = vmatpush.msrb.mxu2 %v6488_v6 }
  0x6d   :  { %1165 = vmatpush.msrb.mxu3 %v6493_v7  ;;  %1204 = vmatpush.msrb.mxu0 %v6313_v21 }
  0x6e   :  { %1086 = vmatpush.msra.mxu1 %v6496_v8  ;;  %1122 = vmatpush.msrb.mxu2 %v6498_v9 }
  0x6f   :  { %1166 = vmatpush.msrb.mxu3 %v6503_v10  ;;  %1087 = vmatmul.f32.vlgmr.msra.gmra.mxu1 %v9445_v54 }
  0x70   :  { %1123 = vmatpush.msrb.mxu2 %v6506_v11  ;;  %1242 = vmatpush.msrb.mxu1 %v6341_v27 }
  0x71   :  { %1167 = vmatpush.msrb.mxu3 %v6511_v12  ;;  %1205 = vmatpush.msrb.mxu0 %v6319_v22 }
  0x72   :  { %1124 = vmatpush.msrb.mxu2 %v6515_v13  ;;  %1243 = vmatpush.msrb.mxu1 %v6352_v29 }
  0x73   :  { %1168 = vmatpush.msrb.mxu3 %v6518_v14  ;;  %1206 = vmatpush.msrb.mxu0 %v6323_v23 }
  0x74   :  { %1125 = vmatpush.msrb.mxu2 %v6522_v15  ;;  %1244 = vmatpush.msrb.mxu1 %v6358_v31 }
  0x75   :  { %1169 = vmatpush.msrb.mxu3 %v6526_v16  ;;  %1207 = vmatpush.msrb.mxu0 %v6334_v25 }
  0x76   :  { %1126 = vmatpush.msrb.mxu2 %v6530_v19  ;;  %1245 = vmatpush.msrb.mxu1 %v6366_v33 }
  0x77   :  { %1170 = vmatpush.msrb.mxu3 %v6534_v20  ;;  %1127 = vmatmul.f32.vlgmr.msrb.gmra.mxu2 %v9445_v54 }
  0x78   :  { %1171 = vmatmul.f32.vlgmr.msrb.gmra.mxu3 %v9445_v54  ;;  %1282 = vmatpush.msra.mxu2 %v6378_v36  ;;  %v6870_v54 = vld [vmem:[#allocation7 + $0xf0] sm:$0xff] }
  0x79   :  { %1326 = vmatpush.msra.mxu3 %v6380_v37  ;;  %1246 = vmatpush.msrb.mxu1 %v6374_v35 }
  0x7a   :  { %1283 = vmatpush.msra.mxu2 %v6392_v40  ;;  %1208 = vmatpush.msrb.mxu0 %v6339_v26 }
  0x7b   :  { %1327 = vmatpush.msra.mxu3 %v6394_v41  ;;  %1247 = vmatpush.msrb.mxu1 %v6388_v39 }
  0x7c   :  { %1284 = vmatpush.msra.mxu2 %v6404_v44  ;;  %1209 = vmatpush.msrb.mxu0 %v6350_v28 }
  0x7d   :  { %1328 = vmatpush.msra.mxu3 %v6406_v45  ;;  %1248 = vmatpush.msrb.mxu1 %v6400_v43 }
  0x7e   :  { %1285 = vmatpush.msra.mxu2 %v6416_v48  ;;  %1210 = vmatpush.msrb.mxu0 %v6356_v30 }
  0x7f   :  { %1329 = vmatpush.msra.mxu3 %v6418_v49  ;;  %1249 = vmatpush.msrb.mxu1 %v6412_v47 }
  0x80   :  { %1286 = vmatpush.msra.mxu2 %v6426_v51  ;;  %1211 = vmatpush.msrb.mxu0 %v6364_v32 }
  0x81   :  { %1330 = vmatpush.msra.mxu3 %v6428_v52  ;;  %1250 = vmatpush.msrb.mxu1 %v6422_v50 }
  0x82   :  { %1287 = vmatpush.msra.mxu2 %v6436_v55  ;;  %1212 = vmatpush.msrb.mxu0 %v6372_v34 }
  0x83   :  { %1331 = vmatpush.msra.mxu3 %v6438_v56  ;;  %1251 = vmatpush.msrb.mxu1 %v6432_v53 }
  0x84   :  { %1288 = vmatpush.msra.mxu2 %v6445_v58  ;;  %1213 = vmatpush.msrb.mxu0 %v6386_v38 }
  0x85   :  { %1332 = vmatpush.msra.mxu3 %v6447_v59  ;;  %1252 = vmatpush.msrb.mxu1 %v6442_v57 }
  0x86   :  { %1289 = vmatpush.msra.mxu2 %v6456_v61  ;;  %1214 = vmatpush.msrb.mxu0 %v6398_v42 }
  0x87   :  { %1333 = vmatpush.msra.mxu3 %v6458_v62  ;;  %1253 = vmatpush.msrb.mxu1 %v6453_v60 }
  0x88   :  { %1290 = vmatpush.msra.mxu2 %v6467_v0  ;;  %1215 = vmatpush.msrb.mxu0 %v6410_v46 }
  0x89   :  { %1334 = vmatpush.msra.mxu3 %v6472_v1  ;;  %1254 = vmatpush.msrb.mxu1 %v6465_v63 }
  0x8a   :  { %1291 = vmatpush.msra.mxu2 %v6478_v3  ;;  %1371 = vmatpush.msra.mxu0 %v6291_v17 }
  0x8b   :  { %1335 = vmatpush.msra.mxu3 %v6483_v4  ;;  %1255 = vmatpush.msrb.mxu1 %v6476_v2 }
  0x8c   :  { %1292 = vmatpush.msra.mxu2 %v6488_v6  ;;  %1372 = vmatpush.msra.mxu0 %v6298_v18 }
  0x8d   :  { %1336 = vmatpush.msra.mxu3 %v6493_v7  ;;  %1256 = vmatpush.msrb.mxu1 %v6486_v5 }
  0x8e   :  { %1293 = vmatpush.msra.mxu2 %v6498_v9 }
  0x8f   :  { %1337 = vmatpush.msra.mxu3 %v6503_v10  ;;  %1257 = vmatpush.msrb.mxu1 %v6496_v8 }
  0x90   :  { %1294 = vmatpush.msra.mxu2 %v6506_v11 }
  0x91   :  { %1413 = vmatpush.msra.mxu1 %v6341_v27  ;;  %1338 = vmatpush.msra.mxu3 %v6511_v12 }
  0x92   :  { %1295 = vmatpush.msra.mxu2 %v6515_v13 }
  0x93   :  { %1414 = vmatpush.msra.mxu1 %v6352_v29  ;;  %1339 = vmatpush.msra.mxu3 %v6518_v14 }
  0x94   :  { %1296 = vmatpush.msra.mxu2 %v6522_v15 }
  0x95   :  { %1415 = vmatpush.msra.mxu1 %v6358_v31  ;;  %1340 = vmatpush.msra.mxu3 %v6526_v16 }
  0x96   :  { %1297 = vmatpush.msra.mxu2 %v6530_v19 }
  0x97   :  { %1416 = vmatpush.msra.mxu1 %v6366_v33  ;;  %1341 = vmatpush.msra.mxu3 %v6534_v20 }
  0x98   :  { %1453 = vmatpush.msrb.mxu2 %v6378_v36 }
  0x99   :  { %1497 = vmatpush.msrb.mxu3 %v6380_v37  ;;  %1417 = vmatpush.msra.mxu1 %v6374_v35 }
  0x9a   :  { %1454 = vmatpush.msrb.mxu2 %v6392_v40  ;;  %v163_v22 = vpop.f32.mrf.mxu1 }
  0x9b   :  { %1498 = vmatpush.msrb.mxu3 %v6394_v41  ;;  %1418 = vmatpush.msra.mxu1 %v6388_v39  ;;  %v6646_v25 = vpop.f32.mrf.mxu0 }
  0x9c   :  { %1455 = vmatpush.msrb.mxu2 %v6404_v44 }
  0x9d   :  { %1499 = vmatpush.msrb.mxu3 %v6406_v45  ;;  %1419 = vmatpush.msra.mxu1 %v6400_v43 }
  0x9e   :  { %1456 = vmatpush.msrb.mxu2 %v6416_v48 }
  0x9f   :  { %1500 = vmatpush.msrb.mxu3 %v6418_v49  ;;  %1420 = vmatpush.msra.mxu1 %v6412_v47 }
  0xa0   :  { %1457 = vmatpush.msrb.mxu2 %v6426_v51  ;;  %v136_v17 = vpop.f32.mrf.mxu2 }
  0xa1   :  { %1501 = vmatpush.msrb.mxu3 %v6428_v52  ;;  %1421 = vmatpush.msra.mxu1 %v6422_v50  ;;  %v6620_v18 = vpop.f32.mrf.mxu3 }
  0xa2   :  { %1458 = vmatpush.msrb.mxu2 %v6436_v55  ;;  %v6649_v26 = vpop.f32.mrf.mxu1 }
  0xa3   :  { %1502 = vmatpush.msrb.mxu3 %v6438_v56  ;;  %1422 = vmatpush.msra.mxu1 %v6432_v53  ;;  %v6658_v29 = vpop.f32.mrf.mxu0  ;;  %v5666_v53 = vld [vmem:[%s9428_s3] ss:$0 sm:$0xff] }
  0xa4   :  { %1459 = vmatpush.msrb.mxu2 %v6445_v58  ;;  %9622 = vst [vmem:[#allocation17_spill] sm:$0xff] %v6658_v29  ;;  %v137_v58 = vadd.f32 %v5666_v53, %v136_v17 }
  0xa5   :  { %1503 = vmatpush.msrb.mxu3 %v6447_v59  ;;  %1423 = vmatpush.msra.mxu1 %v6442_v57 }
  0xa6   :  { %1460 = vmatpush.msrb.mxu2 %v6456_v61  ;;  %v5668_v61 = vld [vmem:[%s9428_s3 + $0x1] ss:$0 sm:$0xff] }
  0xa7   :  { %1504 = vmatpush.msrb.mxu3 %v6458_v62  ;;  %1424 = vmatpush.msra.mxu1 %v6453_v60  ;;  %v5667_v62 = vld [vmem:[%s9428_s3 + $0x2] ss:$0 sm:$0xff] }
  0xa8   :  { %1461 = vmatpush.msrb.mxu2 %v6467_v0  ;;  %v190_v23 = vpop.f32.mrf.mxu2  ;;  %v5670_v0 = vld [vmem:[%s9428_s3 + $0x3] ss:$0 sm:$0xff] }
  0xa9   :  { %1505 = vmatpush.msrb.mxu3 %v6472_v1  ;;  %1425 = vmatpush.msra.mxu1 %v6465_v63  ;;  %v6637_v24 = vpop.f32.mrf.mxu3  ;;  %v164_v1 = vadd.f32 %v5668_v61, %v163_v22  ;;  %v6726_v61 = vld [vmem:[#allocation7 + $0x1a0] sm:$0xff] }
  0xaa   :  { %1462 = vmatpush.msrb.mxu2 %v6478_v3  ;;  %v6660_v30 = vpop.f32.mrf.mxu1  ;;  %1373 = vmatpush.msra.mxu0 %v6726_v61 }
  0xab   :  { %1506 = vmatpush.msrb.mxu3 %v6483_v4  ;;  %1426 = vmatpush.msra.mxu1 %v6476_v2  ;;  %v6666_v33 = vpop.f32.mrf.mxu0  ;;  %v191_v4 = vadd.f32 %v5667_v62, %v190_v23  ;;  %v6729_v62 = vld [vmem:[#allocation7 + $0x180] sm:$0xff] }
  0xac   :  { %1463 = vmatpush.msrb.mxu2 %v6488_v6  ;;  %9623 = vst [vmem:[#allocation18_spill] sm:$0xff] %v6666_v33  ;;  %1374 = vmatpush.msra.mxu0 %v6729_v62  ;;  %v6926_v33 = vld [vmem:[#allocation7 + $0x40] sm:$0xff] }
  0xad   :  { %1507 = vmatpush.msrb.mxu3 %v6493_v7  ;;  %1427 = vmatpush.msra.mxu1 %v6486_v5  ;;  %v218_v7 = vadd.f32 %v5670_v0, %v6620_v18  ;;  %v6736_v0 = vld [vmem:[#allocation7 + $0x120] sm:$0xff]  ;;  %9649 = vst [vmem:[#allocation44_spill] sm:$0xff] %v6926_v33 }
  0xae   :  { %1464 = vmatpush.msrb.mxu2 %v6498_v9  ;;  %1375 = vmatpush.msra.mxu0 %v6313_v21  ;;  %v6748_v21 = vld [vmem:[#allocation7 + $0xa0] sm:$0xff] }
  0xaf   :  { %1508 = vmatpush.msrb.mxu3 %v6503_v10  ;;  %1428 = vmatpush.msra.mxu1 %v6496_v8 }
  0xb0   :  { %1465 = vmatpush.msrb.mxu2 %v6506_v11  ;;  %v6653_v27 = vpop.f32.mrf.mxu2 }
  0xb1   :  { %1509 = vmatpush.msrb.mxu3 %v6511_v12  ;;  %v6656_v28 = vpop.f32.mrf.mxu3 }
  0xb2   :  { %1466 = vmatpush.msrb.mxu2 %v6515_v13  ;;  %v6668_v35 = vpop.f32.mrf.mxu1 }
  0xb3   :  { %1510 = vmatpush.msrb.mxu3 %v6518_v14  ;;  %9624 = vst [vmem:[#allocation19_spill] sm:$0xff] %v6668_v35  ;;  %v6674_v39 = vpop.f32.mrf.mxu0  ;;  %v5676_v35 = vld [vmem:[%s9428_s3 + $0x1] ss:$0 sm:$0xff] }
  0xb4   :  { %1467 = vmatpush.msrb.mxu2 %v6522_v15  ;;  %9627 = vst [vmem:[#allocation22_spill] sm:$0xff] %v6674_v39  ;;  %v6915_v39 = vld [vmem:[#allocation7 + $0x70] sm:$0xff] }
  0xb5   :  { %1511 = vmatpush.msrb.mxu3 %v6526_v16  ;;  %9646 = vst [vmem:[#allocation41_spill] sm:$0xff] %v6915_v39 }
  0xb6   :  { %1468 = vmatpush.msrb.mxu2 %v6530_v19 }
  0xb7   :  { %1512 = vmatpush.msrb.mxu3 %v6534_v20 }
  0xb8   :  { %v6662_v31 = vpop.f32.mrf.mxu2 }
  0xb9   :  { %v6664_v32 = vpop.f32.mrf.mxu3 }
  0xba   :  { %v6676_v40 = vpop.f32.mrf.mxu1 }
  0xbb   :  { %9628 = vst [vmem:[#allocation23_spill] sm:$0xff] %v6676_v40  ;;  %v6682_v44 = vpop.f32.mrf.mxu0 }
  0xbc   :  { %9631 = vst [vmem:[#allocation26_spill] sm:$0xff] %v6682_v44  ;;  %v6903_v44 = vld [vmem:[#allocation7 + $0x90] sm:$0xff] }
  0xc0   :  { %v6670_v36 = vpop.f32.mrf.mxu2 }
  0xc1   :  { %9625 = vst [vmem:[#allocation20_spill] sm:$0xff] %v6670_v36  ;;  %v6672_v37 = vpop.f32.mrf.mxu3  ;;  %v6928_v36 = vld [vmem:[#allocation7 + $0x50] sm:$0xff] }
  0xc2   :  { %9626 = vst [vmem:[#allocation21_spill] sm:$0xff] %v6672_v37  ;;  %v6930_v37 = vld [vmem:[#allocation7 + $0x48] sm:$0xff] }
  0xc3   :  { %v6684_v45 = vpop.f32.mrf.mxu1  ;;  %9650 = vst [vmem:[#allocation45_spill] sm:$0xff] %v6928_v36 }
  0xc4   :  { %9632 = vst [vmem:[#allocation27_spill] sm:$0xff] %v6684_v45  ;;  %v6913_v45 = vld [vmem:[#allocation7 + $0x60] sm:$0xff] }
  0xc5   :  { %9645 = vst [vmem:[#allocation40_spill] sm:$0xff] %v6913_v45 }
  0xc6   :  { %9651 = vst [vmem:[#allocation46_spill] sm:$0xff] %v6930_v37 }
  0xc8   :  { %v6678_v41 = vpop.f32.mrf.mxu2 }
  0xc9   :  { %9629 = vst [vmem:[#allocation24_spill] sm:$0xff] %v6678_v41  ;;  %v6680_v43 = vpop.f32.mrf.mxu3  ;;  %v6690_v49 = vpop.f32.mrf.mxu0  ;;  %v6917_v41 = vld [vmem:[#allocation7 + $0x68] sm:$0xff] }
  0xca   :  { %9630 = vst [vmem:[#allocation25_spill] sm:$0xff] %v6680_v43  ;;  %v6921_v43 = vld [vmem:[#allocation7 + $0x78] sm:$0xff] }
  0xcb   :  { %9635 = vst [vmem:[#allocation30_spill] sm:$0xff] %v6690_v49  ;;  %v6692_v50 = vpop.f32.mrf.mxu1  ;;  %v6880_v49 = vld [vmem:[#allocation7 + $0xd0] sm:$0xff] }
  0xcc   :  { %9636 = vst [vmem:[#allocation31_spill] sm:$0xff] %v6692_v50  ;;  %v5669_v50 = vld [vmem:[%s9428_s3] ss:$0 sm:$0xff] }
  0xcd   :  { %9647 = vst [vmem:[#allocation42_spill] sm:$0xff] %v6917_v41  ;;  %v363_v40 = vadd.f32 %v5669_v50, %v6646_v25  ;;  %v6937_v25 = vld [vmem:[#allocation7 + $0x58] sm:$0xff] }
  0xce   :  { %9648 = vst [vmem:[#allocation43_spill] sm:$0xff] %v6921_v43 }
  0xcf   :  { %9652 = vst [vmem:[#allocation47_spill] sm:$0xff] %v6937_v25 }
  0xd0   :  { %v6686_v47 = vpop.f32.mrf.mxu2 }
  0xd1   :  { %9633 = vst [vmem:[#allocation28_spill] sm:$0xff] %v6686_v47  ;;  %v6688_v48 = vpop.f32.mrf.mxu3  ;;  %v6905_v47 = vld [vmem:[#allocation7 + $0x88] sm:$0xff] }
  0xd2   :  { %9634 = vst [vmem:[#allocation29_spill] sm:$0xff] %v6688_v48  ;;  %v6907_v48 = vld [vmem:[#allocation7 + $0x98] sm:$0xff] }
  0xd9   :  { %v6694_v51 = vpop.f32.mrf.mxu2  ;;  %v6696_v52 = vpop.f32.mrf.mxu3 }
  0xda   :  { %9637 = vst [vmem:[#allocation32_spill] sm:$0xff] %v6694_v51  ;;  %v6892_v51 = vld [vmem:[#allocation7 + $0xa8] sm:$0xff] }
  0xdb   :  { %9638 = vst [vmem:[#allocation33_spill] sm:$0xff] %v6696_v52  ;;  %v6894_v52 = vld [vmem:[#allocation7 + $0xb8] sm:$0xff] }
  0xdc   :  { %v1046_v55 = vpop.f32.mrf.mxu0 }
  0xdd   :  { %v1049_v60 = vadd.f32 %v1046_v55, %v137_v58 }
  0xdf   :  { %v1050_v63 = vmul.f32 0.5, %v1049_v60 }
  0xe1   :  { %5737 = vtanh.f32 %v1050_v63  ;;  %v6733_v63 = vld [vmem:[#allocation7 + $0x140] sm:$0xff] }
  0xe2   :  { %1376 = vmatpush.msra.mxu0 %v6733_v63 }
  0xe4   :  { %v6701_v56 = vpop.f32.mrf.mxu1  ;;  %v6703_v57 = vpop.f32.mrf.mxu2  ;;  %1377 = vmatpush.msra.mxu0 %v6736_v0 }
  0xe5   :  { %9639 = vst [vmem:[#allocation34_spill] sm:$0xff] %v6701_v56  ;;  %v6882_v56 = vld [vmem:[#allocation7 + $0xc8] sm:$0xff] }
  0xe6   :  { %9640 = vst [vmem:[#allocation35_spill] sm:$0xff] %v6703_v57  ;;  %v6705_v59 = vpop.f32.mrf.mxu3  ;;  %v6874_v57 = vld [vmem:[#allocation7 + $0xf8] sm:$0xff] }
  0xe7   :  { %9641 = vst [vmem:[#allocation36_spill] sm:$0xff] %v6705_v59  ;;  %v5738_v11 = vpop.eup %5737  ;;  %v6872_v59 = vld [vmem:[#allocation7 + $0xe8] sm:$0xff] }
  0xe8   :  { %v1052_v13 = vmul.f32 0.5, %v5738_v11  ;;  %v5678_v11 = vld [vmem:[%s9428_s3 + $0x3] ss:$0 sm:$0xff] }
  0xea   :  { %v1053_v19 = vadd.f32 0.5, %v1052_v13 }
  0xec   :  { %v1088_v2 = vpop.f32.mrf.mxu1 }
  0xed   :  { %v1091_v8 = vadd.f32 %v1088_v2, %v191_v4  ;;  %v6742_v2 = vld [vmem:[#allocation7 + $0xe0] sm:$0xff]  ;;  %v5674_v4 = vld [vmem:[%s9428_s3] ss:$0 sm:$0xff] }
  0xfa   :  { %v1128_v3 = vpop.f32.mrf.mxu2 }
  0xfb   :  { %v1131_v5 = vadd.f32 %v1128_v3, %v164_v1  ;;  %v1172_v6 = vpop.f32.mrf.mxu3  ;;  %v6739_v1 = vld [vmem:[#allocation7 + $0x100] sm:$0xff] }
  0xfc   :  { %v1175_v10 = vadd.f32 %v1172_v6, %v218_v7  ;;  %1378 = vmatpush.msra.mxu0 %v6739_v1  ;;  %v6745_v3 = vld [vmem:[#allocation7 + $0xc0] sm:$0xff]  ;;  %v250_v6 = vadd.f32 %v5674_v4, %v6637_v24 }
  0xfd   :  { %v1132_v9 = vmul.f32 0.5, %v1131_v5  ;;  %v6754_v5 = vld [vmem:[#allocation7 + $0x80] sm:$0xff] }
  0xfe   :  { %v1176_v12 = vmul.f32 0.5, %v1175_v10  ;;  %1379 = vmatpush.msra.mxu0 %v6742_v2 }
  0xff   :  { %5739 = vtanh.f32 %v1132_v9  ;;  %v5672_v9 = vld [vmem:[%s9428_s3 + $0x1] ss:$0 sm:$0xff] }
 0x100   :  { %5741 = vtanh.f32 %v1091_v8  ;;  %1380 = vmatpush.msra.mxu0 %v6745_v3 }
 0x101   :  { %5743 = vtanh.f32 %v1176_v12 }
 0x102   :  { %1381 = vmatpush.msra.mxu0 %v6748_v21 }
 0x104   :  { %1382 = vmatpush.msra.mxu0 %v6754_v5 }
 0x105   :  { %v5740_v14 = vpop.eup %5739 }
 0x106   :  { %v1134_v15 = vmul.f32 0.5, %v5740_v14  ;;  %v5742_v16 = vpop.eup %5741  ;;  %1383 = vmatpush.msra.mxu0 %v6372_v34  ;;  %v5671_v34 = vld [vmem:[%s9428_s3 + $0x2] ss:$0 sm:$0xff]  ;;  %v331_v14 = vadd.f32 %v5678_v11, %v6656_v28 }
 0x107   :  { %v1093_v17 = vmul.f32 %v5742_v16, %v1053_v19  ;;  %v5744_v23 = vpop.eup %5743  ;;  %v6784_v11 = vld [vmem:[#allocation7 + $0x1e0] sm:$0xff] }
 0x108   :  { %v1135_v20 = vadd.f32 0.5, %v1134_v15  ;;  %v1178_v18 = vmul.f32 0.5, %v5744_v23  ;;  %1384 = vmatpush.msra.mxu0 %v6386_v38  ;;  %v277_v38 = vadd.f32 %v5672_v9, %v6649_v26  ;;  %v304_v15 = vadd.f32 %v5671_v34, %v6653_v27  ;;  %v6788_v34 = vld [vmem:[#allocation7 + $0x1e8] sm:$0xff] }
 0x10a   :  { %v1136_v22 = vmul.f32 0.0, %v1135_v20  ;;  %v1179_v55 = vadd.f32 0.5, %v1178_v18  ;;  %1385 = vmatpush.msra.mxu0 %v6398_v42 }
 0x10c   :  { %v6717_v53 = vadd.f32 %v1136_v22, %v1093_v17  ;;  %1386 = vmatpush.msra.mxu0 %v6410_v46 }
 0x10e   :  { %5745 = vtanh.f32 %v6717_v53 }
 0x114   :  { %v5746_v58 = vpop.eup %5745 }
 0x115   :  { %v6720_v60 = vmul.f32 %v5746_v58, %v1179_v55 }
 0x117   :  { %9642 = vst [vmem:[#allocation37_spill] sm:$0xff] %v6720_v60  ;;  %1216 = vmatmul.f32.vlgmr.msrb.gmra.mxu0 %v6720_v60  ;;  %1258 = vmatmul.f32.vlgmr.msrb.gmra.mxu1 %v6720_v60 }
 0x118   :  { %1298 = vmatmul.f32.vlgmr.msra.gmra.mxu2 %v6720_v60  ;;  %1342 = vmatmul.f32.vlgmr.msra.gmra.mxu3 %v6720_v60  ;;  %v6890_v60 = vld [vmem:[#allocation7 + $0xb0] sm:$0xff] }
 0x119   :  { %1542 = vmatpush.msrb.mxu0 %v6784_v11  ;;  %1624 = vmatpush.msra.mxu2 %v6788_v34 }
 0x194   :  { %v1217_v7 = vpop.f32.mrf.mxu0  ;;  %v1259_v42 = vpop.f32.mrf.mxu1 }
 0x195   :  { %v1220_v8 = vadd.f32 %v1217_v7, %v250_v6  ;;  %v1262_v20 = vadd.f32 %v1259_v42, %v304_v15  ;;  %v6808_v42 = vld [vmem:[#allocation7 + $0x1b0] sm:$0xff]  ;;  %v6810_v15 = vld [vmem:[#allocation7 + $0x1a8] sm:$0xff] }
 0x197   :  { %v1221_v10 = vmul.f32 0.5, %v1220_v8 }
 0x199   :  { %5747 = vtanh.f32 %v1221_v10 }
 0x19b   :  { %v1299_v24 = vpop.f32.mrf.mxu2  ;;  %v1343_v13 = vpop.f32.mrf.mxu3 }
 0x19c   :  { %v1302_v12 = vadd.f32 %v1299_v24, %v277_v38  ;;  %v1346_v16 = vadd.f32 %v1343_v13, %v331_v14  ;;  %v6792_v38 = vld [vmem:[#allocation7 + $0x1f8] sm:$0xff]  ;;  %v6796_v24 = vld [vmem:[#allocation7 + $0x1c0] sm:$0xff]  ;;  %v6800_v13 = vld [vmem:[#allocation7 + $0x1c8] sm:$0xff] }
 0x19d   :  { %1668 = vmatpush.msra.mxu3 %v6792_v38  ;;  %1543 = vmatpush.msrb.mxu0 %v6796_v24  ;;  %v6804_v14 = vld [vmem:[#allocation7 + $0x1d8] sm:$0xff] }
 0x19e   :  { %v1303_v46 = vmul.f32 0.5, %v1302_v12  ;;  %v1347_v22 = vmul.f32 0.5, %v1346_v16  ;;  %v6798_v12 = vld [vmem:[#allocation7 + $0x1d0] sm:$0xff]  ;;  %1625 = vmatpush.msra.mxu2 %v6800_v13 }
 0x19f   :  { %v5748_v19 = vpop.eup %5747  ;;  %1669 = vmatpush.msra.mxu3 %v6804_v14  ;;  %1544 = vmatpush.msrb.mxu0 %v6726_v61  ;;  %v6818_v16 = vld [vmem:[#allocation7 + $0x190] sm:$0xff] }
 0x1a0   :  { %5749 = vtanh.f32 %v1303_v46  ;;  %v1223_v17 = vmul.f32 0.5, %v5748_v19  ;;  %v6812_v46 = vld [vmem:[#allocation7 + $0x1b8] sm:$0xff]  ;;  %1626 = vmatpush.msra.mxu2 %v6810_v15  ;;  %v6820_v19 = vld [vmem:[#allocation7 + $0x188] sm:$0xff] }
 0x1a1   :  { %5751 = vtanh.f32 %v1262_v20  ;;  %1670 = vmatpush.msra.mxu3 %v6812_v46  ;;  %v6822_v20 = vld [vmem:[#allocation7 + $0x198] sm:$0xff]  ;;  %1545 = vmatpush.msrb.mxu0 %v6729_v62 }
 0x1a2   :  { %v1224_v18 = vadd.f32 0.5, %v1223_v17  ;;  %5753 = vtanh.f32 %v1347_v22  ;;  %1627 = vmatpush.msra.mxu2 %v6820_v19  ;;  %v6828_v17 = vld [vmem:[#allocation7 + $0x160] sm:$0xff]  ;;  %v6830_v22 = vld [vmem:[#allocation7 + $0x170] sm:$0xff] }
 0x1a3   :  { %1671 = vmatpush.msra.mxu3 %v6822_v20  ;;  %9644 = vst [vmem:[#allocation39_spill] sm:$0xff] %v6828_v17  ;;  %1546 = vmatpush.msrb.mxu0 %v6828_v17 }
 0x1a5   :  { %1547 = vmatpush.msrb.mxu0 %v6733_v63 }
 0x1a6   :  { %v5750_v23 = vpop.eup %5749 }
 0x1a7   :  { %v1305_v26 = vmul.f32 0.5, %v5750_v23  ;;  %v5752_v58 = vpop.eup %5751  ;;  %v6832_v23 = vld [vmem:[#allocation7 + $0x168] sm:$0xff]  ;;  %1548 = vmatpush.msrb.mxu0 %v6736_v0 }
 0x1a8   :  { %v1264_v4 = vmul.f32 %v5752_v58, %v1224_v18  ;;  %v5754_v6 = vpop.eup %5753  ;;  %v6836_v18 = vld [vmem:[#allocation7 + $0x178] sm:$0xff]  ;;  %1628 = vmatpush.msra.mxu2 %v6832_v23 }
 0x1a9   :  { %v1306_v55 = vadd.f32 0.5, %v1305_v26  ;;  %v1349_v27 = vmul.f32 0.5, %v5754_v6  ;;  %1672 = vmatpush.msra.mxu3 %v6836_v18  ;;  %v6840_v26 = vld [vmem:[#allocation7 + $0x150] sm:$0xff]  ;;  %v6844_v58 = vld [vmem:[#allocation7 + $0x158] sm:$0xff]  ;;  %1549 = vmatpush.msrb.mxu0 %v6739_v1 }
 0x1aa   :  { %v6854_v6 = vld [vmem:[#allocation7 + $0x138] sm:$0xff] }
 0x1ab   :  { %v1307_v28 = vmul.f32 %v1306_v55, %v6717_v53  ;;  %v1350_v8 = vadd.f32 0.5, %v1349_v27  ;;  %v6786_v53 = vld [vmem:[#allocation7 + $0x1f0] sm:$0xff]  ;;  %v6842_v55 = vld [vmem:[#allocation7 + $0x148] sm:$0xff]  ;;  %1673 = vmatpush.msra.mxu3 %v6844_v58  ;;  %1550 = vmatpush.msrb.mxu0 %v6742_v2 }
 0x1ac   :  { %1584 = vmatpush.msrb.mxu1 %v6786_v53  ;;  %1629 = vmatpush.msra.mxu2 %v6842_v55  ;;  %v6860_v27 = vld [vmem:[#allocation7 + $0x110] sm:$0xff] }
 0x1ad   :  { %v6775_v7 = vadd.f32 %v1307_v28, %v1264_v4  ;;  %v6850_v4 = vld [vmem:[#allocation7 + $0x130] sm:$0xff]  ;;  %v6852_v28 = vld [vmem:[#allocation7 + $0x128] sm:$0xff]  ;;  %1674 = vmatpush.msra.mxu3 %v6854_v6  ;;  %1551 = vmatpush.msrb.mxu0 %v6745_v3 }
 0x1ae   :  { %1585 = vmatpush.msrb.mxu1 %v6798_v12  ;;  %1630 = vmatpush.msra.mxu2 %v6852_v28 }
 0x1af   :  { %5755 = vtanh.f32 %v6775_v7  ;;  %1552 = vmatpush.msrb.mxu0 %v6748_v21 }
 0x1b0   :  { %1586 = vmatpush.msrb.mxu1 %v6808_v42 }
 0x1b1   :  { %1553 = vmatpush.msrb.mxu0 %v6754_v5 }
 0x1b2   :  { %1587 = vmatpush.msrb.mxu1 %v6818_v16 }
 0x1b3   :  { %1554 = vmatpush.msrb.mxu0 %v6913_v45  ;;  %v6953_v45 = vld [vmem:[#allocation7 + $0x10] sm:$0xff] }
 0x1b4   :  { %1588 = vmatpush.msrb.mxu1 %v6830_v22  ;;  %9658 = vst [vmem:[#allocation53_spill] sm:$0xff] %v6953_v45 }
 0x1b5   :  { %v5756_v9 = vpop.eup %5755  ;;  %1555 = vmatpush.msrb.mxu0 %v6926_v33  ;;  %v6949_v33 = vld [vmem:[#allocation7 + $0x38] sm:$0xff] }
 0x1b6   :  { %v6778_v10 = vmul.f32 %v5756_v9, %v1350_v8  ;;  %1589 = vmatpush.msrb.mxu1 %v6840_v26  ;;  %v6862_v8 = vld [vmem:[#allocation7 + $0x108] sm:$0xff]  ;;  %v6864_v9 = vld [vmem:[#allocation7 + $0x118] sm:$0xff]  ;;  %9656 = vst [vmem:[#allocation51_spill] sm:$0xff] %v6949_v33 }
 0x1b7   :  { %1631 = vmatpush.msra.mxu2 %v6862_v8  ;;  %1675 = vmatpush.msra.mxu3 %v6864_v9 }
 0x1b8   :  { %9643 = vst [vmem:[#allocation38_spill] sm:$0xff] %v6778_v10  ;;  %1387 = vmatmul.f32.vlgmr.msra.gmra.mxu0 %v6778_v10  ;;  %1429 = vmatmul.f32.vlgmr.msra.gmra.mxu1 %v6778_v10 }
 0x1b9   :  { %1469 = vmatmul.f32.vlgmr.msrb.gmra.mxu2 %v6778_v10  ;;  %1513 = vmatmul.f32.vlgmr.msrb.gmra.mxu3 %v6778_v10  ;;  %v6884_v10 = vld [vmem:[#allocation7 + $0xd8] sm:$0xff] }
 0x1ba   :  { %1590 = vmatpush.msrb.mxu1 %v6850_v4  ;;  %1632 = vmatpush.msra.mxu2 %v6872_v59 }
 0x1bb   :  { %1676 = vmatpush.msra.mxu3 %v6874_v57 }
 0x1bc   :  { %1591 = vmatpush.msrb.mxu1 %v6860_v27  ;;  %1633 = vmatpush.msra.mxu2 %v6882_v56 }
 0x1bd   :  { %1677 = vmatpush.msra.mxu3 %v6884_v10 }
 0x1be   :  { %1592 = vmatpush.msrb.mxu1 %v6870_v54  ;;  %1634 = vmatpush.msra.mxu2 %v6892_v51 }
 0x1bf   :  { %1678 = vmatpush.msra.mxu3 %v6894_v52 }
 0x1c0   :  { %1593 = vmatpush.msrb.mxu1 %v6880_v49  ;;  %1635 = vmatpush.msra.mxu2 %v6905_v47 }
 0x1c1   :  { %1679 = vmatpush.msra.mxu3 %v6907_v48 }
 0x1c2   :  { %1594 = vmatpush.msrb.mxu1 %v6890_v60  ;;  %1636 = vmatpush.msra.mxu2 %v6917_v41  ;;  %v6943_v41 = vld [vmem:[#allocation7 + $0x30] sm:$0xff] }
 0x1c3   :  { %1680 = vmatpush.msra.mxu3 %v6921_v43  ;;  %v6941_v43 = vld [vmem:[#allocation7 + $0x20] sm:$0xff]  ;;  %9654 = vst [vmem:[#allocation49_spill] sm:$0xff] %v6943_v41 }
 0x1c4   :  { %1595 = vmatpush.msrb.mxu1 %v6903_v44  ;;  %1637 = vmatpush.msra.mxu2 %v6930_v37  ;;  %9653 = vst [vmem:[#allocation48_spill] sm:$0xff] %v6941_v43 }
 0x1c5   :  { %1681 = vmatpush.msra.mxu3 %v6937_v25  ;;  %1556 = vmatpush.msrb.mxu0 %v6941_v43  ;;  %v6959_v25 = vld [vmem:[#allocation7 + $0x18] sm:$0xff] }
 0x1c6   :  { %1596 = vmatpush.msrb.mxu1 %v6915_v39  ;;  %v6945_v39 = vld [vmem:[#allocation7 + $0x28] sm:$0xff]  ;;  %9660 = vst [vmem:[#allocation55_spill] sm:$0xff] %v6959_v25 }
 0x1c7   :  { %9655 = vst [vmem:[#allocation50_spill] sm:$0xff] %v6945_v39  ;;  %1638 = vmatpush.msra.mxu2 %v6945_v39  ;;  %1682 = vmatpush.msra.mxu3 %v6949_v33  ;;  %v390_v33 = vadd.f32 %v5676_v35, %v6660_v30 }
 0x1c8   :  { %1597 = vmatpush.msrb.mxu1 %v6928_v36  ;;  %v6951_v36 = vld [vmem:[#allocation7] sm:$0xff] }
 0x1c9   :  { %9657 = vst [vmem:[#allocation52_spill] sm:$0xff] %v6951_v36  ;;  %1557 = vmatpush.msrb.mxu0 %v6951_v36  ;;  %1683 = vmatpush.msra.mxu3 %v6959_v25 }
 0x1ca   :  { %1598 = vmatpush.msrb.mxu1 %v6943_v41  ;;  %v5682_v41 = vld [vmem:[%s9428_s3 + $0x3] ss:$0 sm:$0xff] }
 0x1cb   :  { %1713 = vmatpush.msra.mxu0 %v6784_v11  ;;  %1839 = vmatpush.msrb.mxu3 %v6792_v38  ;;  %v444_v25 = vadd.f32 %v5682_v41, %v6664_v32 }
 0x1cc   :  { %1599 = vmatpush.msrb.mxu1 %v6953_v45 }
 0x1cd   :  { %1714 = vmatpush.msra.mxu0 %v6796_v24  ;;  %1840 = vmatpush.msrb.mxu3 %v6804_v14 }
 0x1ce   :  { %1755 = vmatpush.msra.mxu1 %v6786_v53 }
 0x1cf   :  { %1715 = vmatpush.msra.mxu0 %v6726_v61  ;;  %1841 = vmatpush.msrb.mxu3 %v6812_v46 }
 0x1d0   :  { %1756 = vmatpush.msra.mxu1 %v6798_v12 }
 0x1d1   :  { %1716 = vmatpush.msra.mxu0 %v6729_v62  ;;  %1842 = vmatpush.msrb.mxu3 %v6822_v20 }
 0x1d2   :  { %1757 = vmatpush.msra.mxu1 %v6808_v42 }
 0x1d3   :  { %1717 = vmatpush.msra.mxu0 %v6828_v17  ;;  %1843 = vmatpush.msrb.mxu3 %v6836_v18 }
 0x1d4   :  { %1758 = vmatpush.msra.mxu1 %v6818_v16 }
 0x1d5   :  { %1718 = vmatpush.msra.mxu0 %v6733_v63  ;;  %1844 = vmatpush.msrb.mxu3 %v6844_v58 }
 0x1d6   :  { %1759 = vmatpush.msra.mxu1 %v6830_v22 }
 0x1d7   :  { %1719 = vmatpush.msra.mxu0 %v6736_v0  ;;  %1845 = vmatpush.msrb.mxu3 %v6854_v6 }
 0x1d8   :  { %1760 = vmatpush.msra.mxu1 %v6840_v26 }
 0x1d9   :  { %1720 = vmatpush.msra.mxu0 %v6739_v1  ;;  %1846 = vmatpush.msrb.mxu3 %v6864_v9 }
 0x1da   :  { %1761 = vmatpush.msra.mxu1 %v6850_v4 }
 0x1db   :  { %1721 = vmatpush.msra.mxu0 %v6742_v2  ;;  %1847 = vmatpush.msrb.mxu3 %v6874_v57 }
 0x1dc   :  { %1762 = vmatpush.msra.mxu1 %v6860_v27 }
 0x1dd   :  { %1722 = vmatpush.msra.mxu0 %v6745_v3  ;;  %1848 = vmatpush.msrb.mxu3 %v6884_v10 }
 0x1de   :  { %1763 = vmatpush.msra.mxu1 %v6870_v54 }
 0x1df   :  { %1723 = vmatpush.msra.mxu0 %v6748_v21  ;;  %1849 = vmatpush.msrb.mxu3 %v6894_v52 }
 0x1e0   :  { %1764 = vmatpush.msra.mxu1 %v6880_v49 }
 0x1e1   :  { %1724 = vmatpush.msra.mxu0 %v6754_v5  ;;  %1850 = vmatpush.msrb.mxu3 %v6907_v48 }
 0x1e2   :  { %1765 = vmatpush.msra.mxu1 %v6890_v60 }
 0x1e4   :  { %1766 = vmatpush.msra.mxu1 %v6903_v44 }
 0x235   :  { %v1388_v29 = vpop.f32.mrf.mxu0  ;;  %v1430_v39 = vpop.f32.mrf.mxu1 }
 0x236   :  { %v1391_v50 = vadd.f32 %v1388_v29, %v363_v40  ;;  %v6957_v40 = vld [vmem:[#allocation7 + $0x8] sm:$0xff] }
 0x237   :  { %9659 = vst [vmem:[#allocation54_spill] sm:$0xff] %v6957_v40  ;;  %1639 = vmatpush.msra.mxu2 %v6957_v40 }
 0x238   :  { %v1392_v29 = vmul.f32 0.5, %v1391_v50  ;;  %v5675_v50 = vld [vmem:[%s9428_s3 + $0x2] ss:$0 sm:$0xff] }
 0x239   :  { %1795 = vmatpush.msrb.mxu2 %v6788_v34  ;;  %v417_v30 = vadd.f32 %v5675_v50, %v6662_v31 }
 0x23a   :  { %5757 = vtanh.f32 %v1392_v29 }
 0x23b   :  { %1796 = vmatpush.msrb.mxu2 %v6800_v13  ;;  %v1433_v29 = vadd.f32 %v1430_v39, %v417_v30 }
 0x23c   :  { %v1470_v45 = vpop.f32.mrf.mxu2  ;;  %v1514_v40 = vpop.f32.mrf.mxu3 }
 0x23d   :  { %v1473_v36 = vadd.f32 %v1470_v45, %v390_v33  ;;  %v1517_v33 = vadd.f32 %v1514_v40, %v444_v25  ;;  %1797 = vmatpush.msrb.mxu2 %v6810_v15 }
 0x23f   :  { %v1474_v35 = vmul.f32 0.5, %v1473_v36  ;;  %1798 = vmatpush.msrb.mxu2 %v6820_v19  ;;  %v1518_v32 = vmul.f32 0.5, %v1517_v33 }
 0x240   :  { %v5758_v45 = vpop.eup %5757 }
 0x241   :  { %5759 = vtanh.f32 %v1474_v35  ;;  %v1394_v31 = vmul.f32 0.5, %v5758_v45  ;;  %1799 = vmatpush.msrb.mxu2 %v6832_v23  ;;  %v9662_v45 = vld [vmem:[#allocation40_spill] sm:$0xff] }
 0x242   :  { %5761 = vtanh.f32 %v1433_v29  ;;  %1725 = vmatpush.msra.mxu0 %v9662_v45  ;;  %v9663_v29 = vld [vmem:[#allocation41_spill] sm:$0xff] }
 0x243   :  { %1800 = vmatpush.msrb.mxu2 %v6842_v55  ;;  %v1395_v39 = vadd.f32 0.5, %v1394_v31  ;;  %5763 = vtanh.f32 %v1518_v32  ;;  %1767 = vmatpush.msra.mxu1 %v9663_v29  ;;  %v9664_v31 = vld [vmem:[#allocation42_spill] sm:$0xff]  ;;  %v9665_v32 = vld [vmem:[#allocation43_spill] sm:$0xff] }
 0x244   :  { %1851 = vmatpush.msrb.mxu3 %v9665_v32 }
 0x245   :  { %1801 = vmatpush.msrb.mxu2 %v6852_v28 }
 0x247   :  { %v5760_v36 = vpop.eup %5759  ;;  %1802 = vmatpush.msrb.mxu2 %v6862_v8 }
 0x248   :  { %v1476_v41 = vmul.f32 0.5, %v5760_v36  ;;  %v5762_v40 = vpop.eup %5761 }
 0x249   :  { %v1435_v50 = vmul.f32 %v5762_v40, %v1395_v39  ;;  %1803 = vmatpush.msrb.mxu2 %v6872_v59  ;;  %v5764_v35 = vpop.eup %5763  ;;  %v9666_v39 = vld [vmem:[#allocation44_spill] sm:$0xff]  ;;  %v9668_v40 = vld [vmem:[#allocation47_spill] sm:$0xff] }
 0x24a   :  { %v1477_v25 = vadd.f32 0.5, %v1476_v41  ;;  %1726 = vmatpush.msra.mxu0 %v9666_v39  ;;  %v9667_v41 = vld [vmem:[#allocation45_spill] sm:$0xff]  ;;  %1852 = vmatpush.msrb.mxu3 %v9668_v40 }
 0x24b   :  { %1804 = vmatpush.msrb.mxu2 %v6882_v56  ;;  %1768 = vmatpush.msra.mxu1 %v9667_v41 }
 0x24c   :  { %v1478_v30 = vmul.f32 %v1477_v25, %v6775_v7  ;;  %v1520_v7 = vmul.f32 0.5, %v5764_v35  ;;  %1727 = vmatpush.msra.mxu0 %v6941_v43  ;;  %v9671_v35 = vld [vmem:[#allocation50_spill] sm:$0xff]  ;;  %v9676_v43 = vld [vmem:[#allocation55_spill] sm:$0xff] }
 0x24d   :  { %1805 = vmatpush.msrb.mxu2 %v6892_v51 }
 0x24e   :  { %v7013_v33 = vadd.f32 %v1478_v30, %v1435_v50  ;;  %v1521_v36 = vadd.f32 0.5, %v1520_v7  ;;  %v9670_v30 = vld [vmem:[#allocation49_spill] sm:$0xff]  ;;  %v9673_v7 = vld [vmem:[#allocation52_spill] sm:$0xff] }
 0x24f   :  { %1806 = vmatpush.msrb.mxu2 %v6905_v47  ;;  %1769 = vmatpush.msra.mxu1 %v9670_v30 }
 0x250   :  { %9661 = vst [vmem:[#allocation56_spill] sm:$0xff] %v7013_v33  ;;  %5765 = vtanh.f32 %v7013_v33  ;;  %v9672_v33 = vld [vmem:[#allocation51_spill] sm:$0xff]  ;;  %1728 = vmatpush.msra.mxu0 %v9673_v7 }
 0x251   :  { %1807 = vmatpush.msrb.mxu2 %v9664_v31  ;;  %1853 = vmatpush.msrb.mxu3 %v9672_v33 }
 0x253   :  { %1808 = vmatpush.msrb.mxu2 %v6930_v37  ;;  %1854 = vmatpush.msrb.mxu3 %v9676_v43 }
 0x255   :  { %1809 = vmatpush.msrb.mxu2 %v9671_v35 }
 0x256   :  { %v5766_v25 = vpop.eup %5765 }
 0x257   :  { %v7034_v50 = vmul.f32 %v5766_v25, %v1521_v36  ;;  %v9674_v36 = vld [vmem:[#allocation53_spill] sm:$0xff]  ;;  %v9675_v25 = vld [vmem:[#allocation54_spill] sm:$0xff] }
 0x258   :  { %1770 = vmatpush.msra.mxu1 %v9674_v36  ;;  %1810 = vmatpush.msrb.mxu2 %v9675_v25 }
 0x259   :  { %9669 = vst [vmem:[#allocation41_spill] sm:$0xff] %v7034_v50  ;;  %1558 = vmatmul.f32.vlgmr.msrb.gmra.mxu0 %v7034_v50  ;;  %1600 = vmatmul.f32.vlgmr.msrb.gmra.mxu1 %v7034_v50 }
 0x25a   :  { %1640 = vmatmul.f32.vlgmr.msra.gmra.mxu2 %v7034_v50  ;;  %1684 = vmatmul.f32.vlgmr.msra.gmra.mxu3 %v7034_v50  ;;  %v5679_v50 = vld [vmem:[%s9428_s3 + $0x2] ss:$0 sm:$0xff] }
 0x25b   :  { %1884 = vmatpush.msrb.mxu0 %v6784_v11  ;;  %1926 = vmatpush.msrb.mxu1 %v6786_v53 }
 0x25c   :  { %1966 = vmatpush.msra.mxu2 %v6788_v34  ;;  %2010 = vmatpush.msra.mxu3 %v6792_v38 }
 0x25d   :  { %1885 = vmatpush.msrb.mxu0 %v6796_v24  ;;  %1927 = vmatpush.msrb.mxu1 %v6798_v12 }
 0x25e   :  { %1967 = vmatpush.msra.mxu2 %v6800_v13  ;;  %2011 = vmatpush.msra.mxu3 %v6804_v14 }
 0x25f   :  { %1886 = vmatpush.msrb.mxu0 %v6726_v61  ;;  %1928 = vmatpush.msrb.mxu1 %v6808_v42  ;;  %v9677_v61 = vld [vmem:[#allocation48_spill] sm:$0xff] }
 0x260   :  { %1968 = vmatpush.msra.mxu2 %v6810_v15  ;;  %2012 = vmatpush.msra.mxu3 %v6812_v46 }
 0x261   :  { %1887 = vmatpush.msrb.mxu0 %v6729_v62  ;;  %1929 = vmatpush.msrb.mxu1 %v6818_v16  ;;  %v5673_v62 = vld [vmem:[%s9428_s3] ss:$0 sm:$0xff] }
 0x262   :  { %1969 = vmatpush.msra.mxu2 %v6820_v19  ;;  %2013 = vmatpush.msra.mxu3 %v6822_v20 }
 0x263   :  { %1888 = vmatpush.msrb.mxu0 %v6828_v17  ;;  %1930 = vmatpush.msrb.mxu1 %v6830_v22  ;;  %v9681_v17 = vld [vmem:[#allocation20_spill] sm:$0xff] }
 0x264   :  { %1970 = vmatpush.msra.mxu2 %v6832_v23  ;;  %2014 = vmatpush.msra.mxu3 %v6836_v18 }
 0x265   :  { %1889 = vmatpush.msrb.mxu0 %v6733_v63  ;;  %1931 = vmatpush.msrb.mxu1 %v6840_v26  ;;  %v9678_v63 = vld [vmem:[#allocation17_spill] sm:$0xff] }
 0x266   :  { %1971 = vmatpush.msra.mxu2 %v6842_v55  ;;  %2015 = vmatpush.msra.mxu3 %v6844_v58 }
 0x267   :  { %1890 = vmatpush.msrb.mxu0 %v6736_v0  ;;  %1932 = vmatpush.msrb.mxu1 %v6850_v4  ;;  %v476_v0 = vadd.f32 %v5673_v62, %v9678_v63 }
 0x268   :  { %1972 = vmatpush.msra.mxu2 %v6852_v28  ;;  %2016 = vmatpush.msra.mxu3 %v6854_v6 }
 0x269   :  { %1891 = vmatpush.msrb.mxu0 %v6739_v1  ;;  %1933 = vmatpush.msrb.mxu1 %v6860_v27 }
 0x26a   :  { %1973 = vmatpush.msra.mxu2 %v6862_v8  ;;  %2017 = vmatpush.msra.mxu3 %v6864_v9 }
 0x26b   :  { %1892 = vmatpush.msrb.mxu0 %v6742_v2  ;;  %1934 = vmatpush.msrb.mxu1 %v6870_v54 }
 0x26c   :  { %1974 = vmatpush.msra.mxu2 %v6872_v59  ;;  %2018 = vmatpush.msra.mxu3 %v6874_v57 }
 0x26d   :  { %1893 = vmatpush.msrb.mxu0 %v6745_v3  ;;  %1935 = vmatpush.msrb.mxu1 %v6880_v49  ;;  %v5680_v3 = vld [vmem:[%s9428_s3 + $0x1] ss:$0 sm:$0xff] }
 0x26e   :  { %1975 = vmatpush.msra.mxu2 %v6882_v56  ;;  %2019 = vmatpush.msra.mxu3 %v6884_v10 }
 0x26f   :  { %1894 = vmatpush.msrb.mxu0 %v6748_v21  ;;  %1936 = vmatpush.msrb.mxu1 %v6890_v60 }
 0x270   :  { %1976 = vmatpush.msra.mxu2 %v6892_v51  ;;  %2020 = vmatpush.msra.mxu3 %v6894_v52 }
 0x271   :  { %1895 = vmatpush.msrb.mxu0 %v6754_v5  ;;  %1937 = vmatpush.msrb.mxu1 %v6903_v44  ;;  %v5686_v5 = vld [vmem:[%s9428_s3 + $0x3] ss:$0 sm:$0xff] }
 0x272   :  { %1977 = vmatpush.msra.mxu2 %v6905_v47  ;;  %2021 = vmatpush.msra.mxu3 %v6907_v48 }
 0x273   :  { %1896 = vmatpush.msrb.mxu0 %v9662_v45  ;;  %1938 = vmatpush.msrb.mxu1 %v9663_v29 }
 0x274   :  { %1978 = vmatpush.msra.mxu2 %v9664_v31  ;;  %2022 = vmatpush.msra.mxu3 %v9665_v32 }
 0x275   :  { %1897 = vmatpush.msrb.mxu0 %v9666_v39  ;;  %1939 = vmatpush.msrb.mxu1 %v9667_v41 }
 0x276   :  { %1979 = vmatpush.msra.mxu2 %v6930_v37  ;;  %2023 = vmatpush.msra.mxu3 %v9668_v40 }
 0x277   :  { %1898 = vmatpush.msrb.mxu0 %v9677_v61  ;;  %1940 = vmatpush.msrb.mxu1 %v9670_v30 }
 0x278   :  { %1980 = vmatpush.msra.mxu2 %v9671_v35  ;;  %2024 = vmatpush.msra.mxu3 %v9672_v33 }
 0x279   :  { %1899 = vmatpush.msrb.mxu0 %v9673_v7  ;;  %1941 = vmatpush.msrb.mxu1 %v9674_v36  ;;  %v9679_v7 = vld [vmem:[#allocation19_spill] sm:$0xff] }
 0x27a   :  { %1981 = vmatpush.msra.mxu2 %v9675_v25  ;;  %2025 = vmatpush.msra.mxu3 %v9676_v43  ;;  %v503_v61 = vadd.f32 %v5680_v3, %v9679_v7  ;;  %v530_v43 = vadd.f32 %v5679_v50, %v9681_v17 }
 0x2d6   :  { %v1559_v1 = vpop.f32.mrf.mxu0  ;;  %v1601_v45 = vpop.f32.mrf.mxu1 }
 0x2d7   :  { %v1562_v2 = vadd.f32 %v1559_v1, %v476_v0  ;;  %v9680_v0 = vld [vmem:[#allocation21_spill] sm:$0xff]  ;;  %v1604_v33 = vadd.f32 %v1601_v45, %v530_v43 }
 0x2d8   :  { %v557_v1 = vadd.f32 %v5686_v5, %v9680_v0 }
 0x2d9   :  { %v1563_v21 = vmul.f32 0.5, %v1562_v2 }
 0x2db   :  { %5767 = vtanh.f32 %v1563_v21  ;;  %v9682_v21 = vld [vmem:[#allocation56_spill] sm:$0xff] }
 0x2dd   :  { %v1641_v39 = vpop.f32.mrf.mxu2  ;;  %v1685_v63 = vpop.f32.mrf.mxu3 }
 0x2de   :  { %v1644_v62 = vadd.f32 %v1641_v39, %v503_v61  ;;  %v1688_v25 = vadd.f32 %v1685_v63, %v557_v1  ;;  %v7218_v63 = vld [vmem:[#allocation7 + $0x140] sm:$0xff] }
 0x2df   :  { %v7221_v1 = vld [vmem:[#allocation7 + $0x120] sm:$0xff] }
 0x2e0   :  { %v1645_v2 = vmul.f32 0.5, %v1644_v62  ;;  %v1689_v30 = vmul.f32 0.5, %v1688_v25  ;;  %v2052_v25 = vld [vmem:[#allocation7 + $0x1a0] sm:$0xff]  ;;  %v9698_v62 = vld [vmem:[#allocation39_spill] sm:$0xff] }
 0x2e1   :  { %v5768_v36 = vpop.eup %5767 }
 0x2e2   :  { %5769 = vtanh.f32 %v1645_v2  ;;  %v1565_v35 = vmul.f32 0.5, %v5768_v36  ;;  %v7224_v2 = vld [vmem:[#allocation7 + $0x100] sm:$0xff] }
 0x2e3   :  { %5771 = vtanh.f32 %v1604_v33 }
 0x2e4   :  { %v1566_v37 = vadd.f32 0.5, %v1565_v35  ;;  %5773 = vtanh.f32 %v1689_v30 }
 0x2e8   :  { %v5770_v40 = vpop.eup %5769 }
 0x2e9   :  { %v1647_v7 = vmul.f32 0.5, %v5770_v40  ;;  %v5772_v39 = vpop.eup %5771 }
 0x2ea   :  { %v1606_v61 = vmul.f32 %v5772_v39, %v1566_v37  ;;  %v5774_v0 = vpop.eup %5773  ;;  %v9685_v37 = vld [vmem:[#allocation46_spill] sm:$0xff]  ;;  %v7233_v39 = vld [vmem:[#allocation7 + $0xa0] sm:$0xff] }
 0x2eb   :  { %v1648_v3 = vadd.f32 0.5, %v1647_v7  ;;  %v1691_v17 = vmul.f32 0.5, %v5774_v0  ;;  %v7227_v7 = vld [vmem:[#allocation7 + $0xe0] sm:$0xff]  ;;  %v9700_v0 = vld [vmem:[#allocation22_spill] sm:$0xff] }
 0x2ed   :  { %v1649_v5 = vmul.f32 %v1648_v3, %v9682_v21  ;;  %v1692_v43 = vadd.f32 0.5, %v1691_v17  ;;  %v7230_v3 = vld [vmem:[#allocation7 + $0xc0] sm:$0xff] }
 0x2ee   :  { %v7239_v21 = vld [vmem:[#allocation7 + $0x80] sm:$0xff] }
 0x2ef   :  { %v7129_v41 = vadd.f32 %v1649_v5, %v1606_v61  ;;  %v5681_v61 = vld [vmem:[%s9428_s3] ss:$0 sm:$0xff]  ;;  %v9699_v5 = vld [vmem:[#allocation40_spill] sm:$0xff] }
 0x2f0   :  { %v702_v17 = vadd.f32 %v5681_v61, %v9700_v0  ;;  %v2344_v0 = vld [vmem:[#allocation7 + $0x118] sm:$0xff] }
 0x2f1   :  { %5775 = vtanh.f32 %v7129_v41 }
 0x2f7   :  { %v5776_v45 = vpop.eup %5775 }
 0x2f8   :  { %v7132_v50 = vmul.f32 %v5776_v45, %v1692_v43  ;;  %v9701_v45 = vld [vmem:[#allocation44_spill] sm:$0xff] }
 0x2fa   :  { %9683 = vst [vmem:[#allocation42_spill] sm:$0xff] %v7132_v50  ;;  %1729 = vmatmul.f32.vlgmr.msra.gmra.mxu0 %v7132_v50  ;;  %1771 = vmatmul.f32.vlgmr.msra.gmra.mxu1 %v7132_v50 }
 0x2fb   :  { %1811 = vmatmul.f32.vlgmr.msrb.gmra.mxu2 %v7132_v50  ;;  %1855 = vmatmul.f32.vlgmr.msrb.gmra.mxu3 %v7132_v50  ;;  %v7456_v50 = vld [vmem:[#allocation10 + $0x30] sm:$0xff] }
 0x2fc   :  { %2055 = vmatpush.msra.mxu0 %v6784_v11  ;;  %2097 = vmatpush.msra.mxu1 %v6786_v53  ;;  %v5684_v53 = vld [vmem:[%s9428_s3 + $0x1] ss:$0 sm:$0xff]  ;;  %9726 = vst [vmem:[#allocation39_spill] sm:$0xff] %v7456_v50 }
 0x2fd   :  { %2137 = vmatpush.msrb.mxu2 %v6788_v34  ;;  %2181 = vmatpush.msrb.mxu3 %v6792_v38  ;;  %v5690_v38 = vld [vmem:[%s9428_s3 + $0x3] ss:$0 sm:$0xff] }
 0x2fe   :  { %2056 = vmatpush.msra.mxu0 %v6796_v24  ;;  %2098 = vmatpush.msra.mxu1 %v6798_v12  ;;  %v5683_v24 = vld [vmem:[%s9428_s3 + $0x2] ss:$0 sm:$0xff]  ;;  %v9694_v12 = vld [vmem:[#allocation23_spill] sm:$0xff] }
 0x2ff   :  { %2138 = vmatpush.msrb.mxu2 %v6800_v13  ;;  %2182 = vmatpush.msrb.mxu3 %v6804_v14  ;;  %v616_v13 = vadd.f32 %v5684_v53, %v9694_v12  ;;  %v2266_v53 = vld [vmem:[#allocation7 + $0x1d0] sm:$0xff] }
 0x300   :  { %2099 = vmatpush.msra.mxu1 %v6808_v42  ;;  %2057 = vmatpush.msra.mxu0 %v2052_v25  ;;  %v2265_v12 = vld [vmem:[#allocation7 + $0x1b0] sm:$0xff] }
 0x301   :  { %2139 = vmatpush.msrb.mxu2 %v6810_v15  ;;  %2183 = vmatpush.msrb.mxu3 %v6812_v46  ;;  %v9695_v46 = vld [vmem:[#allocation25_spill] sm:$0xff] }
 0x302   :  { %2100 = vmatpush.msra.mxu1 %v6818_v16  ;;  %v670_v16 = vadd.f32 %v5690_v38, %v9695_v46  ;;  %v2306_v38 = vld [vmem:[#allocation7 + $0x1c8] sm:$0xff] }
 0x303   :  { %2140 = vmatpush.msrb.mxu2 %v6820_v19  ;;  %2184 = vmatpush.msrb.mxu3 %v6822_v20  ;;  %v9696_v20 = vld [vmem:[#allocation24_spill] sm:$0xff]  ;;  %v9705_v46 = vld [vmem:[#allocation29_spill] sm:$0xff] }
 0x304   :  { %2101 = vmatpush.msra.mxu1 %v6830_v22  ;;  %v643_v22 = vadd.f32 %v5683_v24, %v9696_v20  ;;  %v2350_v24 = vld [vmem:[#allocation7 + $0x1d8] sm:$0xff]  ;;  %v2264_v20 = vld [vmem:[#allocation7 + $0x190] sm:$0xff] }
 0x305   :  { %2141 = vmatpush.msrb.mxu2 %v6832_v23  ;;  %2185 = vmatpush.msrb.mxu3 %v6836_v18 }
 0x306   :  { %2102 = vmatpush.msra.mxu1 %v6840_v26 }
 0x307   :  { %2142 = vmatpush.msrb.mxu2 %v6842_v55  ;;  %2186 = vmatpush.msrb.mxu3 %v6844_v58 }
 0x308   :  { %2103 = vmatpush.msra.mxu1 %v6850_v4 }
 0x309   :  { %2143 = vmatpush.msrb.mxu2 %v6852_v28  ;;  %2187 = vmatpush.msrb.mxu3 %v6854_v6 }
 0x30a   :  { %2104 = vmatpush.msra.mxu1 %v6860_v27 }
 0x30b   :  { %2144 = vmatpush.msrb.mxu2 %v6862_v8  ;;  %2188 = vmatpush.msrb.mxu3 %v6864_v9 }
 0x30c   :  { %2105 = vmatpush.msra.mxu1 %v6870_v54  ;;  %v9684_v54 = vld [vmem:[#allocation45_spill] sm:$0xff] }
 0x30d   :  { %2145 = vmatpush.msrb.mxu2 %v6872_v59  ;;  %2189 = vmatpush.msrb.mxu3 %v6874_v57  ;;  %v5677_v57 = vld [vmem:[%s9428_s3] ss:$0 sm:$0xff]  ;;  %v9693_v59 = vld [vmem:[#allocation18_spill] sm:$0xff] }
 0x30e   :  { %2106 = vmatpush.msra.mxu1 %v6880_v49  ;;  %v9686_v49 = vld [vmem:[#allocation47_spill] sm:$0xff] }
 0x30f   :  { %2146 = vmatpush.msrb.mxu2 %v6882_v56  ;;  %2190 = vmatpush.msrb.mxu3 %v6884_v10  ;;  %v9692_v56 = vld [vmem:[#allocation55_spill] sm:$0xff] }
 0x310   :  { %2107 = vmatpush.msra.mxu1 %v6890_v60  ;;  %v589_v60 = vadd.f32 %v5677_v57, %v9693_v59  ;;  %v2307_v57 = vld [vmem:[#allocation7 + $0x1e8] sm:$0xff]  ;;  %v9704_v59 = vld [vmem:[#allocation27_spill] sm:$0xff] }
 0x311   :  { %2147 = vmatpush.msrb.mxu2 %v6892_v51  ;;  %2191 = vmatpush.msrb.mxu3 %v6894_v52  ;;  %v9687_v51 = vld [vmem:[#allocation49_spill] sm:$0xff]  ;;  %v9688_v52 = vld [vmem:[#allocation50_spill] sm:$0xff] }
 0x312   :  { %2108 = vmatpush.msra.mxu1 %v6903_v44  ;;  %v9689_v44 = vld [vmem:[#allocation51_spill] sm:$0xff] }
 0x313   :  { %2148 = vmatpush.msrb.mxu2 %v6905_v47  ;;  %2192 = vmatpush.msrb.mxu3 %v6907_v48  ;;  %v9690_v47 = vld [vmem:[#allocation53_spill] sm:$0xff]  ;;  %v9691_v48 = vld [vmem:[#allocation54_spill] sm:$0xff] }
 0x314   :  { %2109 = vmatpush.msra.mxu1 %v9663_v29 }
 0x315   :  { %2149 = vmatpush.msrb.mxu2 %v9664_v31  ;;  %2193 = vmatpush.msrb.mxu3 %v9665_v32 }
 0x316   :  { %2110 = vmatpush.msra.mxu1 %v9684_v54 }
 0x317   :  { %2150 = vmatpush.msrb.mxu2 %v9685_v37  ;;  %2194 = vmatpush.msrb.mxu3 %v9686_v49  ;;  %v5688_v37 = vld [vmem:[%s9428_s3 + $0x1] ss:$0 sm:$0xff]  ;;  %v9702_v49 = vld [vmem:[#allocation48_spill] sm:$0xff] }
 0x318   :  { %2111 = vmatpush.msra.mxu1 %v9687_v51 }
 0x319   :  { %2151 = vmatpush.msrb.mxu2 %v9688_v52  ;;  %2195 = vmatpush.msrb.mxu3 %v9689_v44  ;;  %v5687_v52 = vld [vmem:[%s9428_s3 + $0x2] ss:$0 sm:$0xff]  ;;  %v5693_v44 = vld [vmem:[%s9428_s3 + $0x3] ss:$0 sm:$0xff] }
 0x31a   :  { %2112 = vmatpush.msra.mxu1 %v9690_v47  ;;  %v9703_v47 = vld [vmem:[#allocation52_spill] sm:$0xff] }
 0x31b   :  { %2152 = vmatpush.msrb.mxu2 %v9691_v48  ;;  %2196 = vmatpush.msrb.mxu3 %v9692_v56  ;;  %v2225_v48 = vld [vmem:[#allocation7 + $0x1e0] sm:$0xff]  ;;  %v2267_v56 = vld [vmem:[#allocation7 + $0x1f0] sm:$0xff] }
 0x377   :  { %v1730_v10 = vpop.f32.mrf.mxu0  ;;  %v1772_v19 = vpop.f32.mrf.mxu1 }
 0x378   :  { %v1733_v11 = vadd.f32 %v1730_v10, %v589_v60  ;;  %v1775_v55 = vadd.f32 %v1772_v19, %v643_v22  ;;  %v729_v60 = vadd.f32 %v5688_v37, %v9704_v59  ;;  %v2351_v10 = vld [vmem:[#allocation7 + $0x1f8] sm:$0xff]  ;;  %v9706_v22 = vld [vmem:[#allocation28_spill] sm:$0xff] }
 0x37a   :  { %v1734_v34 = vmul.f32 0.5, %v1733_v11  ;;  %v2224_v11 = vld [vmem:[#allocation7 + $0x1c0] sm:$0xff] }
 0x37c   :  { %5777 = vtanh.f32 %v1734_v34 }
 0x37e   :  { %v1812_v14 = vpop.f32.mrf.mxu2  ;;  %v1856_v15 = vpop.f32.mrf.mxu3 }
 0x37f   :  { %v1815_v42 = vadd.f32 %v1812_v14, %v616_v13  ;;  %v1859_v18 = vadd.f32 %v1856_v15, %v670_v16  ;;  %v2349_v15 = vld [vmem:[#allocation7 + $0x1b8] sm:$0xff]  ;;  %v783_v16 = vadd.f32 %v5693_v44, %v9705_v46  ;;  %v2293_v46 = vld [vmem:[#allocation7 + $0x28] sm:$0xff] }
 0x381   :  { %v1816_v23 = vmul.f32 0.5, %v1815_v42  ;;  %v1860_v4 = vmul.f32 0.5, %v1859_v18  ;;  %v2305_v42 = vld [vmem:[#allocation7 + $0x1a8] sm:$0xff] }
 0x382   :  { %v5778_v26 = vpop.eup %5777 }
 0x383   :  { %5779 = vtanh.f32 %v1816_v23  ;;  %v1736_v58 = vmul.f32 0.5, %v5778_v26  ;;  %v756_v23 = vadd.f32 %v5687_v52, %v9706_v22  ;;  %v2304_v26 = vld [vmem:[#allocation7 + $0x188] sm:$0xff]  ;;  %v2342_v52 = vld [vmem:[#allocation7 + $0xd8] sm:$0xff] }
 0x384   :  { %5781 = vtanh.f32 %v1775_v55  ;;  %v2348_v55 = vld [vmem:[#allocation7 + $0x198] sm:$0xff]  ;;  %v2292_v22 = vld [vmem:[#allocation7 + $0x8] sm:$0xff] }
 0x385   :  { %v1737_v6 = vadd.f32 0.5, %v1736_v58  ;;  %5783 = vtanh.f32 %v1860_v4  ;;  %v2221_v4 = vld [vmem:[#allocation7 + $0x160] sm:$0xff] }
 0x389   :  { %v5780_v28 = vpop.eup %5779 }
 0x38a   :  { %v1818_v27 = vmul.f32 0.5, %v5780_v28  ;;  %v5782_v9 = vpop.eup %5781  ;;  %v2263_v28 = vld [vmem:[#allocation7 + $0x170] sm:$0xff] }
 0x38b   :  { %v1777_v33 = vmul.f32 %v5782_v9, %v1737_v6  ;;  %v5784_v31 = vpop.eup %5783  ;;  %v2347_v9 = vld [vmem:[#allocation7 + $0x178] sm:$0xff] }
 0x38c   :  { %v1819_v8 = vadd.f32 0.5, %v1818_v27  ;;  %v1862_v40 = vmul.f32 0.5, %v5784_v31  ;;  %v2346_v31 = vld [vmem:[#allocation7 + $0x158] sm:$0xff] }
 0x38e   :  { %v1820_v29 = vmul.f32 %v1819_v8, %v7129_v41  ;;  %v1863_v30 = vadd.f32 0.5, %v1862_v40  ;;  %v7214_v41 = vld [vmem:[#allocation7 + $0x180] sm:$0xff]  ;;  %v2303_v8 = vld [vmem:[#allocation7 + $0x168] sm:$0xff] }
 0x38f   :  { %2058 = vmatpush.msra.mxu0 %v7214_v41 }
 0x390   :  { %v7205_v32 = vadd.f32 %v1820_v29, %v1777_v33  ;;  %v2262_v33 = vld [vmem:[#allocation7 + $0x150] sm:$0xff]  ;;  %v2302_v29 = vld [vmem:[#allocation7 + $0x148] sm:$0xff] }
 0x391   :  { %2059 = vmatpush.msra.mxu0 %v9698_v62  ;;  %v2260_v62 = vld [vmem:[#allocation7 + $0x110] sm:$0xff] }
 0x392   :  { %5785 = vtanh.f32 %v7205_v32 }
 0x393   :  { %2060 = vmatpush.msra.mxu0 %v7218_v63 }
 0x395   :  { %2061 = vmatpush.msra.mxu0 %v7221_v1 }
 0x397   :  { %2062 = vmatpush.msra.mxu0 %v7224_v2 }
 0x398   :  { %v5786_v35 = vpop.eup %5785 }
 0x399   :  { %v7208_v36 = vmul.f32 %v5786_v35, %v1863_v30  ;;  %2063 = vmatpush.msra.mxu0 %v7227_v7  ;;  %v2261_v35 = vld [vmem:[#allocation7 + $0x130] sm:$0xff] }
 0x39b   :  { %9697 = vst [vmem:[#allocation43_spill] sm:$0xff] %v7208_v36  ;;  %1900 = vmatmul.f32.vlgmr.msrb.gmra.mxu0 %v7208_v36  ;;  %1942 = vmatmul.f32.vlgmr.msrb.gmra.mxu1 %v7208_v36 }
 0x39c   :  { %1982 = vmatmul.f32.vlgmr.msra.gmra.mxu2 %v7208_v36  ;;  %2026 = vmatmul.f32.vlgmr.msra.gmra.mxu3 %v7208_v36  ;;  %v7454_v36 = vld [vmem:[#allocation10 + $0x28] sm:$0xff] }
 0x39d   :  { %2064 = vmatpush.msra.mxu0 %v7230_v3  ;;  %2268 = vmatpush.msrb.mxu1 %v2267_v56  ;;  %v2341_v56 = vld [vmem:[#allocation7 + $0xb8] sm:$0xff]  ;;  %9725 = vst [vmem:[#allocation24_spill] sm:$0xff] %v7454_v36 }
 0x39e   :  { %2308 = vmatpush.msra.mxu2 %v2307_v57  ;;  %2352 = vmatpush.msra.mxu3 %v2351_v10  ;;  %v2340_v10 = vld [vmem:[#allocation7 + $0x98] sm:$0xff] }
 0x39f   :  { %2065 = vmatpush.msra.mxu0 %v7233_v39  ;;  %2269 = vmatpush.msrb.mxu1 %v2266_v53  ;;  %v2295_v53 = vld [vmem:[#allocation7 + $0x68] sm:$0xff] }
 0x3a0   :  { %2309 = vmatpush.msra.mxu2 %v2306_v38  ;;  %2353 = vmatpush.msra.mxu3 %v2350_v24  ;;  %v2212_v38 = vld [vmem:[#allocation7 + $0x40] sm:$0xff]  ;;  %v2254_v24 = vld [vmem:[#allocation7 + $0x50] sm:$0xff] }
 0x3a1   :  { %2066 = vmatpush.msra.mxu0 %v7239_v21  ;;  %2270 = vmatpush.msrb.mxu1 %v2265_v12  ;;  %v2338_v12 = vld [vmem:[#allocation7 + $0x58] sm:$0xff] }
 0x3a2   :  { %2310 = vmatpush.msra.mxu2 %v2305_v42  ;;  %2354 = vmatpush.msra.mxu3 %v2349_v15  ;;  %v2211_v42 = vld [vmem:[#allocation7 + $0x20] sm:$0xff]  ;;  %v2253_v15 = vld [vmem:[#allocation7 + $0x30] sm:$0xff] }
 0x3a3   :  { %2067 = vmatpush.msra.mxu0 %v9699_v5  ;;  %2271 = vmatpush.msrb.mxu1 %v2264_v20  ;;  %v2300_v5 = vld [vmem:[#allocation7 + $0x108] sm:$0xff]  ;;  %v2252_v20 = vld [vmem:[#allocation7 + $0x10] sm:$0xff] }
 0x3a4   :  { %2311 = vmatpush.msra.mxu2 %v2304_v26  ;;  %2355 = vmatpush.msra.mxu3 %v2348_v55  ;;  %v7279_v26 = vld [vmem:[#allocation10 + $0x1e8] sm:$0xff]  ;;  %v7281_v55 = vld [vmem:[#allocation10 + $0x1f0] sm:$0xff] }
 0x3a5   :  { %2068 = vmatpush.msra.mxu0 %v9701_v45  ;;  %2272 = vmatpush.msrb.mxu1 %v2263_v28  ;;  %v2259_v45 = vld [vmem:[#allocation7 + $0xf0] sm:$0xff]  ;;  %v7291_v28 = vld [vmem:[#allocation10 + $0x1c8] sm:$0xff] }
 0x3a6   :  { %2312 = vmatpush.msra.mxu2 %v2303_v8  ;;  %2356 = vmatpush.msra.mxu3 %v2347_v9  ;;  %v7301_v8 = vld [vmem:[#allocation10 + $0x1a0] sm:$0xff]  ;;  %v7303_v9 = vld [vmem:[#allocation10 + $0x1a8] sm:$0xff] }
 0x3a7   :  { %2069 = vmatpush.msra.mxu0 %v9702_v49  ;;  %2273 = vmatpush.msrb.mxu1 %v2262_v33  ;;  %v2258_v49 = vld [vmem:[#allocation7 + $0xd0] sm:$0xff] }
 0x3a8   :  { %2313 = vmatpush.msra.mxu2 %v2302_v29  ;;  %2357 = vmatpush.msra.mxu3 %v2346_v31  ;;  %v7305_v33 = vld [vmem:[#allocation10 + $0x1b0] sm:$0xff]  ;;  %v7309_v29 = vld [vmem:[#allocation10 + $0x1b8] sm:$0xff]  ;;  %v7313_v31 = vld [vmem:[#allocation10 + $0x180] sm:$0xff] }
 0x3a9   :  { %2070 = vmatpush.msra.mxu0 %v9703_v47  ;;  %2274 = vmatpush.msrb.mxu1 %v2261_v35  ;;  %v7321_v35 = vld [vmem:[#allocation10 + $0x198] sm:$0xff] }
 0x3ab   :  { %2226 = vmatpush.msrb.mxu0 %v2225_v48  ;;  %2275 = vmatpush.msrb.mxu1 %v2260_v62  ;;  %v2257_v48 = vld [vmem:[#allocation7 + $0xb0] sm:$0xff] }
 0x3ac   :  { %v7329_v62 = vld [vmem:[#allocation10 + $0x170] sm:$0xff] }
 0x3ad   :  { %2227 = vmatpush.msrb.mxu0 %v2224_v11  ;;  %2276 = vmatpush.msrb.mxu1 %v2259_v45  ;;  %v7349_v45 = vld [vmem:[#allocation10 + $0x120] sm:$0xff] }
 0x3af   :  { %2228 = vmatpush.msrb.mxu0 %v2052_v25  ;;  %v2301_v25 = vld [vmem:[#allocation7 + $0x128] sm:$0xff]  ;;  %2277 = vmatpush.msrb.mxu1 %v2258_v49  ;;  %v7361_v49 = vld [vmem:[#allocation10 + $0x100] sm:$0xff] }
 0x3b0   :  { %2314 = vmatpush.msra.mxu2 %v2301_v25  ;;  %v7325_v25 = vld [vmem:[#allocation10 + $0x160] sm:$0xff] }
 0x3b1   :  { %2229 = vmatpush.msrb.mxu0 %v7214_v41  ;;  %v2345_v41 = vld [vmem:[#allocation7 + $0x138] sm:$0xff]  ;;  %2278 = vmatpush.msrb.mxu1 %v2257_v48  ;;  %v7377_v48 = vld [vmem:[#allocation10 + $0xf0] sm:$0xff] }
 0x3b2   :  { %2358 = vmatpush.msra.mxu3 %v2345_v41  ;;  %2315 = vmatpush.msra.mxu2 %v2300_v5  ;;  %v7327_v41 = vld [vmem:[#allocation10 + $0x168] sm:$0xff]  ;;  %v7337_v5 = vld [vmem:[#allocation10 + $0x140] sm:$0xff] }
 0x3b3   :  { %2230 = vmatpush.msrb.mxu0 %v2221_v4  ;;  %v7289_v4 = vld [vmem:[#allocation10 + $0x1c0] sm:$0xff] }
 0x3b4   :  { %2359 = vmatpush.msra.mxu3 %v2344_v0  ;;  %v7339_v0 = vld [vmem:[#allocation10 + $0x148] sm:$0xff] }
 0x3b5   :  { %2231 = vmatpush.msrb.mxu0 %v7218_v63  ;;  %v2299_v63 = vld [vmem:[#allocation7 + $0xe8] sm:$0xff] }
 0x3b6   :  { %2316 = vmatpush.msra.mxu2 %v2299_v63  ;;  %v7351_v63 = vld [vmem:[#allocation10 + $0x128] sm:$0xff] }
 0x3b7   :  { %2232 = vmatpush.msrb.mxu0 %v7221_v1  ;;  %v2298_v1 = vld [vmem:[#allocation7 + $0xc8] sm:$0xff] }
 0x3b8   :  { %2317 = vmatpush.msra.mxu2 %v2298_v1  ;;  %v7365_v1 = vld [vmem:[#allocation10 + $0x110] sm:$0xff] }
 0x3b9   :  { %2233 = vmatpush.msrb.mxu0 %v7224_v2  ;;  %v2297_v2 = vld [vmem:[#allocation7 + $0xa8] sm:$0xff] }
 0x3ba   :  { %2318 = vmatpush.msra.mxu2 %v2297_v2  ;;  %v7381_v2 = vld [vmem:[#allocation10 + $0xf8] sm:$0xff] }
 0x3bb   :  { %2234 = vmatpush.msrb.mxu0 %v7227_v7  ;;  %v2256_v7 = vld [vmem:[#allocation7 + $0x90] sm:$0xff] }
 0x3bc   :  { %2279 = vmatpush.msrb.mxu1 %v2256_v7  ;;  %v7389_v7 = vld [vmem:[#allocation10 + $0xd0] sm:$0xff] }
 0x3bd   :  { %2235 = vmatpush.msrb.mxu0 %v7230_v3  ;;  %v2255_v3 = vld [vmem:[#allocation7 + $0x70] sm:$0xff] }
 0x3be   :  { %2280 = vmatpush.msrb.mxu1 %v2255_v3  ;;  %v7401_v3 = vld [vmem:[#allocation10 + $0xb0] sm:$0xff] }
 0x3bf   :  { %2236 = vmatpush.msrb.mxu0 %v7233_v39  ;;  %v2294_v39 = vld [vmem:[#allocation7 + $0x48] sm:$0xff]  ;;  %9709 = vst [vmem:[#allocation21_spill] sm:$0xff] %v7401_v3 }
 0x3c0   :  { %2281 = vmatpush.msrb.mxu1 %v2254_v24  ;;  %v7416_v24 = vld [vmem:[#allocation10 + $0x90] sm:$0xff] }
 0x3c1   :  { %2237 = vmatpush.msrb.mxu0 %v7239_v21  ;;  %9713 = vst [vmem:[#allocation46_spill] sm:$0xff] %v7416_v24 }
 0x3c2   :  { %2282 = vmatpush.msrb.mxu1 %v2253_v15  ;;  %v9719_v15 = vld [vmem:[#allocation26_spill] sm:$0xff] }
 0x3c4   :  { %2283 = vmatpush.msrb.mxu1 %v2252_v20  ;;  %v7441_v20 = vld [vmem:[#allocation10 + $0x50] sm:$0xff] }
 0x3c5   :  { %9722 = vst [vmem:[#allocation18_spill] sm:$0xff] %v7441_v20 }
 0x418   :  { %v1901_v43 = vpop.f32.mrf.mxu0  ;;  %v1943_v19 = vpop.f32.mrf.mxu1 }
 0x419   :  { %v1904_v54 = vadd.f32 %v1901_v43, %v702_v17  ;;  %v1946_v27 = vadd.f32 %v1943_v19, %v756_v23  ;;  %v2210_v19 = vld [vmem:[#allocation7] sm:$0xff]  ;;  %v2336_v23 = vld [vmem:[#allocation7 + $0x18] sm:$0xff] }
 0x41b   :  { %v1905_v51 = vmul.f32 0.5, %v1904_v54  ;;  %v2343_v54 = vld [vmem:[#allocation7 + $0xf8] sm:$0xff] }
 0x41c   :  { %2360 = vmatpush.msra.mxu3 %v2343_v54  ;;  %v7353_v54 = vld [vmem:[#allocation10 + $0x130] sm:$0xff] }
 0x41d   :  { %5787 = vtanh.f32 %v1905_v51 }
 0x41e   :  { %2361 = vmatpush.msra.mxu3 %v2342_v52  ;;  %v7369_v52 = vld [vmem:[#allocation10 + $0x118] sm:$0xff] }
 0x41f   :  { %v1983_v34 = vpop.f32.mrf.mxu2  ;;  %v2027_v14 = vpop.f32.mrf.mxu3 }
 0x420   :  { %v1986_v13 = vadd.f32 %v1983_v34, %v729_v60  ;;  %v2030_v58 = vadd.f32 %v2027_v14, %v783_v16  ;;  %v2296_v60 = vld [vmem:[#allocation7 + $0x88] sm:$0xff]  ;;  %2362 = vmatpush.msra.mxu3 %v2341_v56  ;;  %v2339_v34 = vld [vmem:[#allocation7 + $0x78] sm:$0xff]  ;;  %v7385_v56 = vld [vmem:[#allocation10 + $0xc0] sm:$0xff] }
 0x421   :  { %2319 = vmatpush.msra.mxu2 %v2296_v60  ;;  %v2337_v16 = vld [vmem:[#allocation7 + $0x38] sm:$0xff] }
 0x422   :  { %v1987_v18 = vmul.f32 0.5, %v1986_v13  ;;  %v2031_v30 = vmul.f32 0.5, %v2030_v58  ;;  %2363 = vmatpush.msra.mxu3 %v2340_v10  ;;  %v7283_v58 = vld [vmem:[#allocation10 + $0x1f8] sm:$0xff]  ;;  %v7397_v10 = vld [vmem:[#allocation10 + $0xa0] sm:$0xff] }
 0x423   :  { %v5788_v6 = vpop.eup %5787  ;;  %2320 = vmatpush.msra.mxu2 %v2295_v53  ;;  %v7393_v60 = vld [vmem:[#allocation10 + $0xd8] sm:$0xff] }
 0x424   :  { %5789 = vtanh.f32 %v1987_v18  ;;  %v1907_v40 = vmul.f32 0.5, %v5788_v6  ;;  %2364 = vmatpush.msra.mxu3 %v2339_v34  ;;  %v7277_v18 = vld [vmem:[#allocation10 + $0x1e0] sm:$0xff]  ;;  %v7293_v6 = vld [vmem:[#allocation10 + $0x1d0] sm:$0xff]  ;;  %v7408_v53 = vld [vmem:[#allocation10 + $0xb8] sm:$0xff] }
 0x425   :  { %5791 = vtanh.f32 %v1946_v27  ;;  %2321 = vmatpush.msra.mxu2 %v2294_v39  ;;  %v7297_v27 = vld [vmem:[#allocation10 + $0x1d8] sm:$0xff]  ;;  %9710 = vst [vmem:[#allocation20_spill] sm:$0xff] %v7408_v53  ;;  %v7412_v34 = vld [vmem:[#allocation10 + $0x80] sm:$0xff] }
 0x426   :  { %v1908_v17 = vadd.f32 0.5, %v1907_v40  ;;  %5793 = vtanh.f32 %v2031_v30  ;;  %2365 = vmatpush.msra.mxu3 %v2338_v12  ;;  %v7315_v40 = vld [vmem:[#allocation10 + $0x188] sm:$0xff]  ;;  %v7317_v30 = vld [vmem:[#allocation10 + $0x190] sm:$0xff]  ;;  %9711 = vst [vmem:[#allocation56_spill] sm:$0xff] %v7412_v34  ;;  %v7420_v39 = vld [vmem:[#allocation10 + $0x98] sm:$0xff] }
 0x427   :  { %2322 = vmatpush.msra.mxu2 %v2293_v46  ;;  %9714 = vst [vmem:[#allocation47_spill] sm:$0xff] %v7420_v39  ;;  %v7424_v12 = vld [vmem:[#allocation10 + $0x60] sm:$0xff] }
 0x428   :  { %2366 = vmatpush.msra.mxu3 %v2337_v16  ;;  %9715 = vst [vmem:[#allocation49_spill] sm:$0xff] %v7424_v12  ;;  %v7437_v16 = vld [vmem:[#allocation10 + $0x40] sm:$0xff] }
 0x429   :  { %2323 = vmatpush.msra.mxu2 %v2292_v22  ;;  %9720 = vst [vmem:[#allocation54_spill] sm:$0xff] %v7437_v16  ;;  %v5692_v22 = vld [vmem:[%s9428_s3 + $0x1] ss:$0 sm:$0xff] }
 0x42a   :  { %v5790_v61 = vpop.eup %5789  ;;  %2367 = vmatpush.msra.mxu3 %v2336_v23 }
 0x42b   :  { %v1989_v43 = vmul.f32 0.5, %v5790_v61  ;;  %v5792_v51 = vpop.eup %5791  ;;  %v7333_v61 = vld [vmem:[#allocation10 + $0x178] sm:$0xff] }
 0x42c   :  { %v1948_v44 = vmul.f32 %v5792_v51, %v1908_v17  ;;  %v5794_v57 = vpop.eup %5793  ;;  %v7341_v17 = vld [vmem:[#allocation10 + $0x150] sm:$0xff]  ;;  %v7363_v51 = vld [vmem:[#allocation10 + $0x108] sm:$0xff] }
 0x42d   :  { %v1990_v37 = vadd.f32 0.5, %v1989_v43  ;;  %v2033_v11 = vmul.f32 0.5, %v5794_v57  ;;  %v7345_v43 = vld [vmem:[#allocation10 + $0x158] sm:$0xff]  ;;  %v7387_v57 = vld [vmem:[#allocation10 + $0xc8] sm:$0xff] }
 0x42f   :  { %v1991_v47 = vmul.f32 %v1990_v37, %v7205_v32  ;;  %v2213_v32 = vld [vmem:[#allocation7 + $0x60] sm:$0xff]  ;;  %v2034_v13 = vadd.f32 0.5, %v2033_v11  ;;  %v7357_v37 = vld [vmem:[#allocation10 + $0x138] sm:$0xff] }
 0x430   :  { %2238 = vmatpush.msrb.mxu0 %v2213_v32  ;;  %v7399_v32 = vld [vmem:[#allocation10 + $0xa8] sm:$0xff]  ;;  %v5685_v11 = vld [vmem:[%s9428_s3] ss:$0 sm:$0xff] }
 0x431   :  { %v7266_v59 = vadd.f32 %v1991_v47, %v1948_v44  ;;  %v7373_v44 = vld [vmem:[#allocation10 + $0xe0] sm:$0xff]  ;;  %v7375_v47 = vld [vmem:[#allocation10 + $0xe8] sm:$0xff]  ;;  %9708 = vst [vmem:[#allocation19_spill] sm:$0xff] %v7399_v32  ;;  %v815_v46 = vadd.f32 %v5685_v11, %v9719_v15  ;;  %v7448_v11 = vld [vmem:[#allocation10 + $0x58] sm:$0xff] }
 0x432   :  { %2239 = vmatpush.msrb.mxu0 %v2212_v38  ;;  %v7414_v38 = vld [vmem:[#allocation10 + $0x88] sm:$0xff]  ;;  %9723 = vst [vmem:[#allocation23_spill] sm:$0xff] %v7448_v11 }
 0x433   :  { %5795 = vtanh.f32 %v7266_v59  ;;  %9712 = vst [vmem:[#allocation45_spill] sm:$0xff] %v7414_v38 }
 0x434   :  { %2240 = vmatpush.msrb.mxu0 %v2211_v42  ;;  %v7432_v42 = vld [vmem:[#allocation10 + $0x78] sm:$0xff] }
 0x435   :  { %9718 = vst [vmem:[#allocation53_spill] sm:$0xff] %v7432_v42 }
 0x436   :  { %2241 = vmatpush.msrb.mxu0 %v2210_v19  ;;  %v7439_v19 = vld [vmem:[#allocation10 + $0x48] sm:$0xff] }
 0x437   :  { %9721 = vst [vmem:[#allocation55_spill] sm:$0xff] %v7439_v19 }
 0x439   :  { %v5796_v14 = vpop.eup %5795 }
 0x43a   :  { %v7271_v21 = vmul.f32 %v5796_v14, %v2034_v13  ;;  %v7426_v13 = vld [vmem:[#allocation10 + $0x68] sm:$0xff]  ;;  %v7428_v14 = vld [vmem:[#allocation10 + $0x70] sm:$0xff] }
 0x43b   :  { %9716 = vst [vmem:[#allocation50_spill] sm:$0xff] %v7426_v13 }
 0x43c   :  { %9707 = vst [vmem:[#allocation17_spill] sm:$0xff] %v7271_v21  ;;  %2071 = vmatmul.f32.vlgmr.msra.gmra.mxu0 %v7271_v21  ;;  %2113 = vmatmul.f32.vlgmr.msra.gmra.mxu1 %v7271_v21 }
 0x43d   :  { %2153 = vmatmul.f32.vlgmr.msrb.gmra.mxu2 %v7271_v21  ;;  %2197 = vmatmul.f32.vlgmr.msrb.gmra.mxu3 %v7271_v21  ;;  %9717 = vst [vmem:[#allocation51_spill] sm:$0xff] %v7428_v14  ;;  %v7452_v21 = vld [vmem:[#allocation10 + $0x20] sm:$0xff] }
 0x43e   :  { %2401 = vmatpush.msra.mxu0 %v7277_v18  ;;  %2442 = vmatpush.msra.mxu1 %v7279_v26  ;;  %9724 = vst [vmem:[#allocation25_spill] sm:$0xff] %v7452_v21 }
 0x43f   :  { %2483 = vmatpush.msrb.mxu2 %v7281_v55  ;;  %2524 = vmatpush.msrb.mxu3 %v7283_v58 }
 0x440   :  { %2402 = vmatpush.msra.mxu0 %v7289_v4  ;;  %2443 = vmatpush.msra.mxu1 %v7291_v28 }
 0x441   :  { %2484 = vmatpush.msrb.mxu2 %v7293_v6  ;;  %2525 = vmatpush.msrb.mxu3 %v7297_v27 }
 0x442   :  { %2403 = vmatpush.msra.mxu0 %v7301_v8  ;;  %2444 = vmatpush.msra.mxu1 %v7303_v9 }
 0x443   :  { %2485 = vmatpush.msrb.mxu2 %v7305_v33  ;;  %2526 = vmatpush.msrb.mxu3 %v7309_v29 }
 0x444   :  { %2404 = vmatpush.msra.mxu0 %v7313_v31  ;;  %2445 = vmatpush.msra.mxu1 %v7315_v40 }
 0x445   :  { %2486 = vmatpush.msrb.mxu2 %v7317_v30  ;;  %2527 = vmatpush.msrb.mxu3 %v7321_v35 }
 0x446   :  { %2405 = vmatpush.msra.mxu0 %v7325_v25  ;;  %2446 = vmatpush.msra.mxu1 %v7327_v41 }
 0x447   :  { %2487 = vmatpush.msrb.mxu2 %v7329_v62  ;;  %2528 = vmatpush.msrb.mxu3 %v7333_v61 }
 0x448   :  { %2406 = vmatpush.msra.mxu0 %v7337_v5  ;;  %2447 = vmatpush.msra.mxu1 %v7339_v0 }
 0x449   :  { %2488 = vmatpush.msrb.mxu2 %v7341_v17  ;;  %2529 = vmatpush.msrb.mxu3 %v7345_v43 }
 0x44a   :  { %2407 = vmatpush.msra.mxu0 %v7349_v45  ;;  %2448 = vmatpush.msra.mxu1 %v7351_v63 }
 0x44b   :  { %2489 = vmatpush.msrb.mxu2 %v7353_v54  ;;  %2530 = vmatpush.msrb.mxu3 %v7357_v37 }
 0x44c   :  { %2408 = vmatpush.msra.mxu0 %v7361_v49  ;;  %2449 = vmatpush.msra.mxu1 %v7363_v51 }
 0x44d   :  { %2490 = vmatpush.msrb.mxu2 %v7365_v1  ;;  %2531 = vmatpush.msrb.mxu3 %v7369_v52 }
 0x44e   :  { %2409 = vmatpush.msra.mxu0 %v7373_v44  ;;  %2450 = vmatpush.msra.mxu1 %v7375_v47 }
 0x44f   :  { %2491 = vmatpush.msrb.mxu2 %v7377_v48  ;;  %2532 = vmatpush.msrb.mxu3 %v7381_v2 }
 0x450   :  { %2410 = vmatpush.msra.mxu0 %v7385_v56  ;;  %2451 = vmatpush.msra.mxu1 %v7387_v57 }
 0x451   :  { %2492 = vmatpush.msrb.mxu2 %v7389_v7  ;;  %2533 = vmatpush.msrb.mxu3 %v7393_v60 }
 0x452   :  { %2411 = vmatpush.msra.mxu0 %v7397_v10  ;;  %2452 = vmatpush.msra.mxu1 %v7399_v32 }
 0x453   :  { %2493 = vmatpush.msrb.mxu2 %v7401_v3  ;;  %2534 = vmatpush.msrb.mxu3 %v7408_v53 }
 0x454   :  { %2412 = vmatpush.msra.mxu0 %v7412_v34  ;;  %2453 = vmatpush.msra.mxu1 %v7414_v38 }
 0x455   :  { %2494 = vmatpush.msrb.mxu2 %v7416_v24  ;;  %2535 = vmatpush.msrb.mxu3 %v7420_v39 }
 0x456   :  { %2413 = vmatpush.msra.mxu0 %v7424_v12  ;;  %2454 = vmatpush.msra.mxu1 %v7426_v13  ;;  %v9734_v12 = vld [vmem:[#allocation32_spill] sm:$0xff] }
 0x457   :  { %2495 = vmatpush.msrb.mxu2 %v7428_v14  ;;  %2536 = vmatpush.msrb.mxu3 %v7432_v42  ;;  %v7464_v42 = vld [vmem:[#allocation10 + $0x8] sm:$0xff] }
 0x458   :  { %2414 = vmatpush.msra.mxu0 %v7437_v16  ;;  %2455 = vmatpush.msra.mxu1 %v7439_v19  ;;  %v7460_v16 = vld [vmem:[#allocation10 + $0x38] sm:$0xff]  ;;  %v7462_v19 = vld [vmem:[#allocation10] sm:$0xff]  ;;  %9729 = vst [vmem:[#allocation44_spill] sm:$0xff] %v7464_v42  ;;  %v9733_v14 = vld [vmem:[#allocation33_spill] sm:$0xff] }
 0x459   :  { %2496 = vmatpush.msrb.mxu2 %v7441_v20  ;;  %2537 = vmatpush.msrb.mxu3 %v7448_v11  ;;  %9727 = vst [vmem:[#allocation40_spill] sm:$0xff] %v7460_v16  ;;  %v7470_v11 = vld [vmem:[#allocation10 + $0x18] sm:$0xff] }
 0x45a   :  { %2415 = vmatpush.msra.mxu0 %v7452_v21  ;;  %2456 = vmatpush.msra.mxu1 %v7454_v36  ;;  %9728 = vst [vmem:[#allocation22_spill] sm:$0xff] %v7462_v19  ;;  %v5695_v36 = vld [vmem:[%s9428_s3 + $0x3] ss:$0 sm:$0xff] }
 0x45b   :  { %2497 = vmatpush.msrb.mxu2 %v7456_v50  ;;  %2538 = vmatpush.msrb.mxu3 %v7460_v16  ;;  %9731 = vst [vmem:[#allocation52_spill] sm:$0xff] %v7470_v11  ;;  %v9732_v16 = vld [vmem:[#allocation31_spill] sm:$0xff] }
 0x45c   :  { %2416 = vmatpush.msra.mxu0 %v7462_v19  ;;  %2457 = vmatpush.msra.mxu1 %v7464_v42  ;;  %v842_v50 = vadd.f32 %v5692_v22, %v9732_v16  ;;  %v896_v42 = vadd.f32 %v5695_v36, %v9733_v14 }
 0x45d   :  { %2539 = vmatpush.msrb.mxu3 %v7470_v11 }
 0x4b9   :  { %v2072_v23 = vpop.f32.mrf.mxu0  ;;  %v2114_v13 = vpop.f32.mrf.mxu1 }
 0x4ba   :  { %v2075_v15 = vadd.f32 %v2072_v23, %v815_v46  ;;  %v7468_v23 = vld [vmem:[#allocation10 + $0x10] sm:$0xff] }
 0x4bb   :  { %9730 = vst [vmem:[#allocation48_spill] sm:$0xff] %v7468_v23  ;;  %2498 = vmatpush.msrb.mxu2 %v7468_v23 }
 0x4bc   :  { %v2076_v46 = vmul.f32 0.5, %v2075_v15  ;;  %v5691_v15 = vld [vmem:[%s9428_s3 + $0x2] ss:$0 sm:$0xff] }
 0x4bd   :  { %v869_v39 = vadd.f32 %v5691_v15, %v9734_v12  ;;  %v9748_v15 = vld [vmem:[#allocation53_spill] sm:$0xff] }
 0x4be   :  { %5797 = vtanh.f32 %v2076_v46 }
 0x4bf   :  { %v2117_v34 = vadd.f32 %v2114_v13, %v869_v39 }
 0x4c0   :  { %v2154_v21 = vpop.f32.mrf.mxu2  ;;  %v2198_v19 = vpop.f32.mrf.mxu3 }
 0x4c1   :  { %v2157_v20 = vadd.f32 %v2154_v21, %v842_v50  ;;  %v2201_v38 = vadd.f32 %v2198_v19, %v896_v42  ;;  %v9743_v42 = vld [vmem:[#allocation46_spill] sm:$0xff]  ;;  %v9744_v19 = vld [vmem:[#allocation47_spill] sm:$0xff] }
 0x4c3   :  { %v2158_v24 = vmul.f32 0.5, %v2157_v20  ;;  %v2202_v53 = vmul.f32 0.5, %v2201_v38  ;;  %v9742_v38 = vld [vmem:[#allocation45_spill] sm:$0xff] }
 0x4c4   :  { %v5798_v23 = vpop.eup %5797  ;;  %v9745_v20 = vld [vmem:[#allocation49_spill] sm:$0xff] }
 0x4c5   :  { %5799 = vtanh.f32 %v2158_v24  ;;  %v2078_v11 = vmul.f32 0.5, %v5798_v23  ;;  %v9747_v23 = vld [vmem:[#allocation51_spill] sm:$0xff] }
 0x4c6   :  { %5801 = vtanh.f32 %v2117_v34  ;;  %v9741_v34 = vld [vmem:[#allocation56_spill] sm:$0xff] }
 0x4c7   :  { %v2079_v32 = vadd.f32 0.5, %v2078_v11  ;;  %5803 = vtanh.f32 %v2202_v53  ;;  %v9740_v53 = vld [vmem:[#allocation20_spill] sm:$0xff]  ;;  %v9746_v11 = vld [vmem:[#allocation50_spill] sm:$0xff] }
 0x4cb   :  { %v5800_v3 = vpop.eup %5799 }
 0x4cc   :  { %v2160_v16 = vmul.f32 0.5, %v5800_v3  ;;  %v5802_v50 = vpop.eup %5801  ;;  %v9739_v3 = vld [vmem:[#allocation21_spill] sm:$0xff] }
 0x4cd   :  { %v2119_v21 = vmul.f32 %v5802_v50, %v2079_v32  ;;  %v5804_v14 = vpop.eup %5803  ;;  %v9738_v32 = vld [vmem:[#allocation19_spill] sm:$0xff]  ;;  %v9751_v50 = vld [vmem:[#allocation18_spill] sm:$0xff] }
 0x4ce   :  { %v2161_v22 = vadd.f32 0.5, %v2160_v16  ;;  %v2204_v12 = vmul.f32 0.5, %v5804_v14  ;;  %v9749_v16 = vld [vmem:[#allocation54_spill] sm:$0xff]  ;;  %v9754_v14 = vld [vmem:[#allocation24_spill] sm:$0xff] }
 0x4d0   :  { %v2162_v36 = vmul.f32 %v2161_v22, %v7266_v59  ;;  %v2205_v39 = vadd.f32 0.5, %v2204_v12  ;;  %v9737_v59 = vld [vmem:[#allocation37_spill] sm:$0xff]  ;;  %v9750_v22 = vld [vmem:[#allocation55_spill] sm:$0xff] }
 0x4d1   :  { %v9755_v12 = vld [vmem:[#allocation39_spill] sm:$0xff] }
 0x4d2   :  { %v7486_v46 = vadd.f32 %v2162_v36, %v2119_v21  ;;  %v9752_v21 = vld [vmem:[#allocation23_spill] sm:$0xff]  ;;  %v9753_v36 = vld [vmem:[#allocation25_spill] sm:$0xff] }
 0x4d4   :  { %9735 = vst [vmem:[#allocation27_spill] sm:$0xff] %v7486_v46  ;;  %5805 = vtanh.f32 %v7486_v46  ;;  %v9759_v46 = vld [vmem:[#allocation48_spill] sm:$0xff] }
 0x4da   :  { %v5806_v24 = vpop.eup %5805 }
 0x4db   :  { %v7489_v13 = vmul.f32 %v5806_v24, %v2205_v39  ;;  %v9756_v39 = vld [vmem:[#allocation40_spill] sm:$0xff]  ;;  %v9757_v24 = vld [vmem:[#allocation22_spill] sm:$0xff] }
 0x4dd   :  { %9736 = vst [vmem:[#allocation29_spill] sm:$0xff] %v7489_v13  ;;  %2242 = vmatmul.f32.vlgmr.msrb.gmra.mxu0 %v7489_v13  ;;  %2284 = vmatmul.f32.vlgmr.msrb.gmra.mxu1 %v7489_v13 }
 0x4de   :  { %2324 = vmatmul.f32.vlgmr.msra.gmra.mxu2 %v7489_v13  ;;  %2368 = vmatmul.f32.vlgmr.msra.gmra.mxu3 %v7489_v13  ;;  %v9760_v13 = vld [vmem:[#allocation52_spill] sm:$0xff] }
 0x4df   :  { %2566 = vmatpush.msrb.mxu0 %v7277_v18  ;;  %2607 = vmatpush.msrb.mxu1 %v7279_v26 }
 0x4e0   :  { %2648 = vmatpush.msra.mxu2 %v7281_v55  ;;  %2689 = vmatpush.msra.mxu3 %v7283_v58 }
 0x4e1   :  { %2567 = vmatpush.msrb.mxu0 %v7289_v4  ;;  %2608 = vmatpush.msrb.mxu1 %v7291_v28 }
 0x4e2   :  { %2649 = vmatpush.msra.mxu2 %v7293_v6  ;;  %2690 = vmatpush.msra.mxu3 %v7297_v27 }
 0x4e3   :  { %2568 = vmatpush.msrb.mxu0 %v7301_v8  ;;  %2609 = vmatpush.msrb.mxu1 %v7303_v9 }
 0x4e4   :  { %2650 = vmatpush.msra.mxu2 %v7305_v33  ;;  %2691 = vmatpush.msra.mxu3 %v7309_v29 }
 0x4e5   :  { %2569 = vmatpush.msrb.mxu0 %v7313_v31  ;;  %2610 = vmatpush.msrb.mxu1 %v7315_v40 }
 0x4e6   :  { %2651 = vmatpush.msra.mxu2 %v7317_v30  ;;  %2692 = vmatpush.msra.mxu3 %v7321_v35 }
 0x4e7   :  { %2417 = vmatmul.f32.vlgmr.msra.gmra.mxu0 %v9737_v59  ;;  %2458 = vmatmul.f32.vlgmr.msra.gmra.mxu1 %v9737_v59 }
 0x4e8   :  { %2499 = vmatmul.f32.vlgmr.msrb.gmra.mxu2 %v9737_v59  ;;  %2540 = vmatmul.f32.vlgmr.msrb.gmra.mxu3 %v9737_v59  ;;  %v9758_v59 = vld [vmem:[#allocation44_spill] sm:$0xff] }
 0x4e9   :  { %2570 = vmatpush.msrb.mxu0 %v7325_v25  ;;  %2611 = vmatpush.msrb.mxu1 %v7327_v41 }
 0x4ea   :  { %2652 = vmatpush.msra.mxu2 %v7329_v62  ;;  %2693 = vmatpush.msra.mxu3 %v7333_v61 }
 0x4eb   :  { %2571 = vmatpush.msrb.mxu0 %v7337_v5  ;;  %2612 = vmatpush.msrb.mxu1 %v7339_v0 }
 0x4ec   :  { %2653 = vmatpush.msra.mxu2 %v7341_v17  ;;  %2694 = vmatpush.msra.mxu3 %v7345_v43 }
 0x4ed   :  { %2572 = vmatpush.msrb.mxu0 %v7349_v45  ;;  %2613 = vmatpush.msrb.mxu1 %v7351_v63 }
 0x4ee   :  { %2654 = vmatpush.msra.mxu2 %v7353_v54  ;;  %2695 = vmatpush.msra.mxu3 %v7357_v37 }
 0x4ef   :  { %2573 = vmatpush.msrb.mxu0 %v7361_v49  ;;  %2614 = vmatpush.msrb.mxu1 %v7363_v51 }
 0x4f0   :  { %2655 = vmatpush.msra.mxu2 %v7365_v1  ;;  %2696 = vmatpush.msra.mxu3 %v7369_v52 }
 0x4f1   :  { %2574 = vmatpush.msrb.mxu0 %v7373_v44  ;;  %2615 = vmatpush.msrb.mxu1 %v7375_v47 }
 0x4f2   :  { %2656 = vmatpush.msra.mxu2 %v7377_v48  ;;  %2697 = vmatpush.msra.mxu3 %v7381_v2 }
 0x4f3   :  { %2575 = vmatpush.msrb.mxu0 %v7385_v56  ;;  %2616 = vmatpush.msrb.mxu1 %v7387_v57 }
 0x4f4   :  { %2657 = vmatpush.msra.mxu2 %v7389_v7  ;;  %2698 = vmatpush.msra.mxu3 %v7393_v60 }
 0x4f5   :  { %2576 = vmatpush.msrb.mxu0 %v7397_v10  ;;  %2617 = vmatpush.msrb.mxu1 %v9738_v32 }
 0x4f6   :  { %2658 = vmatpush.msra.mxu2 %v9739_v3  ;;  %2699 = vmatpush.msra.mxu3 %v9740_v53 }
 0x4f7   :  { %2577 = vmatpush.msrb.mxu0 %v9741_v34  ;;  %2618 = vmatpush.msrb.mxu1 %v9742_v38 }
 0x4f8   :  { %2659 = vmatpush.msra.mxu2 %v9743_v42  ;;  %2700 = vmatpush.msra.mxu3 %v9744_v19 }
 0x4f9   :  { %2578 = vmatpush.msrb.mxu0 %v9745_v20  ;;  %2619 = vmatpush.msrb.mxu1 %v9746_v11 }
 0x4fa   :  { %2660 = vmatpush.msra.mxu2 %v9747_v23  ;;  %2701 = vmatpush.msra.mxu3 %v9748_v15 }
 0x4fb   :  { %2579 = vmatpush.msrb.mxu0 %v9749_v16  ;;  %2620 = vmatpush.msrb.mxu1 %v9750_v22  ;;  %v9761_v22 = vld [vmem:[#allocation38_spill] sm:$0xff] }
 0x4fc   :  { %2661 = vmatpush.msra.mxu2 %v9751_v50  ;;  %2702 = vmatpush.msra.mxu3 %v9752_v21 }
 0x4fd   :  { %2580 = vmatpush.msrb.mxu0 %v9753_v36  ;;  %2621 = vmatpush.msrb.mxu1 %v9754_v14 }
 0x4fe   :  { %2662 = vmatpush.msra.mxu2 %v9755_v12  ;;  %2703 = vmatpush.msra.mxu3 %v9756_v39 }
 0x4ff   :  { %2581 = vmatpush.msrb.mxu0 %v9757_v24  ;;  %2622 = vmatpush.msrb.mxu1 %v9758_v59 }
 0x500   :  { %2663 = vmatpush.msra.mxu2 %v9759_v46  ;;  %2704 = vmatpush.msra.mxu3 %v9760_v13 }
 0x501   :  { %2582 = vmatmul.f32.vlgmr.msrb.gmra.mxu0 %v9761_v22  ;;  %2623 = vmatmul.f32.vlgmr.msrb.gmra.mxu1 %v9761_v22 }
 0x502   :  { %2664 = vmatmul.f32.vlgmr.msra.gmra.mxu2 %v9761_v22  ;;  %2705 = vmatmul.f32.vlgmr.msra.gmra.mxu3 %v9761_v22  ;;  %v9762_v22 = vld [vmem:[#allocation55_spill] sm:$0xff] }
 0x503   :  { %2731 = vmatpush.msra.mxu0 %v7277_v18  ;;  %2772 = vmatpush.msra.mxu1 %v7279_v26 }
 0x504   :  { %2813 = vmatpush.msrb.mxu2 %v7281_v55  ;;  %2854 = vmatpush.msrb.mxu3 %v7283_v58 }
 0x505   :  { %2732 = vmatpush.msra.mxu0 %v7289_v4  ;;  %2773 = vmatpush.msra.mxu1 %v7291_v28 }
 0x506   :  { %2814 = vmatpush.msrb.mxu2 %v7293_v6  ;;  %2855 = vmatpush.msrb.mxu3 %v7297_v27 }
 0x507   :  { %2733 = vmatpush.msra.mxu0 %v7301_v8  ;;  %2774 = vmatpush.msra.mxu1 %v7303_v9 }
 0x508   :  { %2815 = vmatpush.msrb.mxu2 %v7305_v33  ;;  %2856 = vmatpush.msrb.mxu3 %v7309_v29 }
 0x509   :  { %2734 = vmatpush.msra.mxu0 %v7313_v31  ;;  %2775 = vmatpush.msra.mxu1 %v7315_v40 }
 0x50a   :  { %2816 = vmatpush.msrb.mxu2 %v7317_v30  ;;  %2857 = vmatpush.msrb.mxu3 %v7321_v35 }
 0x50b   :  { %2735 = vmatpush.msra.mxu0 %v7325_v25  ;;  %2776 = vmatpush.msra.mxu1 %v7327_v41 }
 0x50c   :  { %2817 = vmatpush.msrb.mxu2 %v7329_v62  ;;  %2858 = vmatpush.msrb.mxu3 %v7333_v61 }
 0x50d   :  { %2736 = vmatpush.msra.mxu0 %v7337_v5  ;;  %2777 = vmatpush.msra.mxu1 %v7339_v0 }
 0x50e   :  { %2818 = vmatpush.msrb.mxu2 %v7341_v17  ;;  %2859 = vmatpush.msrb.mxu3 %v7345_v43 }
 0x50f   :  { %2737 = vmatpush.msra.mxu0 %v7349_v45  ;;  %2778 = vmatpush.msra.mxu1 %v7351_v63 }
 0x510   :  { %2819 = vmatpush.msrb.mxu2 %v7353_v54  ;;  %2860 = vmatpush.msrb.mxu3 %v7357_v37 }
 0x511   :  { %2738 = vmatpush.msra.mxu0 %v7361_v49  ;;  %2779 = vmatpush.msra.mxu1 %v7363_v51 }
 0x512   :  { %2820 = vmatpush.msrb.mxu2 %v7365_v1  ;;  %2861 = vmatpush.msrb.mxu3 %v7369_v52 }
 0x513   :  { %2739 = vmatpush.msra.mxu0 %v7373_v44  ;;  %2780 = vmatpush.msra.mxu1 %v7375_v47 }
 0x514   :  { %2821 = vmatpush.msrb.mxu2 %v7377_v48  ;;  %2862 = vmatpush.msrb.mxu3 %v7381_v2 }
 0x515   :  { %2740 = vmatpush.msra.mxu0 %v7385_v56  ;;  %2781 = vmatpush.msra.mxu1 %v7387_v57 }
 0x516   :  { %2822 = vmatpush.msrb.mxu2 %v7389_v7  ;;  %2863 = vmatpush.msrb.mxu3 %v7393_v60 }
 0x517   :  { %2741 = vmatpush.msra.mxu0 %v7397_v10  ;;  %2782 = vmatpush.msra.mxu1 %v9738_v32 }
 0x518   :  { %2823 = vmatpush.msrb.mxu2 %v9739_v3  ;;  %2864 = vmatpush.msrb.mxu3 %v9740_v53 }
 0x519   :  { %2742 = vmatpush.msra.mxu0 %v9741_v34  ;;  %2783 = vmatpush.msra.mxu1 %v9742_v38 }
 0x51a   :  { %2824 = vmatpush.msrb.mxu2 %v9743_v42  ;;  %2865 = vmatpush.msrb.mxu3 %v9744_v19 }
 0x51b   :  { %2743 = vmatpush.msra.mxu0 %v9745_v20  ;;  %2784 = vmatpush.msra.mxu1 %v9746_v11 }
 0x51c   :  { %2825 = vmatpush.msrb.mxu2 %v9747_v23  ;;  %2866 = vmatpush.msrb.mxu3 %v9748_v15 }
 0x51d   :  { %2744 = vmatpush.msra.mxu0 %v9749_v16  ;;  %2785 = vmatpush.msra.mxu1 %v9762_v22  ;;  %v9763_v22 = vld [vmem:[#allocation41_spill] sm:$0xff] }
 0x51e   :  { %2826 = vmatpush.msrb.mxu2 %v9751_v50  ;;  %2867 = vmatpush.msrb.mxu3 %v9752_v21 }
 0x51f   :  { %2745 = vmatpush.msra.mxu0 %v9753_v36  ;;  %2786 = vmatpush.msra.mxu1 %v9754_v14 }
 0x520   :  { %2827 = vmatpush.msrb.mxu2 %v9755_v12  ;;  %2868 = vmatpush.msrb.mxu3 %v9756_v39 }
 0x521   :  { %2746 = vmatpush.msra.mxu0 %v9757_v24  ;;  %2787 = vmatpush.msra.mxu1 %v9758_v59 }
 0x522   :  { %2828 = vmatpush.msrb.mxu2 %v9759_v46  ;;  %2869 = vmatpush.msrb.mxu3 %v9760_v13 }
 0x523   :  { %2747 = vmatmul.f32.vlgmr.msra.gmra.mxu0 %v9763_v22  ;;  %2788 = vmatmul.f32.vlgmr.msra.gmra.mxu1 %v9763_v22 }
 0x524   :  { %2829 = vmatmul.f32.vlgmr.msrb.gmra.mxu2 %v9763_v22  ;;  %2870 = vmatmul.f32.vlgmr.msrb.gmra.mxu3 %v9763_v22  ;;  %v7881_v22 = vld [vmem:[#allocation10 + $0x8] sm:$0xff] }
 0x525   :  { %2896 = vmatpush.msrb.mxu0 %v7277_v18  ;;  %2937 = vmatpush.msrb.mxu1 %v7279_v26  ;;  %v9764_v18 = vld [vmem:[#allocation55_spill] sm:$0xff]  ;;  %v7699_v26 = vld [vmem:[#allocation10 + $0x1e0] sm:$0xff] }
 0x526   :  { %2978 = vmatpush.msra.mxu2 %v7281_v55  ;;  %3019 = vmatpush.msra.mxu3 %v7283_v58  ;;  %v7701_v55 = vld [vmem:[#allocation10 + $0x1e8] sm:$0xff]  ;;  %v9765_v58 = vld [vmem:[#allocation42_spill] sm:$0xff] }
 0x527   :  { %2897 = vmatpush.msrb.mxu0 %v7289_v4  ;;  %2938 = vmatpush.msrb.mxu1 %v7291_v28  ;;  %v7705_v4 = vld [vmem:[#allocation10 + $0x1f0] sm:$0xff]  ;;  %v7707_v28 = vld [vmem:[#allocation10 + $0x1f8] sm:$0xff] }
 0x528   :  { %2979 = vmatpush.msra.mxu2 %v7293_v6  ;;  %3020 = vmatpush.msra.mxu3 %v7297_v27  ;;  %v7711_v6 = vld [vmem:[#allocation10 + $0x1c0] sm:$0xff]  ;;  %v7713_v27 = vld [vmem:[#allocation10 + $0x1c8] sm:$0xff] }
 0x529   :  { %2898 = vmatpush.msrb.mxu0 %v7301_v8  ;;  %2939 = vmatpush.msrb.mxu1 %v7303_v9  ;;  %v7717_v8 = vld [vmem:[#allocation10 + $0x1d0] sm:$0xff]  ;;  %v7719_v9 = vld [vmem:[#allocation10 + $0x1d8] sm:$0xff] }
 0x52a   :  { %2980 = vmatpush.msra.mxu2 %v7305_v33  ;;  %3021 = vmatpush.msra.mxu3 %v7309_v29  ;;  %v7723_v33 = vld [vmem:[#allocation10 + $0x1a0] sm:$0xff]  ;;  %v7725_v29 = vld [vmem:[#allocation10 + $0x1a8] sm:$0xff] }
 0x52b   :  { %2899 = vmatpush.msrb.mxu0 %v7313_v31  ;;  %2940 = vmatpush.msrb.mxu1 %v7315_v40  ;;  %v7729_v31 = vld [vmem:[#allocation10 + $0x1b0] sm:$0xff]  ;;  %v7731_v40 = vld [vmem:[#allocation10 + $0x1b8] sm:$0xff] }
 0x52c   :  { %2981 = vmatpush.msra.mxu2 %v7317_v30  ;;  %3022 = vmatpush.msra.mxu3 %v7321_v35  ;;  %v7735_v30 = vld [vmem:[#allocation10 + $0x180] sm:$0xff]  ;;  %v7737_v35 = vld [vmem:[#allocation10 + $0x188] sm:$0xff] }
 0x52d   :  { %2900 = vmatpush.msrb.mxu0 %v7325_v25  ;;  %2941 = vmatpush.msrb.mxu1 %v7327_v41  ;;  %v7741_v25 = vld [vmem:[#allocation10 + $0x190] sm:$0xff]  ;;  %v7743_v41 = vld [vmem:[#allocation10 + $0x198] sm:$0xff] }
 0x52e   :  { %2982 = vmatpush.msra.mxu2 %v7329_v62  ;;  %3023 = vmatpush.msra.mxu3 %v7333_v61  ;;  %v7747_v62 = vld [vmem:[#allocation10 + $0x160] sm:$0xff]  ;;  %v7749_v61 = vld [vmem:[#allocation10 + $0x168] sm:$0xff] }
 0x52f   :  { %2901 = vmatpush.msrb.mxu0 %v7337_v5  ;;  %2942 = vmatpush.msrb.mxu1 %v7339_v0  ;;  %v7753_v5 = vld [vmem:[#allocation10 + $0x170] sm:$0xff]  ;;  %v7755_v0 = vld [vmem:[#allocation10 + $0x178] sm:$0xff] }
 0x530   :  { %2983 = vmatpush.msra.mxu2 %v7341_v17  ;;  %3024 = vmatpush.msra.mxu3 %v7345_v43  ;;  %v7759_v17 = vld [vmem:[#allocation10 + $0x140] sm:$0xff]  ;;  %v7761_v43 = vld [vmem:[#allocation10 + $0x148] sm:$0xff] }
 0x531   :  { %2902 = vmatpush.msrb.mxu0 %v7349_v45  ;;  %2943 = vmatpush.msrb.mxu1 %v7351_v63  ;;  %v7765_v45 = vld [vmem:[#allocation10 + $0x150] sm:$0xff]  ;;  %v7767_v63 = vld [vmem:[#allocation10 + $0x158] sm:$0xff] }
 0x532   :  { %2984 = vmatpush.msra.mxu2 %v7353_v54  ;;  %3025 = vmatpush.msra.mxu3 %v7357_v37  ;;  %v7771_v54 = vld [vmem:[#allocation10 + $0x120] sm:$0xff]  ;;  %v7773_v37 = vld [vmem:[#allocation10 + $0x128] sm:$0xff] }
 0x533   :  { %2903 = vmatpush.msrb.mxu0 %v7361_v49  ;;  %2944 = vmatpush.msrb.mxu1 %v7363_v51  ;;  %v7777_v49 = vld [vmem:[#allocation10 + $0x130] sm:$0xff]  ;;  %v7779_v51 = vld [vmem:[#allocation10 + $0x138] sm:$0xff] }
 0x534   :  { %2985 = vmatpush.msra.mxu2 %v7365_v1  ;;  %3026 = vmatpush.msra.mxu3 %v7369_v52  ;;  %v7783_v1 = vld [vmem:[#allocation10 + $0x100] sm:$0xff]  ;;  %v7785_v52 = vld [vmem:[#allocation10 + $0x108] sm:$0xff] }
 0x535   :  { %2904 = vmatpush.msrb.mxu0 %v7373_v44  ;;  %2945 = vmatpush.msrb.mxu1 %v7375_v47  ;;  %9766 = vst [vmem:[#allocation28_spill] sm:$0xff] %v7785_v52  ;;  %v7789_v44 = vld [vmem:[#allocation10 + $0x110] sm:$0xff]  ;;  %v7791_v47 = vld [vmem:[#allocation10 + $0x118] sm:$0xff] }
 0x536   :  { %2986 = vmatpush.msra.mxu2 %v7377_v48  ;;  %3027 = vmatpush.msra.mxu3 %v7381_v2  ;;  %9767 = vst [vmem:[#allocation26_spill] sm:$0xff] %v7789_v44  ;;  %v7795_v48 = vld [vmem:[#allocation10 + $0xe0] sm:$0xff]  ;;  %v7797_v2 = vld [vmem:[#allocation10 + $0xe8] sm:$0xff] }
 0x537   :  { %2905 = vmatpush.msrb.mxu0 %v7385_v56  ;;  %2946 = vmatpush.msrb.mxu1 %v7387_v57  ;;  %9768 = vst [vmem:[#allocation31_spill] sm:$0xff] %v7791_v47  ;;  %v7801_v56 = vld [vmem:[#allocation10 + $0xf0] sm:$0xff]  ;;  %v7803_v57 = vld [vmem:[#allocation10 + $0xf8] sm:$0xff] }
 0x538   :  { %2987 = vmatpush.msra.mxu2 %v7389_v7  ;;  %3028 = vmatpush.msra.mxu3 %v7393_v60  ;;  %9769 = vst [vmem:[#allocation33_spill] sm:$0xff] %v7795_v48  ;;  %v7807_v7 = vld [vmem:[#allocation10 + $0xc0] sm:$0xff]  ;;  %v7809_v60 = vld [vmem:[#allocation10 + $0xc8] sm:$0xff] }
 0x539   :  { %2906 = vmatpush.msrb.mxu0 %v7397_v10  ;;  %2947 = vmatpush.msrb.mxu1 %v9738_v32  ;;  %9770 = vst [vmem:[#allocation32_spill] sm:$0xff] %v7797_v2  ;;  %v7813_v10 = vld [vmem:[#allocation10 + $0xd0] sm:$0xff]  ;;  %v7821_v32 = vld [vmem:[#allocation10 + $0xa8] sm:$0xff] }
 0x53a   :  { %2988 = vmatpush.msra.mxu2 %v9739_v3  ;;  %3029 = vmatpush.msra.mxu3 %v9740_v53  ;;  %9771 = vst [vmem:[#allocation37_spill] sm:$0xff] %v7801_v56  ;;  %v7825_v3 = vld [vmem:[#allocation10 + $0xb0] sm:$0xff]  ;;  %v7827_v53 = vld [vmem:[#allocation10 + $0xb8] sm:$0xff] }
 0x53b   :  { %2907 = vmatpush.msrb.mxu0 %v9741_v34  ;;  %2948 = vmatpush.msrb.mxu1 %v9742_v38  ;;  %9772 = vst [vmem:[#allocation19_spill] sm:$0xff] %v7803_v57  ;;  %v7831_v34 = vld [vmem:[#allocation10 + $0x80] sm:$0xff]  ;;  %v7833_v38 = vld [vmem:[#allocation10 + $0x88] sm:$0xff] }
 0x53c   :  { %2989 = vmatpush.msra.mxu2 %v9743_v42  ;;  %3030 = vmatpush.msra.mxu3 %v9744_v19  ;;  %9773 = vst [vmem:[#allocation21_spill] sm:$0xff] %v7807_v7  ;;  %v7837_v42 = vld [vmem:[#allocation10 + $0x90] sm:$0xff]  ;;  %v7839_v19 = vld [vmem:[#allocation10 + $0x98] sm:$0xff] }
 0x53d   :  { %2908 = vmatpush.msrb.mxu0 %v9745_v20  ;;  %2949 = vmatpush.msrb.mxu1 %v9746_v11  ;;  %v7843_v20 = vld [vmem:[#allocation10 + $0x60] sm:$0xff]  ;;  %v7845_v11 = vld [vmem:[#allocation10 + $0x68] sm:$0xff] }
 0x53e   :  { %2990 = vmatpush.msra.mxu2 %v9747_v23  ;;  %3031 = vmatpush.msra.mxu3 %v9748_v15  ;;  %v7849_v23 = vld [vmem:[#allocation10 + $0x70] sm:$0xff]  ;;  %v7851_v15 = vld [vmem:[#allocation10 + $0x78] sm:$0xff] }
 0x53f   :  { %2909 = vmatpush.msrb.mxu0 %v9749_v16  ;;  %2950 = vmatpush.msrb.mxu1 %v9764_v18  ;;  %v7855_v16 = vld [vmem:[#allocation10 + $0x40] sm:$0xff]  ;;  %v7885_v18 = vld [vmem:[#allocation10 + $0x10] sm:$0xff] }
 0x540   :  { %2991 = vmatpush.msra.mxu2 %v9751_v50  ;;  %3032 = vmatpush.msra.mxu3 %v9752_v21  ;;  %v7857_v50 = vld [vmem:[#allocation10 + $0x48] sm:$0xff]  ;;  %v7861_v21 = vld [vmem:[#allocation10 + $0x50] sm:$0xff] }
 0x541   :  { %2910 = vmatpush.msrb.mxu0 %v9753_v36  ;;  %2951 = vmatpush.msrb.mxu1 %v9754_v14  ;;  %9774 = vst [vmem:[#allocation20_spill] sm:$0xff] %v7857_v50  ;;  %v7863_v36 = vld [vmem:[#allocation10 + $0x58] sm:$0xff]  ;;  %v7867_v14 = vld [vmem:[#allocation10 + $0x20] sm:$0xff] }
 0x542   :  { %2992 = vmatpush.msra.mxu2 %v9755_v12  ;;  %3033 = vmatpush.msra.mxu3 %v9756_v39  ;;  %9775 = vst [vmem:[#allocation56_spill] sm:$0xff] %v7863_v36  ;;  %v7869_v12 = vld [vmem:[#allocation10 + $0x28] sm:$0xff]  ;;  %v7873_v39 = vld [vmem:[#allocation10 + $0x30] sm:$0xff] }
 0x543   :  { %2911 = vmatpush.msrb.mxu0 %v9757_v24  ;;  %2952 = vmatpush.msrb.mxu1 %v9758_v59  ;;  %v7875_v24 = vld [vmem:[#allocation10 + $0x38] sm:$0xff]  ;;  %v7879_v59 = vld [vmem:[#allocation10] sm:$0xff] }
 0x544   :  { %2993 = vmatpush.msra.mxu2 %v9759_v46  ;;  %3034 = vmatpush.msra.mxu3 %v9760_v13  ;;  %v7815_v46 = vld [vmem:[#allocation10 + $0xd8] sm:$0xff]  ;;  %v7819_v13 = vld [vmem:[#allocation10 + $0xa0] sm:$0xff] }
 0x545   :  { %2912 = vmatmul.f32.vlgmr.msrb.gmra.mxu0 %v9765_v58  ;;  %2953 = vmatmul.f32.vlgmr.msrb.gmra.mxu1 %v9765_v58 }
 0x546   :  { %2994 = vmatmul.f32.vlgmr.msra.gmra.mxu2 %v9765_v58  ;;  %3035 = vmatmul.f32.vlgmr.msra.gmra.mxu3 %v9765_v58  ;;  %v7887_v58 = vld [vmem:[#allocation10 + $0x18] sm:$0xff] }
 0x547   :  { %3061 = vmatpush.msra.mxu0 %v7699_v26  ;;  %3102 = vmatpush.msra.mxu1 %v7701_v55 }
 0x548   :  { %3143 = vmatpush.msrb.mxu2 %v7705_v4  ;;  %3184 = vmatpush.msrb.mxu3 %v7707_v28 }
 0x549   :  { %3062 = vmatpush.msra.mxu0 %v7711_v6  ;;  %3103 = vmatpush.msra.mxu1 %v7713_v27 }
 0x54a   :  { %3144 = vmatpush.msrb.mxu2 %v7717_v8  ;;  %3185 = vmatpush.msrb.mxu3 %v7719_v9 }
 0x54b   :  { %3063 = vmatpush.msra.mxu0 %v7723_v33  ;;  %3104 = vmatpush.msra.mxu1 %v7725_v29 }
 0x54c   :  { %3145 = vmatpush.msrb.mxu2 %v7729_v31  ;;  %3186 = vmatpush.msrb.mxu3 %v7731_v40 }
 0x54d   :  { %3064 = vmatpush.msra.mxu0 %v7735_v30  ;;  %3105 = vmatpush.msra.mxu1 %v7737_v35 }
 0x54e   :  { %3146 = vmatpush.msrb.mxu2 %v7741_v25  ;;  %3187 = vmatpush.msrb.mxu3 %v7743_v41 }
 0x54f   :  { %3065 = vmatpush.msra.mxu0 %v7747_v62  ;;  %3106 = vmatpush.msra.mxu1 %v7749_v61 }
 0x550   :  { %3147 = vmatpush.msrb.mxu2 %v7753_v5  ;;  %3188 = vmatpush.msrb.mxu3 %v7755_v0 }
 0x551   :  { %3066 = vmatpush.msra.mxu0 %v7759_v17  ;;  %3107 = vmatpush.msra.mxu1 %v7761_v43 }
 0x552   :  { %3148 = vmatpush.msrb.mxu2 %v7765_v45  ;;  %3189 = vmatpush.msrb.mxu3 %v7767_v63 }
 0x553   :  { %3067 = vmatpush.msra.mxu0 %v7771_v54  ;;  %3108 = vmatpush.msra.mxu1 %v7773_v37 }
 0x554   :  { %3149 = vmatpush.msrb.mxu2 %v7777_v49  ;;  %3190 = vmatpush.msrb.mxu3 %v7779_v51 }
 0x555   :  { %3068 = vmatpush.msra.mxu0 %v7783_v1  ;;  %3109 = vmatpush.msra.mxu1 %v7785_v52 }
 0x556   :  { %3150 = vmatpush.msrb.mxu2 %v7789_v44  ;;  %3191 = vmatpush.msrb.mxu3 %v7791_v47 }
 0x557   :  { %3069 = vmatpush.msra.mxu0 %v7795_v48  ;;  %3110 = vmatpush.msra.mxu1 %v7797_v2 }
 0x558   :  { %3151 = vmatpush.msrb.mxu2 %v7801_v56  ;;  %3192 = vmatpush.msrb.mxu3 %v7803_v57 }
 0x559   :  { %3070 = vmatpush.msra.mxu0 %v7807_v7  ;;  %3111 = vmatpush.msra.mxu1 %v7809_v60 }
 0x55a   :  { %3152 = vmatpush.msrb.mxu2 %v7813_v10  ;;  %3193 = vmatpush.msrb.mxu3 %v7815_v46 }
 0x55b   :  { %3071 = vmatpush.msra.mxu0 %v7819_v13  ;;  %3112 = vmatpush.msra.mxu1 %v7821_v32 }
 0x55c   :  { %3153 = vmatpush.msrb.mxu2 %v7825_v3  ;;  %3194 = vmatpush.msrb.mxu3 %v7827_v53 }
 0x55d   :  { %3072 = vmatpush.msra.mxu0 %v7831_v34  ;;  %3113 = vmatpush.msra.mxu1 %v7833_v38 }
 0x55e   :  { %3154 = vmatpush.msrb.mxu2 %v7837_v42  ;;  %3195 = vmatpush.msrb.mxu3 %v7839_v19 }
 0x55f   :  { %3073 = vmatpush.msra.mxu0 %v7843_v20  ;;  %3114 = vmatpush.msra.mxu1 %v7845_v11 }
 0x560   :  { %3155 = vmatpush.msrb.mxu2 %v7849_v23  ;;  %3196 = vmatpush.msrb.mxu3 %v7851_v15 }
 0x561   :  { %3074 = vmatpush.msra.mxu0 %v7855_v16  ;;  %3115 = vmatpush.msra.mxu1 %v7857_v50 }
 0x562   :  { %3156 = vmatpush.msrb.mxu2 %v7861_v21  ;;  %3197 = vmatpush.msrb.mxu3 %v7863_v36  ;;  %v9776_v36 = vld [vmem:[#allocation43_spill] sm:$0xff] }
 0x563   :  { %3075 = vmatpush.msra.mxu0 %v7867_v14  ;;  %3116 = vmatpush.msra.mxu1 %v7869_v12 }
 0x564   :  { %3157 = vmatpush.msrb.mxu2 %v7873_v39  ;;  %3198 = vmatpush.msrb.mxu3 %v7875_v24 }
 0x565   :  { %3076 = vmatpush.msra.mxu0 %v7879_v59  ;;  %3117 = vmatpush.msra.mxu1 %v7881_v22 }
 0x566   :  { %3158 = vmatpush.msrb.mxu2 %v7885_v18  ;;  %3199 = vmatpush.msrb.mxu3 %v7887_v58 }
 0x567   :  { %3077 = vmatmul.f32.vlgmr.msra.gmra.mxu0 %v9776_v36  ;;  %3118 = vmatmul.f32.vlgmr.msra.gmra.mxu1 %v9776_v36 }
 0x568   :  { %3159 = vmatmul.f32.vlgmr.msrb.gmra.mxu2 %v9776_v36  ;;  %3200 = vmatmul.f32.vlgmr.msrb.gmra.mxu3 %v9776_v36  ;;  %v9777_v36 = vld [vmem:[#allocation56_spill] sm:$0xff] }
 0x569   :  { %3226 = vmatpush.msrb.mxu0 %v7699_v26  ;;  %3267 = vmatpush.msrb.mxu1 %v7701_v55 }
 0x56a   :  { %3308 = vmatpush.msra.mxu2 %v7705_v4  ;;  %3349 = vmatpush.msra.mxu3 %v7707_v28 }
 0x56b   :  { %3227 = vmatpush.msrb.mxu0 %v7711_v6  ;;  %3268 = vmatpush.msrb.mxu1 %v7713_v27 }
 0x56c   :  { %3309 = vmatpush.msra.mxu2 %v7717_v8  ;;  %3350 = vmatpush.msra.mxu3 %v7719_v9 }
 0x56d   :  { %3228 = vmatpush.msrb.mxu0 %v7723_v33  ;;  %3269 = vmatpush.msrb.mxu1 %v7725_v29 }
 0x56e   :  { %3310 = vmatpush.msra.mxu2 %v7729_v31  ;;  %3351 = vmatpush.msra.mxu3 %v7731_v40 }
 0x56f   :  { %3229 = vmatpush.msrb.mxu0 %v7735_v30  ;;  %3270 = vmatpush.msrb.mxu1 %v7737_v35 }
 0x570   :  { %3311 = vmatpush.msra.mxu2 %v7741_v25  ;;  %3352 = vmatpush.msra.mxu3 %v7743_v41 }
 0x571   :  { %3230 = vmatpush.msrb.mxu0 %v7747_v62  ;;  %3271 = vmatpush.msrb.mxu1 %v7749_v61 }
 0x572   :  { %3312 = vmatpush.msra.mxu2 %v7753_v5  ;;  %3353 = vmatpush.msra.mxu3 %v7755_v0 }
 0x573   :  { %3231 = vmatpush.msrb.mxu0 %v7759_v17  ;;  %3272 = vmatpush.msrb.mxu1 %v7761_v43 }
 0x574   :  { %3313 = vmatpush.msra.mxu2 %v7765_v45  ;;  %3354 = vmatpush.msra.mxu3 %v7767_v63 }
 0x575   :  { %3232 = vmatpush.msrb.mxu0 %v7771_v54  ;;  %3273 = vmatpush.msrb.mxu1 %v7773_v37 }
 0x576   :  { %3314 = vmatpush.msra.mxu2 %v7777_v49  ;;  %3355 = vmatpush.msra.mxu3 %v7779_v51 }
 0x577   :  { %3233 = vmatpush.msrb.mxu0 %v7783_v1  ;;  %3274 = vmatpush.msrb.mxu1 %v7785_v52 }
 0x578   :  { %3315 = vmatpush.msra.mxu2 %v7789_v44  ;;  %3356 = vmatpush.msra.mxu3 %v7791_v47 }
 0x579   :  { %3234 = vmatpush.msrb.mxu0 %v7795_v48  ;;  %3275 = vmatpush.msrb.mxu1 %v7797_v2 }
 0x57a   :  { %3316 = vmatpush.msra.mxu2 %v7801_v56  ;;  %3357 = vmatpush.msra.mxu3 %v7803_v57 }
 0x57b   :  { %3235 = vmatpush.msrb.mxu0 %v7807_v7  ;;  %3276 = vmatpush.msrb.mxu1 %v7809_v60 }
 0x57c   :  { %3317 = vmatpush.msra.mxu2 %v7813_v10  ;;  %3358 = vmatpush.msra.mxu3 %v7815_v46 }
 0x57d   :  { %3236 = vmatpush.msrb.mxu0 %v7819_v13  ;;  %3277 = vmatpush.msrb.mxu1 %v7821_v32 }
 0x57e   :  { %3318 = vmatpush.msra.mxu2 %v7825_v3  ;;  %3359 = vmatpush.msra.mxu3 %v7827_v53 }
 0x57f   :  { %3237 = vmatpush.msrb.mxu0 %v7831_v34  ;;  %3278 = vmatpush.msrb.mxu1 %v7833_v38 }
 0x580   :  { %3319 = vmatpush.msra.mxu2 %v7837_v42  ;;  %3360 = vmatpush.msra.mxu3 %v7839_v19 }
 0x581   :  { %3238 = vmatpush.msrb.mxu0 %v7843_v20  ;;  %3279 = vmatpush.msrb.mxu1 %v7845_v11 }
 0x582   :  { %3320 = vmatpush.msra.mxu2 %v7849_v23  ;;  %3361 = vmatpush.msra.mxu3 %v7851_v15 }
 0x583   :  { %3239 = vmatpush.msrb.mxu0 %v7855_v16  ;;  %3280 = vmatpush.msrb.mxu1 %v7857_v50  ;;  %v9778_v50 = vld [vmem:[#allocation17_spill] sm:$0xff] }
 0x584   :  { %3321 = vmatpush.msra.mxu2 %v7861_v21  ;;  %3362 = vmatpush.msra.mxu3 %v9777_v36 }
 0x585   :  { %3240 = vmatpush.msrb.mxu0 %v7867_v14  ;;  %3281 = vmatpush.msrb.mxu1 %v7869_v12 }
 0x586   :  { %3322 = vmatpush.msra.mxu2 %v7873_v39  ;;  %3363 = vmatpush.msra.mxu3 %v7875_v24 }
 0x587   :  { %3241 = vmatpush.msrb.mxu0 %v7879_v59  ;;  %3282 = vmatpush.msrb.mxu1 %v7881_v22 }
 0x588   :  { %3323 = vmatpush.msra.mxu2 %v7885_v18  ;;  %3364 = vmatpush.msra.mxu3 %v7887_v58 }
 0x589   :  { %3242 = vmatmul.f32.vlgmr.msrb.gmra.mxu0 %v9778_v50  ;;  %3283 = vmatmul.f32.vlgmr.msrb.gmra.mxu1 %v9778_v50 }
 0x58a   :  { %3324 = vmatmul.f32.vlgmr.msra.gmra.mxu2 %v9778_v50  ;;  %3365 = vmatmul.f32.vlgmr.msra.gmra.mxu3 %v9778_v50  ;;  %v5694_v50 = vld [vmem:[%s9428_s3 + $0x1] ss:$0 sm:$0xff] }
 0x58b   :  { %3391 = vmatpush.msra.mxu0 %v7699_v26  ;;  %3432 = vmatpush.msra.mxu1 %v7701_v55 }
 0x58c   :  { %3473 = vmatpush.msrb.mxu2 %v7705_v4  ;;  %3514 = vmatpush.msrb.mxu3 %v7707_v28 }
 0x58d   :  { %3392 = vmatpush.msra.mxu0 %v7711_v6  ;;  %3433 = vmatpush.msra.mxu1 %v7713_v27 }
 0x58e   :  { %3474 = vmatpush.msrb.mxu2 %v7717_v8  ;;  %3515 = vmatpush.msrb.mxu3 %v7719_v9 }
 0x58f   :  { %3393 = vmatpush.msra.mxu0 %v7723_v33  ;;  %3434 = vmatpush.msra.mxu1 %v7725_v29 }
 0x590   :  { %3475 = vmatpush.msrb.mxu2 %v7729_v31  ;;  %3516 = vmatpush.msrb.mxu3 %v7731_v40 }
 0x591   :  { %3394 = vmatpush.msra.mxu0 %v7735_v30  ;;  %3435 = vmatpush.msra.mxu1 %v7737_v35 }
 0x592   :  { %3476 = vmatpush.msrb.mxu2 %v7741_v25  ;;  %3517 = vmatpush.msrb.mxu3 %v7743_v41 }
 0x593   :  { %3395 = vmatpush.msra.mxu0 %v7747_v62  ;;  %3436 = vmatpush.msra.mxu1 %v7749_v61 }
 0x594   :  { %3477 = vmatpush.msrb.mxu2 %v7753_v5  ;;  %3518 = vmatpush.msrb.mxu3 %v7755_v0 }
 0x595   :  { %3396 = vmatpush.msra.mxu0 %v7759_v17  ;;  %3437 = vmatpush.msra.mxu1 %v7761_v43 }
 0x596   :  { %3478 = vmatpush.msrb.mxu2 %v7765_v45  ;;  %3519 = vmatpush.msrb.mxu3 %v7767_v63 }
 0x597   :  { %3397 = vmatpush.msra.mxu0 %v7771_v54  ;;  %3438 = vmatpush.msra.mxu1 %v7773_v37 }
 0x598   :  { %3479 = vmatpush.msrb.mxu2 %v7777_v49  ;;  %3520 = vmatpush.msrb.mxu3 %v7779_v51 }
 0x599   :  { %3398 = vmatpush.msra.mxu0 %v7783_v1  ;;  %3439 = vmatpush.msra.mxu1 %v7785_v52  ;;  %v5689_v52 = vld [vmem:[%s9428_s3] ss:$0 sm:$0xff] }
 0x59a   :  { %3480 = vmatpush.msrb.mxu2 %v7789_v44  ;;  %3521 = vmatpush.msrb.mxu3 %v7791_v47  ;;  %v2325_v47 = vpop.f32.mrf.mxu2 }
 0x59b   :  { %3399 = vmatpush.msra.mxu0 %v7795_v48  ;;  %3440 = vmatpush.msra.mxu1 %v7797_v2  ;;  %v9779_v48 = vld [vmem:[#allocation34_spill] sm:$0xff] }
 0x59c   :  { %3481 = vmatpush.msrb.mxu2 %v7801_v56  ;;  %3522 = vmatpush.msrb.mxu3 %v7803_v57  ;;  %v955_v44 = vadd.f32 %v5694_v50, %v9779_v48  ;;  %v2243_v57 = vpop.f32.mrf.mxu0  ;;  %v9780_v56 = vld [vmem:[#allocation30_spill] sm:$0xff] }
 0x59d   :  { %3400 = vmatpush.msra.mxu0 %v7807_v7  ;;  %3441 = vmatpush.msra.mxu1 %v7809_v60  ;;  %v928_v7 = vadd.f32 %v5689_v52, %v9780_v56  ;;  %v9781_v52 = vld [vmem:[#allocation20_spill] sm:$0xff] }
 0x59e   :  { %3482 = vmatpush.msrb.mxu2 %v7813_v10  ;;  %3523 = vmatpush.msrb.mxu3 %v7815_v46  ;;  %v2328_v2 = vadd.f32 %v2325_v47, %v955_v44  ;;  %v5696_v47 = vld [vmem:[%s9428_s3 + $0x2] ss:$0 sm:$0xff]  ;;  %v5697_v56 = vld [vmem:[%s9428_s3 + $0x3] ss:$0 sm:$0xff] }
 0x59f   :  { %3401 = vmatpush.msra.mxu0 %v7819_v13  ;;  %3442 = vmatpush.msra.mxu1 %v7821_v32  ;;  %v2246_v48 = vadd.f32 %v2243_v57, %v928_v7  ;;  %v2285_v57 = vpop.f32.mrf.mxu1 }
 0x5a0   :  { %3483 = vmatpush.msrb.mxu2 %v7825_v3  ;;  %3524 = vmatpush.msrb.mxu3 %v7827_v53  ;;  %v2329_v50 = vmul.f32 0.5, %v2328_v2  ;;  %v9782_v2 = vld [vmem:[#allocation29_spill] sm:$0xff] }
 0x5a1   :  { %3402 = vmatpush.msra.mxu0 %v7831_v34  ;;  %3443 = vmatpush.msra.mxu1 %v7833_v38  ;;  %v2247_v44 = vmul.f32 0.5, %v2246_v48  ;;  %v9783_v48 = vld [vmem:[#allocation35_spill] sm:$0xff] }
 0x5a2   :  { %3484 = vmatpush.msrb.mxu2 %v7837_v42  ;;  %3525 = vmatpush.msrb.mxu3 %v7839_v19  ;;  %5807 = vtanh.f32 %v2329_v50  ;;  %v982_v50 = vadd.f32 %v5696_v47, %v9783_v48  ;;  %v8198_v47 = vld [vmem:[#allocation12 + $0x110] sm:$0xff] }
 0x5a3   :  { %3403 = vmatpush.msra.mxu0 %v7843_v20  ;;  %3444 = vmatpush.msra.mxu1 %v7845_v11  ;;  %5809 = vtanh.f32 %v2247_v44  ;;  %v2369_v44 = vpop.f32.mrf.mxu3  ;;  %v8210_v48 = vld [vmem:[#allocation12 + $0xf0] sm:$0xff] }
 0x5a4   :  { %3485 = vmatpush.msrb.mxu2 %v7849_v23  ;;  %3526 = vmatpush.msrb.mxu3 %v7851_v15 }
 0x5a5   :  { %3404 = vmatpush.msra.mxu0 %v7855_v16  ;;  %3445 = vmatpush.msra.mxu1 %v9781_v52 }
 0x5a6   :  { %3486 = vmatpush.msrb.mxu2 %v7861_v21  ;;  %3527 = vmatpush.msrb.mxu3 %v9777_v36 }
 0x5a7   :  { %3405 = vmatpush.msra.mxu0 %v7867_v14  ;;  %3446 = vmatpush.msra.mxu1 %v7869_v12 }
 0x5a8   :  { %3487 = vmatpush.msrb.mxu2 %v7873_v39  ;;  %3528 = vmatpush.msrb.mxu3 %v7875_v24  ;;  %v5808_v7 = vpop.eup %5807 }
 0x5a9   :  { %3406 = vmatpush.msra.mxu0 %v7879_v59  ;;  %3447 = vmatpush.msra.mxu1 %v7881_v22 }
 0x5aa   :  { %3488 = vmatpush.msrb.mxu2 %v7885_v18  ;;  %3529 = vmatpush.msrb.mxu3 %v7887_v58 }
 0x5ab   :  { %3407 = vmatmul.f32.vlgmr.msra.gmra.mxu0 %v9782_v2  ;;  %3448 = vmatmul.f32.vlgmr.msra.gmra.mxu1 %v9782_v2 }
 0x5ac   :  { %3489 = vmatmul.f32.vlgmr.msrb.gmra.mxu2 %v9782_v2  ;;  %3530 = vmatmul.f32.vlgmr.msrb.gmra.mxu3 %v9782_v2  ;;  %v2331_v2 = vmul.f32 0.5, %v5808_v7  ;;  %v8208_v7 = vld [vmem:[#allocation12 + $0xe0] sm:$0xff] }
 0x5ad   :  { %3556 = vmatpush.msrb.mxu0 %v7699_v26  ;;  %3597 = vmatpush.msrb.mxu1 %v7701_v55  ;;  %v5810_v26 = vpop.eup %5809  ;;  %v2288_v55 = vadd.f32 %v2285_v57, %v982_v50  ;;  %v8204_v57 = vld [vmem:[#allocation12 + $0x118] sm:$0xff]  ;;  %v8214_v50 = vld [vmem:[#allocation12 + $0xe8] sm:$0xff] }
 0x5ae   :  { %3638 = vmatpush.msra.mxu2 %v7705_v4  ;;  %3679 = vmatpush.msra.mxu3 %v7707_v28  ;;  %v9784_v4 = vld [vmem:[#allocation36_spill] sm:$0xff] }
 0x5af   :  { %3557 = vmatpush.msrb.mxu0 %v7711_v6  ;;  %3598 = vmatpush.msrb.mxu1 %v7713_v27  ;;  %v1009_v28 = vadd.f32 %v5697_v56, %v9784_v4  ;;  %v2249_v6 = vmul.f32 0.5, %v5810_v26  ;;  %5811 = vtanh.f32 %v2288_v55  ;;  %v8202_v56 = vld [vmem:[#allocation12 + $0x108] sm:$0xff]  ;;  %v8216_v26 = vld [vmem:[#allocation12 + $0xf8] sm:$0xff]  ;;  %v8220_v55 = vld [vmem:[#allocation12 + $0xc0] sm:$0xff] }
 0x5b0   :  { %3639 = vmatpush.msra.mxu2 %v7717_v8  ;;  %3680 = vmatpush.msra.mxu3 %v7719_v9  ;;  %v2332_v8 = vadd.f32 0.5, %v2331_v2  ;;  %v8226_v4 = vld [vmem:[#allocation12 + $0xc8] sm:$0xff]  ;;  %v8232_v2 = vld [vmem:[#allocation12 + $0xa0] sm:$0xff] }
 0x5b1   :  { %3558 = vmatpush.msrb.mxu0 %v7723_v33  ;;  %3599 = vmatpush.msrb.mxu1 %v7725_v29  ;;  %v2372_v27 = vadd.f32 %v2369_v44, %v1009_v28  ;;  %v2250_v9 = vadd.f32 0.5, %v2249_v6  ;;  %v9785_v29 = vld [vmem:[#allocation27_spill] sm:$0xff]  ;;  %v8222_v44 = vld [vmem:[#allocation12 + $0xd0] sm:$0xff] }
 0x5b2   :  { %3640 = vmatpush.msra.mxu2 %v7729_v31  ;;  %3681 = vmatpush.msra.mxu3 %v7731_v40  ;;  %v2333_v31 = vmul.f32 %v2332_v8, %v9785_v29  ;;  %v8228_v28 = vld [vmem:[#allocation12 + $0xd8] sm:$0xff]  ;;  %v8234_v6 = vld [vmem:[#allocation12 + $0xb0] sm:$0xff]  ;;  %v8250_v29 = vld [vmem:[#allocation12 + $0x88] sm:$0xff] }
 0x5b3   :  { %3559 = vmatpush.msrb.mxu0 %v7735_v30  ;;  %3600 = vmatpush.msrb.mxu1 %v7737_v35  ;;  %v2373_v33 = vmul.f32 0.5, %v2372_v27  ;;  %v9786_v30 = vld [vmem:[#allocation28_spill] sm:$0xff]  ;;  %v8238_v27 = vld [vmem:[#allocation12 + $0xa8] sm:$0xff]  ;;  %v8240_v8 = vld [vmem:[#allocation12 + $0xb8] sm:$0xff] }
 0x5b4   :  { %3641 = vmatpush.msra.mxu2 %v7741_v25  ;;  %3682 = vmatpush.msra.mxu3 %v7743_v41  ;;  %v9787_v25 = vld [vmem:[#allocation26_spill] sm:$0xff]  ;;  %v9788_v41 = vld [vmem:[#allocation31_spill] sm:$0xff] }
 0x5b5   :  { %3560 = vmatpush.msrb.mxu0 %v7747_v62  ;;  %3601 = vmatpush.msrb.mxu1 %v7749_v61  ;;  %v5812_v40 = vpop.eup %5811  ;;  %5813 = vtanh.f32 %v2373_v33  ;;  %v9789_v62 = vld [vmem:[#allocation33_spill] sm:$0xff]  ;;  %v9790_v61 = vld [vmem:[#allocation32_spill] sm:$0xff]  ;;  %v8246_v33 = vld [vmem:[#allocation12 + $0x90] sm:$0xff] }
 0x5b6   :  { %3642 = vmatpush.msra.mxu2 %v7753_v5  ;;  %3683 = vmatpush.msra.mxu3 %v7755_v0  ;;  %v2290_v35 = vmul.f32 %v5812_v40, %v2250_v9  ;;  %v9791_v0 = vld [vmem:[#allocation37_spill] sm:$0xff]  ;;  %v8244_v9 = vld [vmem:[#allocation12 + $0x80] sm:$0xff] }
 0x5b7   :  { %3561 = vmatpush.msrb.mxu0 %v7759_v17  ;;  %3602 = vmatpush.msrb.mxu1 %v7761_v43  ;;  %v9792_v17 = vld [vmem:[#allocation19_spill] sm:$0xff]  ;;  %v9793_v43 = vld [vmem:[#allocation21_spill] sm:$0xff]  ;;  %v8256_v40 = vld [vmem:[#allocation12 + $0x60] sm:$0xff] }
 0x5b8   :  { %3643 = vmatpush.msra.mxu2 %v7765_v45  ;;  %3684 = vmatpush.msra.mxu3 %v7767_v63  ;;  %v2334_v5 = vadd.f32 %v2333_v31, %v2290_v35  ;;  %v8252_v31 = vld [vmem:[#allocation12 + $0x98] sm:$0xff]  ;;  %v8262_v35 = vld [vmem:[#allocation12 + $0x68] sm:$0xff] }
 0x5b9   :  { %3562 = vmatpush.msrb.mxu0 %v7771_v54  ;;  %3603 = vmatpush.msrb.mxu1 %v7773_v37 }
 0x5ba   :  { %3644 = vmatpush.msra.mxu2 %v7777_v49  ;;  %3685 = vmatpush.msra.mxu3 %v7779_v51  ;;  %5815 = vtanh.f32 %v2334_v5  ;;  %v8116_v51 = vld [vmem:[#allocation12 + $0x1e0] sm:$0xff]  ;;  %v8276_v5 = vld [vmem:[#allocation12 + $0x58] sm:$0xff] }
 0x5bb   :  { %3563 = vmatpush.msrb.mxu0 %v7783_v1  ;;  %3604 = vmatpush.msrb.mxu1 %v9786_v30  ;;  %v5814_v45 = vpop.eup %5813  ;;  %v8118_v1 = vld [vmem:[#allocation12 + $0x1f0] sm:$0xff]  ;;  %9794 = vst [vmem:[#allocation45_spill] sm:$0xff] %v8276_v5 }
 0x5bc   :  { %3645 = vmatpush.msra.mxu2 %v9787_v25  ;;  %3686 = vmatpush.msra.mxu3 %v9788_v41  ;;  %v2375_v63 = vmul.f32 0.5, %v5814_v45  ;;  %v8258_v30 = vld [vmem:[#allocation12 + $0x70] sm:$0xff]  ;;  %v8264_v25 = vld [vmem:[#allocation12 + $0x78] sm:$0xff]  ;;  %v8268_v41 = vld [vmem:[#allocation12 + $0x40] sm:$0xff] }
 0x5bd   :  { %3564 = vmatpush.msrb.mxu0 %v9789_v62  ;;  %3605 = vmatpush.msrb.mxu1 %v9790_v61  ;;  %v8270_v62 = vld [vmem:[#allocation12 + $0x50] sm:$0xff]  ;;  %v8274_v61 = vld [vmem:[#allocation12 + $0x48] sm:$0xff]  ;;  %v8288_v45 = vld [vmem:[#allocation12 + $0x38] sm:$0xff] }
 0x5be   :  { %3646 = vmatpush.msra.mxu2 %v9791_v0  ;;  %3687 = vmatpush.msra.mxu3 %v9792_v17  ;;  %v2376_v37 = vadd.f32 0.5, %v2375_v63  ;;  %v8280_v0 = vld [vmem:[#allocation12 + $0x20] sm:$0xff]  ;;  %v8282_v17 = vld [vmem:[#allocation12 + $0x30] sm:$0xff] }
 0x5bf   :  { %3565 = vmatpush.msrb.mxu0 %v9793_v43  ;;  %3606 = vmatpush.msrb.mxu1 %v7809_v60  ;;  %v8120_v60 = vld [vmem:[#allocation12 + $0x1e8] sm:$0xff]  ;;  %v8292_v63 = vld [vmem:[#allocation12] sm:$0xff] }
 0x5c0   :  { %3647 = vmatpush.msra.mxu2 %v7813_v10  ;;  %3688 = vmatpush.msra.mxu3 %v7815_v46  ;;  %v5816_v54 = vpop.eup %5815  ;;  %v8122_v10 = vld [vmem:[#allocation12 + $0x1f8] sm:$0xff]  ;;  %v8124_v46 = vld [vmem:[#allocation12 + $0x1c0] sm:$0xff]  ;;  %v8286_v43 = vld [vmem:[#allocation12 + $0x28] sm:$0xff] }
 0x5c1   :  { %3566 = vmatpush.msrb.mxu0 %v7819_v13  ;;  %3607 = vmatpush.msrb.mxu1 %v7821_v32  ;;  %v2378_v49 = vmul.f32 %v5816_v54, %v2376_v37  ;;  %v8126_v13 = vld [vmem:[#allocation12 + $0x1d0] sm:$0xff]  ;;  %v8130_v32 = vld [vmem:[#allocation12 + $0x1c8] sm:$0xff] }
 0x5c2   :  { %3648 = vmatpush.msra.mxu2 %v7825_v3  ;;  %3689 = vmatpush.msra.mxu3 %v7827_v53  ;;  %v8132_v3 = vld [vmem:[#allocation12 + $0x1d8] sm:$0xff]  ;;  %v8136_v53 = vld [vmem:[#allocation12 + $0x1a0] sm:$0xff]  ;;  %v8294_v54 = vld [vmem:[#allocation12 + $0x10] sm:$0xff] }
 0x5c3   :  { %3567 = vmatpush.msrb.mxu0 %v7831_v34  ;;  %3608 = vmatpush.msrb.mxu1 %v7833_v38  ;;  %v8138_v34 = vld [vmem:[#allocation12 + $0x1b0] sm:$0xff]  ;;  %v8142_v38 = vld [vmem:[#allocation12 + $0x1a8] sm:$0xff] }
 0x5c4   :  { %3649 = vmatpush.msra.mxu2 %v7837_v42  ;;  %3690 = vmatpush.msra.mxu3 %v7839_v19  ;;  %v8144_v42 = vld [vmem:[#allocation12 + $0x1b8] sm:$0xff]  ;;  %v8148_v19 = vld [vmem:[#allocation12 + $0x180] sm:$0xff]  ;;  %v8298_v37 = vld [vmem:[#allocation12 + $0x8] sm:$0xff] }
 0x5c5   :  { %3568 = vmatpush.msrb.mxu0 %v7843_v20  ;;  %3609 = vmatpush.msrb.mxu1 %v7845_v11  ;;  %v8150_v20 = vld [vmem:[#allocation12 + $0x190] sm:$0xff]  ;;  %v8154_v11 = vld [vmem:[#allocation12 + $0x188] sm:$0xff] }
 0x5c6   :  { %3650 = vmatpush.msra.mxu2 %v7849_v23  ;;  %3691 = vmatpush.msra.mxu3 %v7851_v15  ;;  %v8156_v23 = vld [vmem:[#allocation12 + $0x198] sm:$0xff]  ;;  %v8160_v15 = vld [vmem:[#allocation12 + $0x160] sm:$0xff] }
 0x5c7   :  { %3569 = vmatpush.msrb.mxu0 %v7855_v16  ;;  %3610 = vmatpush.msrb.mxu1 %v9781_v52  ;;  %v8162_v16 = vld [vmem:[#allocation12 + $0x170] sm:$0xff]  ;;  %v8196_v52 = vld [vmem:[#allocation12 + $0x100] sm:$0xff] }
 0x5c8   :  { %3651 = vmatpush.msra.mxu2 %v7861_v21  ;;  %3692 = vmatpush.msra.mxu3 %v9777_v36  ;;  %v8166_v21 = vld [vmem:[#allocation12 + $0x168] sm:$0xff]  ;;  %v8192_v36 = vld [vmem:[#allocation12 + $0x138] sm:$0xff] }
 0x5c9   :  { %3570 = vmatpush.msrb.mxu0 %v7867_v14  ;;  %3611 = vmatpush.msrb.mxu1 %v7869_v12  ;;  %v8168_v14 = vld [vmem:[#allocation12 + $0x178] sm:$0xff]  ;;  %v8172_v12 = vld [vmem:[#allocation12 + $0x140] sm:$0xff] }
 0x5ca   :  { %3652 = vmatpush.msra.mxu2 %v7873_v39  ;;  %3693 = vmatpush.msra.mxu3 %v7875_v24  ;;  %v8174_v39 = vld [vmem:[#allocation12 + $0x150] sm:$0xff]  ;;  %v8178_v24 = vld [vmem:[#allocation12 + $0x148] sm:$0xff] }
 0x5cb   :  { %3571 = vmatpush.msrb.mxu0 %v7879_v59  ;;  %3612 = vmatpush.msrb.mxu1 %v7881_v22  ;;  %v8180_v59 = vld [vmem:[#allocation12 + $0x158] sm:$0xff]  ;;  %v8184_v22 = vld [vmem:[#allocation12 + $0x120] sm:$0xff] }
 0x5cc   :  { %3653 = vmatpush.msra.mxu2 %v7885_v18  ;;  %3694 = vmatpush.msra.mxu3 %v7887_v58  ;;  %v8186_v18 = vld [vmem:[#allocation12 + $0x130] sm:$0xff]  ;;  %v8190_v58 = vld [vmem:[#allocation12 + $0x128] sm:$0xff] }
 0x5cd   :  { %3572 = vmatmul.f32.vlgmr.msrb.gmra.mxu0 %v2378_v49  ;;  %3613 = vmatmul.f32.vlgmr.msrb.gmra.mxu1 %v2378_v49 }
 0x5ce   :  { %3654 = vmatmul.f32.vlgmr.msra.gmra.mxu2 %v2378_v49  ;;  %3695 = vmatmul.f32.vlgmr.msra.gmra.mxu3 %v2378_v49  ;;  %v8300_v49 = vld [vmem:[#allocation12 + $0x18] sm:$0xff] }
 0x5cf   :  { %3717 = vmatpush.msra.mxu0 %v8116_v51  ;;  %3759 = vmatpush.msra.mxu1 %v8118_v1 }
 0x5d0   :  { %3799 = vmatpush.msrb.mxu2 %v8120_v60  ;;  %3843 = vmatpush.msrb.mxu3 %v8122_v10 }
 0x5d1   :  { %3718 = vmatpush.msra.mxu0 %v8124_v46  ;;  %3760 = vmatpush.msra.mxu1 %v8126_v13 }
 0x5d2   :  { %3800 = vmatpush.msrb.mxu2 %v8130_v32  ;;  %3844 = vmatpush.msrb.mxu3 %v8132_v3 }
 0x5d3   :  { %3719 = vmatpush.msra.mxu0 %v8136_v53  ;;  %3761 = vmatpush.msra.mxu1 %v8138_v34 }
 0x5d4   :  { %3801 = vmatpush.msrb.mxu2 %v8142_v38  ;;  %3845 = vmatpush.msrb.mxu3 %v8144_v42 }
 0x5d5   :  { %3720 = vmatpush.msra.mxu0 %v8148_v19  ;;  %3762 = vmatpush.msra.mxu1 %v8150_v20 }
 0x5d6   :  { %3802 = vmatpush.msrb.mxu2 %v8154_v11  ;;  %3846 = vmatpush.msrb.mxu3 %v8156_v23 }
 0x5d7   :  { %3721 = vmatpush.msra.mxu0 %v8160_v15  ;;  %3763 = vmatpush.msra.mxu1 %v8162_v16 }
 0x5d8   :  { %3803 = vmatpush.msrb.mxu2 %v8166_v21  ;;  %3847 = vmatpush.msrb.mxu3 %v8168_v14 }
 0x5d9   :  { %3722 = vmatpush.msra.mxu0 %v8172_v12  ;;  %3764 = vmatpush.msra.mxu1 %v8174_v39 }
 0x5da   :  { %3804 = vmatpush.msrb.mxu2 %v8178_v24  ;;  %3848 = vmatpush.msrb.mxu3 %v8180_v59 }
 0x5db   :  { %3723 = vmatpush.msra.mxu0 %v8184_v22  ;;  %3765 = vmatpush.msra.mxu1 %v8186_v18 }
 0x5dc   :  { %3805 = vmatpush.msrb.mxu2 %v8190_v58  ;;  %3849 = vmatpush.msrb.mxu3 %v8192_v36 }
 0x5dd   :  { %3724 = vmatpush.msra.mxu0 %v8196_v52  ;;  %3766 = vmatpush.msra.mxu1 %v8198_v47 }
 0x5de   :  { %3806 = vmatpush.msrb.mxu2 %v8202_v56  ;;  %3850 = vmatpush.msrb.mxu3 %v8204_v57 }
 0x5df   :  { %3725 = vmatpush.msra.mxu0 %v8208_v7  ;;  %3767 = vmatpush.msra.mxu1 %v8210_v48 }
 0x5e0   :  { %3807 = vmatpush.msrb.mxu2 %v8214_v50  ;;  %3851 = vmatpush.msrb.mxu3 %v8216_v26 }
 0x5e1   :  { %3726 = vmatpush.msra.mxu0 %v8220_v55  ;;  %3768 = vmatpush.msra.mxu1 %v8222_v44 }
 0x5e2   :  { %3808 = vmatpush.msrb.mxu2 %v8226_v4  ;;  %3852 = vmatpush.msrb.mxu3 %v8228_v28 }
 0x5e3   :  { %3727 = vmatpush.msra.mxu0 %v8232_v2  ;;  %3769 = vmatpush.msra.mxu1 %v8234_v6 }
 0x5e4   :  { %3809 = vmatpush.msrb.mxu2 %v8238_v27  ;;  %3853 = vmatpush.msrb.mxu3 %v8240_v8 }
 0x5e5   :  { %3728 = vmatpush.msra.mxu0 %v8244_v9  ;;  %3770 = vmatpush.msra.mxu1 %v8246_v33 }
 0x5e6   :  { %3810 = vmatpush.msrb.mxu2 %v8250_v29  ;;  %3854 = vmatpush.msrb.mxu3 %v8252_v31 }
 0x5e7   :  { %3729 = vmatpush.msra.mxu0 %v8256_v40  ;;  %3771 = vmatpush.msra.mxu1 %v8258_v30 }
 0x5e8   :  { %3811 = vmatpush.msrb.mxu2 %v8262_v35  ;;  %3855 = vmatpush.msrb.mxu3 %v8264_v25 }
 0x5e9   :  { %3730 = vmatpush.msra.mxu0 %v8268_v41  ;;  %3772 = vmatpush.msra.mxu1 %v8270_v62 }
 0x5ea   :  { %3812 = vmatpush.msrb.mxu2 %v8274_v61  ;;  %3856 = vmatpush.msrb.mxu3 %v8276_v5  ;;  %v9795_v5 = vmov 0.0  }
 0x5eb   :  { %3731 = vmatpush.msra.mxu0 %v8280_v0  ;;  %3773 = vmatpush.msra.mxu1 %v8282_v17 }
 0x5ec   :  { %3813 = vmatpush.msrb.mxu2 %v8286_v43  ;;  %3857 = vmatpush.msrb.mxu3 %v8288_v45 }
 0x5ed   :  { %3732 = vmatpush.msra.mxu0 %v8292_v63  ;;  %3774 = vmatpush.msra.mxu1 %v8294_v54 }
 0x5ee   :  { %3814 = vmatpush.msrb.mxu2 %v8298_v37  ;;  %3858 = vmatpush.msrb.mxu3 %v8300_v49 }
 0x5ef   :  { %3733 = vmatmul.f32.vlgmr.msra.gmra.mxu0 %v9795_v5  ;;  %3775 = vmatmul.f32.vlgmr.msra.gmra.mxu1 %v9795_v5 }
 0x5f0   :  { %3815 = vmatmul.f32.vlgmr.msrb.gmra.mxu2 %v9795_v5  ;;  %3859 = vmatmul.f32.vlgmr.msrb.gmra.mxu3 %v9795_v5  ;;  %v9796_v5 = vld [vmem:[#allocation45_spill] sm:$0xff] }
 0x5f1   :  { %3888 = vmatpush.msrb.mxu0 %v8116_v51  ;;  %3930 = vmatpush.msrb.mxu1 %v8118_v1 }
 0x5f2   :  { %3970 = vmatpush.msra.mxu2 %v8120_v60  ;;  %4014 = vmatpush.msra.mxu3 %v8122_v10 }
 0x5f3   :  { %3889 = vmatpush.msrb.mxu0 %v8124_v46  ;;  %3931 = vmatpush.msrb.mxu1 %v8126_v13 }
 0x5f4   :  { %3971 = vmatpush.msra.mxu2 %v8130_v32  ;;  %4015 = vmatpush.msra.mxu3 %v8132_v3 }
 0x5f5   :  { %3890 = vmatpush.msrb.mxu0 %v8136_v53  ;;  %3932 = vmatpush.msrb.mxu1 %v8138_v34 }
 0x5f6   :  { %3972 = vmatpush.msra.mxu2 %v8142_v38  ;;  %4016 = vmatpush.msra.mxu3 %v8144_v42 }
 0x5f7   :  { %3891 = vmatpush.msrb.mxu0 %v8148_v19  ;;  %3933 = vmatpush.msrb.mxu1 %v8150_v20 }
 0x5f8   :  { %3973 = vmatpush.msra.mxu2 %v8154_v11  ;;  %4017 = vmatpush.msra.mxu3 %v8156_v23 }
 0x5f9   :  { %3892 = vmatpush.msrb.mxu0 %v8160_v15  ;;  %3934 = vmatpush.msrb.mxu1 %v8162_v16 }
 0x5fa   :  { %3974 = vmatpush.msra.mxu2 %v8166_v21  ;;  %4018 = vmatpush.msra.mxu3 %v8168_v14 }
 0x5fb   :  { %3893 = vmatpush.msrb.mxu0 %v8172_v12  ;;  %3935 = vmatpush.msrb.mxu1 %v8174_v39 }
 0x5fc   :  { %3975 = vmatpush.msra.mxu2 %v8178_v24  ;;  %4019 = vmatpush.msra.mxu3 %v8180_v59 }
 0x5fd   :  { %3894 = vmatpush.msrb.mxu0 %v8184_v22  ;;  %3936 = vmatpush.msrb.mxu1 %v8186_v18 }
 0x5fe   :  { %3976 = vmatpush.msra.mxu2 %v8190_v58  ;;  %4020 = vmatpush.msra.mxu3 %v8192_v36 }
 0x5ff   :  { %3895 = vmatpush.msrb.mxu0 %v8196_v52  ;;  %3937 = vmatpush.msrb.mxu1 %v8198_v47 }
 0x600   :  { %3977 = vmatpush.msra.mxu2 %v8202_v56  ;;  %4021 = vmatpush.msra.mxu3 %v8204_v57 }
 0x601   :  { %3896 = vmatpush.msrb.mxu0 %v8208_v7  ;;  %3938 = vmatpush.msrb.mxu1 %v8210_v48 }
 0x602   :  { %3978 = vmatpush.msra.mxu2 %v8214_v50  ;;  %4022 = vmatpush.msra.mxu3 %v8216_v26 }
 0x603   :  { %3897 = vmatpush.msrb.mxu0 %v8220_v55  ;;  %3939 = vmatpush.msrb.mxu1 %v8222_v44 }
 0x604   :  { %3979 = vmatpush.msra.mxu2 %v8226_v4  ;;  %4023 = vmatpush.msra.mxu3 %v8228_v28 }
 0x605   :  { %3898 = vmatpush.msrb.mxu0 %v8232_v2  ;;  %3940 = vmatpush.msrb.mxu1 %v8234_v6 }
 0x606   :  { %3980 = vmatpush.msra.mxu2 %v8238_v27  ;;  %4024 = vmatpush.msra.mxu3 %v8240_v8 }
 0x607   :  { %3899 = vmatpush.msrb.mxu0 %v8244_v9  ;;  %3941 = vmatpush.msrb.mxu1 %v8246_v33 }
 0x608   :  { %3981 = vmatpush.msra.mxu2 %v8250_v29  ;;  %4025 = vmatpush.msra.mxu3 %v8252_v31 }
 0x609   :  { %3900 = vmatpush.msrb.mxu0 %v8256_v40  ;;  %3942 = vmatpush.msrb.mxu1 %v8258_v30 }
 0x60a   :  { %3982 = vmatpush.msra.mxu2 %v8262_v35  ;;  %4026 = vmatpush.msra.mxu3 %v8264_v25 }
 0x60b   :  { %3901 = vmatpush.msrb.mxu0 %v8268_v41  ;;  %3943 = vmatpush.msrb.mxu1 %v8270_v62 }
 0x60c   :  { %3983 = vmatpush.msra.mxu2 %v8274_v61  ;;  %4027 = vmatpush.msra.mxu3 %v9796_v5 }
 0x60d   :  { %3902 = vmatpush.msrb.mxu0 %v8280_v0  ;;  %3944 = vmatpush.msrb.mxu1 %v8282_v17 }
 0x60e   :  { %3984 = vmatpush.msra.mxu2 %v8286_v43  ;;  %4028 = vmatpush.msra.mxu3 %v8288_v45 }
 0x60f   :  { %3903 = vmatpush.msrb.mxu0 %v8292_v63  ;;  %3945 = vmatpush.msrb.mxu1 %v8294_v54 }
 0x610   :  { %3985 = vmatpush.msra.mxu2 %v8298_v37  ;;  %4029 = vmatpush.msra.mxu3 %v8300_v49 }
 0x611   :  { %4059 = vmatpush.msra.mxu0 %v8116_v51  ;;  %4101 = vmatpush.msra.mxu1 %v8118_v1  ;;  %v2418_v51 = vpop.f32.mrf.mxu0  ;;  %v2500_v1 = vpop.f32.mrf.mxu2 }
 0x612   :  { %4141 = vmatpush.msrb.mxu2 %v8120_v60  ;;  %4185 = vmatpush.msrb.mxu3 %v8122_v10  ;;  %v2541_v60 = vpop.f32.mrf.mxu3 }
 0x613   :  { %4060 = vmatpush.msra.mxu0 %v8124_v46  ;;  %4102 = vmatpush.msra.mxu1 %v8126_v13  ;;  %v2459_v46 = vpop.f32.mrf.mxu1 }
 0x614   :  { %4142 = vmatpush.msrb.mxu2 %v8130_v32  ;;  %4186 = vmatpush.msrb.mxu3 %v8132_v3 }
 0x615   :  { %4061 = vmatpush.msra.mxu0 %v8136_v53  ;;  %4103 = vmatpush.msra.mxu1 %v8138_v34 }
 0x616   :  { %4143 = vmatpush.msrb.mxu2 %v8142_v38  ;;  %4187 = vmatpush.msrb.mxu3 %v8144_v42 }
 0x617   :  { %4062 = vmatpush.msra.mxu0 %v8148_v19  ;;  %4104 = vmatpush.msra.mxu1 %v8150_v20 }
 0x618   :  { %4144 = vmatpush.msrb.mxu2 %v8154_v11  ;;  %4188 = vmatpush.msrb.mxu3 %v8156_v23 }
 0x619   :  { %4063 = vmatpush.msra.mxu0 %v8160_v15  ;;  %4105 = vmatpush.msra.mxu1 %v8162_v16  ;;  %v8440_v10 = vpop.f32.mrf.mxu0  ;;  %v8442_v13 = vpop.f32.mrf.mxu2 }
 0x61a   :  { %4145 = vmatpush.msrb.mxu2 %v8166_v21  ;;  %4189 = vmatpush.msrb.mxu3 %v8168_v14  ;;  %v8444_v32 = vpop.f32.mrf.mxu3 }
 0x61b   :  { %4064 = vmatpush.msra.mxu0 %v8172_v12  ;;  %4106 = vmatpush.msra.mxu1 %v8174_v39  ;;  %v8448_v53 = vpop.f32.mrf.mxu1 }
 0x61c   :  { %4146 = vmatpush.msrb.mxu2 %v8178_v24  ;;  %4190 = vmatpush.msrb.mxu3 %v8180_v59 }
 0x61d   :  { %4065 = vmatpush.msra.mxu0 %v8184_v22  ;;  %4107 = vmatpush.msra.mxu1 %v8186_v18 }
 0x61e   :  { %4147 = vmatpush.msrb.mxu2 %v8190_v58  ;;  %4191 = vmatpush.msrb.mxu3 %v8192_v36 }
 0x61f   :  { %4066 = vmatpush.msra.mxu0 %v8196_v52  ;;  %4108 = vmatpush.msra.mxu1 %v8198_v47  ;;  %v5698_v47 = vld [vmem:[%s9431_s6] ss:$0 sm:$0xff] }
 0x620   :  { %4148 = vmatpush.msrb.mxu2 %v8202_v56  ;;  %4192 = vmatpush.msrb.mxu3 %v8204_v57  ;;  %v2419_v56 = vadd.f32 %v5698_v47, %v2418_v51  ;;  %v5704_v47 = vld [vmem:[%s9431_s6 + $0x2] ss:$0 sm:$0xff] }
 0x621   :  { %4067 = vmatpush.msra.mxu0 %v8208_v7  ;;  %4109 = vmatpush.msra.mxu1 %v8210_v48  ;;  %v8446_v3 = vpop.f32.mrf.mxu0  ;;  %v8450_v34 = vpop.f32.mrf.mxu2 }
 0x622   :  { %4149 = vmatpush.msrb.mxu2 %v8214_v50  ;;  %4193 = vmatpush.msrb.mxu3 %v8216_v26  ;;  %v8452_v38 = vpop.f32.mrf.mxu3 }
 0x623   :  { %4068 = vmatpush.msra.mxu0 %v8220_v55  ;;  %4110 = vmatpush.msra.mxu1 %v8222_v44  ;;  %v8456_v19 = vpop.f32.mrf.mxu1  ;;  %v5699_v55 = vld [vmem:[%s9431_s6 + $0x1] ss:$0 sm:$0xff] }
 0x624   :  { %4150 = vmatpush.msrb.mxu2 %v8226_v4  ;;  %4194 = vmatpush.msrb.mxu3 %v8228_v28  ;;  %v5701_v4 = vld [vmem:[%s9431_s6 + $0x3] ss:$0 sm:$0xff]  ;;  %v2460_v28 = vadd.f32 %v5699_v55, %v2459_v46 }
 0x625   :  { %4069 = vmatpush.msra.mxu0 %v8232_v2  ;;  %4111 = vmatpush.msra.mxu1 %v8234_v6  ;;  %v5700_v2 = vld [vmem:[%s9431_s6 + $0x2] ss:$0 sm:$0xff] }
 0x626   :  { %4151 = vmatpush.msrb.mxu2 %v8238_v27  ;;  %4195 = vmatpush.msrb.mxu3 %v8240_v8 }
 0x627   :  { %4070 = vmatpush.msra.mxu0 %v8244_v9  ;;  %4112 = vmatpush.msra.mxu1 %v8246_v33  ;;  %v2542_v9 = vadd.f32 %v5701_v4, %v2541_v60  ;;  %v5702_v60 = vld [vmem:[%s9431_s6] ss:$0 sm:$0xff] }
 0x628   :  { %4152 = vmatpush.msrb.mxu2 %v8250_v29  ;;  %4196 = vmatpush.msrb.mxu3 %v8252_v31  ;;  %v2501_v29 = vadd.f32 %v5700_v2, %v2500_v1  ;;  %v2584_v46 = vadd.f32 %v5702_v60, %v8440_v10  ;;  %v8553_v60 = vld [vmem:[#allocation12 + $0x1d0] sm:$0xff] }
 0x629   :  { %4071 = vmatpush.msra.mxu0 %v8256_v40  ;;  %4113 = vmatpush.msra.mxu1 %v8258_v30  ;;  %v8454_v42 = vpop.f32.mrf.mxu0  ;;  %v8458_v20 = vpop.f32.mrf.mxu2 }
 0x62a   :  { %4153 = vmatpush.msrb.mxu2 %v8262_v35  ;;  %4197 = vmatpush.msrb.mxu3 %v8264_v25  ;;  %9797 = vst [vmem:[#allocation46_spill] sm:$0xff] %v8454_v42  ;;  %v8460_v11 = vpop.f32.mrf.mxu3  ;;  %v5707_v42 = vld [vmem:[%s9431_s6 + $0x1] ss:$0 sm:$0xff] }
 0x62b   :  { %4072 = vmatpush.msra.mxu0 %v8268_v41  ;;  %4114 = vmatpush.msra.mxu1 %v8270_v62  ;;  %9798 = vst [vmem:[#allocation47_spill] sm:$0xff] %v8458_v20  ;;  %v8464_v15 = vpop.f32.mrf.mxu1  ;;  %v8706_v20 = vld [vmem:[#allocation12 + $0x48] sm:$0xff] }
 0x62c   :  { %4154 = vmatpush.msrb.mxu2 %v8274_v61  ;;  %4198 = vmatpush.msrb.mxu3 %v9796_v5  ;;  %9799 = vst [vmem:[#allocation49_spill] sm:$0xff] %v8460_v11  ;;  %v8702_v11 = vld [vmem:[#allocation12 + $0x40] sm:$0xff] }
 0x62d   :  { %4073 = vmatpush.msra.mxu0 %v8280_v0  ;;  %4115 = vmatpush.msra.mxu1 %v8282_v17  ;;  %9801 = vst [vmem:[#allocation51_spill] sm:$0xff] %v8464_v15  ;;  %v8704_v15 = vld [vmem:[#allocation12 + $0x50] sm:$0xff] }
 0x62e   :  { %4155 = vmatpush.msrb.mxu2 %v8286_v43  ;;  %4199 = vmatpush.msrb.mxu3 %v8288_v45  ;;  %9829 = vst [vmem:[#allocation26_spill] sm:$0xff] %v8702_v11 }
 0x62f   :  { %4074 = vmatpush.msra.mxu0 %v8292_v63  ;;  %4116 = vmatpush.msra.mxu1 %v8294_v54  ;;  %9830 = vst [vmem:[#allocation31_spill] sm:$0xff] %v8704_v15 }
 0x630   :  { %4156 = vmatpush.msrb.mxu2 %v8298_v37  ;;  %4200 = vmatpush.msrb.mxu3 %v8300_v49  ;;  %9831 = vst [vmem:[#allocation33_spill] sm:$0xff] %v8706_v20 }
 0x631   :  { %v8462_v23 = vpop.f32.mrf.mxu0  ;;  %v8466_v16 = vpop.f32.mrf.mxu2 }
 0x632   :  { %9800 = vst [vmem:[#allocation50_spill] sm:$0xff] %v8462_v23  ;;  %v8468_v21 = vpop.f32.mrf.mxu3 }
 0x633   :  { %9802 = vst [vmem:[#allocation53_spill] sm:$0xff] %v8466_v16  ;;  %v8472_v12 = vpop.f32.mrf.mxu1  ;;  %v8697_v16 = vld [vmem:[#allocation12 + $0x78] sm:$0xff] }
 0x634   :  { %9803 = vst [vmem:[#allocation54_spill] sm:$0xff] %v8468_v21  ;;  %v8690_v21 = vld [vmem:[#allocation12 + $0x68] sm:$0xff] }
 0x635   :  { %9805 = vst [vmem:[#allocation23_spill] sm:$0xff] %v8472_v12  ;;  %v5708_v12 = vld [vmem:[%s9431_s6 + $0x2] ss:$0 sm:$0xff] }
 0x636   :  { %9827 = vst [vmem:[#allocation27_spill] sm:$0xff] %v8690_v21 }
 0x637   :  { %9828 = vst [vmem:[#allocation28_spill] sm:$0xff] %v8697_v16 }
 0x639   :  { %v8470_v14 = vpop.f32.mrf.mxu0  ;;  %v8474_v39 = vpop.f32.mrf.mxu2 }
 0x63a   :  { %9804 = vst [vmem:[#allocation18_spill] sm:$0xff] %v8470_v14  ;;  %v8476_v24 = vpop.f32.mrf.mxu3  ;;  %v8688_v14 = vld [vmem:[#allocation12 + $0x70] sm:$0xff] }
 0x63b   :  { %9806 = vst [vmem:[#allocation25_spill] sm:$0xff] %v8474_v39  ;;  %v8480_v22 = vpop.f32.mrf.mxu1  ;;  %v8686_v39 = vld [vmem:[#allocation12 + $0x60] sm:$0xff] }
 0x63c   :  { %9807 = vst [vmem:[#allocation24_spill] sm:$0xff] %v8476_v24  ;;  %v8678_v24 = vld [vmem:[#allocation12 + $0x88] sm:$0xff] }
 0x63d   :  { %9809 = vst [vmem:[#allocation40_spill] sm:$0xff] %v8480_v22  ;;  %v8682_v22 = vld [vmem:[#allocation12 + $0x98] sm:$0xff] }
 0x63e   :  { %9823 = vst [vmem:[#allocation20_spill] sm:$0xff] %v8678_v24 }
 0x63f   :  { %9824 = vst [vmem:[#allocation29_spill] sm:$0xff] %v8682_v22 }
 0x640   :  { %9825 = vst [vmem:[#allocation35_spill] sm:$0xff] %v8686_v39 }
 0x641   :  { %v8478_v59 = vpop.f32.mrf.mxu0  ;;  %v8482_v18 = vpop.f32.mrf.mxu2  ;;  %9826 = vst [vmem:[#allocation36_spill] sm:$0xff] %v8688_v14 }
 0x642   :  { %9808 = vst [vmem:[#allocation39_spill] sm:$0xff] %v8478_v59  ;;  %v8484_v58 = vpop.f32.mrf.mxu3  ;;  %v8676_v59 = vld [vmem:[#allocation12 + $0x90] sm:$0xff] }
 0x643   :  { %9810 = vst [vmem:[#allocation22_spill] sm:$0xff] %v8482_v18  ;;  %v8488_v52 = vpop.f32.mrf.mxu1  ;;  %v8674_v18 = vld [vmem:[#allocation12 + $0x80] sm:$0xff] }
 0x644   :  { %9811 = vst [vmem:[#allocation44_spill] sm:$0xff] %v8484_v58  ;;  %v5706_v58 = vld [vmem:[%s9431_s6] ss:$0 sm:$0xff] }
 0x645   :  { %9813 = vst [vmem:[#allocation52_spill] sm:$0xff] %v8488_v52  ;;  %v8670_v52 = vld [vmem:[#allocation12 + $0xb8] sm:$0xff]  ;;  %v2749_v23 = vadd.f32 %v5706_v58, %v8446_v3 }
 0x646   :  { %9820 = vst [vmem:[#allocation17_spill] sm:$0xff] %v8670_v52  ;;  %v8713_v3 = vld [vmem:[#allocation12 + $0x58] sm:$0xff] }
 0x647   :  { %9821 = vst [vmem:[#allocation34_spill] sm:$0xff] %v8674_v18 }
 0x648   :  { %9822 = vst [vmem:[#allocation30_spill] sm:$0xff] %v8676_v59 }
 0x649   :  { %9832 = vst [vmem:[#allocation32_spill] sm:$0xff] %v8713_v3 }
 0x64a   :  { %v8486_v36 = vpop.f32.mrf.mxu0 }
 0x64b   :  { %9812 = vst [vmem:[#allocation48_spill] sm:$0xff] %v8486_v36  ;;  %v8497_v50 = vpop.f32.mrf.mxu1  ;;  %v8659_v36 = vld [vmem:[#allocation12 + $0xa0] sm:$0xff] }
 0x64c   :  { %9816 = vst [vmem:[#allocation55_spill] sm:$0xff] %v8497_v50  ;;  %v8651_v50 = vld [vmem:[#allocation12 + $0xc8] sm:$0xff] }
 0x651   :  { %v8493_v57 = vpop.f32.mrf.mxu2  ;;  %v8495_v7 = vpop.f32.mrf.mxu3 }
 0x652   :  { %9814 = vst [vmem:[#allocation38_spill] sm:$0xff] %v8493_v57  ;;  %v8655_v57 = vld [vmem:[#allocation12 + $0xd8] sm:$0xff] }
 0x653   :  { %9815 = vst [vmem:[#allocation41_spill] sm:$0xff] %v8495_v7  ;;  %v8649_v7 = vld [vmem:[#allocation12 + $0xd0] sm:$0xff] }
 0x66c   :  { %v3734_v48 = vpop.f32.mrf.mxu0  ;;  %v3776_v33 = vpop.f32.mrf.mxu1 }
 0x66d   :  { %v3737_v26 = vadd.f32 %v3734_v48, %v2419_v56  ;;  %v3779_v35 = vadd.f32 %v3776_v33, %v2501_v29 }
 0x66f   :  { %v3738_v44 = vmul.f32 0.5, %v3737_v26  ;;  %v5703_v26 = vld [vmem:[%s9431_s6 + $0x1] ss:$0 sm:$0xff] }
 0x670   :  { %v2625_v2 = vadd.f32 %v5703_v26, %v8448_v53  ;;  %v8567_v26 = vld [vmem:[#allocation12 + $0x1a8] sm:$0xff] }
 0x671   :  { %5817 = vtanh.f32 %v3738_v44  ;;  %v2666_v44 = vadd.f32 %v5704_v47, %v8442_v13  ;;  %v8559_v47 = vld [vmem:[#allocation12 + $0x1d8] sm:$0xff] }
 0x673   :  { %v3816_v6 = vpop.f32.mrf.mxu2  ;;  %v3860_v8 = vpop.f32.mrf.mxu3 }
 0x674   :  { %v3819_v27 = vadd.f32 %v3816_v6, %v2460_v28  ;;  %v3863_v40 = vadd.f32 %v3860_v8, %v2542_v9  ;;  %v5705_v28 = vld [vmem:[%s9431_s6 + $0x3] ss:$0 sm:$0xff] }
 0x675   :  { %v2707_v9 = vadd.f32 %v5705_v28, %v8444_v32  ;;  %v8579_v28 = vld [vmem:[#allocation12 + $0x188] sm:$0xff] }
 0x676   :  { %v3820_v31 = vmul.f32 0.5, %v3819_v27  ;;  %v3864_v41 = vmul.f32 0.5, %v3863_v40 }
 0x677   :  { %v5818_v30 = vpop.eup %5817 }
 0x678   :  { %5819 = vtanh.f32 %v3820_v31  ;;  %v3740_v25 = vmul.f32 0.5, %v5818_v30 }
 0x679   :  { %5821 = vtanh.f32 %v3779_v35 }
 0x67a   :  { %v3741_v61 = vadd.f32 0.5, %v3740_v25  ;;  %5823 = vtanh.f32 %v3864_v41 }
 0x67e   :  { %v5820_v62 = vpop.eup %5819 }
 0x67f   :  { %v3822_v0 = vmul.f32 0.5, %v5820_v62  ;;  %v5822_v43 = vpop.eup %5821 }
 0x680   :  { %v3781_v45 = vmul.f32 %v5822_v43, %v3741_v61  ;;  %v5824_v54 = vpop.eup %5823 }
 0x681   :  { %v3823_v17 = vadd.f32 0.5, %v3822_v0  ;;  %v3866_v49 = vmul.f32 0.5, %v5824_v54  ;;  %v8539_v54 = vld [vmem:[#allocation12 + $0x1e0] sm:$0xff] }
 0x683   :  { %v3824_v63 = vmul.f32 0.0, %v3823_v17  ;;  %v3867_v5 = vadd.f32 0.5, %v3866_v49  ;;  %v8543_v49 = vld [vmem:[#allocation12 + $0x1e8] sm:$0xff] }
 0x685   :  { %v3825_v37 = vadd.f32 %v3824_v63, %v3781_v45 }
 0x687   :  { %5825 = vtanh.f32 %v3825_v37 }
 0x68d   :  { %v5826_v51 = vpop.eup %5825 }
 0x68e   :  { %v8508_v1 = vmul.f32 %v5826_v51, %v3867_v5  ;;  %v8547_v5 = vld [vmem:[#allocation12 + $0x1f8] sm:$0xff]  ;;  %v8551_v51 = vld [vmem:[#allocation12 + $0x1c0] sm:$0xff] }
 0x690   :  { %9817 = vst [vmem:[#allocation42_spill] sm:$0xff] %v8508_v1  ;;  %3904 = vmatmul.f32.vlgmr.msrb.gmra.mxu0 %v8508_v1  ;;  %3946 = vmatmul.f32.vlgmr.msrb.gmra.mxu1 %v8508_v1 }
 0x691   :  { %3986 = vmatmul.f32.vlgmr.msra.gmra.mxu2 %v8508_v1  ;;  %4030 = vmatmul.f32.vlgmr.msra.gmra.mxu3 %v8508_v1  ;;  %v8663_v1 = vld [vmem:[#allocation12 + $0xa8] sm:$0xff] }
 0x692   :  { %4230 = vmatpush.msrb.mxu0 %v8539_v54  ;;  %4312 = vmatpush.msra.mxu2 %v8543_v49  ;;  %9819 = vst [vmem:[#allocation56_spill] sm:$0xff] %v8663_v1 }
 0x693   :  { %4356 = vmatpush.msra.mxu3 %v8547_v5 }
 0x694   :  { %4231 = vmatpush.msrb.mxu0 %v8551_v51 }
 0x695   :  { %4357 = vmatpush.msra.mxu3 %v8559_v47 }
 0x70d   :  { %v3905_v56 = vpop.f32.mrf.mxu0  ;;  %v3947_v55 = vpop.f32.mrf.mxu1 }
 0x70e   :  { %v3908_v48 = vadd.f32 %v3905_v56, %v2584_v46  ;;  %v3950_v10 = vadd.f32 %v3947_v55, %v2666_v44  ;;  %v8555_v46 = vld [vmem:[#allocation12 + $0x1c8] sm:$0xff]  ;;  %v8563_v56 = vld [vmem:[#allocation12 + $0x1a0] sm:$0xff]  ;;  %v8571_v55 = vld [vmem:[#allocation12 + $0x1b8] sm:$0xff] }
 0x70f   :  { %4313 = vmatpush.msra.mxu2 %v8555_v46  ;;  %4232 = vmatpush.msrb.mxu0 %v8563_v56  ;;  %v8575_v44 = vld [vmem:[#allocation12 + $0x180] sm:$0xff] }
 0x710   :  { %v3909_v4 = vmul.f32 0.5, %v3908_v48  ;;  %v8565_v48 = vld [vmem:[#allocation12 + $0x1b0] sm:$0xff]  ;;  %4358 = vmatpush.msra.mxu3 %v8571_v55 }
 0x711   :  { %4314 = vmatpush.msra.mxu2 %v8567_v26  ;;  %4233 = vmatpush.msrb.mxu0 %v8575_v44 }
 0x712   :  { %5827 = vtanh.f32 %v3909_v4  ;;  %v8577_v4 = vld [vmem:[#allocation12 + $0x190] sm:$0xff] }
 0x713   :  { %5829 = vtanh.f32 %v3950_v10  ;;  %v8583_v10 = vld [vmem:[#allocation12 + $0x198] sm:$0xff]  ;;  %4315 = vmatpush.msra.mxu2 %v8579_v28 }
 0x714   :  { %v3987_v6 = vpop.f32.mrf.mxu2  ;;  %v4031_v8 = vpop.f32.mrf.mxu3  ;;  %4359 = vmatpush.msra.mxu3 %v8583_v10 }
 0x715   :  { %v3990_v27 = vadd.f32 %v3987_v6, %v2625_v2  ;;  %v4034_v31 = vadd.f32 %v4031_v8, %v2707_v9  ;;  %v8587_v2 = vld [vmem:[#allocation12 + $0x160] sm:$0xff]  ;;  %v8589_v6 = vld [vmem:[#allocation12 + $0x170] sm:$0xff]  ;;  %v8595_v8 = vld [vmem:[#allocation12 + $0x178] sm:$0xff] }
 0x716   :  { %4234 = vmatpush.msrb.mxu0 %v8587_v2  ;;  %4360 = vmatpush.msra.mxu3 %v8595_v8  ;;  %v8599_v9 = vld [vmem:[#allocation12 + $0x140] sm:$0xff] }
 0x717   :  { %v3991_v33 = vmul.f32 0.5, %v3990_v27  ;;  %v4035_v35 = vmul.f32 0.5, %v4034_v31  ;;  %v8591_v27 = vld [vmem:[#allocation12 + $0x168] sm:$0xff]  ;;  %v8607_v31 = vld [vmem:[#allocation12 + $0x158] sm:$0xff] }
 0x718   :  { %v5828_v29 = vpop.eup %5827  ;;  %4316 = vmatpush.msra.mxu2 %v8591_v27  ;;  %4235 = vmatpush.msrb.mxu0 %v8599_v9 }
 0x719   :  { %v3911_v40 = vmul.f32 0.5, %v5828_v29  ;;  %5831 = vtanh.f32 %v3991_v33  ;;  %v5830_v30 = vpop.eup %5829  ;;  %v8601_v33 = vld [vmem:[#allocation12 + $0x150] sm:$0xff]  ;;  %v8603_v29 = vld [vmem:[#allocation12 + $0x148] sm:$0xff]  ;;  %4361 = vmatpush.msra.mxu3 %v8607_v31 }
 0x71a   :  { %5833 = vtanh.f32 %v4035_v35  ;;  %4317 = vmatpush.msra.mxu2 %v8603_v29  ;;  %v8619_v35 = vld [vmem:[#allocation12 + $0x138] sm:$0xff] }
 0x71b   :  { %v3912_v13 = vadd.f32 0.5, %v3911_v40  ;;  %v8611_v40 = vld [vmem:[#allocation12 + $0x120] sm:$0xff]  ;;  %4362 = vmatpush.msra.mxu3 %v8619_v35 }
 0x71c   :  { %4236 = vmatpush.msrb.mxu0 %v8611_v40 }
 0x71d   :  { %v3952_v25 = vmul.f32 %v5830_v30, %v3912_v13  ;;  %v8613_v13 = vld [vmem:[#allocation12 + $0x130] sm:$0xff]  ;;  %v8615_v30 = vld [vmem:[#allocation12 + $0x128] sm:$0xff] }
 0x71e   :  { %4318 = vmatpush.msra.mxu2 %v8615_v30 }
 0x71f   :  { %v5832_v41 = vpop.eup %5831 }
 0x720   :  { %v3993_v62 = vmul.f32 0.5, %v5832_v41  ;;  %v5834_v0 = vpop.eup %5833  ;;  %v8625_v41 = vld [vmem:[#allocation12 + $0x110] sm:$0xff] }
 0x721   :  { %v4037_v32 = vmul.f32 0.5, %v5834_v0  ;;  %v8637_v0 = vld [vmem:[#allocation12 + $0xf0] sm:$0xff] }
 0x722   :  { %v3994_v61 = vadd.f32 0.5, %v3993_v62  ;;  %v8627_v62 = vld [vmem:[#allocation12 + $0x108] sm:$0xff] }
 0x723   :  { %v4038_v43 = vadd.f32 0.5, %v4037_v32  ;;  %4319 = vmatpush.msra.mxu2 %v8627_v62  ;;  %v8639_v32 = vld [vmem:[#allocation12 + $0xe8] sm:$0xff] }
 0x724   :  { %v3995_v53 = vmul.f32 %v3994_v61, %v3825_v37  ;;  %v8541_v37 = vld [vmem:[#allocation12 + $0x1f0] sm:$0xff]  ;;  %v8631_v61 = vld [vmem:[#allocation12 + $0x118] sm:$0xff] }
 0x725   :  { %4272 = vmatpush.msrb.mxu1 %v8541_v37  ;;  %4363 = vmatpush.msra.mxu3 %v8631_v61 }
 0x726   :  { %v8530_v17 = vadd.f32 %v3995_v53, %v3952_v25  ;;  %v8623_v25 = vld [vmem:[#allocation12 + $0x100] sm:$0xff]  ;;  %4320 = vmatpush.msra.mxu2 %v8639_v32 }
 0x727   :  { %4273 = vmatpush.msrb.mxu1 %v8553_v60  ;;  %4237 = vmatpush.msrb.mxu0 %v8623_v25  ;;  %v8635_v53 = vld [vmem:[#allocation12 + $0xe0] sm:$0xff] }
 0x728   :  { %5835 = vtanh.f32 %v8530_v17  ;;  %4321 = vmatpush.msra.mxu2 %v8651_v50 }
 0x729   :  { %4274 = vmatpush.msrb.mxu1 %v8565_v48  ;;  %4238 = vmatpush.msrb.mxu0 %v8635_v53 }
 0x72a   :  { %4322 = vmatpush.msra.mxu2 %v8663_v1 }
 0x72b   :  { %4275 = vmatpush.msrb.mxu1 %v8577_v4 }
 0x72c   :  { %4323 = vmatpush.msra.mxu2 %v8678_v24  ;;  %v8736_v24 = vld [vmem:[#allocation12 + $0x18] sm:$0xff] }
 0x72d   :  { %4276 = vmatpush.msrb.mxu1 %v8589_v6  ;;  %9840 = vst [vmem:[#allocation60_spill] sm:$0xff] %v8736_v24 }
 0x72e   :  { %v5836_v45 = vpop.eup %5835  ;;  %4324 = vmatpush.msra.mxu2 %v8690_v21  ;;  %v8719_v21 = vld [vmem:[#allocation12 + $0x30] sm:$0xff] }
 0x72f   :  { %v8533_v63 = vmul.f32 %v5836_v45, %v4038_v43  ;;  %4277 = vmatpush.msrb.mxu1 %v8601_v33  ;;  %v8643_v43 = vld [vmem:[#allocation12 + $0xf8] sm:$0xff]  ;;  %v8647_v45 = vld [vmem:[#allocation12 + $0xc0] sm:$0xff]  ;;  %9834 = vst [vmem:[#allocation19_spill] sm:$0xff] %v8719_v21 }
 0x730   :  { %4364 = vmatpush.msra.mxu3 %v8643_v43  ;;  %4239 = vmatpush.msrb.mxu0 %v8647_v45 }
 0x731   :  { %9818 = vst [vmem:[#allocation43_spill] sm:$0xff] %v8533_v63  ;;  %4075 = vmatmul.f32.vlgmr.msra.gmra.mxu0 %v8533_v63  ;;  %4117 = vmatmul.f32.vlgmr.msra.gmra.mxu1 %v8533_v63 }
 0x732   :  { %4157 = vmatmul.f32.vlgmr.msrb.gmra.mxu2 %v8533_v63  ;;  %4201 = vmatmul.f32.vlgmr.msrb.gmra.mxu3 %v8533_v63  ;;  %v8661_v63 = vld [vmem:[#allocation12 + $0xb0] sm:$0xff] }
 0x733   :  { %4278 = vmatpush.msrb.mxu1 %v8613_v13  ;;  %4365 = vmatpush.msra.mxu3 %v8655_v57 }
 0x734   :  { %4240 = vmatpush.msrb.mxu0 %v8659_v36  ;;  %4325 = vmatpush.msra.mxu2 %v8706_v20  ;;  %v8734_v20 = vld [vmem:[#allocation12 + $0x8] sm:$0xff] }
 0x735   :  { %4279 = vmatpush.msrb.mxu1 %v8625_v41  ;;  %4366 = vmatpush.msra.mxu3 %v8670_v52  ;;  %9839 = vst [vmem:[#allocation59_spill] sm:$0xff] %v8734_v20 }
 0x736   :  { %4241 = vmatpush.msrb.mxu0 %v8674_v18 }
 0x737   :  { %4280 = vmatpush.msrb.mxu1 %v8637_v0  ;;  %4367 = vmatpush.msra.mxu3 %v8682_v22 }
 0x738   :  { %4242 = vmatpush.msrb.mxu0 %v8686_v39 }
 0x739   :  { %4281 = vmatpush.msrb.mxu1 %v8649_v7  ;;  %4368 = vmatpush.msra.mxu3 %v8697_v16  ;;  %v8717_v16 = vld [vmem:[#allocation12 + $0x20] sm:$0xff] }
 0x73a   :  { %4243 = vmatpush.msrb.mxu0 %v8702_v11  ;;  %9833 = vst [vmem:[#allocation37_spill] sm:$0xff] %v8717_v16  ;;  %v8725_v11 = vld [vmem:[#allocation12 + $0x38] sm:$0xff] }
 0x73b   :  { %4282 = vmatpush.msrb.mxu1 %v8661_v63  ;;  %4369 = vmatpush.msra.mxu3 %v8713_v3  ;;  %9836 = vst [vmem:[#allocation45_spill] sm:$0xff] %v8725_v11 }
 0x73c   :  { %4244 = vmatpush.msrb.mxu0 %v8717_v16 }
 0x73d   :  { %4283 = vmatpush.msrb.mxu1 %v8676_v59  ;;  %4370 = vmatpush.msra.mxu3 %v8725_v11 }
 0x73f   :  { %4284 = vmatpush.msrb.mxu1 %v8688_v14  ;;  %v8721_v14 = vld [vmem:[#allocation12 + $0x28] sm:$0xff]  ;;  %4371 = vmatpush.msra.mxu3 %v8736_v24 }
 0x740   :  { %9835 = vst [vmem:[#allocation21_spill] sm:$0xff] %v8721_v14  ;;  %4326 = vmatpush.msra.mxu2 %v8721_v14 }
 0x741   :  { %4285 = vmatpush.msrb.mxu1 %v8704_v15  ;;  %v8727_v15 = vld [vmem:[#allocation12] sm:$0xff]  ;;  %4527 = vmatpush.msrb.mxu3 %v8547_v5 }
 0x742   :  { %9837 = vst [vmem:[#allocation57_spill] sm:$0xff] %v8727_v15  ;;  %4245 = vmatpush.msrb.mxu0 %v8727_v15  ;;  %4327 = vmatpush.msra.mxu2 %v8734_v20 }
 0x743   :  { %4286 = vmatpush.msrb.mxu1 %v8719_v21  ;;  %v5709_v21 = vld [vmem:[%s9431_s6 + $0x3] ss:$0 sm:$0xff]  ;;  %4528 = vmatpush.msrb.mxu3 %v8559_v47 }
 0x744   :  { %4401 = vmatpush.msra.mxu0 %v8539_v54  ;;  %4483 = vmatpush.msrb.mxu2 %v8543_v49 }
 0x745   :  { %4529 = vmatpush.msrb.mxu3 %v8571_v55 }
 0x746   :  { %4402 = vmatpush.msra.mxu0 %v8551_v51  ;;  %4484 = vmatpush.msrb.mxu2 %v8555_v46 }
 0x747   :  { %4530 = vmatpush.msrb.mxu3 %v8583_v10 }
 0x748   :  { %4403 = vmatpush.msra.mxu0 %v8563_v56  ;;  %4485 = vmatpush.msrb.mxu2 %v8567_v26 }
 0x749   :  { %4531 = vmatpush.msrb.mxu3 %v8595_v8 }
 0x74a   :  { %4404 = vmatpush.msra.mxu0 %v8575_v44  ;;  %4486 = vmatpush.msrb.mxu2 %v8579_v28 }
 0x74b   :  { %4532 = vmatpush.msrb.mxu3 %v8607_v31 }
 0x74c   :  { %4405 = vmatpush.msra.mxu0 %v8587_v2  ;;  %4487 = vmatpush.msrb.mxu2 %v8591_v27 }
 0x74d   :  { %4533 = vmatpush.msrb.mxu3 %v8619_v35 }
 0x74e   :  { %4406 = vmatpush.msra.mxu0 %v8599_v9  ;;  %4488 = vmatpush.msrb.mxu2 %v8603_v29 }
 0x74f   :  { %4534 = vmatpush.msrb.mxu3 %v8631_v61 }
 0x750   :  { %4407 = vmatpush.msra.mxu0 %v8611_v40  ;;  %4489 = vmatpush.msrb.mxu2 %v8615_v30 }
 0x751   :  { %4535 = vmatpush.msrb.mxu3 %v8643_v43 }
 0x752   :  { %4408 = vmatpush.msra.mxu0 %v8623_v25  ;;  %4490 = vmatpush.msrb.mxu2 %v8627_v62 }
 0x753   :  { %4536 = vmatpush.msrb.mxu3 %v8655_v57 }
 0x754   :  { %4409 = vmatpush.msra.mxu0 %v8635_v53  ;;  %4491 = vmatpush.msrb.mxu2 %v8639_v32 }
 0x755   :  { %4537 = vmatpush.msrb.mxu3 %v8670_v52 }
 0x756   :  { %4410 = vmatpush.msra.mxu0 %v8647_v45  ;;  %4492 = vmatpush.msrb.mxu2 %v8651_v50 }
 0x758   :  { %4411 = vmatpush.msra.mxu0 %v8659_v36  ;;  %4493 = vmatpush.msrb.mxu2 %v8663_v1 }
 0x75a   :  { %4412 = vmatpush.msra.mxu0 %v8674_v18 }
 0x7ae   :  { %v4076_v39 = vpop.f32.mrf.mxu0  ;;  %v4118_v22 = vpop.f32.mrf.mxu1 }
 0x7af   :  { %v4079_v58 = vadd.f32 %v4076_v39, %v2749_v23  ;;  %v8729_v23 = vld [vmem:[#allocation12 + $0x10] sm:$0xff]  ;;  %v2831_v39 = vadd.f32 %v5708_v12, %v8450_v34  ;;  %v2790_v34 = vadd.f32 %v5707_v42, %v8456_v19 }
 0x7b0   :  { %9838 = vst [vmem:[#allocation58_spill] sm:$0xff] %v8729_v23  ;;  %4287 = vmatpush.msrb.mxu1 %v8729_v23 }
 0x7b1   :  { %v4080_v3 = vmul.f32 0.5, %v4079_v58  ;;  %v4121_v16 = vadd.f32 %v4118_v22, %v2831_v39  ;;  %v2872_v22 = vadd.f32 %v5709_v21, %v8452_v38 }
 0x7b2   :  { %4443 = vmatpush.msra.mxu1 %v8541_v37 }
 0x7b3   :  { %5837 = vtanh.f32 %v4080_v3 }
 0x7b4   :  { %4444 = vmatpush.msra.mxu1 %v8553_v60  ;;  %5839 = vtanh.f32 %v4121_v16 }
 0x7b5   :  { %v4158_v12 = vpop.f32.mrf.mxu2  ;;  %v4202_v23 = vpop.f32.mrf.mxu3 }
 0x7b6   :  { %v4161_v58 = vadd.f32 %v4158_v12, %v2790_v34  ;;  %4445 = vmatpush.msra.mxu1 %v8565_v48  ;;  %v4205_v3 = vadd.f32 %v4202_v23, %v2872_v22 }
 0x7b8   :  { %v4162_v42 = vmul.f32 0.5, %v4161_v58  ;;  %4446 = vmatpush.msra.mxu1 %v8577_v4  ;;  %v4206_v21 = vmul.f32 0.5, %v4205_v3  ;;  %v9842_v3 = vld [vmem:[#allocation20_spill] sm:$0xff] }
 0x7b9   :  { %v5838_v19 = vpop.eup %5837  ;;  %4494 = vmatpush.msrb.mxu2 %v9842_v3 }
 0x7ba   :  { %v4082_v39 = vmul.f32 0.5, %v5838_v19  ;;  %5841 = vtanh.f32 %v4162_v42  ;;  %4447 = vmatpush.msra.mxu1 %v8589_v6  ;;  %v5840_v16 = vpop.eup %5839 }
 0x7bb   :  { %5843 = vtanh.f32 %v4206_v21  ;;  %v9846_v21 = vld [vmem:[#allocation27_spill] sm:$0xff] }
 0x7bc   :  { %v4083_v38 = vadd.f32 0.5, %v4082_v39  ;;  %4448 = vmatpush.msra.mxu1 %v8601_v33  ;;  %v9843_v39 = vld [vmem:[#allocation29_spill] sm:$0xff]  ;;  %4495 = vmatpush.msrb.mxu2 %v9846_v21 }
 0x7bd   :  { %4538 = vmatpush.msrb.mxu3 %v9843_v39  ;;  %v9853_v39 = vld [vmem:[#allocation37_spill] sm:$0xff] }
 0x7be   :  { %v4123_v23 = vmul.f32 %v5840_v16, %v4083_v38  ;;  %4449 = vmatpush.msra.mxu1 %v8613_v13  ;;  %v9844_v38 = vld [vmem:[#allocation35_spill] sm:$0xff]  ;;  %v9845_v16 = vld [vmem:[#allocation36_spill] sm:$0xff] }
 0x7bf   :  { %4413 = vmatpush.msra.mxu0 %v9844_v38  ;;  %v9854_v38 = vld [vmem:[#allocation19_spill] sm:$0xff] }
 0x7c0   :  { %v5842_v34 = vpop.eup %5841  ;;  %4450 = vmatpush.msra.mxu1 %v8625_v41 }
 0x7c1   :  { %v4164_v12 = vmul.f32 0.5, %v5842_v34  ;;  %v5844_v42 = vpop.eup %5843 }
 0x7c2   :  { %4451 = vmatpush.msra.mxu1 %v8637_v0 }
 0x7c3   :  { %v4165_v58 = vadd.f32 0.5, %v4164_v12  ;;  %v9848_v12 = vld [vmem:[#allocation26_spill] sm:$0xff] }
 0x7c4   :  { %4452 = vmatpush.msra.mxu1 %v8649_v7  ;;  %4414 = vmatpush.msra.mxu0 %v9848_v12 }
 0x7c5   :  { %v4166_v22 = vmul.f32 %v4165_v58, %v8530_v17  ;;  %v4208_v17 = vmul.f32 0.5, %v5844_v42  ;;  %v9849_v58 = vld [vmem:[#allocation31_spill] sm:$0xff]  ;;  %v9850_v42 = vld [vmem:[#allocation33_spill] sm:$0xff] }
 0x7c6   :  { %4453 = vmatpush.msra.mxu1 %v8661_v63  ;;  %4496 = vmatpush.msrb.mxu2 %v9850_v42 }
 0x7c7   :  { %v8786_v19 = vadd.f32 %v4166_v22, %v4123_v23  ;;  %v9847_v23 = vld [vmem:[#allocation28_spill] sm:$0xff]  ;;  %v4209_v34 = vadd.f32 0.5, %v4208_v17  ;;  %4415 = vmatpush.msra.mxu0 %v9853_v39  ;;  %v9855_v17 = vld [vmem:[#allocation58_spill] sm:$0xff] }
 0x7c8   :  { %4454 = vmatpush.msra.mxu1 %v8676_v59  ;;  %4539 = vmatpush.msrb.mxu3 %v9847_v23 }
 0x7c9   :  { %9841 = vst [vmem:[#allocation61_spill] sm:$0xff] %v8786_v19  ;;  %5845 = vtanh.f32 %v8786_v19  ;;  %v9851_v19 = vld [vmem:[#allocation32_spill] sm:$0xff]  ;;  %4497 = vmatpush.msrb.mxu2 %v8721_v14  ;;  %4416 = vmatpush.msra.mxu0 %v8727_v15 }
 0x7ca   :  { %4455 = vmatpush.msra.mxu1 %v9845_v16  ;;  %4540 = vmatpush.msrb.mxu3 %v9851_v19 }
 0x7cb   :  { %4498 = vmatpush.msrb.mxu2 %v8734_v20 }
 0x7cc   :  { %4456 = vmatpush.msra.mxu1 %v9849_v58  ;;  %4541 = vmatpush.msrb.mxu3 %v8725_v11 }
 0x7ce   :  { %4457 = vmatpush.msra.mxu1 %v9854_v38  ;;  %4542 = vmatpush.msrb.mxu3 %v8736_v24 }
 0x7cf   :  { %v5846_v22 = vpop.eup %5845 }
 0x7d0   :  { %v8807_v3 = vmul.f32 %v5846_v22, %v4209_v34  ;;  %4458 = vmatpush.msra.mxu1 %v9855_v17  ;;  %v9856_v34 = vld [vmem:[#allocation20_spill] sm:$0xff]  ;;  %v9857_v22 = vld [vmem:[#allocation29_spill] sm:$0xff] }
 0x7d2   :  { %9852 = vst [vmem:[#allocation62_spill] sm:$0xff] %v8807_v3  ;;  %4246 = vmatmul.f32.vlgmr.msrb.gmra.mxu0 %v8807_v3  ;;  %4288 = vmatmul.f32.vlgmr.msrb.gmra.mxu1 %v8807_v3 }
 0x7d3   :  { %4328 = vmatmul.f32.vlgmr.msra.gmra.mxu2 %v8807_v3  ;;  %4372 = vmatmul.f32.vlgmr.msra.gmra.mxu3 %v8807_v3  ;;  %v9858_v3 = vld [vmem:[#allocation35_spill] sm:$0xff] }
 0x7d4   :  { %4572 = vmatpush.msrb.mxu0 %v8539_v54  ;;  %4614 = vmatpush.msrb.mxu1 %v8541_v37 }
 0x7d5   :  { %4654 = vmatpush.msra.mxu2 %v8543_v49  ;;  %4698 = vmatpush.msra.mxu3 %v8547_v5 }
 0x7d6   :  { %4573 = vmatpush.msrb.mxu0 %v8551_v51  ;;  %4615 = vmatpush.msrb.mxu1 %v8553_v60 }
 0x7d7   :  { %4655 = vmatpush.msra.mxu2 %v8555_v46  ;;  %4699 = vmatpush.msra.mxu3 %v8559_v47 }
 0x7d8   :  { %4574 = vmatpush.msrb.mxu0 %v8563_v56  ;;  %4616 = vmatpush.msrb.mxu1 %v8565_v48 }
 0x7d9   :  { %4656 = vmatpush.msra.mxu2 %v8567_v26  ;;  %4700 = vmatpush.msra.mxu3 %v8571_v55 }
 0x7da   :  { %4575 = vmatpush.msrb.mxu0 %v8575_v44  ;;  %4617 = vmatpush.msrb.mxu1 %v8577_v4 }
 0x7db   :  { %4657 = vmatpush.msra.mxu2 %v8579_v28  ;;  %4701 = vmatpush.msra.mxu3 %v8583_v10 }
 0x7dc   :  { %4576 = vmatpush.msrb.mxu0 %v8587_v2  ;;  %4618 = vmatpush.msrb.mxu1 %v8589_v6 }
 0x7dd   :  { %4658 = vmatpush.msra.mxu2 %v8591_v27  ;;  %4702 = vmatpush.msra.mxu3 %v8595_v8 }
 0x7de   :  { %4577 = vmatpush.msrb.mxu0 %v8599_v9  ;;  %4619 = vmatpush.msrb.mxu1 %v8601_v33 }
 0x7df   :  { %4659 = vmatpush.msra.mxu2 %v8603_v29  ;;  %4703 = vmatpush.msra.mxu3 %v8607_v31 }
 0x7e0   :  { %4578 = vmatpush.msrb.mxu0 %v8611_v40  ;;  %4620 = vmatpush.msrb.mxu1 %v8613_v13 }
 0x7e1   :  { %4660 = vmatpush.msra.mxu2 %v8615_v30  ;;  %4704 = vmatpush.msra.mxu3 %v8619_v35 }
 0x7e2   :  { %4579 = vmatpush.msrb.mxu0 %v8623_v25  ;;  %4621 = vmatpush.msrb.mxu1 %v8625_v41 }
 0x7e3   :  { %4661 = vmatpush.msra.mxu2 %v8627_v62  ;;  %4705 = vmatpush.msra.mxu3 %v8631_v61 }
 0x7e4   :  { %4580 = vmatpush.msrb.mxu0 %v8635_v53  ;;  %4622 = vmatpush.msrb.mxu1 %v8637_v0 }
 0x7e5   :  { %4662 = vmatpush.msra.mxu2 %v8639_v32  ;;  %4706 = vmatpush.msra.mxu3 %v8643_v43 }
 0x7e6   :  { %4581 = vmatpush.msrb.mxu0 %v8647_v45  ;;  %4623 = vmatpush.msrb.mxu1 %v8649_v7 }
 0x7e7   :  { %4663 = vmatpush.msra.mxu2 %v8651_v50  ;;  %4707 = vmatpush.msra.mxu3 %v8655_v57 }
 0x7e8   :  { %4582 = vmatpush.msrb.mxu0 %v8659_v36  ;;  %4624 = vmatpush.msrb.mxu1 %v8661_v63 }
 0x7e9   :  { %4664 = vmatpush.msra.mxu2 %v8663_v1  ;;  %4708 = vmatpush.msra.mxu3 %v8670_v52 }
 0x7ea   :  { %4583 = vmatpush.msrb.mxu0 %v8674_v18  ;;  %4625 = vmatpush.msrb.mxu1 %v8676_v59 }
 0x7eb   :  { %4665 = vmatpush.msra.mxu2 %v9856_v34  ;;  %4709 = vmatpush.msra.mxu3 %v9857_v22 }
 0x7ec   :  { %4584 = vmatpush.msrb.mxu0 %v9858_v3  ;;  %4626 = vmatpush.msrb.mxu1 %v9845_v16 }
 0x7ed   :  { %4666 = vmatpush.msra.mxu2 %v9846_v21  ;;  %4710 = vmatpush.msra.mxu3 %v9847_v23 }
 0x7ee   :  { %4585 = vmatpush.msrb.mxu0 %v9848_v12  ;;  %4627 = vmatpush.msrb.mxu1 %v9849_v58  ;;  %v5713_v12 = vld [vmem:[%s9431_s6 + $0x3] ss:$0 sm:$0xff] }
 0x7ef   :  { %4667 = vmatpush.msra.mxu2 %v9850_v42  ;;  %4711 = vmatpush.msra.mxu3 %v9851_v19  ;;  %v5710_v19 = vld [vmem:[%s9431_s6] ss:$0 sm:$0xff]  ;;  %v9859_v42 = vld [vmem:[#allocation46_spill] sm:$0xff] }
 0x7f0   :  { %4586 = vmatpush.msrb.mxu0 %v9853_v39  ;;  %4628 = vmatpush.msrb.mxu1 %v9854_v38  ;;  %v2914_v39 = vadd.f32 %v5710_v19, %v9859_v42  ;;  %v9861_v42 = vld [vmem:[#allocation51_spill] sm:$0xff] }
 0x7f1   :  { %4668 = vmatpush.msra.mxu2 %v8721_v14  ;;  %4712 = vmatpush.msra.mxu3 %v8725_v11  ;;  %v5712_v14 = vld [vmem:[%s9431_s6 + $0x2] ss:$0 sm:$0xff] }
 0x7f2   :  { %4587 = vmatpush.msrb.mxu0 %v8727_v15  ;;  %4629 = vmatpush.msrb.mxu1 %v9855_v17  ;;  %v5711_v17 = vld [vmem:[%s9431_s6 + $0x1] ss:$0 sm:$0xff] }
 0x7f3   :  { %4669 = vmatpush.msra.mxu2 %v8734_v20  ;;  %4713 = vmatpush.msra.mxu3 %v8736_v24  ;;  %v9860_v20 = vld [vmem:[#allocation47_spill] sm:$0xff]  ;;  %v2955_v23 = vadd.f32 %v5711_v17, %v9861_v42 }
 0x7f4   :  { %v2996_v58 = vadd.f32 %v5712_v14, %v9860_v20 }
 0x84f   :  { %v4247_v38 = vpop.f32.mrf.mxu0  ;;  %v4289_v15 = vpop.f32.mrf.mxu1 }
 0x850   :  { %v4250_v11 = vadd.f32 %v4247_v38, %v2914_v39  ;;  %v4292_v19 = vadd.f32 %v4289_v15, %v2996_v58  ;;  %v9862_v39 = vld [vmem:[#allocation49_spill] sm:$0xff] }
 0x851   :  { %v3037_v38 = vadd.f32 %v5713_v12, %v9862_v39  ;;  %v9863_v58 = vld [vmem:[#allocation61_spill] sm:$0xff] }
 0x852   :  { %v4251_v24 = vmul.f32 0.5, %v4250_v11 }
 0x854   :  { %5847 = vtanh.f32 %v4251_v24 }
 0x855   :  { %5849 = vtanh.f32 %v4292_v19 }
 0x856   :  { %v4329_v21 = vpop.f32.mrf.mxu2  ;;  %v4373_v3 = vpop.f32.mrf.mxu3 }
 0x857   :  { %v4332_v16 = vadd.f32 %v4329_v21, %v2955_v23  ;;  %v4376_v59 = vadd.f32 %v4373_v3, %v3037_v38 }
 0x859   :  { %v4333_v22 = vmul.f32 0.5, %v4332_v16  ;;  %v4377_v14 = vmul.f32 0.5, %v4376_v59  ;;  %v9864_v59 = vld [vmem:[#allocation56_spill] sm:$0xff] }
 0x85a   :  { %v5848_v34 = vpop.eup %5847 }
 0x85b   :  { %v4253_v18 = vmul.f32 0.5, %v5848_v34  ;;  %5851 = vtanh.f32 %v4333_v22  ;;  %v5850_v11 = vpop.eup %5849 }
 0x85c   :  { %5853 = vtanh.f32 %v4377_v14 }
 0x85d   :  { %v4254_v20 = vadd.f32 0.5, %v4253_v18  ;;  %v9865_v18 = vld [vmem:[#allocation17_spill] sm:$0xff] }
 0x85f   :  { %v4294_v52 = vmul.f32 %v5850_v11, %v4254_v20 }
 0x861   :  { %v5852_v1 = vpop.eup %5851 }
 0x862   :  { %v4335_v24 = vmul.f32 0.5, %v5852_v1  ;;  %v5854_v21 = vpop.eup %5853  ;;  %v9867_v1 = vld [vmem:[#allocation30_spill] sm:$0xff] }
 0x863   :  { %v4379_v16 = vmul.f32 0.5, %v5854_v21 }
 0x864   :  { %v4336_v15 = vadd.f32 0.5, %v4335_v24 }
 0x865   :  { %v4380_v12 = vadd.f32 0.5, %v4379_v16 }
 0x866   :  { %v4337_v17 = vmul.f32 %v4336_v15, %v9863_v58 }
 0x868   :  { %v8902_v23 = vadd.f32 %v4337_v17, %v4294_v52  ;;  %v9866_v52 = vld [vmem:[#allocation34_spill] sm:$0xff] }
 0x86a   :  { %5855 = vtanh.f32 %v8902_v23 }
 0x870   :  { %v5856_v3 = vpop.eup %5855 }
 0x871   :  { %v8905_v34 = vmul.f32 %v5856_v3, %v4380_v12  ;;  %v9890_v12 = vld [vmem:[#allocation18_spill] sm:$0xff] }
 0x873   :  { %4417 = vmatmul.f32.vlgmr.msra.gmra.mxu0 %v8905_v34  ;;  %4459 = vmatmul.f32.vlgmr.msra.gmra.mxu1 %v8905_v34 }
 0x874   :  { %4499 = vmatmul.f32.vlgmr.msrb.gmra.mxu2 %v8905_v34  ;;  %4543 = vmatmul.f32.vlgmr.msrb.gmra.mxu3 %v8905_v34 }
 0x875   :  { %4743 = vmatpush.msra.mxu0 %v8539_v54  ;;  %4785 = vmatpush.msra.mxu1 %v8541_v37  ;;  %v9868_v54 = vld [vmem:[#allocation20_spill] sm:$0xff]  ;;  %v9869_v37 = vld [vmem:[#allocation29_spill] sm:$0xff] }
 0x876   :  { %4825 = vmatpush.msrb.mxu2 %v8543_v49  ;;  %4869 = vmatpush.msrb.mxu3 %v8547_v5  ;;  %v9875_v49 = vld [vmem:[#allocation31_spill] sm:$0xff]  ;;  %v9876_v5 = vld [vmem:[#allocation33_spill] sm:$0xff] }
 0x877   :  { %4744 = vmatpush.msra.mxu0 %v8551_v51  ;;  %4786 = vmatpush.msra.mxu1 %v8553_v60  ;;  %v9877_v51 = vld [vmem:[#allocation32_spill] sm:$0xff]  ;;  %v9878_v60 = vld [vmem:[#allocation37_spill] sm:$0xff] }
 0x878   :  { %4826 = vmatpush.msrb.mxu2 %v8555_v46  ;;  %4870 = vmatpush.msrb.mxu3 %v8559_v47  ;;  %v9879_v46 = vld [vmem:[#allocation19_spill] sm:$0xff]  ;;  %v9880_v47 = vld [vmem:[#allocation21_spill] sm:$0xff] }
 0x879   :  { %4745 = vmatpush.msra.mxu0 %v8563_v56  ;;  %4787 = vmatpush.msra.mxu1 %v8565_v48  ;;  %v9881_v56 = vld [vmem:[#allocation45_spill] sm:$0xff] }
 0x87a   :  { %4827 = vmatpush.msrb.mxu2 %v8567_v26  ;;  %4871 = vmatpush.msrb.mxu3 %v8571_v55  ;;  %v9882_v48 = vld [vmem:[#allocation57_spill] sm:$0xff]  ;;  %v9883_v26 = vld [vmem:[#allocation58_spill] sm:$0xff]  ;;  %v9884_v55 = vld [vmem:[#allocation59_spill] sm:$0xff] }
 0x87b   :  { %4746 = vmatpush.msra.mxu0 %v8575_v44  ;;  %4788 = vmatpush.msra.mxu1 %v8577_v4  ;;  %v9885_v44 = vld [vmem:[#allocation60_spill] sm:$0xff]  ;;  %v5714_v4 = vld [vmem:[%s9431_s6] ss:$0 sm:$0xff] }
 0x87c   :  { %4828 = vmatpush.msrb.mxu2 %v8579_v28  ;;  %4872 = vmatpush.msrb.mxu3 %v8583_v10  ;;  %v9886_v28 = vld [vmem:[#allocation50_spill] sm:$0xff] }
 0x87d   :  { %4747 = vmatpush.msra.mxu0 %v8587_v2  ;;  %4789 = vmatpush.msra.mxu1 %v8589_v6  ;;  %v3079_v10 = vadd.f32 %v5714_v4, %v9886_v28  ;;  %v5716_v2 = vld [vmem:[%s9431_s6 + $0x2] ss:$0 sm:$0xff]  ;;  %v4993_v28 = vld [vmem:[#allocation12 + $0x1a8] sm:$0xff] }
 0x87e   :  { %4829 = vmatpush.msrb.mxu2 %v8591_v27  ;;  %4873 = vmatpush.msrb.mxu3 %v8595_v8  ;;  %v5715_v8 = vld [vmem:[%s9431_s6 + $0x1] ss:$0 sm:$0xff] }
 0x87f   :  { %4748 = vmatpush.msra.mxu0 %v8599_v9  ;;  %4790 = vmatpush.msra.mxu1 %v8601_v33  ;;  %v9887_v33 = vld [vmem:[#allocation53_spill] sm:$0xff] }
 0x880   :  { %4830 = vmatpush.msrb.mxu2 %v8603_v29  ;;  %4874 = vmatpush.msrb.mxu3 %v8607_v31  ;;  %v3161_v29 = vadd.f32 %v5716_v2, %v9887_v33  ;;  %v5039_v33 = vld [vmem:[#allocation12 + $0x1f8] sm:$0xff] }
 0x881   :  { %4749 = vmatpush.msra.mxu0 %v8611_v40  ;;  %4791 = vmatpush.msra.mxu1 %v8613_v13  ;;  %v5717_v40 = vld [vmem:[%s9431_s6 + $0x3] ss:$0 sm:$0xff] }
 0x882   :  { %4831 = vmatpush.msrb.mxu2 %v8615_v30  ;;  %4875 = vmatpush.msrb.mxu3 %v8619_v35  ;;  %v9888_v30 = vld [vmem:[#allocation23_spill] sm:$0xff] }
 0x883   :  { %4750 = vmatpush.msra.mxu0 %v8623_v25  ;;  %4792 = vmatpush.msra.mxu1 %v8625_v41  ;;  %v3120_v35 = vadd.f32 %v5715_v8, %v9888_v30  ;;  %v5038_v30 = vld [vmem:[#allocation12 + $0x1d8] sm:$0xff] }
 0x884   :  { %4832 = vmatpush.msrb.mxu2 %v8627_v62  ;;  %4876 = vmatpush.msrb.mxu3 %v8631_v61  ;;  %v9889_v61 = vld [vmem:[#allocation54_spill] sm:$0xff] }
 0x885   :  { %4751 = vmatpush.msra.mxu0 %v8635_v53  ;;  %4793 = vmatpush.msra.mxu1 %v8637_v0  ;;  %v3202_v53 = vadd.f32 %v5717_v40, %v9889_v61  ;;  %v4909_v40 = vld [vmem:[#allocation12 + $0x160] sm:$0xff]  ;;  %v4950_v61 = vld [vmem:[#allocation12 + $0x150] sm:$0xff] }
 0x886   :  { %4833 = vmatpush.msrb.mxu2 %v8639_v32  ;;  %4877 = vmatpush.msrb.mxu3 %v8643_v43 }
 0x887   :  { %4752 = vmatpush.msra.mxu0 %v8647_v45  ;;  %4794 = vmatpush.msra.mxu1 %v8649_v7  ;;  %v9870_v7 = vld [vmem:[#allocation35_spill] sm:$0xff] }
 0x888   :  { %4834 = vmatpush.msrb.mxu2 %v8651_v50  ;;  %4878 = vmatpush.msrb.mxu3 %v8655_v57  ;;  %v9871_v50 = vld [vmem:[#allocation36_spill] sm:$0xff]  ;;  %v9872_v57 = vld [vmem:[#allocation27_spill] sm:$0xff] }
 0x889   :  { %4753 = vmatpush.msra.mxu0 %v8659_v36  ;;  %4795 = vmatpush.msra.mxu1 %v8661_v63  ;;  %v9873_v36 = vld [vmem:[#allocation28_spill] sm:$0xff]  ;;  %v9874_v63 = vld [vmem:[#allocation26_spill] sm:$0xff] }
 0x88a   :  { %4835 = vmatpush.msrb.mxu2 %v9864_v59  ;;  %4879 = vmatpush.msrb.mxu3 %v9865_v18  ;;  %v5720_v59 = vld [vmem:[%s9431_s6 + $0x2] ss:$0 sm:$0xff] }
 0x88b   :  { %4754 = vmatpush.msra.mxu0 %v9866_v52  ;;  %4796 = vmatpush.msra.mxu1 %v9867_v1  ;;  %v5719_v1 = vld [vmem:[%s9431_s6 + $0x1] ss:$0 sm:$0xff] }
 0x88c   :  { %4836 = vmatpush.msrb.mxu2 %v9868_v54  ;;  %4880 = vmatpush.msrb.mxu3 %v9869_v37  ;;  %v9891_v37 = vld [vmem:[#allocation25_spill] sm:$0xff] }
 0x88d   :  { %4755 = vmatpush.msra.mxu0 %v9870_v7  ;;  %4797 = vmatpush.msra.mxu1 %v9871_v50  ;;  %v3326_v7 = vadd.f32 %v5720_v59, %v9891_v37 }
 0x88e   :  { %4837 = vmatpush.msrb.mxu2 %v9872_v57  ;;  %4881 = vmatpush.msrb.mxu3 %v9873_v36  ;;  %v5721_v57 = vld [vmem:[%s9431_s6 + $0x3] ss:$0 sm:$0xff] }
 0x88f   :  { %4756 = vmatpush.msra.mxu0 %v9874_v63  ;;  %4798 = vmatpush.msra.mxu1 %v9875_v49  ;;  %v4913_v63 = vld [vmem:[#allocation12 + $0x1e0] sm:$0xff]  ;;  %v4955_v49 = vld [vmem:[#allocation12 + $0x1f0] sm:$0xff] }
 0x890   :  { %4838 = vmatpush.msrb.mxu2 %v9876_v5  ;;  %4882 = vmatpush.msrb.mxu3 %v9877_v51  ;;  %v4995_v5 = vld [vmem:[#allocation12 + $0x1e8] sm:$0xff]  ;;  %v9892_v51 = vld [vmem:[#allocation40_spill] sm:$0xff] }
 0x891   :  { %4757 = vmatpush.msra.mxu0 %v9878_v60  ;;  %4799 = vmatpush.msra.mxu1 %v9879_v46  ;;  %v3285_v60 = vadd.f32 %v5719_v1, %v9892_v51  ;;  %v4912_v46 = vld [vmem:[#allocation12 + $0x1c0] sm:$0xff]  ;;  %v4986_v1 = vld [vmem:[#allocation12 + $0xc8] sm:$0xff]  ;;  %v4944_v51 = vld [vmem:[#allocation12 + $0x90] sm:$0xff] }
 0x892   :  { %4839 = vmatpush.msrb.mxu2 %v9880_v47  ;;  %4883 = vmatpush.msrb.mxu3 %v9881_v56  ;;  %v4954_v47 = vld [vmem:[#allocation12 + $0x1d0] sm:$0xff]  ;;  %v4994_v56 = vld [vmem:[#allocation12 + $0x1c8] sm:$0xff] }
 0x893   :  { %4758 = vmatpush.msra.mxu0 %v9882_v48  ;;  %4800 = vmatpush.msra.mxu1 %v9883_v26  ;;  %v4911_v26 = vld [vmem:[#allocation12 + $0x1a0] sm:$0xff] }
 0x894   :  { %4840 = vmatpush.msrb.mxu2 %v9884_v55  ;;  %4884 = vmatpush.msrb.mxu3 %v9885_v44  ;;  %v4953_v55 = vld [vmem:[#allocation12 + $0x1b0] sm:$0xff] }
 0x8f0   :  { %v4418_v6 = vpop.f32.mrf.mxu0  ;;  %v4460_v9 = vpop.f32.mrf.mxu1 }
 0x8f1   :  { %v4421_v27 = vadd.f32 %v4418_v6, %v3079_v10  ;;  %v4463_v13 = vadd.f32 %v4460_v9, %v3161_v29  ;;  %v9893_v10 = vld [vmem:[#allocation24_spill] sm:$0xff]  ;;  %v4992_v9 = vld [vmem:[#allocation12 + $0x188] sm:$0xff] }
 0x8f2   :  { %v3367_v2 = vadd.f32 %v5721_v57, %v9893_v10  ;;  %v4910_v6 = vld [vmem:[#allocation12 + $0x180] sm:$0xff]  ;;  %v4985_v57 = vld [vmem:[#allocation12 + $0xa8] sm:$0xff] }
 0x8f3   :  { %v4422_v31 = vmul.f32 0.5, %v4421_v27  ;;  %v4952_v27 = vld [vmem:[#allocation12 + $0x190] sm:$0xff] }
 0x8f5   :  { %5857 = vtanh.f32 %v4422_v31 }
 0x8f6   :  { %5859 = vtanh.f32 %v4463_v13  ;;  %v4951_v13 = vld [vmem:[#allocation12 + $0x170] sm:$0xff] }
 0x8f7   :  { %v4500_v25 = vpop.f32.mrf.mxu2  ;;  %v4544_v62 = vpop.f32.mrf.mxu3 }
 0x8f8   :  { %v4503_v41 = vadd.f32 %v4500_v25, %v3120_v35  ;;  %v4547_v43 = vadd.f32 %v4544_v62, %v3202_v53  ;;  %v4991_v25 = vld [vmem:[#allocation12 + $0x168] sm:$0xff]  ;;  %v4908_v62 = vld [vmem:[#allocation12 + $0x140] sm:$0xff] }
 0x8fa   :  { %v4504_v0 = vmul.f32 0.5, %v4503_v41  ;;  %v4548_v42 = vmul.f32 0.5, %v4547_v43  ;;  %v5037_v41 = vld [vmem:[#allocation12 + $0x1b8] sm:$0xff] }
 0x8fb   :  { %v5858_v32 = vpop.eup %5857 }
 0x8fc   :  { %v4424_v45 = vmul.f32 0.5, %v5858_v32  ;;  %5861 = vtanh.f32 %v4504_v0  ;;  %v5860_v19 = vpop.eup %5859  ;;  %v4990_v0 = vld [vmem:[#allocation12 + $0x148] sm:$0xff]  ;;  %v5036_v32 = vld [vmem:[#allocation12 + $0x198] sm:$0xff] }
 0x8fd   :  { %5863 = vtanh.f32 %v4548_v42 }
 0x8fe   :  { %v4425_v22 = vadd.f32 0.5, %v4424_v45 }
 0x900   :  { %v4465_v39 = vmul.f32 %v5860_v19, %v4425_v22  ;;  %v4907_v22 = vld [vmem:[#allocation12 + $0x120] sm:$0xff]  ;;  %v4949_v19 = vld [vmem:[#allocation12 + $0x130] sm:$0xff] }
 0x902   :  { %v5862_v38 = vpop.eup %5861 }
 0x903   :  { %v4506_v20 = vmul.f32 0.5, %v5862_v38  ;;  %v5864_v24 = vpop.eup %5863  ;;  %v5035_v38 = vld [vmem:[#allocation12 + $0x178] sm:$0xff] }
 0x904   :  { %v4550_v58 = vmul.f32 0.5, %v5864_v24  ;;  %v4988_v24 = vld [vmem:[#allocation12 + $0x108] sm:$0xff] }
 0x905   :  { %v4507_v11 = vadd.f32 0.5, %v4506_v20  ;;  %v4906_v20 = vld [vmem:[#allocation12 + $0x100] sm:$0xff] }
 0x906   :  { %v4551_v17 = vadd.f32 0.5, %v4550_v58  ;;  %v5034_v58 = vld [vmem:[#allocation12 + $0x158] sm:$0xff] }
 0x907   :  { %v4508_v14 = vmul.f32 %v4507_v11, %v8902_v23  ;;  %v5718_v23 = vld [vmem:[%s9431_s6] ss:$0 sm:$0xff]  ;;  %v4948_v11 = vld [vmem:[#allocation12 + $0x110] sm:$0xff] }
 0x908   :  { %v3244_v3 = vadd.f32 %v5718_v23, %v9890_v12  ;;  %v4947_v23 = vld [vmem:[#allocation12 + $0xf0] sm:$0xff]  ;;  %v4987_v12 = vld [vmem:[#allocation12 + $0xe8] sm:$0xff] }
 0x909   :  { %v8992_v15 = vadd.f32 %v4508_v14, %v4465_v39  ;;  %v4989_v39 = vld [vmem:[#allocation12 + $0x128] sm:$0xff] }
 0x90b   :  { %5865 = vtanh.f32 %v8992_v15 }
 0x911   :  { %v5866_v21 = vpop.eup %5865 }
 0x912   :  { %v8995_v16 = vmul.f32 %v5866_v21, %v4551_v17  ;;  %v4905_v21 = vld [vmem:[#allocation12 + $0xe0] sm:$0xff] }
 0x914   :  { %4588 = vmatmul.f32.vlgmr.msrb.gmra.mxu0 %v8995_v16  ;;  %4630 = vmatmul.f32.vlgmr.msrb.gmra.mxu1 %v8995_v16 }
 0x915   :  { %4670 = vmatmul.f32.vlgmr.msra.gmra.mxu2 %v8995_v16  ;;  %4714 = vmatmul.f32.vlgmr.msra.gmra.mxu3 %v8995_v16 }
 0x916   :  { %4914 = vmatpush.msrb.mxu0 %v4913_v63  ;;  %4956 = vmatpush.msrb.mxu1 %v4955_v49 }
 0x917   :  { %4996 = vmatpush.msra.mxu2 %v4995_v5  ;;  %5040 = vmatpush.msra.mxu3 %v5039_v33  ;;  %v4902_v5 = vld [vmem:[#allocation12 + $0x80] sm:$0xff]  ;;  %v4940_v33 = vld [vmem:[#allocation12 + $0x10] sm:$0xff] }
 0x918   :  { %4915 = vmatpush.msrb.mxu0 %v4912_v46  ;;  %4957 = vmatpush.msrb.mxu1 %v4954_v47  ;;  %v5030_v46 = vld [vmem:[#allocation12 + $0xd8] sm:$0xff]  ;;  %v4943_v47 = vld [vmem:[#allocation12 + $0x70] sm:$0xff] }
 0x919   :  { %4997 = vmatpush.msra.mxu2 %v4994_v56  ;;  %5041 = vmatpush.msra.mxu3 %v5038_v30  ;;  %v9038_v30 = vld [vmem:[%s9432_s7 + $0x70] sm:$0xff] }
 0x91a   :  { %4916 = vmatpush.msrb.mxu0 %v4911_v26  ;;  %4958 = vmatpush.msrb.mxu1 %v4953_v55  ;;  %v4900_v26 = vld [vmem:[#allocation12 + $0x40] sm:$0xff]  ;;  %v4942_v55 = vld [vmem:[#allocation12 + $0x50] sm:$0xff] }
 0x91b   :  { %4998 = vmatpush.msra.mxu2 %v4993_v28  ;;  %5042 = vmatpush.msra.mxu3 %v5037_v41  ;;  %v5025_v41 = vld [vmem:[#allocation12 + $0x38] sm:$0xff] }
 0x91c   :  { %4917 = vmatpush.msrb.mxu0 %v4910_v6  ;;  %4959 = vmatpush.msrb.mxu1 %v4952_v27  ;;  %v4941_v6 = vld [vmem:[#allocation12 + $0x30] sm:$0xff]  ;;  %v4981_v27 = vld [vmem:[#allocation12 + $0x28] sm:$0xff] }
 0x91d   :  { %4999 = vmatpush.msra.mxu2 %v4992_v9  ;;  %5043 = vmatpush.msra.mxu3 %v5036_v32  ;;  %v4898_v9 = vld [vmem:[#allocation12] sm:$0xff] }
 0x91e   :  { %4918 = vmatpush.msrb.mxu0 %v4909_v40  ;;  %4960 = vmatpush.msrb.mxu1 %v4951_v13  ;;  %v9030_v40 = vld [vmem:[%s9432_s7 + $0x78] sm:$0xff]  ;;  %v9080_v32 = vld [vmem:[%s9432_s7 + $0x48] sm:$0xff] }
 0x91f   :  { %5000 = vmatpush.msra.mxu2 %v4991_v25  ;;  %5044 = vmatpush.msra.mxu3 %v5035_v38  ;;  %v5027_v13 = vld [vmem:[#allocation12 + $0x78] sm:$0xff]  ;;  %v9046_v25 = vld [vmem:[%s9432_s7 + $0x68] sm:$0xff] }
 0x920   :  { %4919 = vmatpush.msrb.mxu0 %v4908_v62  ;;  %4961 = vmatpush.msrb.mxu1 %v4950_v61  ;;  %v9054_v62 = vld [vmem:[%s9432_s7 + $0x60] sm:$0xff]  ;;  %v9137_v38 = vld [vmem:[%s9432_s7 + $0x18] sm:$0xff] }
 0x921   :  { %5001 = vmatpush.msra.mxu2 %v4990_v0  ;;  %5045 = vmatpush.msra.mxu3 %v5034_v58  ;;  %v5024_v61 = vld [vmem:[#allocation12 + $0x18] sm:$0xff]  ;;  %v9071_v0 = vld [vmem:[%s9432_s7 + $0x50] sm:$0xff] }
 0x922   :  { %4920 = vmatpush.msrb.mxu0 %v4907_v22  ;;  %4962 = vmatpush.msrb.mxu1 %v4949_v19  ;;  %v9107_v22 = vld [vmem:[%s9432_s7 + $0x30] sm:$0xff]  ;;  %v9116_v19 = vld [vmem:[%s9432_s7 + $0x28] sm:$0xff] }
 0x923   :  { %5002 = vmatpush.msra.mxu2 %v4989_v39  ;;  %v9128_v39 = vld [vmem:[%s9432_s7 + $0x20] sm:$0xff] }
 0x924   :  { %4921 = vmatpush.msrb.mxu0 %v4906_v20  ;;  %4963 = vmatpush.msrb.mxu1 %v4948_v11  ;;  %v9894_v20 = vld [vmem:[#allocation39_spill] sm:$0xff] }
 0x925   :  { %5003 = vmatpush.msra.mxu2 %v4988_v24  ;;  %v9150_v24 = vld [vmem:[%s9432_s7 + $0x10] sm:$0xff] }
 0x926   :  { %4922 = vmatpush.msrb.mxu0 %v4905_v21  ;;  %4964 = vmatpush.msrb.mxu1 %v4947_v23  ;;  %v9159_v21 = vld [vmem:[%s9432_s7 + $0x8] sm:$0xff]  ;;  %v5723_v23 = vld [vmem:[%s9431_s6 + $0x1] ss:$0 sm:$0xff] }
 0x927   :  { %5004 = vmatpush.msra.mxu2 %v4987_v12 }
 0x929   :  { %5005 = vmatpush.msra.mxu2 %v4986_v1  ;;  %v5725_v1 = vld [vmem:[%s9431_s6 + $0x3] ss:$0 sm:$0xff] }
 0x92b   :  { %5006 = vmatpush.msra.mxu2 %v4985_v57 }
 0x991   :  { %v4589_v18 = vpop.f32.mrf.mxu0  ;;  %v4631_v54 = vpop.f32.mrf.mxu1 }
 0x992   :  { %v4592_v52 = vadd.f32 %v4589_v18, %v3244_v3  ;;  %v4634_v36 = vadd.f32 %v4631_v54, %v3326_v7  ;;  %v5033_v3 = vld [vmem:[#allocation12 + $0x138] sm:$0xff]  ;;  %v4904_v18 = vld [vmem:[#allocation12 + $0xc0] sm:$0xff] }
 0x993   :  { %v5032_v54 = vld [vmem:[#allocation12 + $0x118] sm:$0xff]  ;;  %v4903_v7 = vld [vmem:[#allocation12 + $0xa0] sm:$0xff]  ;;  %5046 = vmatpush.msra.mxu3 %v5033_v3  ;;  %4923 = vmatpush.msrb.mxu0 %v4904_v18 }
 0x994   :  { %v4593_v50 = vmul.f32 0.5, %v4592_v52  ;;  %v4946_v52 = vld [vmem:[#allocation12 + $0xd0] sm:$0xff]  ;;  %v9169_v3 = vld [vmem:[%s9432_s7] sm:$0xff] }
 0x995   :  { %4965 = vmatpush.msrb.mxu1 %v4946_v52  ;;  %5047 = vmatpush.msra.mxu3 %v5032_v54 }
 0x996   :  { %5867 = vtanh.f32 %v4593_v50  ;;  %v4945_v50 = vld [vmem:[#allocation12 + $0xb0] sm:$0xff]  ;;  %4924 = vmatpush.msrb.mxu0 %v4903_v7 }
 0x997   :  { %5869 = vtanh.f32 %v4634_v36  ;;  %v5031_v36 = vld [vmem:[#allocation12 + $0xf8] sm:$0xff]  ;;  %4966 = vmatpush.msrb.mxu1 %v4945_v50 }
 0x998   :  { %v4671_v48 = vpop.f32.mrf.mxu2  ;;  %v4715_v4 = vpop.f32.mrf.mxu3  ;;  %5048 = vmatpush.msra.mxu3 %v5031_v36  ;;  %4925 = vmatpush.msrb.mxu0 %v4902_v5 }
 0x999   :  { %v4674_v44 = vadd.f32 %v4671_v48, %v3285_v60  ;;  %v4718_v31 = vadd.f32 %v4715_v4, %v3367_v2  ;;  %v4984_v60 = vld [vmem:[#allocation12 + $0x88] sm:$0xff]  ;;  %4967 = vmatpush.msrb.mxu1 %v4944_v51  ;;  %v4899_v2 = vld [vmem:[#allocation12 + $0x20] sm:$0xff] }
 0x99a   :  { %v4983_v48 = vld [vmem:[#allocation12 + $0x68] sm:$0xff]  ;;  %5007 = vmatpush.msra.mxu2 %v4984_v60  ;;  %5049 = vmatpush.msra.mxu3 %v5030_v46 }
 0x99b   :  { %v4675_v8 = vmul.f32 0.5, %v4674_v44  ;;  %v4719_v45 = vmul.f32 0.5, %v4718_v31  ;;  %4968 = vmatpush.msrb.mxu1 %v4943_v47  ;;  %v4982_v44 = vld [vmem:[#allocation12 + $0x48] sm:$0xff]  ;;  %v5028_v31 = vld [vmem:[#allocation12 + $0x98] sm:$0xff] }
 0x99c   :  { %v5868_v29 = vpop.eup %5867  ;;  %5008 = vmatpush.msra.mxu2 %v4983_v48 }
 0x99d   :  { %v4595_v35 = vmul.f32 0.5, %v5868_v29  ;;  %5871 = vtanh.f32 %v4675_v8  ;;  %v5870_v43 = vpop.eup %5869  ;;  %4969 = vmatpush.msrb.mxu1 %v4942_v55  ;;  %v5029_v8 = vld [vmem:[#allocation12 + $0xb8] sm:$0xff]  ;;  %v4980_v29 = vld [vmem:[#allocation12 + $0x8] sm:$0xff] }
 0x99e   :  { %5873 = vtanh.f32 %v4719_v45  ;;  %5009 = vmatpush.msra.mxu2 %v4982_v44  ;;  %5050 = vmatpush.msra.mxu3 %v5029_v8  ;;  %v9098_v45 = vld [vmem:[%s9432_s7 + $0x38] sm:$0xff] }
 0x99f   :  { %v4596_v53 = vadd.f32 0.5, %v4595_v35  ;;  %4970 = vmatpush.msrb.mxu1 %v4941_v6  ;;  %v5026_v35 = vld [vmem:[#allocation12 + $0x58] sm:$0xff] }
 0x9a0   :  { %5010 = vmatpush.msra.mxu2 %v4981_v27  ;;  %5051 = vmatpush.msra.mxu3 %v5028_v31  ;;  %v9900_v31 = vld [vmem:[#allocation62_spill] sm:$0xff] }
 0x9a1   :  { %v4636_v42 = vmul.f32 %v5870_v43, %v4596_v53  ;;  %4971 = vmatpush.msrb.mxu1 %v4940_v33  ;;  %v9062_v53 = vld [vmem:[%s9432_s7 + $0x58] sm:$0xff]  ;;  %v9089_v43 = vld [vmem:[%s9432_s7 + $0x40] sm:$0xff] }
 0x9a2   :  { %5011 = vmatpush.msra.mxu2 %v4980_v29  ;;  %5052 = vmatpush.msra.mxu3 %v5027_v13  ;;  %v9899_v29 = vld [vmem:[#allocation43_spill] sm:$0xff]  ;;  %v9901_v13 = vld [vmem:[#allocation48_spill] sm:$0xff] }
 0x9a3   :  { %v5872_v14 = vpop.eup %5871 }
 0x9a4   :  { %v4677_v17 = vmul.f32 0.5, %v5872_v14  ;;  %v5874_v63 = vpop.eup %5873  ;;  %5053 = vmatpush.msra.mxu3 %v5026_v35  ;;  %v5724_v14 = vld [vmem:[%s9431_s6 + $0x2] ss:$0 sm:$0xff] }
 0x9a5   :  { %v4721_v56 = vmul.f32 0.5, %v5874_v63  ;;  %v9897_v63 = vld [vmem:[#allocation44_spill] sm:$0xff] }
 0x9a6   :  { %v4678_v59 = vadd.f32 0.5, %v4677_v17  ;;  %5054 = vmatpush.msra.mxu3 %v5025_v41  ;;  %v3532_v5 = vadd.f32 %v5725_v1, %v9897_v63  ;;  %v5728_v35 = vld [vmem:[%s9431_s6 + $0x2] ss:$0 sm:$0xff] }
 0x9a7   :  { %v4722_v4 = vadd.f32 0.5, %v4721_v56 }
 0x9a8   :  { %v4679_v37 = vmul.f32 %v4678_v59, %v8992_v15  ;;  %v4901_v15 = vld [vmem:[#allocation12 + $0x60] sm:$0xff]  ;;  %5055 = vmatpush.msra.mxu3 %v5024_v61  ;;  %v9895_v59 = vld [vmem:[#allocation22_spill] sm:$0xff]  ;;  %v5727_v61 = vld [vmem:[%s9431_s6 + $0x1] ss:$0 sm:$0xff] }
 0x9a9   :  { %4926 = vmatpush.msrb.mxu0 %v4901_v15  ;;  %v3491_v18 = vadd.f32 %v5724_v14, %v9895_v59 }
 0x9aa   :  { %v9018_v49 = vadd.f32 %v4679_v37, %v4636_v42  ;;  %v5722_v42 = vld [vmem:[%s9431_s6] ss:$0 sm:$0xff]  ;;  %v9896_v37 = vld [vmem:[#allocation52_spill] sm:$0xff] }
 0x9ab   :  { %4927 = vmatpush.msrb.mxu0 %v4900_v26  ;;  %v3409_v11 = vadd.f32 %v5722_v42, %v9894_v20  ;;  %v3450_v7 = vadd.f32 %v5723_v23, %v9896_v37  ;;  %v9286_v42 = vld [vmem:[%s9433_s8] ss:$0 sm:$0xff] }
 0x9ac   :  { %5875 = vtanh.f32 %v9018_v49 }
 0x9ad   :  { %4928 = vmatpush.msrb.mxu0 %v4899_v2 }
 0x9af   :  { %4929 = vmatpush.msrb.mxu0 %v4898_v9 }
 0x9b2   :  { %v5876_v28 = vpop.eup %5875 }
 0x9b3   :  { %v9021_v10 = vmul.f32 %v5876_v28, %v4722_v4 }
 0x9b5   :  { %4759 = vmatmul.f32.vlgmr.msra.gmra.mxu0 %v9021_v10  ;;  %4801 = vmatmul.f32.vlgmr.msra.gmra.mxu1 %v9021_v10 }
 0x9b6   :  { %4841 = vmatmul.f32.vlgmr.msrb.gmra.mxu2 %v9021_v10  ;;  %4885 = vmatmul.f32.vlgmr.msrb.gmra.mxu3 %v9021_v10 }
 0x9b7   :  { %5089 = vmatpush.msra.mxu0 %v9030_v40  ;;  %5147 = vmatpush.msra.mxu1 %v9030_v40 }
 0x9b8   :  { %5196 = vmatpush.msrb.mxu2 %v9030_v40  ;;  %5245 = vmatpush.msrb.mxu3 %v9030_v40 }
 0x9b9   :  { %5090 = vmatpush.msra.mxu0 %v9038_v30  ;;  %5148 = vmatpush.msra.mxu1 %v9038_v30 }
 0x9ba   :  { %5197 = vmatpush.msrb.mxu2 %v9038_v30  ;;  %5246 = vmatpush.msrb.mxu3 %v9038_v30 }
 0x9bb   :  { %5091 = vmatpush.msra.mxu0 %v9046_v25  ;;  %5149 = vmatpush.msra.mxu1 %v9046_v25 }
 0x9bc   :  { %5198 = vmatpush.msrb.mxu2 %v9046_v25  ;;  %5247 = vmatpush.msrb.mxu3 %v9046_v25 }
 0x9bd   :  { %5092 = vmatpush.msra.mxu0 %v9054_v62  ;;  %5150 = vmatpush.msra.mxu1 %v9054_v62 }
 0x9be   :  { %5199 = vmatpush.msrb.mxu2 %v9054_v62  ;;  %5248 = vmatpush.msrb.mxu3 %v9054_v62 }
 0x9bf   :  { %5093 = vmatpush.msra.mxu0 %v9062_v53  ;;  %5151 = vmatpush.msra.mxu1 %v9062_v53 }
 0x9c0   :  { %5200 = vmatpush.msrb.mxu2 %v9062_v53  ;;  %5249 = vmatpush.msrb.mxu3 %v9062_v53 }
 0x9c1   :  { %5094 = vmatpush.msra.mxu0 %v9071_v0  ;;  %5152 = vmatpush.msra.mxu1 %v9071_v0 }
 0x9c2   :  { %5201 = vmatpush.msrb.mxu2 %v9071_v0  ;;  %5250 = vmatpush.msrb.mxu3 %v9071_v0 }
 0x9c3   :  { %5095 = vmatpush.msra.mxu0 %v9080_v32  ;;  %5153 = vmatpush.msra.mxu1 %v9080_v32 }
 0x9c4   :  { %5202 = vmatpush.msrb.mxu2 %v9080_v32  ;;  %5251 = vmatpush.msrb.mxu3 %v9080_v32 }
 0x9c5   :  { %5096 = vmatpush.msra.mxu0 %v9089_v43  ;;  %5154 = vmatpush.msra.mxu1 %v9089_v43 }
 0x9c6   :  { %5203 = vmatpush.msrb.mxu2 %v9089_v43  ;;  %5252 = vmatpush.msrb.mxu3 %v9089_v43 }
 0x9c7   :  { %5097 = vmatpush.msra.mxu0 %v9098_v45  ;;  %5155 = vmatpush.msra.mxu1 %v9098_v45 }
 0x9c8   :  { %5204 = vmatpush.msrb.mxu2 %v9098_v45  ;;  %5253 = vmatpush.msrb.mxu3 %v9098_v45 }
 0x9c9   :  { %5098 = vmatpush.msra.mxu0 %v9107_v22  ;;  %5156 = vmatpush.msra.mxu1 %v9107_v22 }
 0x9ca   :  { %5205 = vmatpush.msrb.mxu2 %v9107_v22  ;;  %5254 = vmatpush.msrb.mxu3 %v9107_v22 }
 0x9cb   :  { %5099 = vmatpush.msra.mxu0 %v9116_v19  ;;  %5157 = vmatpush.msra.mxu1 %v9116_v19 }
 0x9cc   :  { %5206 = vmatpush.msrb.mxu2 %v9116_v19  ;;  %5255 = vmatpush.msrb.mxu3 %v9116_v19 }
 0x9cd   :  { %5100 = vmatpush.msra.mxu0 %v9128_v39  ;;  %5158 = vmatpush.msra.mxu1 %v9128_v39 }
 0x9ce   :  { %5207 = vmatpush.msrb.mxu2 %v9128_v39  ;;  %5256 = vmatpush.msrb.mxu3 %v9128_v39 }
 0x9cf   :  { %5101 = vmatpush.msra.mxu0 %v9137_v38  ;;  %5159 = vmatpush.msra.mxu1 %v9137_v38 }
 0x9d0   :  { %5208 = vmatpush.msrb.mxu2 %v9137_v38  ;;  %5257 = vmatpush.msrb.mxu3 %v9137_v38 }
 0x9d1   :  { %5102 = vmatpush.msra.mxu0 %v9150_v24  ;;  %5160 = vmatpush.msra.mxu1 %v9150_v24 }
 0x9d2   :  { %5209 = vmatpush.msrb.mxu2 %v9150_v24  ;;  %5258 = vmatpush.msrb.mxu3 %v9150_v24 }
 0x9d3   :  { %5103 = vmatpush.msra.mxu0 %v9159_v21  ;;  %5161 = vmatpush.msra.mxu1 %v9159_v21 }
 0x9d4   :  { %5210 = vmatpush.msrb.mxu2 %v9159_v21  ;;  %5259 = vmatpush.msrb.mxu3 %v9159_v21 }
 0x9d5   :  { %5104 = vmatpush.msra.mxu0 %v9169_v3  ;;  %5162 = vmatpush.msra.mxu1 %v9169_v3 }
 0x9d6   :  { %5211 = vmatpush.msrb.mxu2 %v9169_v3  ;;  %5260 = vmatpush.msrb.mxu3 %v9169_v3 }
 0xa32   :  { %v4760_v58 = vpop.f32.mrf.mxu0  ;;  %v4802_v12 = vpop.f32.mrf.mxu1 }
 0xa33   :  { %v4763_v17 = vadd.f32 %v4760_v58, %v3409_v11  ;;  %v4805_v54 = vadd.f32 %v4802_v12, %v3491_v18 }
 0xa35   :  { %v4764_v52 = vmul.f32 0.5, %v4763_v17 }
 0xa37   :  { %5877 = vtanh.f32 %v4764_v52 }
 0xa38   :  { %5879 = vtanh.f32 %v4805_v54 }
 0xa39   :  { %v4842_v50 = vpop.f32.mrf.mxu2  ;;  %v4886_v36 = vpop.f32.mrf.mxu3 }
 0xa3a   :  { %v4845_v57 = vadd.f32 %v4842_v50, %v3450_v7  ;;  %v4889_v46 = vadd.f32 %v4886_v36, %v3532_v5 }
 0xa3c   :  { %v4846_v51 = vmul.f32 0.5, %v4845_v57  ;;  %v4890_v48 = vmul.f32 0.5, %v4889_v46  ;;  %v9295_v57 = vld [vmem:[%s9434_s9] ss:$0 sm:$0xff] }
 0xa3d   :  { %v5878_v60 = vpop.eup %5877 }
 0xa3e   :  { %v4766_v15 = vmul.f32 0.5, %v5878_v60  ;;  %5881 = vtanh.f32 %v4846_v51  ;;  %v5880_v56 = vpop.eup %5879 }
 0xa3f   :  { %5883 = vtanh.f32 %v4890_v48 }
 0xa40   :  { %v4767_v47 = vadd.f32 0.5, %v4766_v15 }
 0xa42   :  { %v4807_v26 = vmul.f32 %v5880_v56, %v4767_v47 }
 0xa44   :  { %v5882_v55 = vpop.eup %5881 }
 0xa45   :  { %v4848_v44 = vmul.f32 0.5, %v5882_v55  ;;  %v5884_v2 = vpop.eup %5883 }
 0xa46   :  { %v4892_v27 = vmul.f32 0.5, %v5884_v2 }
 0xa47   :  { %v4849_v4 = vadd.f32 0.5, %v4848_v44 }
 0xa48   :  { %v4893_v8 = vadd.f32 0.5, %v4892_v27 }
 0xa49   :  { %v4850_v28 = vmul.f32 %v4849_v4, %v9018_v49  ;;  %v9898_v49 = vld [vmem:[#allocation42_spill] sm:$0xff] }
 0xa4b   :  { %v9188_v6 = vadd.f32 %v4850_v28, %v4807_v26 }
 0xa4d   :  { %5885 = vtanh.f32 %v9188_v6 }
 0xa53   :  { %v5886_v9 = vpop.eup %5885 }
 0xa54   :  { %v9191_v33 = vmul.f32 %v5886_v9, %v4893_v8 }
 0xa56   :  { %4930 = vmatmul.f32.vlgmr.msrb.gmra.mxu0 %v9191_v33  ;;  %4972 = vmatmul.f32.vlgmr.msrb.gmra.mxu1 %v9191_v33 }
 0xa57   :  { %5012 = vmatmul.f32.vlgmr.msra.gmra.mxu2 %v9191_v33  ;;  %5056 = vmatmul.f32.vlgmr.msra.gmra.mxu3 %v9191_v33 }
 0xa58   :  { %5294 = vmatpush.msrb.mxu0 %v9030_v40  ;;  %5343 = vmatpush.msrb.mxu1 %v9030_v40 }
 0xa59   :  { %5392 = vmatpush.msra.mxu2 %v9030_v40  ;;  %5441 = vmatpush.msra.mxu3 %v9030_v40  ;;  %v5726_v40 = vld [vmem:[%s9431_s6] ss:$0 sm:$0xff] }
 0xa5a   :  { %5295 = vmatpush.msrb.mxu0 %v9038_v30  ;;  %5344 = vmatpush.msrb.mxu1 %v9038_v30 }
 0xa5b   :  { %5393 = vmatpush.msra.mxu2 %v9038_v30  ;;  %5442 = vmatpush.msra.mxu3 %v9038_v30  ;;  %v3574_v30 = vadd.f32 %v5726_v40, %v9901_v13 }
 0xa5c   :  { %5296 = vmatpush.msrb.mxu0 %v9046_v25  ;;  %5345 = vmatpush.msrb.mxu1 %v9046_v25 }
 0xa5d   :  { %5394 = vmatpush.msra.mxu2 %v9046_v25  ;;  %5443 = vmatpush.msra.mxu3 %v9046_v25 }
 0xa5e   :  { %5297 = vmatpush.msrb.mxu0 %v9054_v62  ;;  %5346 = vmatpush.msrb.mxu1 %v9054_v62 }
 0xa5f   :  { %5395 = vmatpush.msra.mxu2 %v9054_v62  ;;  %5105 = vmatmul.f32.vlgmr.msra.gmra.mxu0 %v9898_v49 }
 0xa60   :  { %5163 = vmatmul.f32.vlgmr.msra.gmra.mxu1 %v9899_v29  ;;  %5212 = vmatmul.f32.vlgmr.msrb.gmra.mxu2 %v9900_v31 }
 0xa61   :  { %5261 = vmatmul.f32.vlgmr.msrb.gmra.mxu3 %v8905_v34  ;;  %5298 = vmatpush.msrb.mxu0 %v9062_v53 }
 0xa62   :  { %5347 = vmatpush.msrb.mxu1 %v9062_v53  ;;  %5396 = vmatpush.msra.mxu2 %v9062_v53 }
 0xa63   :  { %5299 = vmatpush.msrb.mxu0 %v9071_v0  ;;  %5444 = vmatpush.msra.mxu3 %v9054_v62 }
 0xa64   :  { %5348 = vmatpush.msrb.mxu1 %v9071_v0  ;;  %5397 = vmatpush.msra.mxu2 %v9071_v0 }
 0xa65   :  { %5300 = vmatpush.msrb.mxu0 %v9080_v32  ;;  %5445 = vmatpush.msra.mxu3 %v9062_v53  ;;  %v9902_v53 = vld [vmem:[#allocation38_spill] sm:$0xff] }
 0xa66   :  { %5349 = vmatpush.msrb.mxu1 %v9080_v32  ;;  %5398 = vmatpush.msra.mxu2 %v9080_v32 }
 0xa67   :  { %5301 = vmatpush.msrb.mxu0 %v9089_v43  ;;  %5446 = vmatpush.msra.mxu3 %v9071_v0  ;;  %v3656_v0 = vadd.f32 %v5728_v35, %v9902_v53 }
 0xa68   :  { %5350 = vmatpush.msrb.mxu1 %v9089_v43  ;;  %5399 = vmatpush.msra.mxu2 %v9089_v43 }
 0xa69   :  { %5302 = vmatpush.msrb.mxu0 %v9098_v45  ;;  %5447 = vmatpush.msra.mxu3 %v9080_v32  ;;  %v5729_v32 = vld [vmem:[%s9431_s6 + $0x3] ss:$0 sm:$0xff] }
 0xa6a   :  { %5351 = vmatpush.msrb.mxu1 %v9098_v45  ;;  %5400 = vmatpush.msra.mxu2 %v9098_v45 }
 0xa6b   :  { %5303 = vmatpush.msrb.mxu0 %v9107_v22  ;;  %5448 = vmatpush.msra.mxu3 %v9089_v43 }
 0xa6c   :  { %5352 = vmatpush.msrb.mxu1 %v9107_v22  ;;  %5401 = vmatpush.msra.mxu2 %v9107_v22 }
 0xa6d   :  { %5304 = vmatpush.msrb.mxu0 %v9116_v19  ;;  %5449 = vmatpush.msra.mxu3 %v9098_v45 }
 0xa6e   :  { %5353 = vmatpush.msrb.mxu1 %v9116_v19  ;;  %5402 = vmatpush.msra.mxu2 %v9116_v19 }
 0xa6f   :  { %5305 = vmatpush.msrb.mxu0 %v9128_v39  ;;  %5450 = vmatpush.msra.mxu3 %v9107_v22  ;;  %v9903_v22 = vld [vmem:[#allocation55_spill] sm:$0xff] }
 0xa70   :  { %5354 = vmatpush.msrb.mxu1 %v9128_v39  ;;  %5403 = vmatpush.msra.mxu2 %v9128_v39 }
 0xa71   :  { %5306 = vmatpush.msrb.mxu0 %v9137_v38  ;;  %5451 = vmatpush.msra.mxu3 %v9116_v19  ;;  %v3615_v19 = vadd.f32 %v5727_v61, %v9903_v22 }
 0xa72   :  { %5355 = vmatpush.msrb.mxu1 %v9137_v38  ;;  %5404 = vmatpush.msra.mxu2 %v9137_v38 }
 0xa73   :  { %5307 = vmatpush.msrb.mxu0 %v9150_v24  ;;  %5452 = vmatpush.msra.mxu3 %v9128_v39  ;;  %v9904_v39 = vld [vmem:[#allocation41_spill] sm:$0xff] }
 0xa74   :  { %5356 = vmatpush.msrb.mxu1 %v9150_v24  ;;  %5405 = vmatpush.msra.mxu2 %v9150_v24 }
 0xa75   :  { %5308 = vmatpush.msrb.mxu0 %v9159_v21  ;;  %5453 = vmatpush.msra.mxu3 %v9137_v38  ;;  %v3697_v38 = vadd.f32 %v5729_v32, %v9904_v39 }
 0xa76   :  { %5357 = vmatpush.msrb.mxu1 %v9159_v21  ;;  %5406 = vmatpush.msra.mxu2 %v9159_v21 }
 0xa77   :  { %5309 = vmatpush.msrb.mxu0 %v9169_v3  ;;  %5454 = vmatpush.msra.mxu3 %v9150_v24 }
 0xa78   :  { %5358 = vmatpush.msrb.mxu1 %v9169_v3  ;;  %5407 = vmatpush.msra.mxu2 %v9169_v3 }
 0xa79   :  { %5310 = vmatmul.f32.vlgmr.msrb.gmra.mxu0 %v8995_v16  ;;  %5359 = vmatmul.f32.vlgmr.msrb.gmra.mxu1 %v9021_v10 }
 0xa7a   :  { %5408 = vmatmul.f32.vlgmr.msra.gmra.mxu2 %v9191_v33  ;;  %5455 = vmatpush.msra.mxu3 %v9159_v21 }
 0xa7c   :  { %5456 = vmatpush.msra.mxu3 %v9169_v3 }
 0xad3   :  { %v4931_v25 = vpop.f32.mrf.mxu0  ;;  %v4973_v62 = vpop.f32.mrf.mxu1 }
 0xad4   :  { %v4934_v41 = vadd.f32 %v4931_v25, %v3574_v30  ;;  %v4976_v45 = vadd.f32 %v4973_v62, %v3656_v0 }
 0xad6   :  { %v4935_v43 = vmul.f32 0.5, %v4934_v41 }
 0xad8   :  { %5887 = vtanh.f32 %v4935_v43 }
 0xad9   :  { %5889 = vtanh.f32 %v4976_v45 }
 0xada   :  { %v5013_v20 = vpop.f32.mrf.mxu2  ;;  %v5057_v11 = vpop.f32.mrf.mxu3 }
 0xadb   :  { %v5016_v14 = vadd.f32 %v5013_v20, %v3615_v19  ;;  %v5060_v24 = vadd.f32 %v5057_v11, %v3697_v38  ;;  %v6057_v11 = vmov 0  }
 0xadc   :  { %v5106_v58 = vpop.f32.mrf.mxu0  ;;  %5664 = vset.pattern.permute.xlu0 %v6057_v11  ;;  %5663 = vset.pattern.permute.xlu2 %v6057_v11 }
 0xadd   :  { %v5017_v17 = vmul.f32 0.5, %v5016_v14  ;;  %v5107_v21 = vadd.f32 %v9286_v42, %v5106_v58  ;;  %v5164_v12 = vpop.f32.mrf.mxu1  ;;  %v5061_v59 = vmul.f32 0.5, %v5060_v24  ;;  %5665 = vset.pattern.permute.xlu1 %v6057_v11  ;;  %v9319_v14 = vld [vmem:[#allocation5] ss:$0 sm:$0xff] }
 0xade   :  { %v5888_v23 = vpop.eup %5887  ;;  %v5165_v52 = vadd.f32 %v9286_v42, %v5164_v12 }
 0xadf   :  { %v4937_v3 = vmul.f32 0.5, %v5888_v23  ;;  %5891 = vtanh.f32 %v5017_v17  ;;  %v5890_v1 = vpop.eup %5889 }
 0xae0   :  { %5893 = vtanh.f32 %v5107_v21 }
 0xae1   :  { %v4938_v18 = vadd.f32 0.5, %v4937_v3  ;;  %5895 = vtanh.f32 %v5061_v59 }
 0xae2   :  { %5897 = vtanh.f32 %v5165_v52 }
 0xae3   :  { %v4978_v54 = vmul.f32 %v5890_v1, %v4938_v18  ;;  %v5213_v37 = vpop.f32.mrf.mxu2 }
 0xae4   :  { %v5214_v7 = vadd.f32 %v9286_v42, %v5213_v37  ;;  %v5262_v50 = vpop.f32.mrf.mxu3 }
 0xae5   :  { %v5892_v36 = vpop.eup %5891  ;;  %v5263_v5 = vadd.f32 %v9286_v42, %v5262_v50 }
 0xae6   :  { %v5019_v63 = vmul.f32 0.5, %v5892_v36  ;;  %5899 = vtanh.f32 %v5214_v7  ;;  %v5894_v51 = vpop.eup %5893 }
 0xae7   :  { %v5114_v46 = vmul.f32 %v5894_v51, %v9295_v57  ;;  %v5896_v15 = vpop.eup %5895  ;;  %5901 = vtanh.f32 %v5263_v5 }
 0xae8   :  { %v5020_v60 = vadd.f32 0.5, %v5019_v63  ;;  %v5898_v48 = vpop.eup %5897  ;;  %v5063_v28 = vmul.f32 0.5, %v5896_v15 }
 0xae9   :  { %v5116_v56 = vsel %vm5115_vm1, %v5114_v46, 0.0  ;;  %v5168_v4 = vmul.f32 %v5898_v48, %v9295_v57 }
 0xaea   :  { %v5021_v47 = vmul.f32 %v5020_v60, %v9188_v6  ;;  %5117 = vadd.xlane.f32.xlu0 %v5116_v56  ;;  %v5064_v6 = vadd.f32 0.5, %v5063_v28 }
 0xaeb   :  { %v5169_v8 = vsel %vm5115_vm1, %v5168_v4, 0.0 }
 0xaec   :  { %v5900_v26 = vpop.eup %5899  ;;  %v5022_v55 = vadd.f32 %v5021_v47, %v4978_v54 }
 0xaed   :  { %v5217_v44 = vmul.f32 %v5900_v26, %v9295_v57  ;;  %v5902_v27 = vpop.eup %5901 }
 0xaee   :  { %5903 = vtanh.f32 %v5022_v55  ;;  %v5266_v9 = vmul.f32 %v5902_v27, %v9295_v57 }
 0xaef   :  { %v5218_v2 = vsel %vm5115_vm1, %v5217_v44, 0.0 }
 0xaf0   :  { %5219 = vadd.xlane.f32.xlu1 %v5218_v2  ;;  %v5267_v41 = vsel %vm5115_vm1, %v5266_v9, 0.0 }
 0xaf2   :  { %5170 = vadd.xlane.f32.xlu0 %v5169_v8 }
 0xaf4   :  { %v5904_v40 = vpop.eup %5903 }
 0xaf5   :  { %v9306_v13 = vmul.f32 %v5904_v40, %v5064_v6 }
 0xaf6   :  { %v5311_v30 = vpop.f32.mrf.mxu0  ;;  %v5360_v35 = vpop.f32.mrf.mxu1 }
 0xaf7   :  { %v5312_v25 = vadd.f32 %v9286_v42, %v5311_v30  ;;  %5457 = vmatmul.f32.vlgmr.msra.gmra.mxu3 %v9306_v13  ;;  %v5361_v62 = vadd.f32 %v9286_v42, %v5360_v35 }
 0xaf8   :  { %5268 = vadd.xlane.f32.xlu1 %v5267_v41 }
 0xaf9   :  { %5905 = vtanh.f32 %v5312_v25 }
 0xafa   :  { %5907 = vtanh.f32 %v5361_v62 }
 0xafd   :  { %v5409_v61 = vpop.f32.mrf.mxu2 }
 0xafe   :  { %v5410_v53 = vadd.f32 %v9286_v42, %v5409_v61 }
 0xaff   :  { %v5906_v0 = vpop.eup %5905 }
 0xb00   :  { %5909 = vtanh.f32 %v5410_v53  ;;  %v5315_v32 = vmul.f32 %v5906_v0, %v9295_v57  ;;  %v5908_v45 = vpop.eup %5907 }
 0xb01   :  { %v5364_v19 = vmul.f32 %v5908_v45, %v9295_v57 }
 0xb02   :  { %v5316_v43 = vsel %vm5115_vm1, %v5315_v32, 0.0 }
 0xb03   :  { %5317 = vadd.xlane.f32.xlu2 %v5316_v43  ;;  %v5365_v20 = vsel %vm5115_vm1, %v5364_v19, 0.0 }
 0xb06   :  { %v5910_v22 = vpop.eup %5909 }
 0xb07   :  { %v5413_v39 = vmul.f32 %v5910_v22, %v9295_v57 }
 0xb09   :  { %v5414_v38 = vsel %vm5115_vm1, %v5413_v39, 0.0 }
 0xb0a   :  { %5415 = vadd.xlane.f32.xlu0 %v5414_v38 }
 0xb0b   :  { %5366 = vadd.xlane.f32.xlu2 %v5365_v20 }
 0xb5d   :  { %v5118_v24 = vpop.xlane.xlu0 %5117 }
 0xb5e   :  { %v5123_v58 = vadd.f32 %v9319_v14, %v5118_v24 }
 0xb60   :  { %v5124_v17 = vmax.f32 %v5123_v58, -1e+30 }
 0xb62   :  { %v5125_v21 = vsub.f32 -1e+30, %v5124_v17  ;;  %v5128_v23 = vsub.f32 %v5123_v58, %v5124_v17 }
 0xb63   :  { %v5220_v12 = vpop.xlane.xlu1 %5219 }
 0xb64   :  { %v5126_v3 = vmul.f32 1.442695, %v5125_v21  ;;  %v5129_v59 = vmul.f32 1.442695, %v5128_v23  ;;  %v5221_v1 = vadd.f32 %v9319_v14, %v5220_v12 }
 0xb65   :  { %v5171_v18 = vpop.xlane.xlu0 %5170 }
 0xb66   :  { %5911 = vpow2.f32 %v5126_v3  ;;  %v5172_v52 = vadd.f32 %v9319_v14, %v5171_v18 }
 0xb67   :  { %5913 = vpow2.f32 %v5129_v59 }
 0xb68   :  { %v5173_v54 = vmax.f32 %v5124_v17, %v5172_v52 }
 0xb6a   :  { %v5174_v37 = vsub.f32 %v5124_v17, %v5173_v54  ;;  %v5177_v7 = vsub.f32 %v5172_v52, %v5173_v54  ;;  %v5222_v50 = vmax.f32 %v5173_v54, %v5221_v1 }
 0xb6b   :  { %v5269_v36 = vpop.xlane.xlu1 %5268 }
 0xb6c   :  { %v5270_v63 = vadd.f32 %v9319_v14, %v5269_v36  ;;  %v5912_v5 = vpop.eup %5911  ;;  %v5175_v51 = vmul.f32 1.442695, %v5174_v37  ;;  %v5178_v60 = vmul.f32 1.442695, %v5177_v7  ;;  %v5223_v46 = vsub.f32 %v5173_v54, %v5222_v50 }
 0xb6d   :  { %v5226_v15 = vsub.f32 %v5221_v1, %v5222_v50  ;;  %v5914_v47 = vpop.eup %5913  ;;  %v5131_v56 = vmul.f32 0.0, %v5912_v5  ;;  %5135 = vperm.xlu2 %5663, %v5912_v5  }
 0xb6e   :  { %v5271_v48 = vmax.f32 %v5222_v50, %v5270_v63  ;;  %5915 = vpow2.f32 %v5175_v51  ;;  %v5224_v26 = vmul.f32 1.442695, %v5223_v46  ;;  %5141 = vperm.xlu0 %5664, %v5914_v47  }
 0xb6f   :  { %v5132_v55 = vadd.f32 %v5914_v47, %v5131_v56  ;;  %5917 = vpow2.f32 %v5178_v60  ;;  %v5227_v4 = vmul.f32 1.442695, %v5226_v15 }
 0xb70   :  { %v5272_v44 = vsub.f32 %v5222_v50, %v5271_v48  ;;  %5919 = vpow2.f32 %v5224_v26  ;;  %v5275_v27 = vsub.f32 %v5270_v63, %v5271_v48 }
 0xb71   :  { %5921 = vpow2.f32 %v5227_v4 }
 0xb72   :  { %v5273_v28 = vmul.f32 1.442695, %v5272_v44  ;;  %v5276_v25 = vmul.f32 1.442695, %v5275_v27 }
 0xb74   :  { %v5916_v2 = vpop.eup %5915  ;;  %5923 = vpow2.f32 %v5273_v28 }
 0xb75   :  { %v5918_v8 = vpop.eup %5917  ;;  %v5180_v6 = vmul.f32 %v5916_v2, %v5132_v55  ;;  %5184 = vperm.xlu1 %5665, %v5916_v2   ;;  %5925 = vpow2.f32 %v5276_v25 }
 0xb76   :  { %v5318_v9 = vpop.xlane.xlu2 %5317  ;;  %5190 = vperm.xlu2 %5663, %v5918_v8   ;;  %v5920_v35 = vpop.eup %5919 }
 0xb77   :  { %v5319_v40 = vadd.f32 %v9319_v14, %v5318_v9  ;;  %v5181_v30 = vadd.f32 %v5918_v8, %v5180_v6  ;;  %v5922_v61 = vpop.eup %5921 }
 0xb79   :  { %v5320_v41 = vmax.f32 %v5271_v48, %v5319_v40  ;;  %v5229_v62 = vmul.f32 %v5920_v35, %v5181_v30 }
 0xb7a   :  { %v5924_v43 = vpop.eup %5923  ;;  %v5458_v56 = vpop.f32.mrf.mxu3 }
 0xb7b   :  { %v5321_v53 = vsub.f32 %v5271_v48, %v5320_v41  ;;  %v5324_v0 = vsub.f32 %v5319_v40, %v5320_v41  ;;  %v5230_v32 = vadd.f32 %v5922_v61, %v5229_v62  ;;  %v5926_v58 = vpop.eup %5925  ;;  %v5459_v26 = vadd.f32 %v9286_v42, %v5458_v56  ;;  %v5541_v56 = vld [vmem:[%s9438_s13 + $0x20] sm:$0xff] }
 0xb7d   :  { %v5322_v45 = vmul.f32 1.442695, %v5321_v53  ;;  %v5325_v22 = vmul.f32 1.442695, %v5324_v0  ;;  %v5278_v19 = vmul.f32 %v5924_v43, %v5230_v32  ;;  %v5416_v39 = vpop.xlane.xlu0 %5415  ;;  %5239 = vperm.xlu1 %5665, %v5922_v61  }
 0xb7e   :  { %v5367_v38 = vpop.xlane.xlu2 %5366  ;;  %5233 = vperm.xlu2 %5663, %v5920_v35   ;;  %v5417_v11 = vadd.f32 %v9319_v14, %v5416_v39 }
 0xb7f   :  { %5927 = vpow2.f32 %v5322_v45  ;;  %v5368_v20 = vadd.f32 %v9319_v14, %v5367_v38  ;;  %v5279_v12 = vadd.f32 %v5926_v58, %v5278_v19 }
 0xb80   :  { %5929 = vpow2.f32 %v5325_v22 }
 0xb81   :  { %v5369_v24 = vmax.f32 %v5320_v41, %v5368_v20 }
 0xb83   :  { %v5370_v17 = vsub.f32 %v5320_v41, %v5369_v24  ;;  %v5373_v21 = vsub.f32 %v5368_v20, %v5369_v24  ;;  %v5418_v23 = vmax.f32 %v5369_v24, %v5417_v11 }
 0xb85   :  { %v5928_v3 = vpop.eup %5927  ;;  %v5371_v59 = vmul.f32 1.442695, %v5370_v17  ;;  %v5374_v18 = vmul.f32 1.442695, %v5373_v21  ;;  %v5419_v52 = vsub.f32 %v5369_v24, %v5418_v23  ;;  %v5422_v1 = vsub.f32 %v5417_v11, %v5418_v23  ;;  %v5509_v11 = vld [vmem:[%s9436_s11 + $0x68] sm:$0xff]  ;;  %v5508_v24 = vld [vmem:[%s9436_s11 + $0x60] sm:$0xff] }
 0xb86   :  { %v5327_v54 = vmul.f32 %v5928_v3, %v5279_v12  ;;  %5331 = vperm.xlu0 %5664, %v5928_v3   ;;  %v5930_v37 = vpop.eup %5929  ;;  %5282 = vperm.xlu2 %5663, %v5924_v43   ;;  %v5506_v17 = vld [vmem:[%s9436_s11 + $0x50] sm:$0xff]  ;;  %v5505_v21 = vld [vmem:[%s9436_s11 + $0x48] sm:$0xff]  ;;  %v5503_v12 = vld [vmem:[%s9436_s11 + $0x38] sm:$0xff] }
 0xb87   :  { %5931 = vpow2.f32 %v5371_v59  ;;  %v5420_v7 = vmul.f32 1.442695, %v5419_v52  ;;  %v5423_v36 = vmul.f32 1.442695, %v5422_v1  ;;  %v5502_v3 = vld [vmem:[%s9436_s11 + $0x30] sm:$0xff]  ;;  %v5501_v59 = vld [vmem:[%s9436_s11 + $0x28] sm:$0xff] }
 0xb88   :  { %v5328_v50 = vadd.f32 %v5930_v37, %v5327_v54  ;;  %5933 = vpow2.f32 %v5374_v18  ;;  %v5500_v18 = vld [vmem:[%s9436_s11 + $0x20] sm:$0xff]  ;;  %v5499_v52 = vld [vmem:[%s9436_s11 + $0x18] sm:$0xff] }
 0xb89   :  { %5935 = vpow2.f32 %v5420_v7  ;;  %v5497_v7 = vld [vmem:[%s9436_s11 + $0x8] sm:$0xff] }
 0xb8a   :  { %5937 = vpow2.f32 %v5423_v36 }
 0xb8b   :  { %5939 = vtanh.f32 %v5459_v26 }
 0xb8d   :  { %v5932_v63 = vpop.eup %5931 }
 0xb8e   :  { %v5934_v5 = vpop.eup %5933  ;;  %v5376_v51 = vmul.f32 %v5932_v63, %v5328_v50  ;;  %5337 = vperm.xlu2 %5663, %v5930_v37   ;;  %v5498_v37 = vld [vmem:[%s9436_s11 + $0x10] sm:$0xff] }
 0xb8f   :  { %5386 = vperm.xlu0 %5664, %v5934_v5   ;;  %v5936_v46 = vpop.eup %5935 }
 0xb90   :  { %v5377_v60 = vadd.f32 %v5934_v5, %v5376_v51  ;;  %v5938_v47 = vpop.eup %5937  ;;  %v5544_v51 = vld [vmem:[%s9438_s13 + $0x38] sm:$0xff] }
 0xb91   :  { %v5940_v55 = vpop.eup %5939  ;;  %5560 = vmatpush.msra.mxu1 %v5544_v51 }
 0xb92   :  { %v5425_v15 = vmul.f32 %v5936_v46, %v5377_v60  ;;  %v5462_v44 = vmul.f32 %v5940_v55, %v9295_v57  ;;  %v5543_v60 = vld [vmem:[%s9438_s13 + $0x30] sm:$0xff]  ;;  %v5540_v55 = vld [vmem:[%s9438_s13 + $0x18] sm:$0xff] }
 0xb93   :  { %5561 = vmatpush.msra.mxu1 %v5543_v60 }
 0xb94   :  { %v5426_v48 = vadd.f32 %v5938_v47, %v5425_v15  ;;  %v5463_v4 = vsel %vm5115_vm1, %v5462_v44, 0.0 }
 0xb96   :  { %5429 = vperm.xlu2 %5663, %v5936_v46  }
 0xba7   :  { %5464 = vadd.xlane.f32.xlu1 %v5463_v4 }
 0xbc0   :  { %5288 = vperm.xlu1 %5665, %v5926_v58   ;;  %v5507_v58 = vld [vmem:[%s9436_s11 + $0x58] sm:$0xff] }
 0xbc7   :  { %v5136_v28 = vpop.permute.xlu2 %5135 }
 0xbc8   :  { %5380 = vperm.xlu1 %5665, %v5932_v63   ;;  %v5138_v8 = vmul.f32 0.0, %v5136_v28  ;;  %v5496_v63 = vld [vmem:[%s9436_s11] sm:$0xff] }
 0xbd0   :  { %5435 = vperm.xlu1 %5665, %v5938_v47   ;;  %v5191_v6 = vpop.permute.xlu2 %5190 }
 0xbd1   :  { %v5193_v30 = vmul.f32 %v5191_v6, %v9899_v29 }
 0xbd8   :  { %v5234_v25 = vpop.permute.xlu2 %5233 }
 0xbe0   :  { %v5142_v2 = vpop.permute.xlu0 %5141  ;;  %v5283_v1 = vpop.permute.xlu2 %5282 }
 0xbe1   :  { %v5144_v27 = vmul.f32 %v5142_v2, %v9898_v49 }
 0xbe3   :  { %v5145_v9 = vadd.f32 %v5144_v27, %v5138_v8 }
 0xbe7   :  { %v5185_v40 = vpop.permute.xlu1 %5184 }
 0xbe8   :  { %v5187_v42 = vmul.f32 %v5185_v40, %v5145_v9  ;;  %v5338_v15 = vpop.permute.xlu2 %5337 }
 0xbe9   :  { %v5340_v26 = vmul.f32 %v5338_v15, %v8995_v16 }
 0xbea   :  { %v5194_v35 = vadd.f32 %v5193_v30, %v5187_v42 }
 0xbec   :  { %v5236_v41 = vmul.f32 %v5234_v25, %v5194_v35 }
 0xbef   :  { %v5240_v57 = vpop.permute.xlu1 %5239 }
 0xbf0   :  { %v5242_v62 = vmul.f32 %v5240_v57, %v9900_v31  ;;  %v5511_v31 = vld [vmem:[%s9436_s11 + $0x78] sm:$0xff]  ;;  %v5430_v27 = vpop.permute.xlu2 %5429 }
 0xbf1   :  { %5516 = vmatpush.msra.mxu0 %v5511_v31 }
 0xbf2   :  { %v5243_v61 = vadd.f32 %v5242_v62, %v5236_v41 }
 0xbf4   :  { %v5285_v36 = vmul.f32 %v5283_v1, %v5243_v61  ;;  %v5537_v61 = vld [vmem:[%s9438_s13] sm:$0xff] }
 0xbf8   :  { %v5332_v46 = vpop.permute.xlu0 %5331 }
 0xc01   :  { %v5387_v4 = vpop.permute.xlu0 %5386 }
 0xc02   :  { %v5389_v2 = vmul.f32 %v5387_v4, %v9021_v10  ;;  %v5539_v10 = vld [vmem:[%s9438_s13 + $0x10] sm:$0xff] }
 0xc1a   :  { %v5465_v53 = vpop.xlane.xlu1 %5464 }
 0xc1b   :  { %v5466_v0 = vadd.f32 %v9319_v14, %v5465_v53  ;;  %v5510_v14 = vld [vmem:[%s9436_s11 + $0x70] sm:$0xff] }
 0xc1c   :  { %5517 = vmatpush.msra.mxu0 %v5510_v14 }
 0xc1d   :  { %v5467_v32 = vmax.f32 %v5418_v23, %v5466_v0 }
 0xc1e   :  { %5518 = vmatpush.msra.mxu0 %v5509_v11 }
 0xc1f   :  { %v5468_v43 = vsub.f32 %v5418_v23, %v5467_v32  ;;  %v5471_v49 = vsub.f32 %v5466_v0, %v5467_v32  ;;  %v5504_v23 = vld [vmem:[%s9436_s11 + $0x40] sm:$0xff] }
 0xc20   :  { %5519 = vmatpush.msra.mxu0 %v5508_v24 }
 0xc21   :  { %v5469_v45 = vmul.f32 1.442695, %v5468_v43  ;;  %v5472_v22 = vmul.f32 1.442695, %v5471_v49  ;;  %v5734_v43 = vld [vmem:[%s9439_s14] ss:$0 sm:$0xff] }
 0xc22   :  { %5520 = vmatpush.msra.mxu0 %v5507_v58 }
 0xc23   :  { %5941 = vpow2.f32 %v5469_v45 }
 0xc24   :  { %5943 = vpow2.f32 %v5472_v22  ;;  %5521 = vmatpush.msra.mxu0 %v5506_v17  ;;  %v5735_v22 = vld [vmem:[%s9440_s15] ss:$0 sm:$0xff]  ;;  %s5604_s15 = sshll.u32 %s9441_s17, 4  ;;  %s5605_s15 = int_to_ptr.hbm [resolvable:$true] %s5604_s15 }
 0xc26   :  { %5522 = vmatpush.msra.mxu0 %v5505_v21 }
 0xc28   :  { %5523 = vmatpush.msra.mxu0 %v5504_v23 }
 0xc29   :  { %v5942_v19 = vpop.eup %5941 }
 0xc2a   :  { %v5944_v39 = vpop.eup %5943  ;;  %v5474_v29 = vmul.f32 %v5942_v19, %v5426_v48  ;;  %5478 = vperm.xlu0 %5664, %v5942_v19   ;;  %5524 = vmatpush.msra.mxu0 %v5503_v12 }
 0xc2b   :  { %5484 = vperm.xlu2 %5663, %v5944_v39  }
 0xc2c   :  { %v5475_v38 = vadd.f32 %v5944_v39, %v5474_v29  ;;  %5525 = vmatpush.msra.mxu0 %v5502_v3 }
 0xc2e   :  { %5945 = vrcp.f32 %v5475_v38  ;;  %5526 = vmatpush.msra.mxu0 %v5501_v59  ;;  %v5736_v38 = vld [vmem:[#allocation6] ss:$0 sm:$0xff] }
 0xc30   :  { %5527 = vmatpush.msra.mxu0 %v5500_v18 }
 0xc32   :  { %v5289_v54 = vpop.permute.xlu1 %5288  ;;  %5528 = vmatpush.msra.mxu0 %v5499_v52 }
 0xc33   :  { %v5291_v50 = vmul.f32 %v5289_v54, %v8905_v34  ;;  %v5542_v34 = vld [vmem:[%s9438_s13 + $0x28] sm:$0xff] }
 0xc34   :  { %v5946_v20 = vpop.eup %5945  ;;  %5529 = vmatpush.msra.mxu0 %v5498_v37  ;;  %5562 = vmatpush.msra.mxu1 %v5542_v34 }
 0xc35   :  { %5492 = vperm.xlu1 %5665, %v5946_v20   ;;  %v5292_v5 = vadd.f32 %v5291_v50, %v5285_v36 }
 0xc36   :  { %5530 = vmatpush.msra.mxu0 %v5497_v7  ;;  %5563 = vmatpush.msra.mxu1 %v5541_v56 }
 0xc37   :  { %v5334_v47 = vmul.f32 %v5332_v46, %v5292_v5 }
 0xc38   :  { %5531 = vmatpush.msra.mxu0 %v5496_v63  ;;  %5564 = vmatpush.msra.mxu1 %v5540_v55 }
 0xc39   :  { %v5341_v44 = vadd.f32 %v5340_v26, %v5334_v47 }
 0xc3a   :  { %v5381_v48 = vpop.permute.xlu1 %5380  ;;  %5565 = vmatpush.msra.mxu1 %v5539_v10 }
 0xc3b   :  { %v5383_v28 = vmul.f32 %v5381_v48, %v5341_v44 }
 0xc3d   :  { %v5390_v6 = vadd.f32 %v5389_v2, %v5383_v28 }
 0xc3f   :  { %v5432_v40 = vmul.f32 %v5430_v27, %v5390_v6 }
 0xc42   :  { %v5436_v8 = vpop.permute.xlu1 %5435 }
 0xc43   :  { %v5438_v9 = vmul.f32 %v5436_v8, %v9191_v33  ;;  %v5538_v33 = vld [vmem:[%s9438_s13 + $0x8] sm:$0xff] }
 0xc44   :  { %5566 = vmatpush.msra.mxu1 %v5538_v33 }
 0xc45   :  { %v5439_v30 = vadd.f32 %v5438_v9, %v5432_v40 }
 0xc46   :  { %5567 = vmatpush.msra.mxu1 %v5537_v61 }
 0xc85   :  { %v5485_v16 = vpop.permute.xlu2 %5484 }
 0xc86   :  { %v5487_v25 = vmul.f32 %v5485_v16, %v9306_v13  ;;  %v5733_v13 = vld [vmem:[%s9437_s12] ss:$0 sm:$0xff]  ;;  %s6058_s12 = smov [#allocation13]  }
 0xc87   :  { %s5602_s13 = sshll.u32 %s6058_s12, 4  ;;  %s5603_s13 = int_to_ptr.vmem [resolvable:$true] %s5602_s13 }
 0xc9c   :  { %v5479_v42 = vpop.permute.xlu0 %5478 }
 0xc9d   :  { %v5481_v35 = vmul.f32 %v5479_v42, %v5439_v30 }
 0xc9f   :  { %v5488_v57 = vadd.f32 %v5487_v25, %v5481_v35 }
 0xca7   :  { %v5493_v41 = vpop.permute.xlu1 %5492 }
 0xca8   :  { %v5495_v62 = vmul.f32 %v5493_v41, %v5488_v57 }
 0xcaa   :  { %5532 = vmatmul.f32.vlgmr.msra.gmra.mxu0 %v5495_v62 }
 0xd27   :  { %v5533_v53 = vpop.f32.mrf.mxu0 }
 0xd28   :  { %v5534_v0 = vadd.f32 %v5733_v13, %v5533_v53 }
 0xd2a   :  { %v5536_v32 = vmax.f32 %v5534_v0, 0.0 }
 0xd2c   :  { %5654 = vmatmul.msk.f32.vlgmr.msra.gmra.mxu1 %vm5115_vm1, %v5536_v32 }
 0xda9   :  { %v5569_v49 = vpop.f32.mrf.mxu1 }
 0xdaa   :  { %v5570_v45 = vadd.f32 %v5734_v43, %v5569_v49 }
 0xdac   :  { %v5572_v19 = vmax.f32 %v5570_v45, 0.0 }
 0xdae   :  { %v5577_v39 = vmul.f32 %v5735_v22, %v5572_v19 }
 0xdb0   :  { %v5579_v29 = vsel %vm5578_vm2, %v5577_v39, 0.0 }
 0xdb1   :  { %5580 = vadd.xlane.f32.xlu0 %v5579_v29 }
 0xe24   :  { %v5581_v20 = vpop.xlane.xlu0 %5580 }
 0xe25   :  { %v5586_v31 = vadd.f32 %v5736_v38, %v5581_v20 }
 0xe27   :  { %v5587_v14 = vmul.f32 0.5, %v5586_v31 }
 0xe29   :  { %5947 = vtanh.f32 %v5587_v14 }
 0xe2f   :  { %v5948_v11 = vpop.eup %5947 }
 0xe30   :  { %v5589_v24 = vmul.f32 0.5, %v5948_v11 }
 0xe32   :  { %v5590_v58 = vadd.f32 0.5, %v5589_v24 }
 0xe34   :  { %5593 = vperm.xlu2 %5663, %v5590_v58  }
 0xe8e   :  { %v5594_v17 = vpop.permute.xlu2 %5593 }
 0xe8f   :  { %5596 = vst [vmem:[#allocation13] sm:$0xff] %v5594_v17 }
 0xe90   :  { %5607 = dma.vmem_to_hbm [thread:$0]  %s5603_s13, 128, %s5605_s15, [#allocation9]  }
 0xe91   :  { %6049 = dma.done.wait [#allocation9], 128  }
 0xe92   :  { %6050 = vsyncadd [#allocation9], 4294967168 }
 0xe93   :  { %5612 = vsyncpa [#allocation8], 1 }
 0xe94   :  { %5613 = vsyncpa [#allocation11], 1 }
 0xe95   :  { %5614 = vsyncpa [#allocation9], 1 }

</bundles_post_ra>
